<compile_context>
chip_gen: v7x
topology: tpu7x:2x2x1
jax: 0.10.0
libtpu: 0.0.40
codegen_flags: <defaults>
</compile_context>

<pallas_src>
import functools
import math

import jax
import jax.numpy as jnp
from jax.experimental import pallas as pl
from jax.experimental.pallas import tpu as pltpu


# --------------------------------------------------------------------------
# Fused kernel: one tile of Bt batch elements per grid step
# --------------------------------------------------------------------------

def _trans_encoder_kernel(
    t_ref,                        # (B,) int32 in SMEM (scalar prefetch)
    x_ref,                        # (Bt, C, L)   f32
    pe_ref,                       # (PE_LEN, D)  f32  (full sinusoidal table)
    w_in_ref, b_in_ref,           # (C, D) bf16, (1, D) f32
    w_t1_ref, b_t1_ref,           # (D, D) bf16, (1, D) f32
    w_t2_ref, b_t2_ref,           # (D, D) bf16, (1, D) f32
    w_q_ref, b_q_ref,             # (NL*H, D, Dh) bf16, (NL*H, 1, Dh) f32
    w_k_ref, b_k_ref,             # (scale 1/sqrt(Dh) folded into q weights)
    w_v_ref, b_v_ref,
    w_ao_ref, b_ao_ref,           # (NL*H, Dh, D) bf16, (NL, 1, D) f32
    w_ff1_ref, b_ff1_ref,         # (NL, D, F) bf16, (NL, 1, F) f32
    w_ff2_ref, b_ff2_ref,         # (NL, F, D) bf16, (NL, 1, D) f32
    ln1_g_ref, ln1_b_ref,         # (NL, 1, D) f32
    ln2_g_ref, ln2_b_ref,         # (NL, 1, D) f32
    w_op_ref, b_op_ref,           # (D, C) bf16, (1, C) f32
    o_ref,                        # (Bt, C, L)   f32
    *, num_heads, num_layers, batch_tile, seq_len, channels, eps):
    f32 = jnp.float32
    bf16 = jnp.bfloat16
    Bt, L, C, H = batch_tile, seq_len, channels, num_heads
    S = L + 1
    D = w_in_ref.shape[1]
    N = Bt * S

    def mm(a, w, b):
        # bf16 MXU matmul with f32 accumulation
        return jnp.dot(a.astype(bf16), w, preferred_element_type=f32) + b

    def layer_norm(h, g, b):
        mu = jnp.mean(h, axis=-1, keepdims=True)
        var = jnp.mean(jnp.square(h - mu), axis=-1, keepdims=True)
        return (h - mu) * jax.lax.rsqrt(var + eps) * g + b

    # ---- gather pe[t[b]] rows for this batch tile (t lives in SMEM) -------
    b0 = pl.program_id(0) * Bt
    pet = jnp.concatenate(
        [pe_ref[pl.ds(t_ref[b0 + i], 1), :] for i in range(Bt)], axis=0)  # (Bt,D)

    # ---- timestep-embedding MLP, batched over the whole tile --------------
    temb = mm(pet, w_t1_ref[...], b_t1_ref[...])                          # (Bt,D)
    pos = 1.0 / (1.0 + jnp.exp(-temb))
    neg = jnp.exp(temb) / (1.0 + jnp.exp(temb))
    temb = temb * jnp.where(temb >= 0.0, pos, neg)                        # stable SiLU
    temb = mm(temb, w_t2_ref[...], b_t2_ref[...])                         # (Bt,D)

    # ---- input projection of the tile's tokens -----------------------------
    xt = jnp.concatenate([x_ref[i].T for i in range(Bt)], axis=0)         # (Bt*L,C)
    h = mm(xt, w_in_ref[...], b_in_ref[...])                              # (Bt*L,D)

    # ---- per-sequence layout: [x tokens..., time token]; each token keeps
    #      its original positional encoding (time token -> pe[0], x token j
    #      -> pe[j+1]).  No attention mask, so token order is irrelevant and
    #      putting the time token LAST keeps the final x-token slice aligned.
    pe_tok = pe_ref[1:S, :]                                               # (L, D)
    pe_time = pe_ref[0:1, :]                                              # (1, D)
    pieces = []
    for i in range(Bt):
        pieces.append(h[i * L:(i + 1) * L, :] + pe_tok)
        pieces.append(temb[i:i + 1, :] + pe_time)
    z = jnp.concatenate(pieces, axis=0)                                   # (Bt*S, D)

    # ---- post-norm transformer encoder layers ------------------------------
    # (statically unrolled; num_layers is small here.  For deep stacks switch
    #  to lax.fori_loop with dynamic w_*_ref[l] indexing to bound vreg live
    #  ranges.)
    for l in range(num_layers):
        z_bf = z.astype(bf16)
        ao = jnp.zeros((N, D), f32)
        for hh in range(H):
            lh = l * H + hh
            q = (jnp.dot(z_bf, w_q_ref[lh], preferred_element_type=f32)
                 + b_q_ref[lh]).reshape(Bt, S, -1)                        # (Bt,S,Dh)
            k = (jnp.dot(z_bf, w_k_ref[lh], preferred_element_type=f32)
                 + b_k_ref[lh]).reshape(Bt, S, -1)
            v = (jnp.dot(z_bf, w_v_ref[lh], preferred_element_type=f32)
                 + b_v_ref[lh]).reshape(Bt, S, -1)
            s = jnp.einsum('bqd,bkd->bqk', q.astype(bf16), k.astype(bf16),
                           preferred_element_type=f32)                    # (Bt,S,S)
            m = jnp.max(s, axis=-1, keepdims=True)
            p = jnp.exp(s - m)
            p = p * pl.reciprocal(jnp.sum(p, axis=-1, keepdims=True),
                                  approx=True)
            ctx = jnp.einsum('bqk,bkd->bqd', p.astype(bf16), v.astype(bf16),
                             preferred_element_type=f32)                  # (Bt,S,Dh)
            # fold the output projection per head: no concat / lane re-pack
            ao = ao + jnp.dot(ctx.reshape(N, -1).astype(bf16), w_ao_ref[lh],
                              preferred_element_type=f32)                 # (N, D)
        z = layer_norm(z + ao + b_ao_ref[l], ln1_g_ref[l], ln1_b_ref[l])

        ff = mm(z, w_ff1_ref[l], b_ff1_ref[l])                            # (N, F)
        ff = 0.5 * ff * (1.0 + jax.lax.erf(ff * (1.0 / math.sqrt(2.0))))  # exact GELU
        ff = mm(ff, w_ff2_ref[l], b_ff2_ref[l])                           # (N, D)
        z = layer_norm(z + ff, ln2_g_ref[l], ln2_b_ref[l])

    # ---- drop the time token (last of each sequence) + output projection ---
    tok = jnp.concatenate([z[i * S:i * S + L, :] for i in range(Bt)], axis=0)
    out = mm(tok, w_op_ref[...], b_op_ref[...])                           # (Bt*L, C)
    for i in range(Bt):
        o_ref[i] = out[i * L:(i + 1) * L, :].T.astype(o_ref.dtype)        # (C, L)


# --------------------------------------------------------------------------
# Parameters / buffers (deterministic synthetic init, "PyTorch-like" layout)
# --------------------------------------------------------------------------

def make_pe(max_len, d_model):
    """Sinusoidal positional encoding table, shape (max_len, d_model)."""
    position = jnp.arange(max_len, dtype=jnp.float32)[:, None]
    div_term = jnp.exp(jnp.arange(0, d_model, 2, dtype=jnp.float32)
                       * (-math.log(10000.0) / d_model))
    pe = jnp.zeros((max_len, d_model), jnp.float32)
    pe = pe.at[:, 0::2].set(jnp.sin(position * div_term))
    pe = pe.at[:, 1::2].set(jnp.cos(position * div_term))
    return pe


def init_params(key, features, latent_dim, num_layers, ff_size, max_len=64):
    D, F, C = latent_dim, ff_size, features

    def dense(k, din, dout):
        kw, kb = jax.random.split(k)
        w = jax.random.normal(kw, (din, dout), jnp.float32) * 0.02
        b = jax.random.normal(kb, (dout,), jnp.float32) * 0.01
        return w, b.reshape(1, dout)

    keys = jax.random.split(key, 4 + num_layers)
    w_in, b_in = dense(keys[0], C, D)
    w_op, b_op = dense(keys[1], D, C)
    w_t1, b_t1 = dense(keys[2], D, D)
    w_t2, b_t2 = dense(keys[3], D, D)

    qkv_w, qkv_b, ao_w, ao_b = [], [], [], []
    ff1_w, ff1_b, ff2_w, ff2_b = [], [], [], []
    for l in range(num_layers):
        lk = jax.random.split(keys[4 + l], 4)
        # Packed QKV columns laid out [Wq | Wk | Wv] (torch in_proj_weight is
        # (3D, D) row-major in that order; transpose it to (D, 3D) to match).
        w, b = dense(lk[0], D, 3 * D); qkv_w.append(w); qkv_b.append(b)
        w, b = dense(lk[1], D, D);     ao_w.append(w);  ao_b.append(b)
        w, b = dense(lk[2], D, F);     ff1_w.append(w); ff1_b.append(b)
        w, b = dense(lk[3], F, D);     ff2_w.append(w); ff2_b.append(b)

    ones = jnp.ones((num_layers, 1, D), jnp.float32)
    zeros = jnp.zeros((num_layers, 1, D), jnp.float32)
    return {
        "pe": make_pe(max_len, D),
        "w_in": w_in, "b_in": b_in,
        "w_op": w_op, "b_op": b_op,
        "w_t1": w_t1, "b_t1": b_t1,
        "w_t2": w_t2, "b_t2": b_t2,
        "w_qkv": jnp.stack(qkv_w), "b_qkv": jnp.stack(qkv_b),
        "w_ao": jnp.stack(ao_w), "b_ao": jnp.stack(ao_b),
        "w_ff1": jnp.stack(ff1_w), "b_ff1": jnp.stack(ff1_b),
        "w_ff2": jnp.stack(ff2_w), "b_ff2": jnp.stack(ff2_b),
        "ln1_g": ones, "ln1_b": zeros,
        "ln2_g": ones, "ln2_b": zeros,
    }


def prepare_kernel_params(params, num_heads):
    """One-time repack for the fused kernel: split the packed QKV / out-proj
    weights per head (columns ordered [Wq|Wk|Wv], each with (head, head_dim)
    ordering, matching torch's in_proj_weight), fold 1/sqrt(head_dim) into the
    Q projection, and cast all matmul weight matrices to bf16."""
    f32, bf16 = jnp.float32, jnp.bfloat16
    w_qkv, b_qkv = params["w_qkv"], params["b_qkv"]
    NL, D, _ = w_qkv.shape
    H = num_heads
    Dh = D // H
    scale = 1.0 / math.sqrt(Dh)

    def split_heads(w, b, s=1.0):
        w = (w.reshape(NL, D, H, Dh).transpose(0, 2, 1, 3) * s).reshape(NL * H, D, Dh)
        b = (b.reshape(NL, 1, H, Dh).transpose(0, 2, 1, 3) * s).reshape(NL * H, 1, Dh)
        return w.astype(bf16), b.astype(f32)

    w_q, b_q = split_heads(w_qkv[:, :, 0 * D:1 * D], b_qkv[:, :, 0 * D:1 * D], scale)
    w_k, b_k = split_heads(w_qkv[:, :, 1 * D:2 * D], b_qkv[:, :, 1 * D:2 * D])
    w_v, b_v = split_heads(w_qkv[:, :, 2 * D:3 * D], b_qkv[:, :, 2 * D:3 * D])

    return {
        "pe": params["pe"].astype(f32),
        "w_in": params["w_in"].astype(bf16), "b_in": params["b_in"].astype(f32),
        "w_t1": params["w_t1"].astype(bf16), "b_t1": params["b_t1"].astype(f32),
        "w_t2": params["w_t2"].astype(bf16), "b_t2": params["b_t2"].astype(f32),
        "w_q": w_q, "b_q": b_q, "w_k": w_k, "b_k": b_k, "w_v": w_v, "b_v": b_v,
        # out-proj rows are ordered (head, head_dim) -> per-head (Dh, D) slabs
        "w_ao": params["w_ao"].reshape(NL, H, Dh, D).reshape(NL * H, Dh, D).astype(bf16),
        "b_ao": params["b_ao"].astype(f32),
        "w_ff1": params["w_ff1"].astype(bf16), "b_ff1": params["b_ff1"].astype(f32),
        "w_ff2": params["w_ff2"].astype(bf16), "b_ff2": params["b_ff2"].astype(f32),
        "ln1_g": params["ln1_g"].astype(f32), "ln1_b": params["ln1_b"].astype(f32),
        "ln2_g": params["ln2_g"].astype(f32), "ln2_b": params["ln2_b"].astype(f32),
        "w_op": params["w_op"].astype(bf16), "b_op": params["b_op"].astype(f32),
    }


# --------------------------------------------------------------------------
# Forward pass: one fused pallas_call, zero wrapper glue
# --------------------------------------------------------------------------

def _resident_spec(arr):
    nd = arr.ndim
    return pl.BlockSpec(arr.shape, lambda b, t_s, _nd=nd: (0,) * _nd)


def trans_encoder_forward(kparams, x, t, *, num_heads):
    B, C, L = x.shape
    D = kparams["w_in"].shape[1]
    NL = kparams["w_ff1"].shape[0]
    assert kparams["pe"].shape[0] >= L + 1, "positional-encoding table too short"
    assert D % num_heads == 0

    # batch tile per grid step; for v7x pick Bt so B // Bt stays even to keep
    # both TensorCores fed; on v5e/v6e the grid is a serial loop so bigger is
    # better.
    Bt = math.gcd(B, 8)
    grid = (B // Bt,)

    weights = [
        kparams["w_in"], kparams["b_in"],
        kparams["w_t1"], kparams["b_t1"],
        kparams["w_t2"], kparams["b_t2"],
        kparams["w_q"], kparams["b_q"],
        kparams["w_k"], kparams["b_k"],
        kparams["w_v"], kparams["b_v"],
        kparams["w_ao"], kparams["b_ao"],
        kparams["w_ff1"], kparams["b_ff1"],
        kparams["w_ff2"], kparams["b_ff2"],
        kparams["ln1_g"], kparams["ln1_b"],
        kparams["ln2_g"], kparams["ln2_b"],
        kparams["w_op"], kparams["b_op"],
    ]

    in_specs = ([pl.BlockSpec((Bt, C, L), lambda b, t_s: (b, 0, 0))]
                + [_resident_spec(a) for a in [kparams["pe"]] + weights])

    grid_spec = pltpu.PrefetchScalarGridSpec(
        num_scalar_prefetch=1,                 # t -> SMEM, gathered in-kernel
        grid=grid,
        in_specs=in_specs,
        out_specs=pl.BlockSpec((Bt, C, L), lambda b, t_s: (b, 0, 0)),
    )

    kernel = functools.partial(
        _trans_encoder_kernel,
        num_heads=num_heads, num_layers=NL, batch_tile=Bt,
        seq_len=L, channels=C, eps=1e-5)

    # All-resident stacked weights is the right call on v5e/v6e (128 MiB VMEM);
    # raise vmem_limit_bytes when D/F grow.  On v7x (64 MiB) switch to
    # per-layer weight streaming for large models.
    return pl.pallas_call(
        kernel,
        out_shape=jax.ShapeDtypeStruct((B, C, L), x.dtype),
        grid_spec=grid_spec,
        compiler_params=pltpu.CompilerParams(
            dimension_semantics=("parallel",),
            vmem_limit_bytes=32 * 1024 * 1024),
    )(t.astype(jnp.int32), x, kparams["pe"], *weights)


# --------------------------------------------------------------------------
# Driver
# --------------------------------------------------------------------------

if __name__ == "__main__":
    features = 4        # channels
    latent_dim = 32
    num_heads = 4
    num_layers = 2
    ff_size = 64
    B, L = 2, 8

    key = jax.random.PRNGKey(0)
    kp_key, kx = jax.random.split(key)
    params = init_params(kp_key, features, latent_dim, num_layers, ff_size)
    kparams = prepare_kernel_params(params, num_heads)

    x = jax.random.normal(kx, (B, features, L), jnp.float32)   # (batch, channels, seq)
    t = jnp.array([3, 7], dtype=jnp.int32)                     # diffusion timesteps

    fwd = jax.jit(functools.partial(trans_encoder_forward, num_heads=num_heads))
    out = jax.block_until_ready(fwd(kparams, x, t))
    assert out.shape == (B, features, L), out.shape
    assert out.dtype == jnp.float32
    print("KERNEL_OK")
</pallas_src>

<mosaic_0001>
module attributes {stable_mosaic.version = 11 : i64} {
  func.func @_trans_encoder_kernel(%arg0: i32, %arg1: memref<2xi32, #tpu.memory_space<smem>>, %arg2: memref<2x4x8xf32, #tpu.memory_space<vmem>>, %arg3: memref<64x32xf32, #tpu.memory_space<vmem>>, %arg4: memref<4x32xbf16, #tpu.memory_space<vmem>>, %arg5: memref<1x32xf32, #tpu.memory_space<vmem>>, %arg6: memref<32x32xbf16, #tpu.memory_space<vmem>>, %arg7: memref<1x32xf32, #tpu.memory_space<vmem>>, %arg8: memref<32x32xbf16, #tpu.memory_space<vmem>>, %arg9: memref<1x32xf32, #tpu.memory_space<vmem>>, %arg10: memref<8x32x8xbf16, #tpu.memory_space<vmem>>, %arg11: memref<8x1x8xf32, #tpu.memory_space<vmem>>, %arg12: memref<8x32x8xbf16, #tpu.memory_space<vmem>>, %arg13: memref<8x1x8xf32, #tpu.memory_space<vmem>>, %arg14: memref<8x32x8xbf16, #tpu.memory_space<vmem>>, %arg15: memref<8x1x8xf32, #tpu.memory_space<vmem>>, %arg16: memref<8x8x32xbf16, #tpu.memory_space<vmem>>, %arg17: memref<2x1x32xf32, #tpu.memory_space<vmem>>, %arg18: memref<2x32x64xbf16, #tpu.memory_space<vmem>>, %arg19: memref<2x1x64xf32, #tpu.memory_space<vmem>>, %arg20: memref<2x64x32xbf16, #tpu.memory_space<vmem>>, %arg21: memref<2x1x32xf32, #tpu.memory_space<vmem>>, %arg22: memref<2x1x32xf32, #tpu.memory_space<vmem>>, %arg23: memref<2x1x32xf32, #tpu.memory_space<vmem>>, %arg24: memref<2x1x32xf32, #tpu.memory_space<vmem>>, %arg25: memref<2x1x32xf32, #tpu.memory_space<vmem>>, %arg26: memref<32x4xbf16, #tpu.memory_space<vmem>>, %arg27: memref<1x4xf32, #tpu.memory_space<vmem>>, %arg28: memref<2x4x8xf32, #tpu.memory_space<vmem>>) attributes {dimension_semantics = [#tpu.dimension_semantics<parallel>], iteration_bounds = array<i64: 1>, scalar_prefetch = 1 : i64, scratch_operands = 0 : i64, tpu.core_type = #tpu.core_type<tc>, window_params = [{transform_indices = @transform_0, window_bounds = array<i64: 2, 4, 8>}, {pipeline_mode = #tpu.pipeline_mode<synchronous>, transform_indices = @transform_1, window_bounds = array<i64: 64, 32>}, {pipeline_mode = #tpu.pipeline_mode<synchronous>, transform_indices = @transform_2, window_bounds = array<i64: 4, 32>}, {pipeline_mode = #tpu.pipeline_mode<synchronous>, transform_indices = @transform_3, window_bounds = array<i64: 1, 32>}, {pipeline_mode = #tpu.pipeline_mode<synchronous>, transform_indices = @transform_4, window_bounds = array<i64: 32, 32>}, {pipeline_mode = #tpu.pipeline_mode<synchronous>, transform_indices = @transform_5, window_bounds = array<i64: 1, 32>}, {pipeline_mode = #tpu.pipeline_mode<synchronous>, transform_indices = @transform_6, window_bounds = array<i64: 32, 32>}, {pipeline_mode = #tpu.pipeline_mode<synchronous>, transform_indices = @transform_7, window_bounds = array<i64: 1, 32>}, {pipeline_mode = #tpu.pipeline_mode<synchronous>, transform_indices = @transform_8, window_bounds = array<i64: 8, 32, 8>}, {pipeline_mode = #tpu.pipeline_mode<synchronous>, transform_indices = @transform_9, window_bounds = array<i64: 8, 1, 8>}, {pipeline_mode = #tpu.pipeline_mode<synchronous>, transform_indices = @transform_10, window_bounds = array<i64: 8, 32, 8>}, {pipeline_mode = #tpu.pipeline_mode<synchronous>, transform_indices = @transform_11, window_bounds = array<i64: 8, 1, 8>}, {pipeline_mode = #tpu.pipeline_mode<synchronous>, transform_indices = @transform_12, window_bounds = array<i64: 8, 32, 8>}, {pipeline_mode = #tpu.pipeline_mode<synchronous>, transform_indices = @transform_13, window_bounds = array<i64: 8, 1, 8>}, {pipeline_mode = #tpu.pipeline_mode<synchronous>, transform_indices = @transform_14, window_bounds = array<i64: 8, 8, 32>}, {pipeline_mode = #tpu.pipeline_mode<synchronous>, transform_indices = @transform_15, window_bounds = array<i64: 2, 1, 32>}, {pipeline_mode = #tpu.pipeline_mode<synchronous>, transform_indices = @transform_16, window_bounds = array<i64: 2, 32, 64>}, {pipeline_mode = #tpu.pipeline_mode<synchronous>, transform_indices = @transform_17, window_bounds = array<i64: 2, 1, 64>}, {pipeline_mode = #tpu.pipeline_mode<synchronous>, transform_indices = @transform_18, window_bounds = array<i64: 2, 64, 32>}, {pipeline_mode = #tpu.pipeline_mode<synchronous>, transform_indices = @transform_19, window_bounds = array<i64: 2, 1, 32>}, {pipeline_mode = #tpu.pipeline_mode<synchronous>, transform_indices = @transform_20, window_bounds = array<i64: 2, 1, 32>}, {pipeline_mode = #tpu.pipeline_mode<synchronous>, transform_indices = @transform_21, window_bounds = array<i64: 2, 1, 32>}, {pipeline_mode = #tpu.pipeline_mode<synchronous>, transform_indices = @transform_22, window_bounds = array<i64: 2, 1, 32>}, {pipeline_mode = #tpu.pipeline_mode<synchronous>, transform_indices = @transform_23, window_bounds = array<i64: 2, 1, 32>}, {pipeline_mode = #tpu.pipeline_mode<synchronous>, transform_indices = @transform_24, window_bounds = array<i64: 32, 4>}, {pipeline_mode = #tpu.pipeline_mode<synchronous>, transform_indices = @transform_25, window_bounds = array<i64: 1, 4>}, {transform_indices = @transform_26, window_bounds = array<i64: 2, 4, 8>}]} {
    %c2_i32 = arith.constant 2 : i32
    %0 = arith.muli %arg0, %c2_i32 : i32
    %c0_i32 = arith.constant 0 : i32
    %1 = arith.addi %0, %c0_i32 : i32
    %2 = arith.index_cast %1 : i32 to index
    %3 = memref.load %arg1[%2] : memref<2xi32, #tpu.memory_space<smem>>
    %4 = arith.index_cast %3 : i32 to index
    %c0 = arith.constant 0 : index
    %5 = vector.load %arg3[%4, %c0] : memref<64x32xf32, #tpu.memory_space<vmem>>, vector<1x32xf32>
    %c1_i32 = arith.constant 1 : i32
    %6 = arith.addi %0, %c1_i32 : i32
    %7 = arith.index_cast %6 : i32 to index
    %8 = memref.load %arg1[%7] : memref<2xi32, #tpu.memory_space<smem>>
    %9 = arith.index_cast %8 : i32 to index
    %c0_0 = arith.constant 0 : index
    %10 = vector.load %arg3[%9, %c0_0] : memref<64x32xf32, #tpu.memory_space<vmem>>, vector<1x32xf32>
    %11 = tpu.concatenate %5, %10 in 0 : vector<1x32xf32>, vector<1x32xf32> -> vector<2x32xf32>
    %c0_1 = arith.constant 0 : index
    %c0_2 = arith.constant 0 : index
    %12 = vector.load %arg6[%c0_1, %c0_2] : memref<32x32xbf16, #tpu.memory_space<vmem>>, vector<32x32xbf16>
    %c0_3 = arith.constant 0 : index
    %c0_4 = arith.constant 0 : index
    %13 = vector.load %arg7[%c0_3, %c0_4] : memref<1x32xf32, #tpu.memory_space<vmem>>, vector<1x32xf32>
    %14 = arith.truncf %11 : vector<2x32xf32> to vector<2x32xbf16>
    %cst = arith.constant dense<0.000000e+00> : vector<2x32xf32>
    %15 = tpu.matmul %14, %12, %cst {dimension_numbers = #tpu.dot_dimension_numbers<[1], [0], [0], [1], [0, 0, 1, 1], [], []>} : vector<2x32xbf16>, vector<32x32xbf16>, vector<2x32xf32> -> vector<2x32xf32>
    %16 = vector.broadcast %13 : vector<1x32xf32> to vector<2x32xf32>
    %17 = arith.addf %15, %16 : vector<2x32xf32>
    %cst_5 = arith.constant 0.000000e+00 : f32
    %18 = vector.broadcast %cst_5 : f32 to vector<2x32xf32>
    %19 = arith.subf %18, %17 : vector<2x32xf32>
    %20 = math.exp %19 : vector<2x32xf32>
    %cst_6 = arith.constant 1.000000e+00 : f32
    %21 = vector.broadcast %cst_6 : f32 to vector<2x32xf32>
    %22 = arith.addf %21, %20 : vector<2x32xf32>
    %cst_7 = arith.constant 1.000000e+00 : f32
    %23 = vector.broadcast %cst_7 : f32 to vector<2x32xf32>
    %24 = arith.divf %23, %22 : vector<2x32xf32>
    %25 = math.exp %17 : vector<2x32xf32>
    %26 = math.exp %17 : vector<2x32xf32>
    %cst_8 = arith.constant 1.000000e+00 : f32
    %27 = vector.broadcast %cst_8 : f32 to vector<2x32xf32>
    %28 = arith.addf %27, %26 : vector<2x32xf32>
    %29 = arith.divf %25, %28 : vector<2x32xf32>
    %cst_9 = arith.constant 0.000000e+00 : f32
    %30 = vector.broadcast %cst_9 : f32 to vector<2x32xf32>
    %31 = arith.cmpf oge, %17, %30 : vector<2x32xf32>
    %32 = arith.select %31, %24, %29 : vector<2x32xi1>, vector<2x32xf32>
    %33 = arith.mulf %17, %32 : vector<2x32xf32>
    %c0_10 = arith.constant 0 : index
    %c0_11 = arith.constant 0 : index
    %34 = vector.load %arg8[%c0_10, %c0_11] : memref<32x32xbf16, #tpu.memory_space<vmem>>, vector<32x32xbf16>
    %c0_12 = arith.constant 0 : index
    %c0_13 = arith.constant 0 : index
    %35 = vector.load %arg9[%c0_12, %c0_13] : memref<1x32xf32, #tpu.memory_space<vmem>>, vector<1x32xf32>
    %36 = arith.truncf %33 : vector<2x32xf32> to vector<2x32xbf16>
    %cst_14 = arith.constant dense<0.000000e+00> : vector<2x32xf32>
    %37 = tpu.matmul %36, %34, %cst_14 {dimension_numbers = #tpu.dot_dimension_numbers<[1], [0], [0], [1], [0, 0, 1, 1], [], []>} : vector<2x32xbf16>, vector<32x32xbf16>, vector<2x32xf32> -> vector<2x32xf32>
    %38 = vector.broadcast %35 : vector<1x32xf32> to vector<2x32xf32>
    %39 = arith.addf %37, %38 : vector<2x32xf32>
    %c0_15 = arith.constant 0 : index
    %c0_16 = arith.constant 0 : index
    %c0_17 = arith.constant 0 : index
    %40 = vector.load %arg2[%c0_15, %c0_16, %c0_17] : memref<2x4x8xf32, #tpu.memory_space<vmem>>, vector<1x4x8xf32>
    %41 = vector.shape_cast %40 : vector<1x4x8xf32> to vector<4x8xf32>
    %42 = tpu.transpose %41, [1, 0] : vector<4x8xf32> -> vector<8x4xf32>
    %c1 = arith.constant 1 : index
    %c0_18 = arith.constant 0 : index
    %c0_19 = arith.constant 0 : index
    %43 = vector.load %arg2[%c1, %c0_18, %c0_19] : memref<2x4x8xf32, #tpu.memory_space<vmem>>, vector<1x4x8xf32>
    %44 = vector.shape_cast %43 : vector<1x4x8xf32> to vector<4x8xf32>
    %45 = tpu.transpose %44, [1, 0] : vector<4x8xf32> -> vector<8x4xf32>
    %46 = tpu.concatenate %42, %45 in 0 : vector<8x4xf32>, vector<8x4xf32> -> vector<16x4xf32>
    %c0_20 = arith.constant 0 : index
    %c0_21 = arith.constant 0 : index
    %47 = vector.load %arg4[%c0_20, %c0_21] : memref<4x32xbf16, #tpu.memory_space<vmem>>, vector<4x32xbf16>
    %c0_22 = arith.constant 0 : index
    %c0_23 = arith.constant 0 : index
    %48 = vector.load %arg5[%c0_22, %c0_23] : memref<1x32xf32, #tpu.memory_space<vmem>>, vector<1x32xf32>
    %49 = arith.truncf %46 : vector<16x4xf32> to vector<16x4xbf16>
    %cst_24 = arith.constant dense<0.000000e+00> : vector<16x32xf32>
    %50 = tpu.matmul %49, %47, %cst_24 {dimension_numbers = #tpu.dot_dimension_numbers<[1], [0], [0], [1], [0, 0, 1, 1], [], []>} : vector<16x4xbf16>, vector<4x32xbf16>, vector<16x32xf32> -> vector<16x32xf32>
    %51 = vector.broadcast %48 : vector<1x32xf32> to vector<16x32xf32>
    %52 = arith.addf %50, %51 : vector<16x32xf32>
    %c1_25 = arith.constant 1 : index
    %c0_26 = arith.constant 0 : index
    %53 = vector.load %arg3[%c1_25, %c0_26] : memref<64x32xf32, #tpu.memory_space<vmem>>, vector<8x32xf32>
    %c0_27 = arith.constant 0 : index
    %c0_28 = arith.constant 0 : index
    %54 = vector.load %arg3[%c0_27, %c0_28] : memref<64x32xf32, #tpu.memory_space<vmem>>, vector<1x32xf32>
    %55 = vector.extract_strided_slice %52 {offsets = [0, 0], sizes = [8, 32], strides = [1, 1]} : vector<16x32xf32> to vector<8x32xf32>
    %56 = arith.addf %55, %53 : vector<8x32xf32>
    %57 = vector.extract_strided_slice %39 {offsets = [0, 0], sizes = [1, 32], strides = [1, 1]} : vector<2x32xf32> to vector<1x32xf32>
    %58 = arith.addf %57, %54 : vector<1x32xf32>
    %59 = vector.extract_strided_slice %52 {offsets = [8, 0], sizes = [8, 32], strides = [1, 1]} : vector<16x32xf32> to vector<8x32xf32>
    %60 = arith.addf %59, %53 : vector<8x32xf32>
    %61 = vector.extract_strided_slice %39 {offsets = [1, 0], sizes = [1, 32], strides = [1, 1]} : vector<2x32xf32> to vector<1x32xf32>
    %62 = arith.addf %61, %54 : vector<1x32xf32>
    %63 = tpu.concatenate %56, %58, %60, %62 in 0 : vector<8x32xf32>, vector<1x32xf32>, vector<8x32xf32>, vector<1x32xf32> -> vector<18x32xf32>
    %64 = arith.truncf %63 : vector<18x32xf32> to vector<18x32xbf16>
    %cst_29 = arith.constant 0.000000e+00 : f32
    %65 = vector.broadcast %cst_29 : f32 to vector<18x32xf32>
    %c0_30 = arith.constant 0 : index
    %c0_31 = arith.constant 0 : index
    %c0_32 = arith.constant 0 : index
    %66 = vector.load %arg10[%c0_30, %c0_31, %c0_32] : memref<8x32x8xbf16, #tpu.memory_space<vmem>>, vector<1x32x8xbf16>
    %67 = vector.shape_cast %66 : vector<1x32x8xbf16> to vector<32x8xbf16>
    %cst_33 = arith.constant dense<0.000000e+00> : vector<18x8xf32>
    %68 = tpu.matmul %64, %67, %cst_33 {dimension_numbers = #tpu.dot_dimension_numbers<[1], [0], [0], [1], [0, 0, 1, 1], [], []>} : vector<18x32xbf16>, vector<32x8xbf16>, vector<18x8xf32> -> vector<18x8xf32>
    %c0_34 = arith.constant 0 : index
    %c0_35 = arith.constant 0 : index
    %c0_36 = arith.constant 0 : index
    %69 = vector.load %arg11[%c0_34, %c0_35, %c0_36] : memref<8x1x8xf32, #tpu.memory_space<vmem>>, vector<1x1x8xf32>
    %70 = vector.shape_cast %69 : vector<1x1x8xf32> to vector<1x8xf32>
    %71 = vector.broadcast %70 : vector<1x8xf32> to vector<18x8xf32>
    %72 = arith.addf %68, %71 : vector<18x8xf32>
    %73 = vector.shape_cast %72 : vector<18x8xf32> to vector<2x9x8xf32>
    %c0_37 = arith.constant 0 : index
    %c0_38 = arith.constant 0 : index
    %c0_39 = arith.constant 0 : index
    %74 = vector.load %arg12[%c0_37, %c0_38, %c0_39] : memref<8x32x8xbf16, #tpu.memory_space<vmem>>, vector<1x32x8xbf16>
    %75 = vector.shape_cast %74 : vector<1x32x8xbf16> to vector<32x8xbf16>
    %cst_40 = arith.constant dense<0.000000e+00> : vector<18x8xf32>
    %76 = tpu.matmul %64, %75, %cst_40 {dimension_numbers = #tpu.dot_dimension_numbers<[1], [0], [0], [1], [0, 0, 1, 1], [], []>} : vector<18x32xbf16>, vector<32x8xbf16>, vector<18x8xf32> -> vector<18x8xf32>
    %c0_41 = arith.constant 0 : index
    %c0_42 = arith.constant 0 : index
    %c0_43 = arith.constant 0 : index
    %77 = vector.load %arg13[%c0_41, %c0_42, %c0_43] : memref<8x1x8xf32, #tpu.memory_space<vmem>>, vector<1x1x8xf32>
    %78 = vector.shape_cast %77 : vector<1x1x8xf32> to vector<1x8xf32>
    %79 = vector.broadcast %78 : vector<1x8xf32> to vector<18x8xf32>
    %80 = arith.addf %76, %79 : vector<18x8xf32>
    %81 = vector.shape_cast %80 : vector<18x8xf32> to vector<2x9x8xf32>
    %c0_44 = arith.constant 0 : index
    %c0_45 = arith.constant 0 : index
    %c0_46 = arith.constant 0 : index
    %82 = vector.load %arg14[%c0_44, %c0_45, %c0_46] : memref<8x32x8xbf16, #tpu.memory_space<vmem>>, vector<1x32x8xbf16>
    %83 = vector.shape_cast %82 : vector<1x32x8xbf16> to vector<32x8xbf16>
    %cst_47 = arith.constant dense<0.000000e+00> : vector<18x8xf32>
    %84 = tpu.matmul %64, %83, %cst_47 {dimension_numbers = #tpu.dot_dimension_numbers<[1], [0], [0], [1], [0, 0, 1, 1], [], []>} : vector<18x32xbf16>, vector<32x8xbf16>, vector<18x8xf32> -> vector<18x8xf32>
    %c0_48 = arith.constant 0 : index
    %c0_49 = arith.constant 0 : index
    %c0_50 = arith.constant 0 : index
    %85 = vector.load %arg15[%c0_48, %c0_49, %c0_50] : memref<8x1x8xf32, #tpu.memory_space<vmem>>, vector<1x1x8xf32>
    %86 = vector.shape_cast %85 : vector<1x1x8xf32> to vector<1x8xf32>
    %87 = vector.broadcast %86 : vector<1x8xf32> to vector<18x8xf32>
    %88 = arith.addf %84, %87 : vector<18x8xf32>
    %89 = vector.shape_cast %88 : vector<18x8xf32> to vector<2x9x8xf32>
    %90 = arith.truncf %73 : vector<2x9x8xf32> to vector<2x9x8xbf16>
    %91 = arith.truncf %81 : vector<2x9x8xf32> to vector<2x9x8xbf16>
    "tpu.trace_start"() <{level = 10 : i32, message = "bqd,bkd->bqk"}> : () -> ()
    %cst_51 = arith.constant dense<0.000000e+00> : vector<2x9x9xf32>
    %92 = tpu.matmul %90, %91, %cst_51 {dimension_numbers = #tpu.dot_dimension_numbers<[2], [2], [1], [1], [0, 0, 0, 1, 1, 1], [0], [0]>} : vector<2x9x8xbf16>, vector<2x9x8xbf16>, vector<2x9x9xf32> -> vector<2x9x9xf32>
    "tpu.trace_stop"() : () -> ()
    %cst_52 = arith.constant dense<0xFF800000> : vector<2x9xf32>
    %93 = vector.multi_reduction <maximumf>, %92, %cst_52 [2] : vector<2x9x9xf32> to vector<2x9xf32>
    %94 = vector.shape_cast %93 : vector<2x9xf32> to vector<2x9x1xf32>
    %95 = vector.broadcast %94 : vector<2x9x1xf32> to vector<2x9x9xf32>
    %96 = arith.subf %92, %95 : vector<2x9x9xf32>
    %97 = math.exp %96 : vector<2x9x9xf32>
    %cst_53 = arith.constant dense<0.000000e+00> : vector<2x9xf32>
    %98 = vector.multi_reduction <add>, %97, %cst_53 [2] : vector<2x9x9xf32> to vector<2x9xf32>
    %99 = vector.shape_cast %98 : vector<2x9xf32> to vector<2x9x1xf32>
    %100 = tpu.reciprocal %99 {approx = true} : vector<2x9x1xf32> -> vector<2x9x1xf32>
    %101 = vector.broadcast %100 : vector<2x9x1xf32> to vector<2x9x9xf32>
    %102 = arith.mulf %97, %101 : vector<2x9x9xf32>
    %103 = arith.truncf %102 : vector<2x9x9xf32> to vector<2x9x9xbf16>
    %104 = arith.truncf %89 : vector<2x9x8xf32> to vector<2x9x8xbf16>
    "tpu.trace_start"() <{level = 10 : i32, message = "bqk,bkd->bqd"}> : () -> ()
    %cst_54 = arith.constant dense<0.000000e+00> : vector<2x9x8xf32>
    %105 = tpu.matmul %103, %104, %cst_54 {dimension_numbers = #tpu.dot_dimension_numbers<[2], [1], [1], [2], [0, 0, 0, 1, 1, 2], [0], [0]>} : vector<2x9x9xbf16>, vector<2x9x8xbf16>, vector<2x9x8xf32> -> vector<2x9x8xf32>
    "tpu.trace_stop"() : () -> ()
    %106 = vector.shape_cast %105 : vector<2x9x8xf32> to vector<18x8xf32>
    %107 = arith.truncf %106 : vector<18x8xf32> to vector<18x8xbf16>
    %c0_55 = arith.constant 0 : index
    %c0_56 = arith.constant 0 : index
    %c0_57 = arith.constant 0 : index
    %108 = vector.load %arg16[%c0_55, %c0_56, %c0_57] : memref<8x8x32xbf16, #tpu.memory_space<vmem>>, vector<1x8x32xbf16>
    %109 = vector.shape_cast %108 : vector<1x8x32xbf16> to vector<8x32xbf16>
    %cst_58 = arith.constant dense<0.000000e+00> : vector<18x32xf32>
    %110 = tpu.matmul %107, %109, %cst_58 {dimension_numbers = #tpu.dot_dimension_numbers<[1], [0], [0], [1], [0, 0, 1, 1], [], []>} : vector<18x8xbf16>, vector<8x32xbf16>, vector<18x32xf32> -> vector<18x32xf32>
    %111 = arith.addf %65, %110 : vector<18x32xf32>
    %c1_59 = arith.constant 1 : index
    %c0_60 = arith.constant 0 : index
    %c0_61 = arith.constant 0 : index
    %112 = vector.load %arg10[%c1_59, %c0_60, %c0_61] : memref<8x32x8xbf16, #tpu.memory_space<vmem>>, vector<1x32x8xbf16>
    %113 = vector.shape_cast %112 : vector<1x32x8xbf16> to vector<32x8xbf16>
    %cst_62 = arith.constant dense<0.000000e+00> : vector<18x8xf32>
    %114 = tpu.matmul %64, %113, %cst_62 {dimension_numbers = #tpu.dot_dimension_numbers<[1], [0], [0], [1], [0, 0, 1, 1], [], []>} : vector<18x32xbf16>, vector<32x8xbf16>, vector<18x8xf32> -> vector<18x8xf32>
    %c1_63 = arith.constant 1 : index
    %c0_64 = arith.constant 0 : index
    %c0_65 = arith.constant 0 : index
    %115 = vector.load %arg11[%c1_63, %c0_64, %c0_65] : memref<8x1x8xf32, #tpu.memory_space<vmem>>, vector<1x1x8xf32>
    %116 = vector.shape_cast %115 : vector<1x1x8xf32> to vector<1x8xf32>
    %117 = vector.broadcast %116 : vector<1x8xf32> to vector<18x8xf32>
    %118 = arith.addf %114, %117 : vector<18x8xf32>
    %119 = vector.shape_cast %118 : vector<18x8xf32> to vector<2x9x8xf32>
    %c1_66 = arith.constant 1 : index
    %c0_67 = arith.constant 0 : index
    %c0_68 = arith.constant 0 : index
    %120 = vector.load %arg12[%c1_66, %c0_67, %c0_68] : memref<8x32x8xbf16, #tpu.memory_space<vmem>>, vector<1x32x8xbf16>
    %121 = vector.shape_cast %120 : vector<1x32x8xbf16> to vector<32x8xbf16>
    %cst_69 = arith.constant dense<0.000000e+00> : vector<18x8xf32>
    %122 = tpu.matmul %64, %121, %cst_69 {dimension_numbers = #tpu.dot_dimension_numbers<[1], [0], [0], [1], [0, 0, 1, 1], [], []>} : vector<18x32xbf16>, vector<32x8xbf16>, vector<18x8xf32> -> vector<18x8xf32>
    %c1_70 = arith.constant 1 : index
    %c0_71 = arith.constant 0 : index
    %c0_72 = arith.constant 0 : index
    %123 = vector.load %arg13[%c1_70, %c0_71, %c0_72] : memref<8x1x8xf32, #tpu.memory_space<vmem>>, vector<1x1x8xf32>
    %124 = vector.shape_cast %123 : vector<1x1x8xf32> to vector<1x8xf32>
    %125 = vector.broadcast %124 : vector<1x8xf32> to vector<18x8xf32>
    %126 = arith.addf %122, %125 : vector<18x8xf32>
    %127 = vector.shape_cast %126 : vector<18x8xf32> to vector<2x9x8xf32>
    %c1_73 = arith.constant 1 : index
    %c0_74 = arith.constant 0 : index
    %c0_75 = arith.constant 0 : index
    %128 = vector.load %arg14[%c1_73, %c0_74, %c0_75] : memref<8x32x8xbf16, #tpu.memory_space<vmem>>, vector<1x32x8xbf16>
    %129 = vector.shape_cast %128 : vector<1x32x8xbf16> to vector<32x8xbf16>
    %cst_76 = arith.constant dense<0.000000e+00> : vector<18x8xf32>
    %130 = tpu.matmul %64, %129, %cst_76 {dimension_numbers = #tpu.dot_dimension_numbers<[1], [0], [0], [1], [0, 0, 1, 1], [], []>} : vector<18x32xbf16>, vector<32x8xbf16>, vector<18x8xf32> -> vector<18x8xf32>
    %c1_77 = arith.constant 1 : index
    %c0_78 = arith.constant 0 : index
    %c0_79 = arith.constant 0 : index
    %131 = vector.load %arg15[%c1_77, %c0_78, %c0_79] : memref<8x1x8xf32, #tpu.memory_space<vmem>>, vector<1x1x8xf32>
    %132 = vector.shape_cast %131 : vector<1x1x8xf32> to vector<1x8xf32>
    %133 = vector.broadcast %132 : vector<1x8xf32> to vector<18x8xf32>
    %134 = arith.addf %130, %133 : vector<18x8xf32>
    %135 = vector.shape_cast %134 : vector<18x8xf32> to vector<2x9x8xf32>
    %136 = arith.truncf %119 : vector<2x9x8xf32> to vector<2x9x8xbf16>
    %137 = arith.truncf %127 : vector<2x9x8xf32> to vector<2x9x8xbf16>
    "tpu.trace_start"() <{level = 10 : i32, message = "bqd,bkd->bqk"}> : () -> ()
    %cst_80 = arith.constant dense<0.000000e+00> : vector<2x9x9xf32>
    %138 = tpu.matmul %136, %137, %cst_80 {dimension_numbers = #tpu.dot_dimension_numbers<[2], [2], [1], [1], [0, 0, 0, 1, 1, 1], [0], [0]>} : vector<2x9x8xbf16>, vector<2x9x8xbf16>, vector<2x9x9xf32> -> vector<2x9x9xf32>
    "tpu.trace_stop"() : () -> ()
    %cst_81 = arith.constant dense<0xFF800000> : vector<2x9xf32>
    %139 = vector.multi_reduction <maximumf>, %138, %cst_81 [2] : vector<2x9x9xf32> to vector<2x9xf32>
    %140 = vector.shape_cast %139 : vector<2x9xf32> to vector<2x9x1xf32>
    %141 = vector.broadcast %140 : vector<2x9x1xf32> to vector<2x9x9xf32>
    %142 = arith.subf %138, %141 : vector<2x9x9xf32>
    %143 = math.exp %142 : vector<2x9x9xf32>
    %cst_82 = arith.constant dense<0.000000e+00> : vector<2x9xf32>
    %144 = vector.multi_reduction <add>, %143, %cst_82 [2] : vector<2x9x9xf32> to vector<2x9xf32>
    %145 = vector.shape_cast %144 : vector<2x9xf32> to vector<2x9x1xf32>
    %146 = tpu.reciprocal %145 {approx = true} : vector<2x9x1xf32> -> vector<2x9x1xf32>
    %147 = vector.broadcast %146 : vector<2x9x1xf32> to vector<2x9x9xf32>
    %148 = arith.mulf %143, %147 : vector<2x9x9xf32>
    %149 = arith.truncf %148 : vector<2x9x9xf32> to vector<2x9x9xbf16>
    %150 = arith.truncf %135 : vector<2x9x8xf32> to vector<2x9x8xbf16>
    "tpu.trace_start"() <{level = 10 : i32, message = "bqk,bkd->bqd"}> : () -> ()
    %cst_83 = arith.constant dense<0.000000e+00> : vector<2x9x8xf32>
    %151 = tpu.matmul %149, %150, %cst_83 {dimension_numbers = #tpu.dot_dimension_numbers<[2], [1], [1], [2], [0, 0, 0, 1, 1, 2], [0], [0]>} : vector<2x9x9xbf16>, vector<2x9x8xbf16>, vector<2x9x8xf32> -> vector<2x9x8xf32>
    "tpu.trace_stop"() : () -> ()
    %152 = vector.shape_cast %151 : vector<2x9x8xf32> to vector<18x8xf32>
    %153 = arith.truncf %152 : vector<18x8xf32> to vector<18x8xbf16>
    %c1_84 = arith.constant 1 : index
    %c0_85 = arith.constant 0 : index
    %c0_86 = arith.constant 0 : index
    %154 = vector.load %arg16[%c1_84, %c0_85, %c0_86] : memref<8x8x32xbf16, #tpu.memory_space<vmem>>, vector<1x8x32xbf16>
    %155 = vector.shape_cast %154 : vector<1x8x32xbf16> to vector<8x32xbf16>
    %cst_87 = arith.constant dense<0.000000e+00> : vector<18x32xf32>
    %156 = tpu.matmul %153, %155, %cst_87 {dimension_numbers = #tpu.dot_dimension_numbers<[1], [0], [0], [1], [0, 0, 1, 1], [], []>} : vector<18x8xbf16>, vector<8x32xbf16>, vector<18x32xf32> -> vector<18x32xf32>
    %157 = arith.addf %111, %156 : vector<18x32xf32>
    %c2 = arith.constant 2 : index
    %c0_88 = arith.constant 0 : index
    %c0_89 = arith.constant 0 : index
    %158 = vector.load %arg10[%c2, %c0_88, %c0_89] : memref<8x32x8xbf16, #tpu.memory_space<vmem>>, vector<1x32x8xbf16>
    %159 = vector.shape_cast %158 : vector<1x32x8xbf16> to vector<32x8xbf16>
    %cst_90 = arith.constant dense<0.000000e+00> : vector<18x8xf32>
    %160 = tpu.matmul %64, %159, %cst_90 {dimension_numbers = #tpu.dot_dimension_numbers<[1], [0], [0], [1], [0, 0, 1, 1], [], []>} : vector<18x32xbf16>, vector<32x8xbf16>, vector<18x8xf32> -> vector<18x8xf32>
    %c2_91 = arith.constant 2 : index
    %c0_92 = arith.constant 0 : index
    %c0_93 = arith.constant 0 : index
    %161 = vector.load %arg11[%c2_91, %c0_92, %c0_93] : memref<8x1x8xf32, #tpu.memory_space<vmem>>, vector<1x1x8xf32>
    %162 = vector.shape_cast %161 : vector<1x1x8xf32> to vector<1x8xf32>
    %163 = vector.broadcast %162 : vector<1x8xf32> to vector<18x8xf32>
    %164 = arith.addf %160, %163 : vector<18x8xf32>
    %165 = vector.shape_cast %164 : vector<18x8xf32> to vector<2x9x8xf32>
    %c2_94 = arith.constant 2 : index
    %c0_95 = arith.constant 0 : index
    %c0_96 = arith.constant 0 : index
    %166 = vector.load %arg12[%c2_94, %c0_95, %c0_96] : memref<8x32x8xbf16, #tpu.memory_space<vmem>>, vector<1x32x8xbf16>
    %167 = vector.shape_cast %166 : vector<1x32x8xbf16> to vector<32x8xbf16>
    %cst_97 = arith.constant dense<0.000000e+00> : vector<18x8xf32>
    %168 = tpu.matmul %64, %167, %cst_97 {dimension_numbers = #tpu.dot_dimension_numbers<[1], [0], [0], [1], [0, 0, 1, 1], [], []>} : vector<18x32xbf16>, vector<32x8xbf16>, vector<18x8xf32> -> vector<18x8xf32>
    %c2_98 = arith.constant 2 : index
    %c0_99 = arith.constant 0 : index
    %c0_100 = arith.constant 0 : index
    %169 = vector.load %arg13[%c2_98, %c0_99, %c0_100] : memref<8x1x8xf32, #tpu.memory_space<vmem>>, vector<1x1x8xf32>
    %170 = vector.shape_cast %169 : vector<1x1x8xf32> to vector<1x8xf32>
    %171 = vector.broadcast %170 : vector<1x8xf32> to vector<18x8xf32>
    %172 = arith.addf %168, %171 : vector<18x8xf32>
    %173 = vector.shape_cast %172 : vector<18x8xf32> to vector<2x9x8xf32>
    %c2_101 = arith.constant 2 : index
    %c0_102 = arith.constant 0 : index
    %c0_103 = arith.constant 0 : index
    %174 = vector.load %arg14[%c2_101, %c0_102, %c0_103] : memref<8x32x8xbf16, #tpu.memory_space<vmem>>, vector<1x32x8xbf16>
    %175 = vector.shape_cast %174 : vector<1x32x8xbf16> to vector<32x8xbf16>
    %cst_104 = arith.constant dense<0.000000e+00> : vector<18x8xf32>
    %176 = tpu.matmul %64, %175, %cst_104 {dimension_numbers = #tpu.dot_dimension_numbers<[1], [0], [0], [1], [0, 0, 1, 1], [], []>} : vector<18x32xbf16>, vector<32x8xbf16>, vector<18x8xf32> -> vector<18x8xf32>
    %c2_105 = arith.constant 2 : index
    %c0_106 = arith.constant 0 : index
    %c0_107 = arith.constant 0 : index
    %177 = vector.load %arg15[%c2_105, %c0_106, %c0_107] : memref<8x1x8xf32, #tpu.memory_space<vmem>>, vector<1x1x8xf32>
    %178 = vector.shape_cast %177 : vector<1x1x8xf32> to vector<1x8xf32>
    %179 = vector.broadcast %178 : vector<1x8xf32> to vector<18x8xf32>
    %180 = arith.addf %176, %179 : vector<18x8xf32>
    %181 = vector.shape_cast %180 : vector<18x8xf32> to vector<2x9x8xf32>
    %182 = arith.truncf %165 : vector<2x9x8xf32> to vector<2x9x8xbf16>
    %183 = arith.truncf %173 : vector<2x9x8xf32> to vector<2x9x8xbf16>
    "tpu.trace_start"() <{level = 10 : i32, message = "bqd,bkd->bqk"}> : () -> ()
    %cst_108 = arith.constant dense<0.000000e+00> : vector<2x9x9xf32>
    %184 = tpu.matmul %182, %183, %cst_108 {dimension_numbers = #tpu.dot_dimension_numbers<[2], [2], [1], [1], [0, 0, 0, 1, 1, 1], [0], [0]>} : vector<2x9x8xbf16>, vector<2x9x8xbf16>, vector<2x9x9xf32> -> vector<2x9x9xf32>
    "tpu.trace_stop"() : () -> ()
    %cst_109 = arith.constant dense<0xFF800000> : vector<2x9xf32>
    %185 = vector.multi_reduction <maximumf>, %184, %cst_109 [2] : vector<2x9x9xf32> to vector<2x9xf32>
    %186 = vector.shape_cast %185 : vector<2x9xf32> to vector<2x9x1xf32>
    %187 = vector.broadcast %186 : vector<2x9x1xf32> to vector<2x9x9xf32>
    %188 = arith.subf %184, %187 : vector<2x9x9xf32>
    %189 = math.exp %188 : vector<2x9x9xf32>
    %cst_110 = arith.constant dense<0.000000e+00> : vector<2x9xf32>
    %190 = vector.multi_reduction <add>, %189, %cst_110 [2] : vector<2x9x9xf32> to vector<2x9xf32>
    %191 = vector.shape_cast %190 : vector<2x9xf32> to vector<2x9x1xf32>
    %192 = tpu.reciprocal %191 {approx = true} : vector<2x9x1xf32> -> vector<2x9x1xf32>
    %193 = vector.broadcast %192 : vector<2x9x1xf32> to vector<2x9x9xf32>
    %194 = arith.mulf %189, %193 : vector<2x9x9xf32>
    %195 = arith.truncf %194 : vector<2x9x9xf32> to vector<2x9x9xbf16>
    %196 = arith.truncf %181 : vector<2x9x8xf32> to vector<2x9x8xbf16>
    "tpu.trace_start"() <{level = 10 : i32, message = "bqk,bkd->bqd"}> : () -> ()
    %cst_111 = arith.constant dense<0.000000e+00> : vector<2x9x8xf32>
    %197 = tpu.matmul %195, %196, %cst_111 {dimension_numbers = #tpu.dot_dimension_numbers<[2], [1], [1], [2], [0, 0, 0, 1, 1, 2], [0], [0]>} : vector<2x9x9xbf16>, vector<2x9x8xbf16>, vector<2x9x8xf32> -> vector<2x9x8xf32>
    "tpu.trace_stop"() : () -> ()
    %198 = vector.shape_cast %197 : vector<2x9x8xf32> to vector<18x8xf32>
    %199 = arith.truncf %198 : vector<18x8xf32> to vector<18x8xbf16>
    %c2_112 = arith.constant 2 : index
    %c0_113 = arith.constant 0 : index
    %c0_114 = arith.constant 0 : index
    %200 = vector.load %arg16[%c2_112, %c0_113, %c0_114] : memref<8x8x32xbf16, #tpu.memory_space<vmem>>, vector<1x8x32xbf16>
    %201 = vector.shape_cast %200 : vector<1x8x32xbf16> to vector<8x32xbf16>
    %cst_115 = arith.constant dense<0.000000e+00> : vector<18x32xf32>
    %202 = tpu.matmul %199, %201, %cst_115 {dimension_numbers = #tpu.dot_dimension_numbers<[1], [0], [0], [1], [0, 0, 1, 1], [], []>} : vector<18x8xbf16>, vector<8x32xbf16>, vector<18x32xf32> -> vector<18x32xf32>
    %203 = arith.addf %157, %202 : vector<18x32xf32>
    %c3 = arith.constant 3 : index
    %c0_116 = arith.constant 0 : index
    %c0_117 = arith.constant 0 : index
    %204 = vector.load %arg10[%c3, %c0_116, %c0_117] : memref<8x32x8xbf16, #tpu.memory_space<vmem>>, vector<1x32x8xbf16>
    %205 = vector.shape_cast %204 : vector<1x32x8xbf16> to vector<32x8xbf16>
    %cst_118 = arith.constant dense<0.000000e+00> : vector<18x8xf32>
    %206 = tpu.matmul %64, %205, %cst_118 {dimension_numbers = #tpu.dot_dimension_numbers<[1], [0], [0], [1], [0, 0, 1, 1], [], []>} : vector<18x32xbf16>, vector<32x8xbf16>, vector<18x8xf32> -> vector<18x8xf32>
    %c3_119 = arith.constant 3 : index
    %c0_120 = arith.constant 0 : index
    %c0_121 = arith.constant 0 : index
    %207 = vector.load %arg11[%c3_119, %c0_120, %c0_121] : memref<8x1x8xf32, #tpu.memory_space<vmem>>, vector<1x1x8xf32>
    %208 = vector.shape_cast %207 : vector<1x1x8xf32> to vector<1x8xf32>
    %209 = vector.broadcast %208 : vector<1x8xf32> to vector<18x8xf32>
    %210 = arith.addf %206, %209 : vector<18x8xf32>
    %211 = vector.shape_cast %210 : vector<18x8xf32> to vector<2x9x8xf32>
    %c3_122 = arith.constant 3 : index
    %c0_123 = arith.constant 0 : index
    %c0_124 = arith.constant 0 : index
    %212 = vector.load %arg12[%c3_122, %c0_123, %c0_124] : memref<8x32x8xbf16, #tpu.memory_space<vmem>>, vector<1x32x8xbf16>
    %213 = vector.shape_cast %212 : vector<1x32x8xbf16> to vector<32x8xbf16>
    %cst_125 = arith.constant dense<0.000000e+00> : vector<18x8xf32>
    %214 = tpu.matmul %64, %213, %cst_125 {dimension_numbers = #tpu.dot_dimension_numbers<[1], [0], [0], [1], [0, 0, 1, 1], [], []>} : vector<18x32xbf16>, vector<32x8xbf16>, vector<18x8xf32> -> vector<18x8xf32>
    %c3_126 = arith.constant 3 : index
    %c0_127 = arith.constant 0 : index
    %c0_128 = arith.constant 0 : index
    %215 = vector.load %arg13[%c3_126, %c0_127, %c0_128] : memref<8x1x8xf32, #tpu.memory_space<vmem>>, vector<1x1x8xf32>
    %216 = vector.shape_cast %215 : vector<1x1x8xf32> to vector<1x8xf32>
    %217 = vector.broadcast %216 : vector<1x8xf32> to vector<18x8xf32>
    %218 = arith.addf %214, %217 : vector<18x8xf32>
    %219 = vector.shape_cast %218 : vector<18x8xf32> to vector<2x9x8xf32>
    %c3_129 = arith.constant 3 : index
    %c0_130 = arith.constant 0 : index
    %c0_131 = arith.constant 0 : index
    %220 = vector.load %arg14[%c3_129, %c0_130, %c0_131] : memref<8x32x8xbf16, #tpu.memory_space<vmem>>, vector<1x32x8xbf16>
    %221 = vector.shape_cast %220 : vector<1x32x8xbf16> to vector<32x8xbf16>
    %cst_132 = arith.constant dense<0.000000e+00> : vector<18x8xf32>
    %222 = tpu.matmul %64, %221, %cst_132 {dimension_numbers = #tpu.dot_dimension_numbers<[1], [0], [0], [1], [0, 0, 1, 1], [], []>} : vector<18x32xbf16>, vector<32x8xbf16>, vector<18x8xf32> -> vector<18x8xf32>
    %c3_133 = arith.constant 3 : index
    %c0_134 = arith.constant 0 : index
    %c0_135 = arith.constant 0 : index
    %223 = vector.load %arg15[%c3_133, %c0_134, %c0_135] : memref<8x1x8xf32, #tpu.memory_space<vmem>>, vector<1x1x8xf32>
    %224 = vector.shape_cast %223 : vector<1x1x8xf32> to vector<1x8xf32>
    %225 = vector.broadcast %224 : vector<1x8xf32> to vector<18x8xf32>
    %226 = arith.addf %222, %225 : vector<18x8xf32>
    %227 = vector.shape_cast %226 : vector<18x8xf32> to vector<2x9x8xf32>
    %228 = arith.truncf %211 : vector<2x9x8xf32> to vector<2x9x8xbf16>
    %229 = arith.truncf %219 : vector<2x9x8xf32> to vector<2x9x8xbf16>
    "tpu.trace_start"() <{level = 10 : i32, message = "bqd,bkd->bqk"}> : () -> ()
    %cst_136 = arith.constant dense<0.000000e+00> : vector<2x9x9xf32>
    %230 = tpu.matmul %228, %229, %cst_136 {dimension_numbers = #tpu.dot_dimension_numbers<[2], [2], [1], [1], [0, 0, 0, 1, 1, 1], [0], [0]>} : vector<2x9x8xbf16>, vector<2x9x8xbf16>, vector<2x9x9xf32> -> vector<2x9x9xf32>
    "tpu.trace_stop"() : () -> ()
    %cst_137 = arith.constant dense<0xFF800000> : vector<2x9xf32>
    %231 = vector.multi_reduction <maximumf>, %230, %cst_137 [2] : vector<2x9x9xf32> to vector<2x9xf32>
    %232 = vector.shape_cast %231 : vector<2x9xf32> to vector<2x9x1xf32>
    %233 = vector.broadcast %232 : vector<2x9x1xf32> to vector<2x9x9xf32>
    %234 = arith.subf %230, %233 : vector<2x9x9xf32>
    %235 = math.exp %234 : vector<2x9x9xf32>
    %cst_138 = arith.constant dense<0.000000e+00> : vector<2x9xf32>
    %236 = vector.multi_reduction <add>, %235, %cst_138 [2] : vector<2x9x9xf32> to vector<2x9xf32>
    %237 = vector.shape_cast %236 : vector<2x9xf32> to vector<2x9x1xf32>
    %238 = tpu.reciprocal %237 {approx = true} : vector<2x9x1xf32> -> vector<2x9x1xf32>
    %239 = vector.broadcast %238 : vector<2x9x1xf32> to vector<2x9x9xf32>
    %240 = arith.mulf %235, %239 : vector<2x9x9xf32>
    %241 = arith.truncf %240 : vector<2x9x9xf32> to vector<2x9x9xbf16>
    %242 = arith.truncf %227 : vector<2x9x8xf32> to vector<2x9x8xbf16>
    "tpu.trace_start"() <{level = 10 : i32, message = "bqk,bkd->bqd"}> : () -> ()
    %cst_139 = arith.constant dense<0.000000e+00> : vector<2x9x8xf32>
    %243 = tpu.matmul %241, %242, %cst_139 {dimension_numbers = #tpu.dot_dimension_numbers<[2], [1], [1], [2], [0, 0, 0, 1, 1, 2], [0], [0]>} : vector<2x9x9xbf16>, vector<2x9x8xbf16>, vector<2x9x8xf32> -> vector<2x9x8xf32>
    "tpu.trace_stop"() : () -> ()
    %244 = vector.shape_cast %243 : vector<2x9x8xf32> to vector<18x8xf32>
    %245 = arith.truncf %244 : vector<18x8xf32> to vector<18x8xbf16>
    %c3_140 = arith.constant 3 : index
    %c0_141 = arith.constant 0 : index
    %c0_142 = arith.constant 0 : index
    %246 = vector.load %arg16[%c3_140, %c0_141, %c0_142] : memref<8x8x32xbf16, #tpu.memory_space<vmem>>, vector<1x8x32xbf16>
    %247 = vector.shape_cast %246 : vector<1x8x32xbf16> to vector<8x32xbf16>
    %cst_143 = arith.constant dense<0.000000e+00> : vector<18x32xf32>
    %248 = tpu.matmul %245, %247, %cst_143 {dimension_numbers = #tpu.dot_dimension_numbers<[1], [0], [0], [1], [0, 0, 1, 1], [], []>} : vector<18x8xbf16>, vector<8x32xbf16>, vector<18x32xf32> -> vector<18x32xf32>
    %249 = arith.addf %203, %248 : vector<18x32xf32>
    %250 = arith.addf %63, %249 : vector<18x32xf32>
    %c0_144 = arith.constant 0 : index
    %c0_145 = arith.constant 0 : index
    %c0_146 = arith.constant 0 : index
    %251 = vector.load %arg17[%c0_144, %c0_145, %c0_146] : memref<2x1x32xf32, #tpu.memory_space<vmem>>, vector<1x1x32xf32>
    %252 = vector.shape_cast %251 : vector<1x1x32xf32> to vector<1x32xf32>
    %253 = vector.broadcast %252 : vector<1x32xf32> to vector<18x32xf32>
    %254 = arith.addf %250, %253 : vector<18x32xf32>
    %c0_147 = arith.constant 0 : index
    %c0_148 = arith.constant 0 : index
    %c0_149 = arith.constant 0 : index
    %255 = vector.load %arg22[%c0_147, %c0_148, %c0_149] : memref<2x1x32xf32, #tpu.memory_space<vmem>>, vector<1x1x32xf32>
    %256 = vector.shape_cast %255 : vector<1x1x32xf32> to vector<1x32xf32>
    %c0_150 = arith.constant 0 : index
    %c0_151 = arith.constant 0 : index
    %c0_152 = arith.constant 0 : index
    %257 = vector.load %arg23[%c0_150, %c0_151, %c0_152] : memref<2x1x32xf32, #tpu.memory_space<vmem>>, vector<1x1x32xf32>
    %258 = vector.shape_cast %257 : vector<1x1x32xf32> to vector<1x32xf32>
    %cst_153 = arith.constant dense<0.000000e+00> : vector<18xf32>
    %259 = vector.multi_reduction <add>, %254, %cst_153 [1] : vector<18x32xf32> to vector<18xf32>
    %260 = vector.shape_cast %259 : vector<18xf32> to vector<18x1xf32>
    %cst_154 = arith.constant 3.200000e+01 : f32
    %261 = vector.broadcast %cst_154 : f32 to vector<18x1xf32>
    %262 = arith.divf %260, %261 : vector<18x1xf32>
    %263 = vector.broadcast %262 : vector<18x1xf32> to vector<18x32xf32>
    %264 = arith.subf %254, %263 : vector<18x32xf32>
    %265 = arith.mulf %264, %264 : vector<18x32xf32>
    %cst_155 = arith.constant dense<0.000000e+00> : vector<18xf32>
    %266 = vector.multi_reduction <add>, %265, %cst_155 [1] : vector<18x32xf32> to vector<18xf32>
    %267 = vector.shape_cast %266 : vector<18xf32> to vector<18x1xf32>
    %cst_156 = arith.constant 3.200000e+01 : f32
    %268 = vector.broadcast %cst_156 : f32 to vector<18x1xf32>
    %269 = arith.divf %267, %268 : vector<18x1xf32>
    %270 = vector.broadcast %262 : vector<18x1xf32> to vector<18x32xf32>
    %271 = arith.subf %254, %270 : vector<18x32xf32>
    %cst_157 = arith.constant 9.99999974E-6 : f32
    %272 = vector.broadcast %cst_157 : f32 to vector<18x1xf32>
    %273 = arith.addf %269, %272 : vector<18x1xf32>
    %274 = math.rsqrt %273 : vector<18x1xf32>
    %275 = vector.broadcast %274 : vector<18x1xf32> to vector<18x32xf32>
    %276 = arith.mulf %271, %275 : vector<18x32xf32>
    %277 = vector.broadcast %256 : vector<1x32xf32> to vector<18x32xf32>
    %278 = arith.mulf %276, %277 : vector<18x32xf32>
    %279 = vector.broadcast %258 : vector<1x32xf32> to vector<18x32xf32>
    %280 = arith.addf %278, %279 : vector<18x32xf32>
    %c0_158 = arith.constant 0 : index
    %c0_159 = arith.constant 0 : index
    %c0_160 = arith.constant 0 : index
    %281 = vector.load %arg18[%c0_158, %c0_159, %c0_160] : memref<2x32x64xbf16, #tpu.memory_space<vmem>>, vector<1x32x64xbf16>
    %282 = vector.shape_cast %281 : vector<1x32x64xbf16> to vector<32x64xbf16>
    %c0_161 = arith.constant 0 : index
    %c0_162 = arith.constant 0 : index
    %c0_163 = arith.constant 0 : index
    %283 = vector.load %arg19[%c0_161, %c0_162, %c0_163] : memref<2x1x64xf32, #tpu.memory_space<vmem>>, vector<1x1x64xf32>
    %284 = vector.shape_cast %283 : vector<1x1x64xf32> to vector<1x64xf32>
    %285 = arith.truncf %280 : vector<18x32xf32> to vector<18x32xbf16>
    %cst_164 = arith.constant dense<0.000000e+00> : vector<18x64xf32>
    %286 = tpu.matmul %285, %282, %cst_164 {dimension_numbers = #tpu.dot_dimension_numbers<[1], [0], [0], [1], [0, 0, 1, 1], [], []>} : vector<18x32xbf16>, vector<32x64xbf16>, vector<18x64xf32> -> vector<18x64xf32>
    %287 = vector.broadcast %284 : vector<1x64xf32> to vector<18x64xf32>
    %288 = arith.addf %286, %287 : vector<18x64xf32>
    %cst_165 = arith.constant 5.000000e-01 : f32
    %289 = vector.broadcast %cst_165 : f32 to vector<18x64xf32>
    %290 = arith.mulf %289, %288 : vector<18x64xf32>
    %cst_166 = arith.constant 0.707106769 : f32
    %291 = vector.broadcast %cst_166 : f32 to vector<18x64xf32>
    %292 = arith.mulf %288, %291 : vector<18x64xf32>
    %293 = math.erf %292 : vector<18x64xf32>
    %cst_167 = arith.constant 1.000000e+00 : f32
    %294 = vector.broadcast %cst_167 : f32 to vector<18x64xf32>
    %295 = arith.addf %294, %293 : vector<18x64xf32>
    %296 = arith.mulf %290, %295 : vector<18x64xf32>
    %c0_168 = arith.constant 0 : index
    %c0_169 = arith.constant 0 : index
    %c0_170 = arith.constant 0 : index
    %297 = vector.load %arg20[%c0_168, %c0_169, %c0_170] : memref<2x64x32xbf16, #tpu.memory_space<vmem>>, vector<1x64x32xbf16>
    %298 = vector.shape_cast %297 : vector<1x64x32xbf16> to vector<64x32xbf16>
    %c0_171 = arith.constant 0 : index
    %c0_172 = arith.constant 0 : index
    %c0_173 = arith.constant 0 : index
    %299 = vector.load %arg21[%c0_171, %c0_172, %c0_173] : memref<2x1x32xf32, #tpu.memory_space<vmem>>, vector<1x1x32xf32>
    %300 = vector.shape_cast %299 : vector<1x1x32xf32> to vector<1x32xf32>
    %301 = arith.truncf %296 : vector<18x64xf32> to vector<18x64xbf16>
    %cst_174 = arith.constant dense<0.000000e+00> : vector<18x32xf32>
    %302 = tpu.matmul %301, %298, %cst_174 {dimension_numbers = #tpu.dot_dimension_numbers<[1], [0], [0], [1], [0, 0, 1, 1], [], []>} : vector<18x64xbf16>, vector<64x32xbf16>, vector<18x32xf32> -> vector<18x32xf32>
    %303 = vector.broadcast %300 : vector<1x32xf32> to vector<18x32xf32>
    %304 = arith.addf %302, %303 : vector<18x32xf32>
    %305 = arith.addf %280, %304 : vector<18x32xf32>
    %c0_175 = arith.constant 0 : index
    %c0_176 = arith.constant 0 : index
    %c0_177 = arith.constant 0 : index
    %306 = vector.load %arg24[%c0_175, %c0_176, %c0_177] : memref<2x1x32xf32, #tpu.memory_space<vmem>>, vector<1x1x32xf32>
    %307 = vector.shape_cast %306 : vector<1x1x32xf32> to vector<1x32xf32>
    %c0_178 = arith.constant 0 : index
    %c0_179 = arith.constant 0 : index
    %c0_180 = arith.constant 0 : index
    %308 = vector.load %arg25[%c0_178, %c0_179, %c0_180] : memref<2x1x32xf32, #tpu.memory_space<vmem>>, vector<1x1x32xf32>
    %309 = vector.shape_cast %308 : vector<1x1x32xf32> to vector<1x32xf32>
    %cst_181 = arith.constant dense<0.000000e+00> : vector<18xf32>
    %310 = vector.multi_reduction <add>, %305, %cst_181 [1] : vector<18x32xf32> to vector<18xf32>
    %311 = vector.shape_cast %310 : vector<18xf32> to vector<18x1xf32>
    %cst_182 = arith.constant 3.200000e+01 : f32
    %312 = vector.broadcast %cst_182 : f32 to vector<18x1xf32>
    %313 = arith.divf %311, %312 : vector<18x1xf32>
    %314 = vector.broadcast %313 : vector<18x1xf32> to vector<18x32xf32>
    %315 = arith.subf %305, %314 : vector<18x32xf32>
    %316 = arith.mulf %315, %315 : vector<18x32xf32>
    %cst_183 = arith.constant dense<0.000000e+00> : vector<18xf32>
    %317 = vector.multi_reduction <add>, %316, %cst_183 [1] : vector<18x32xf32> to vector<18xf32>
    %318 = vector.shape_cast %317 : vector<18xf32> to vector<18x1xf32>
    %cst_184 = arith.constant 3.200000e+01 : f32
    %319 = vector.broadcast %cst_184 : f32 to vector<18x1xf32>
    %320 = arith.divf %318, %319 : vector<18x1xf32>
    %321 = vector.broadcast %313 : vector<18x1xf32> to vector<18x32xf32>
    %322 = arith.subf %305, %321 : vector<18x32xf32>
    %cst_185 = arith.constant 9.99999974E-6 : f32
    %323 = vector.broadcast %cst_185 : f32 to vector<18x1xf32>
    %324 = arith.addf %320, %323 : vector<18x1xf32>
    %325 = math.rsqrt %324 : vector<18x1xf32>
    %326 = vector.broadcast %325 : vector<18x1xf32> to vector<18x32xf32>
    %327 = arith.mulf %322, %326 : vector<18x32xf32>
    %328 = vector.broadcast %307 : vector<1x32xf32> to vector<18x32xf32>
    %329 = arith.mulf %327, %328 : vector<18x32xf32>
    %330 = vector.broadcast %309 : vector<1x32xf32> to vector<18x32xf32>
    %331 = arith.addf %329, %330 : vector<18x32xf32>
    %332 = arith.truncf %331 : vector<18x32xf32> to vector<18x32xbf16>
    %cst_186 = arith.constant 0.000000e+00 : f32
    %333 = vector.broadcast %cst_186 : f32 to vector<18x32xf32>
    %c4 = arith.constant 4 : index
    %c0_187 = arith.constant 0 : index
    %c0_188 = arith.constant 0 : index
    %334 = vector.load %arg10[%c4, %c0_187, %c0_188] : memref<8x32x8xbf16, #tpu.memory_space<vmem>>, vector<1x32x8xbf16>
    %335 = vector.shape_cast %334 : vector<1x32x8xbf16> to vector<32x8xbf16>
    %cst_189 = arith.constant dense<0.000000e+00> : vector<18x8xf32>
    %336 = tpu.matmul %332, %335, %cst_189 {dimension_numbers = #tpu.dot_dimension_numbers<[1], [0], [0], [1], [0, 0, 1, 1], [], []>} : vector<18x32xbf16>, vector<32x8xbf16>, vector<18x8xf32> -> vector<18x8xf32>
    %c4_190 = arith.constant 4 : index
    %c0_191 = arith.constant 0 : index
    %c0_192 = arith.constant 0 : index
    %337 = vector.load %arg11[%c4_190, %c0_191, %c0_192] : memref<8x1x8xf32, #tpu.memory_space<vmem>>, vector<1x1x8xf32>
    %338 = vector.shape_cast %337 : vector<1x1x8xf32> to vector<1x8xf32>
    %339 = vector.broadcast %338 : vector<1x8xf32> to vector<18x8xf32>
    %340 = arith.addf %336, %339 : vector<18x8xf32>
    %341 = vector.shape_cast %340 : vector<18x8xf32> to vector<2x9x8xf32>
    %c4_193 = arith.constant 4 : index
    %c0_194 = arith.constant 0 : index
    %c0_195 = arith.constant 0 : index
    %342 = vector.load %arg12[%c4_193, %c0_194, %c0_195] : memref<8x32x8xbf16, #tpu.memory_space<vmem>>, vector<1x32x8xbf16>
    %343 = vector.shape_cast %342 : vector<1x32x8xbf16> to vector<32x8xbf16>
    %cst_196 = arith.constant dense<0.000000e+00> : vector<18x8xf32>
    %344 = tpu.matmul %332, %343, %cst_196 {dimension_numbers = #tpu.dot_dimension_numbers<[1], [0], [0], [1], [0, 0, 1, 1], [], []>} : vector<18x32xbf16>, vector<32x8xbf16>, vector<18x8xf32> -> vector<18x8xf32>
    %c4_197 = arith.constant 4 : index
    %c0_198 = arith.constant 0 : index
    %c0_199 = arith.constant 0 : index
    %345 = vector.load %arg13[%c4_197, %c0_198, %c0_199] : memref<8x1x8xf32, #tpu.memory_space<vmem>>, vector<1x1x8xf32>
    %346 = vector.shape_cast %345 : vector<1x1x8xf32> to vector<1x8xf32>
    %347 = vector.broadcast %346 : vector<1x8xf32> to vector<18x8xf32>
    %348 = arith.addf %344, %347 : vector<18x8xf32>
    %349 = vector.shape_cast %348 : vector<18x8xf32> to vector<2x9x8xf32>
    %c4_200 = arith.constant 4 : index
    %c0_201 = arith.constant 0 : index
    %c0_202 = arith.constant 0 : index
    %350 = vector.load %arg14[%c4_200, %c0_201, %c0_202] : memref<8x32x8xbf16, #tpu.memory_space<vmem>>, vector<1x32x8xbf16>
    %351 = vector.shape_cast %350 : vector<1x32x8xbf16> to vector<32x8xbf16>
    %cst_203 = arith.constant dense<0.000000e+00> : vector<18x8xf32>
    %352 = tpu.matmul %332, %351, %cst_203 {dimension_numbers = #tpu.dot_dimension_numbers<[1], [0], [0], [1], [0, 0, 1, 1], [], []>} : vector<18x32xbf16>, vector<32x8xbf16>, vector<18x8xf32> -> vector<18x8xf32>
    %c4_204 = arith.constant 4 : index
    %c0_205 = arith.constant 0 : index
    %c0_206 = arith.constant 0 : index
    %353 = vector.load %arg15[%c4_204, %c0_205, %c0_206] : memref<8x1x8xf32, #tpu.memory_space<vmem>>, vector<1x1x8xf32>
    %354 = vector.shape_cast %353 : vector<1x1x8xf32> to vector<1x8xf32>
    %355 = vector.broadcast %354 : vector<1x8xf32> to vector<18x8xf32>
    %356 = arith.addf %352, %355 : vector<18x8xf32>
    %357 = vector.shape_cast %356 : vector<18x8xf32> to vector<2x9x8xf32>
    %358 = arith.truncf %341 : vector<2x9x8xf32> to vector<2x9x8xbf16>
    %359 = arith.truncf %349 : vector<2x9x8xf32> to vector<2x9x8xbf16>
    "tpu.trace_start"() <{level = 10 : i32, message = "bqd,bkd->bqk"}> : () -> ()
    %cst_207 = arith.constant dense<0.000000e+00> : vector<2x9x9xf32>
    %360 = tpu.matmul %358, %359, %cst_207 {dimension_numbers = #tpu.dot_dimension_numbers<[2], [2], [1], [1], [0, 0, 0, 1, 1, 1], [0], [0]>} : vector<2x9x8xbf16>, vector<2x9x8xbf16>, vector<2x9x9xf32> -> vector<2x9x9xf32>
    "tpu.trace_stop"() : () -> ()
    %cst_208 = arith.constant dense<0xFF800000> : vector<2x9xf32>
    %361 = vector.multi_reduction <maximumf>, %360, %cst_208 [2] : vector<2x9x9xf32> to vector<2x9xf32>
    %362 = vector.shape_cast %361 : vector<2x9xf32> to vector<2x9x1xf32>
    %363 = vector.broadcast %362 : vector<2x9x1xf32> to vector<2x9x9xf32>
    %364 = arith.subf %360, %363 : vector<2x9x9xf32>
    %365 = math.exp %364 : vector<2x9x9xf32>
    %cst_209 = arith.constant dense<0.000000e+00> : vector<2x9xf32>
    %366 = vector.multi_reduction <add>, %365, %cst_209 [2] : vector<2x9x9xf32> to vector<2x9xf32>
    %367 = vector.shape_cast %366 : vector<2x9xf32> to vector<2x9x1xf32>
    %368 = tpu.reciprocal %367 {approx = true} : vector<2x9x1xf32> -> vector<2x9x1xf32>
    %369 = vector.broadcast %368 : vector<2x9x1xf32> to vector<2x9x9xf32>
    %370 = arith.mulf %365, %369 : vector<2x9x9xf32>
    %371 = arith.truncf %370 : vector<2x9x9xf32> to vector<2x9x9xbf16>
    %372 = arith.truncf %357 : vector<2x9x8xf32> to vector<2x9x8xbf16>
    "tpu.trace_start"() <{level = 10 : i32, message = "bqk,bkd->bqd"}> : () -> ()
    %cst_210 = arith.constant dense<0.000000e+00> : vector<2x9x8xf32>
    %373 = tpu.matmul %371, %372, %cst_210 {dimension_numbers = #tpu.dot_dimension_numbers<[2], [1], [1], [2], [0, 0, 0, 1, 1, 2], [0], [0]>} : vector<2x9x9xbf16>, vector<2x9x8xbf16>, vector<2x9x8xf32> -> vector<2x9x8xf32>
    "tpu.trace_stop"() : () -> ()
    %374 = vector.shape_cast %373 : vector<2x9x8xf32> to vector<18x8xf32>
    %375 = arith.truncf %374 : vector<18x8xf32> to vector<18x8xbf16>
    %c4_211 = arith.constant 4 : index
    %c0_212 = arith.constant 0 : index
    %c0_213 = arith.constant 0 : index
    %376 = vector.load %arg16[%c4_211, %c0_212, %c0_213] : memref<8x8x32xbf16, #tpu.memory_space<vmem>>, vector<1x8x32xbf16>
    %377 = vector.shape_cast %376 : vector<1x8x32xbf16> to vector<8x32xbf16>
    %cst_214 = arith.constant dense<0.000000e+00> : vector<18x32xf32>
    %378 = tpu.matmul %375, %377, %cst_214 {dimension_numbers = #tpu.dot_dimension_numbers<[1], [0], [0], [1], [0, 0, 1, 1], [], []>} : vector<18x8xbf16>, vector<8x32xbf16>, vector<18x32xf32> -> vector<18x32xf32>
    %379 = arith.addf %333, %378 : vector<18x32xf32>
    %c5 = arith.constant 5 : index
    %c0_215 = arith.constant 0 : index
    %c0_216 = arith.constant 0 : index
    %380 = vector.load %arg10[%c5, %c0_215, %c0_216] : memref<8x32x8xbf16, #tpu.memory_space<vmem>>, vector<1x32x8xbf16>
    %381 = vector.shape_cast %380 : vector<1x32x8xbf16> to vector<32x8xbf16>
    %cst_217 = arith.constant dense<0.000000e+00> : vector<18x8xf32>
    %382 = tpu.matmul %332, %381, %cst_217 {dimension_numbers = #tpu.dot_dimension_numbers<[1], [0], [0], [1], [0, 0, 1, 1], [], []>} : vector<18x32xbf16>, vector<32x8xbf16>, vector<18x8xf32> -> vector<18x8xf32>
    %c5_218 = arith.constant 5 : index
    %c0_219 = arith.constant 0 : index
    %c0_220 = arith.constant 0 : index
    %383 = vector.load %arg11[%c5_218, %c0_219, %c0_220] : memref<8x1x8xf32, #tpu.memory_space<vmem>>, vector<1x1x8xf32>
    %384 = vector.shape_cast %383 : vector<1x1x8xf32> to vector<1x8xf32>
    %385 = vector.broadcast %384 : vector<1x8xf32> to vector<18x8xf32>
    %386 = arith.addf %382, %385 : vector<18x8xf32>
    %387 = vector.shape_cast %386 : vector<18x8xf32> to vector<2x9x8xf32>
    %c5_221 = arith.constant 5 : index
    %c0_222 = arith.constant 0 : index
    %c0_223 = arith.constant 0 : index
    %388 = vector.load %arg12[%c5_221, %c0_222, %c0_223] : memref<8x32x8xbf16, #tpu.memory_space<vmem>>, vector<1x32x8xbf16>
    %389 = vector.shape_cast %388 : vector<1x32x8xbf16> to vector<32x8xbf16>
    %cst_224 = arith.constant dense<0.000000e+00> : vector<18x8xf32>
    %390 = tpu.matmul %332, %389, %cst_224 {dimension_numbers = #tpu.dot_dimension_numbers<[1], [0], [0], [1], [0, 0, 1, 1], [], []>} : vector<18x32xbf16>, vector<32x8xbf16>, vector<18x8xf32> -> vector<18x8xf32>
    %c5_225 = arith.constant 5 : index
    %c0_226 = arith.constant 0 : index
    %c0_227 = arith.constant 0 : index
    %391 = vector.load %arg13[%c5_225, %c0_226, %c0_227] : memref<8x1x8xf32, #tpu.memory_space<vmem>>, vector<1x1x8xf32>
    %392 = vector.shape_cast %391 : vector<1x1x8xf32> to vector<1x8xf32>
    %393 = vector.broadcast %392 : vector<1x8xf32> to vector<18x8xf32>
    %394 = arith.addf %390, %393 : vector<18x8xf32>
    %395 = vector.shape_cast %394 : vector<18x8xf32> to vector<2x9x8xf32>
    %c5_228 = arith.constant 5 : index
    %c0_229 = arith.constant 0 : index
    %c0_230 = arith.constant 0 : index
    %396 = vector.load %arg14[%c5_228, %c0_229, %c0_230] : memref<8x32x8xbf16, #tpu.memory_space<vmem>>, vector<1x32x8xbf16>
    %397 = vector.shape_cast %396 : vector<1x32x8xbf16> to vector<32x8xbf16>
    %cst_231 = arith.constant dense<0.000000e+00> : vector<18x8xf32>
    %398 = tpu.matmul %332, %397, %cst_231 {dimension_numbers = #tpu.dot_dimension_numbers<[1], [0], [0], [1], [0, 0, 1, 1], [], []>} : vector<18x32xbf16>, vector<32x8xbf16>, vector<18x8xf32> -> vector<18x8xf32>
    %c5_232 = arith.constant 5 : index
    %c0_233 = arith.constant 0 : index
    %c0_234 = arith.constant 0 : index
    %399 = vector.load %arg15[%c5_232, %c0_233, %c0_234] : memref<8x1x8xf32, #tpu.memory_space<vmem>>, vector<1x1x8xf32>
    %400 = vector.shape_cast %399 : vector<1x1x8xf32> to vector<1x8xf32>
    %401 = vector.broadcast %400 : vector<1x8xf32> to vector<18x8xf32>
    %402 = arith.addf %398, %401 : vector<18x8xf32>
    %403 = vector.shape_cast %402 : vector<18x8xf32> to vector<2x9x8xf32>
    %404 = arith.truncf %387 : vector<2x9x8xf32> to vector<2x9x8xbf16>
    %405 = arith.truncf %395 : vector<2x9x8xf32> to vector<2x9x8xbf16>
    "tpu.trace_start"() <{level = 10 : i32, message = "bqd,bkd->bqk"}> : () -> ()
    %cst_235 = arith.constant dense<0.000000e+00> : vector<2x9x9xf32>
    %406 = tpu.matmul %404, %405, %cst_235 {dimension_numbers = #tpu.dot_dimension_numbers<[2], [2], [1], [1], [0, 0, 0, 1, 1, 1], [0], [0]>} : vector<2x9x8xbf16>, vector<2x9x8xbf16>, vector<2x9x9xf32> -> vector<2x9x9xf32>
    "tpu.trace_stop"() : () -> ()
    %cst_236 = arith.constant dense<0xFF800000> : vector<2x9xf32>
    %407 = vector.multi_reduction <maximumf>, %406, %cst_236 [2] : vector<2x9x9xf32> to vector<2x9xf32>
    %408 = vector.shape_cast %407 : vector<2x9xf32> to vector<2x9x1xf32>
    %409 = vector.broadcast %408 : vector<2x9x1xf32> to vector<2x9x9xf32>
    %410 = arith.subf %406, %409 : vector<2x9x9xf32>
    %411 = math.exp %410 : vector<2x9x9xf32>
    %cst_237 = arith.constant dense<0.000000e+00> : vector<2x9xf32>
    %412 = vector.multi_reduction <add>, %411, %cst_237 [2] : vector<2x9x9xf32> to vector<2x9xf32>
    %413 = vector.shape_cast %412 : vector<2x9xf32> to vector<2x9x1xf32>
    %414 = tpu.reciprocal %413 {approx = true} : vector<2x9x1xf32> -> vector<2x9x1xf32>
    %415 = vector.broadcast %414 : vector<2x9x1xf32> to vector<2x9x9xf32>
    %416 = arith.mulf %411, %415 : vector<2x9x9xf32>
    %417 = arith.truncf %416 : vector<2x9x9xf32> to vector<2x9x9xbf16>
    %418 = arith.truncf %403 : vector<2x9x8xf32> to vector<2x9x8xbf16>
    "tpu.trace_start"() <{level = 10 : i32, message = "bqk,bkd->bqd"}> : () -> ()
    %cst_238 = arith.constant dense<0.000000e+00> : vector<2x9x8xf32>
    %419 = tpu.matmul %417, %418, %cst_238 {dimension_numbers = #tpu.dot_dimension_numbers<[2], [1], [1], [2], [0, 0, 0, 1, 1, 2], [0], [0]>} : vector<2x9x9xbf16>, vector<2x9x8xbf16>, vector<2x9x8xf32> -> vector<2x9x8xf32>
    "tpu.trace_stop"() : () -> ()
    %420 = vector.shape_cast %419 : vector<2x9x8xf32> to vector<18x8xf32>
    %421 = arith.truncf %420 : vector<18x8xf32> to vector<18x8xbf16>
    %c5_239 = arith.constant 5 : index
    %c0_240 = arith.constant 0 : index
    %c0_241 = arith.constant 0 : index
    %422 = vector.load %arg16[%c5_239, %c0_240, %c0_241] : memref<8x8x32xbf16, #tpu.memory_space<vmem>>, vector<1x8x32xbf16>
    %423 = vector.shape_cast %422 : vector<1x8x32xbf16> to vector<8x32xbf16>
    %cst_242 = arith.constant dense<0.000000e+00> : vector<18x32xf32>
    %424 = tpu.matmul %421, %423, %cst_242 {dimension_numbers = #tpu.dot_dimension_numbers<[1], [0], [0], [1], [0, 0, 1, 1], [], []>} : vector<18x8xbf16>, vector<8x32xbf16>, vector<18x32xf32> -> vector<18x32xf32>
    %425 = arith.addf %379, %424 : vector<18x32xf32>
    %c6 = arith.constant 6 : index
    %c0_243 = arith.constant 0 : index
    %c0_244 = arith.constant 0 : index
    %426 = vector.load %arg10[%c6, %c0_243, %c0_244] : memref<8x32x8xbf16, #tpu.memory_space<vmem>>, vector<1x32x8xbf16>
    %427 = vector.shape_cast %426 : vector<1x32x8xbf16> to vector<32x8xbf16>
    %cst_245 = arith.constant dense<0.000000e+00> : vector<18x8xf32>
    %428 = tpu.matmul %332, %427, %cst_245 {dimension_numbers = #tpu.dot_dimension_numbers<[1], [0], [0], [1], [0, 0, 1, 1], [], []>} : vector<18x32xbf16>, vector<32x8xbf16>, vector<18x8xf32> -> vector<18x8xf32>
    %c6_246 = arith.constant 6 : index
    %c0_247 = arith.constant 0 : index
    %c0_248 = arith.constant 0 : index
    %429 = vector.load %arg11[%c6_246, %c0_247, %c0_248] : memref<8x1x8xf32, #tpu.memory_space<vmem>>, vector<1x1x8xf32>
    %430 = vector.shape_cast %429 : vector<1x1x8xf32> to vector<1x8xf32>
    %431 = vector.broadcast %430 : vector<1x8xf32> to vector<18x8xf32>
    %432 = arith.addf %428, %431 : vector<18x8xf32>
    %433 = vector.shape_cast %432 : vector<18x8xf32> to vector<2x9x8xf32>
    %c6_249 = arith.constant 6 : index
    %c0_250 = arith.constant 0 : index
    %c0_251 = arith.constant 0 : index
    %434 = vector.load %arg12[%c6_249, %c0_250, %c0_251] : memref<8x32x8xbf16, #tpu.memory_space<vmem>>, vector<1x32x8xbf16>
    %435 = vector.shape_cast %434 : vector<1x32x8xbf16> to vector<32x8xbf16>
    %cst_252 = arith.constant dense<0.000000e+00> : vector<18x8xf32>
    %436 = tpu.matmul %332, %435, %cst_252 {dimension_numbers = #tpu.dot_dimension_numbers<[1], [0], [0], [1], [0, 0, 1, 1], [], []>} : vector<18x32xbf16>, vector<32x8xbf16>, vector<18x8xf32> -> vector<18x8xf32>
    %c6_253 = arith.constant 6 : index
    %c0_254 = arith.constant 0 : index
    %c0_255 = arith.constant 0 : index
    %437 = vector.load %arg13[%c6_253, %c0_254, %c0_255] : memref<8x1x8xf32, #tpu.memory_space<vmem>>, vector<1x1x8xf32>
    %438 = vector.shape_cast %437 : vector<1x1x8xf32> to vector<1x8xf32>
    %439 = vector.broadcast %438 : vector<1x8xf32> to vector<18x8xf32>
    %440 = arith.addf %436, %439 : vector<18x8xf32>
    %441 = vector.shape_cast %440 : vector<18x8xf32> to vector<2x9x8xf32>
    %c6_256 = arith.constant 6 : index
    %c0_257 = arith.constant 0 : index
    %c0_258 = arith.constant 0 : index
    %442 = vector.load %arg14[%c6_256, %c0_257, %c0_258] : memref<8x32x8xbf16, #tpu.memory_space<vmem>>, vector<1x32x8xbf16>
    %443 = vector.shape_cast %442 : vector<1x32x8xbf16> to vector<32x8xbf16>
    %cst_259 = arith.constant dense<0.000000e+00> : vector<18x8xf32>
    %444 = tpu.matmul %332, %443, %cst_259 {dimension_numbers = #tpu.dot_dimension_numbers<[1], [0], [0], [1], [0, 0, 1, 1], [], []>} : vector<18x32xbf16>, vector<32x8xbf16>, vector<18x8xf32> -> vector<18x8xf32>
    %c6_260 = arith.constant 6 : index
    %c0_261 = arith.constant 0 : index
    %c0_262 = arith.constant 0 : index
    %445 = vector.load %arg15[%c6_260, %c0_261, %c0_262] : memref<8x1x8xf32, #tpu.memory_space<vmem>>, vector<1x1x8xf32>
    %446 = vector.shape_cast %445 : vector<1x1x8xf32> to vector<1x8xf32>
    %447 = vector.broadcast %446 : vector<1x8xf32> to vector<18x8xf32>
    %448 = arith.addf %444, %447 : vector<18x8xf32>
    %449 = vector.shape_cast %448 : vector<18x8xf32> to vector<2x9x8xf32>
    %450 = arith.truncf %433 : vector<2x9x8xf32> to vector<2x9x8xbf16>
    %451 = arith.truncf %441 : vector<2x9x8xf32> to vector<2x9x8xbf16>
    "tpu.trace_start"() <{level = 10 : i32, message = "bqd,bkd->bqk"}> : () -> ()
    %cst_263 = arith.constant dense<0.000000e+00> : vector<2x9x9xf32>
    %452 = tpu.matmul %450, %451, %cst_263 {dimension_numbers = #tpu.dot_dimension_numbers<[2], [2], [1], [1], [0, 0, 0, 1, 1, 1], [0], [0]>} : vector<2x9x8xbf16>, vector<2x9x8xbf16>, vector<2x9x9xf32> -> vector<2x9x9xf32>
    "tpu.trace_stop"() : () -> ()
    %cst_264 = arith.constant dense<0xFF800000> : vector<2x9xf32>
    %453 = vector.multi_reduction <maximumf>, %452, %cst_264 [2] : vector<2x9x9xf32> to vector<2x9xf32>
    %454 = vector.shape_cast %453 : vector<2x9xf32> to vector<2x9x1xf32>
    %455 = vector.broadcast %454 : vector<2x9x1xf32> to vector<2x9x9xf32>
    %456 = arith.subf %452, %455 : vector<2x9x9xf32>
    %457 = math.exp %456 : vector<2x9x9xf32>
    %cst_265 = arith.constant dense<0.000000e+00> : vector<2x9xf32>
    %458 = vector.multi_reduction <add>, %457, %cst_265 [2] : vector<2x9x9xf32> to vector<2x9xf32>
    %459 = vector.shape_cast %458 : vector<2x9xf32> to vector<2x9x1xf32>
    %460 = tpu.reciprocal %459 {approx = true} : vector<2x9x1xf32> -> vector<2x9x1xf32>
    %461 = vector.broadcast %460 : vector<2x9x1xf32> to vector<2x9x9xf32>
    %462 = arith.mulf %457, %461 : vector<2x9x9xf32>
    %463 = arith.truncf %462 : vector<2x9x9xf32> to vector<2x9x9xbf16>
    %464 = arith.truncf %449 : vector<2x9x8xf32> to vector<2x9x8xbf16>
    "tpu.trace_start"() <{level = 10 : i32, message = "bqk,bkd->bqd"}> : () -> ()
    %cst_266 = arith.constant dense<0.000000e+00> : vector<2x9x8xf32>
    %465 = tpu.matmul %463, %464, %cst_266 {dimension_numbers = #tpu.dot_dimension_numbers<[2], [1], [1], [2], [0, 0, 0, 1, 1, 2], [0], [0]>} : vector<2x9x9xbf16>, vector<2x9x8xbf16>, vector<2x9x8xf32> -> vector<2x9x8xf32>
    "tpu.trace_stop"() : () -> ()
    %466 = vector.shape_cast %465 : vector<2x9x8xf32> to vector<18x8xf32>
    %467 = arith.truncf %466 : vector<18x8xf32> to vector<18x8xbf16>
    %c6_267 = arith.constant 6 : index
    %c0_268 = arith.constant 0 : index
    %c0_269 = arith.constant 0 : index
    %468 = vector.load %arg16[%c6_267, %c0_268, %c0_269] : memref<8x8x32xbf16, #tpu.memory_space<vmem>>, vector<1x8x32xbf16>
    %469 = vector.shape_cast %468 : vector<1x8x32xbf16> to vector<8x32xbf16>
    %cst_270 = arith.constant dense<0.000000e+00> : vector<18x32xf32>
    %470 = tpu.matmul %467, %469, %cst_270 {dimension_numbers = #tpu.dot_dimension_numbers<[1], [0], [0], [1], [0, 0, 1, 1], [], []>} : vector<18x8xbf16>, vector<8x32xbf16>, vector<18x32xf32> -> vector<18x32xf32>
    %471 = arith.addf %425, %470 : vector<18x32xf32>
    %c7 = arith.constant 7 : index
    %c0_271 = arith.constant 0 : index
    %c0_272 = arith.constant 0 : index
    %472 = vector.load %arg10[%c7, %c0_271, %c0_272] : memref<8x32x8xbf16, #tpu.memory_space<vmem>>, vector<1x32x8xbf16>
    %473 = vector.shape_cast %472 : vector<1x32x8xbf16> to vector<32x8xbf16>
    %cst_273 = arith.constant dense<0.000000e+00> : vector<18x8xf32>
    %474 = tpu.matmul %332, %473, %cst_273 {dimension_numbers = #tpu.dot_dimension_numbers<[1], [0], [0], [1], [0, 0, 1, 1], [], []>} : vector<18x32xbf16>, vector<32x8xbf16>, vector<18x8xf32> -> vector<18x8xf32>
    %c7_274 = arith.constant 7 : index
    %c0_275 = arith.constant 0 : index
    %c0_276 = arith.constant 0 : index
    %475 = vector.load %arg11[%c7_274, %c0_275, %c0_276] : memref<8x1x8xf32, #tpu.memory_space<vmem>>, vector<1x1x8xf32>
    %476 = vector.shape_cast %475 : vector<1x1x8xf32> to vector<1x8xf32>
    %477 = vector.broadcast %476 : vector<1x8xf32> to vector<18x8xf32>
    %478 = arith.addf %474, %477 : vector<18x8xf32>
    %479 = vector.shape_cast %478 : vector<18x8xf32> to vector<2x9x8xf32>
    %c7_277 = arith.constant 7 : index
    %c0_278 = arith.constant 0 : index
    %c0_279 = arith.constant 0 : index
    %480 = vector.load %arg12[%c7_277, %c0_278, %c0_279] : memref<8x32x8xbf16, #tpu.memory_space<vmem>>, vector<1x32x8xbf16>
    %481 = vector.shape_cast %480 : vector<1x32x8xbf16> to vector<32x8xbf16>
    %cst_280 = arith.constant dense<0.000000e+00> : vector<18x8xf32>
    %482 = tpu.matmul %332, %481, %cst_280 {dimension_numbers = #tpu.dot_dimension_numbers<[1], [0], [0], [1], [0, 0, 1, 1], [], []>} : vector<18x32xbf16>, vector<32x8xbf16>, vector<18x8xf32> -> vector<18x8xf32>
    %c7_281 = arith.constant 7 : index
    %c0_282 = arith.constant 0 : index
    %c0_283 = arith.constant 0 : index
    %483 = vector.load %arg13[%c7_281, %c0_282, %c0_283] : memref<8x1x8xf32, #tpu.memory_space<vmem>>, vector<1x1x8xf32>
    %484 = vector.shape_cast %483 : vector<1x1x8xf32> to vector<1x8xf32>
    %485 = vector.broadcast %484 : vector<1x8xf32> to vector<18x8xf32>
    %486 = arith.addf %482, %485 : vector<18x8xf32>
    %487 = vector.shape_cast %486 : vector<18x8xf32> to vector<2x9x8xf32>
    %c7_284 = arith.constant 7 : index
    %c0_285 = arith.constant 0 : index
    %c0_286 = arith.constant 0 : index
    %488 = vector.load %arg14[%c7_284, %c0_285, %c0_286] : memref<8x32x8xbf16, #tpu.memory_space<vmem>>, vector<1x32x8xbf16>
    %489 = vector.shape_cast %488 : vector<1x32x8xbf16> to vector<32x8xbf16>
    %cst_287 = arith.constant dense<0.000000e+00> : vector<18x8xf32>
    %490 = tpu.matmul %332, %489, %cst_287 {dimension_numbers = #tpu.dot_dimension_numbers<[1], [0], [0], [1], [0, 0, 1, 1], [], []>} : vector<18x32xbf16>, vector<32x8xbf16>, vector<18x8xf32> -> vector<18x8xf32>
    %c7_288 = arith.constant 7 : index
    %c0_289 = arith.constant 0 : index
    %c0_290 = arith.constant 0 : index
    %491 = vector.load %arg15[%c7_288, %c0_289, %c0_290] : memref<8x1x8xf32, #tpu.memory_space<vmem>>, vector<1x1x8xf32>
    %492 = vector.shape_cast %491 : vector<1x1x8xf32> to vector<1x8xf32>
    %493 = vector.broadcast %492 : vector<1x8xf32> to vector<18x8xf32>
    %494 = arith.addf %490, %493 : vector<18x8xf32>
    %495 = vector.shape_cast %494 : vector<18x8xf32> to vector<2x9x8xf32>
    %496 = arith.truncf %479 : vector<2x9x8xf32> to vector<2x9x8xbf16>
    %497 = arith.truncf %487 : vector<2x9x8xf32> to vector<2x9x8xbf16>
    "tpu.trace_start"() <{level = 10 : i32, message = "bqd,bkd->bqk"}> : () -> ()
    %cst_291 = arith.constant dense<0.000000e+00> : vector<2x9x9xf32>
    %498 = tpu.matmul %496, %497, %cst_291 {dimension_numbers = #tpu.dot_dimension_numbers<[2], [2], [1], [1], [0, 0, 0, 1, 1, 1], [0], [0]>} : vector<2x9x8xbf16>, vector<2x9x8xbf16>, vector<2x9x9xf32> -> vector<2x9x9xf32>
    "tpu.trace_stop"() : () -> ()
    %cst_292 = arith.constant dense<0xFF800000> : vector<2x9xf32>
    %499 = vector.multi_reduction <maximumf>, %498, %cst_292 [2] : vector<2x9x9xf32> to vector<2x9xf32>
    %500 = vector.shape_cast %499 : vector<2x9xf32> to vector<2x9x1xf32>
    %501 = vector.broadcast %500 : vector<2x9x1xf32> to vector<2x9x9xf32>
    %502 = arith.subf %498, %501 : vector<2x9x9xf32>
    %503 = math.exp %502 : vector<2x9x9xf32>
    %cst_293 = arith.constant dense<0.000000e+00> : vector<2x9xf32>
    %504 = vector.multi_reduction <add>, %503, %cst_293 [2] : vector<2x9x9xf32> to vector<2x9xf32>
    %505 = vector.shape_cast %504 : vector<2x9xf32> to vector<2x9x1xf32>
    %506 = tpu.reciprocal %505 {approx = true} : vector<2x9x1xf32> -> vector<2x9x1xf32>
    %507 = vector.broadcast %506 : vector<2x9x1xf32> to vector<2x9x9xf32>
    %508 = arith.mulf %503, %507 : vector<2x9x9xf32>
    %509 = arith.truncf %508 : vector<2x9x9xf32> to vector<2x9x9xbf16>
    %510 = arith.truncf %495 : vector<2x9x8xf32> to vector<2x9x8xbf16>
    "tpu.trace_start"() <{level = 10 : i32, message = "bqk,bkd->bqd"}> : () -> ()
    %cst_294 = arith.constant dense<0.000000e+00> : vector<2x9x8xf32>
    %511 = tpu.matmul %509, %510, %cst_294 {dimension_numbers = #tpu.dot_dimension_numbers<[2], [1], [1], [2], [0, 0, 0, 1, 1, 2], [0], [0]>} : vector<2x9x9xbf16>, vector<2x9x8xbf16>, vector<2x9x8xf32> -> vector<2x9x8xf32>
    "tpu.trace_stop"() : () -> ()
    %512 = vector.shape_cast %511 : vector<2x9x8xf32> to vector<18x8xf32>
    %513 = arith.truncf %512 : vector<18x8xf32> to vector<18x8xbf16>
    %c7_295 = arith.constant 7 : index
    %c0_296 = arith.constant 0 : index
    %c0_297 = arith.constant 0 : index
    %514 = vector.load %arg16[%c7_295, %c0_296, %c0_297] : memref<8x8x32xbf16, #tpu.memory_space<vmem>>, vector<1x8x32xbf16>
    %515 = vector.shape_cast %514 : vector<1x8x32xbf16> to vector<8x32xbf16>
    %cst_298 = arith.constant dense<0.000000e+00> : vector<18x32xf32>
    %516 = tpu.matmul %513, %515, %cst_298 {dimension_numbers = #tpu.dot_dimension_numbers<[1], [0], [0], [1], [0, 0, 1, 1], [], []>} : vector<18x8xbf16>, vector<8x32xbf16>, vector<18x32xf32> -> vector<18x32xf32>
    %517 = arith.addf %471, %516 : vector<18x32xf32>
    %518 = arith.addf %331, %517 : vector<18x32xf32>
    %c1_299 = arith.constant 1 : index
    %c0_300 = arith.constant 0 : index
    %c0_301 = arith.constant 0 : index
    %519 = vector.load %arg17[%c1_299, %c0_300, %c0_301] : memref<2x1x32xf32, #tpu.memory_space<vmem>>, vector<1x1x32xf32>
    %520 = vector.shape_cast %519 : vector<1x1x32xf32> to vector<1x32xf32>
    %521 = vector.broadcast %520 : vector<1x32xf32> to vector<18x32xf32>
    %522 = arith.addf %518, %521 : vector<18x32xf32>
    %c1_302 = arith.constant 1 : index
    %c0_303 = arith.constant 0 : index
    %c0_304 = arith.constant 0 : index
    %523 = vector.load %arg22[%c1_302, %c0_303, %c0_304] : memref<2x1x32xf32, #tpu.memory_space<vmem>>, vector<1x1x32xf32>
    %524 = vector.shape_cast %523 : vector<1x1x32xf32> to vector<1x32xf32>
    %c1_305 = arith.constant 1 : index
    %c0_306 = arith.constant 0 : index
    %c0_307 = arith.constant 0 : index
    %525 = vector.load %arg23[%c1_305, %c0_306, %c0_307] : memref<2x1x32xf32, #tpu.memory_space<vmem>>, vector<1x1x32xf32>
    %526 = vector.shape_cast %525 : vector<1x1x32xf32> to vector<1x32xf32>
    %cst_308 = arith.constant dense<0.000000e+00> : vector<18xf32>
    %527 = vector.multi_reduction <add>, %522, %cst_308 [1] : vector<18x32xf32> to vector<18xf32>
    %528 = vector.shape_cast %527 : vector<18xf32> to vector<18x1xf32>
    %cst_309 = arith.constant 3.200000e+01 : f32
    %529 = vector.broadcast %cst_309 : f32 to vector<18x1xf32>
    %530 = arith.divf %528, %529 : vector<18x1xf32>
    %531 = vector.broadcast %530 : vector<18x1xf32> to vector<18x32xf32>
    %532 = arith.subf %522, %531 : vector<18x32xf32>
    %533 = arith.mulf %532, %532 : vector<18x32xf32>
    %cst_310 = arith.constant dense<0.000000e+00> : vector<18xf32>
    %534 = vector.multi_reduction <add>, %533, %cst_310 [1] : vector<18x32xf32> to vector<18xf32>
    %535 = vector.shape_cast %534 : vector<18xf32> to vector<18x1xf32>
    %cst_311 = arith.constant 3.200000e+01 : f32
    %536 = vector.broadcast %cst_311 : f32 to vector<18x1xf32>
    %537 = arith.divf %535, %536 : vector<18x1xf32>
    %538 = vector.broadcast %530 : vector<18x1xf32> to vector<18x32xf32>
    %539 = arith.subf %522, %538 : vector<18x32xf32>
    %cst_312 = arith.constant 9.99999974E-6 : f32
    %540 = vector.broadcast %cst_312 : f32 to vector<18x1xf32>
    %541 = arith.addf %537, %540 : vector<18x1xf32>
    %542 = math.rsqrt %541 : vector<18x1xf32>
    %543 = vector.broadcast %542 : vector<18x1xf32> to vector<18x32xf32>
    %544 = arith.mulf %539, %543 : vector<18x32xf32>
    %545 = vector.broadcast %524 : vector<1x32xf32> to vector<18x32xf32>
    %546 = arith.mulf %544, %545 : vector<18x32xf32>
    %547 = vector.broadcast %526 : vector<1x32xf32> to vector<18x32xf32>
    %548 = arith.addf %546, %547 : vector<18x32xf32>
    %c1_313 = arith.constant 1 : index
    %c0_314 = arith.constant 0 : index
    %c0_315 = arith.constant 0 : index
    %549 = vector.load %arg18[%c1_313, %c0_314, %c0_315] : memref<2x32x64xbf16, #tpu.memory_space<vmem>>, vector<1x32x64xbf16>
    %550 = vector.shape_cast %549 : vector<1x32x64xbf16> to vector<32x64xbf16>
    %c1_316 = arith.constant 1 : index
    %c0_317 = arith.constant 0 : index
    %c0_318 = arith.constant 0 : index
    %551 = vector.load %arg19[%c1_316, %c0_317, %c0_318] : memref<2x1x64xf32, #tpu.memory_space<vmem>>, vector<1x1x64xf32>
    %552 = vector.shape_cast %551 : vector<1x1x64xf32> to vector<1x64xf32>
    %553 = arith.truncf %548 : vector<18x32xf32> to vector<18x32xbf16>
    %cst_319 = arith.constant dense<0.000000e+00> : vector<18x64xf32>
    %554 = tpu.matmul %553, %550, %cst_319 {dimension_numbers = #tpu.dot_dimension_numbers<[1], [0], [0], [1], [0, 0, 1, 1], [], []>} : vector<18x32xbf16>, vector<32x64xbf16>, vector<18x64xf32> -> vector<18x64xf32>
    %555 = vector.broadcast %552 : vector<1x64xf32> to vector<18x64xf32>
    %556 = arith.addf %554, %555 : vector<18x64xf32>
    %cst_320 = arith.constant 5.000000e-01 : f32
    %557 = vector.broadcast %cst_320 : f32 to vector<18x64xf32>
    %558 = arith.mulf %557, %556 : vector<18x64xf32>
    %cst_321 = arith.constant 0.707106769 : f32
    %559 = vector.broadcast %cst_321 : f32 to vector<18x64xf32>
    %560 = arith.mulf %556, %559 : vector<18x64xf32>
    %561 = math.erf %560 : vector<18x64xf32>
    %cst_322 = arith.constant 1.000000e+00 : f32
    %562 = vector.broadcast %cst_322 : f32 to vector<18x64xf32>
    %563 = arith.addf %562, %561 : vector<18x64xf32>
    %564 = arith.mulf %558, %563 : vector<18x64xf32>
    %c1_323 = arith.constant 1 : index
    %c0_324 = arith.constant 0 : index
    %c0_325 = arith.constant 0 : index
    %565 = vector.load %arg20[%c1_323, %c0_324, %c0_325] : memref<2x64x32xbf16, #tpu.memory_space<vmem>>, vector<1x64x32xbf16>
    %566 = vector.shape_cast %565 : vector<1x64x32xbf16> to vector<64x32xbf16>
    %c1_326 = arith.constant 1 : index
    %c0_327 = arith.constant 0 : index
    %c0_328 = arith.constant 0 : index
    %567 = vector.load %arg21[%c1_326, %c0_327, %c0_328] : memref<2x1x32xf32, #tpu.memory_space<vmem>>, vector<1x1x32xf32>
    %568 = vector.shape_cast %567 : vector<1x1x32xf32> to vector<1x32xf32>
    %569 = arith.truncf %564 : vector<18x64xf32> to vector<18x64xbf16>
    %cst_329 = arith.constant dense<0.000000e+00> : vector<18x32xf32>
    %570 = tpu.matmul %569, %566, %cst_329 {dimension_numbers = #tpu.dot_dimension_numbers<[1], [0], [0], [1], [0, 0, 1, 1], [], []>} : vector<18x64xbf16>, vector<64x32xbf16>, vector<18x32xf32> -> vector<18x32xf32>
    %571 = vector.broadcast %568 : vector<1x32xf32> to vector<18x32xf32>
    %572 = arith.addf %570, %571 : vector<18x32xf32>
    %573 = arith.addf %548, %572 : vector<18x32xf32>
    %c1_330 = arith.constant 1 : index
    %c0_331 = arith.constant 0 : index
    %c0_332 = arith.constant 0 : index
    %574 = vector.load %arg24[%c1_330, %c0_331, %c0_332] : memref<2x1x32xf32, #tpu.memory_space<vmem>>, vector<1x1x32xf32>
    %575 = vector.shape_cast %574 : vector<1x1x32xf32> to vector<1x32xf32>
    %c1_333 = arith.constant 1 : index
    %c0_334 = arith.constant 0 : index
    %c0_335 = arith.constant 0 : index
    %576 = vector.load %arg25[%c1_333, %c0_334, %c0_335] : memref<2x1x32xf32, #tpu.memory_space<vmem>>, vector<1x1x32xf32>
    %577 = vector.shape_cast %576 : vector<1x1x32xf32> to vector<1x32xf32>
    %cst_336 = arith.constant dense<0.000000e+00> : vector<18xf32>
    %578 = vector.multi_reduction <add>, %573, %cst_336 [1] : vector<18x32xf32> to vector<18xf32>
    %579 = vector.shape_cast %578 : vector<18xf32> to vector<18x1xf32>
    %cst_337 = arith.constant 3.200000e+01 : f32
    %580 = vector.broadcast %cst_337 : f32 to vector<18x1xf32>
    %581 = arith.divf %579, %580 : vector<18x1xf32>
    %582 = vector.broadcast %581 : vector<18x1xf32> to vector<18x32xf32>
    %583 = arith.subf %573, %582 : vector<18x32xf32>
    %584 = arith.mulf %583, %583 : vector<18x32xf32>
    %cst_338 = arith.constant dense<0.000000e+00> : vector<18xf32>
    %585 = vector.multi_reduction <add>, %584, %cst_338 [1] : vector<18x32xf32> to vector<18xf32>
    %586 = vector.shape_cast %585 : vector<18xf32> to vector<18x1xf32>
    %cst_339 = arith.constant 3.200000e+01 : f32
    %587 = vector.broadcast %cst_339 : f32 to vector<18x1xf32>
    %588 = arith.divf %586, %587 : vector<18x1xf32>
    %589 = vector.broadcast %581 : vector<18x1xf32> to vector<18x32xf32>
    %590 = arith.subf %573, %589 : vector<18x32xf32>
    %cst_340 = arith.constant 9.99999974E-6 : f32
    %591 = vector.broadcast %cst_340 : f32 to vector<18x1xf32>
    %592 = arith.addf %588, %591 : vector<18x1xf32>
    %593 = math.rsqrt %592 : vector<18x1xf32>
    %594 = vector.broadcast %593 : vector<18x1xf32> to vector<18x32xf32>
    %595 = arith.mulf %590, %594 : vector<18x32xf32>
    %596 = vector.broadcast %575 : vector<1x32xf32> to vector<18x32xf32>
    %597 = arith.mulf %595, %596 : vector<18x32xf32>
    %598 = vector.broadcast %577 : vector<1x32xf32> to vector<18x32xf32>
    %599 = arith.addf %597, %598 : vector<18x32xf32>
    %600 = vector.extract_strided_slice %599 {offsets = [0, 0], sizes = [8, 32], strides = [1, 1]} : vector<18x32xf32> to vector<8x32xf32>
    %601 = vector.extract_strided_slice %599 {offsets = [9, 0], sizes = [8, 32], strides = [1, 1]} : vector<18x32xf32> to vector<8x32xf32>
    %602 = tpu.concatenate %600, %601 in 0 : vector<8x32xf32>, vector<8x32xf32> -> vector<16x32xf32>
    %c0_341 = arith.constant 0 : index
    %c0_342 = arith.constant 0 : index
    %603 = vector.load %arg26[%c0_341, %c0_342] : memref<32x4xbf16, #tpu.memory_space<vmem>>, vector<32x4xbf16>
    %c0_343 = arith.constant 0 : index
    %c0_344 = arith.constant 0 : index
    %604 = vector.load %arg27[%c0_343, %c0_344] : memref<1x4xf32, #tpu.memory_space<vmem>>, vector<1x4xf32>
    %605 = arith.truncf %602 : vector<16x32xf32> to vector<16x32xbf16>
    %cst_345 = arith.constant dense<0.000000e+00> : vector<16x4xf32>
    %606 = tpu.matmul %605, %603, %cst_345 {dimension_numbers = #tpu.dot_dimension_numbers<[1], [0], [0], [1], [0, 0, 1, 1], [], []>} : vector<16x32xbf16>, vector<32x4xbf16>, vector<16x4xf32> -> vector<16x4xf32>
    %607 = vector.broadcast %604 : vector<1x4xf32> to vector<16x4xf32>
    %608 = arith.addf %606, %607 : vector<16x4xf32>
    %609 = vector.extract_strided_slice %608 {offsets = [0, 0], sizes = [8, 4], strides = [1, 1]} : vector<16x4xf32> to vector<8x4xf32>
    %610 = tpu.transpose %609, [1, 0] : vector<8x4xf32> -> vector<4x8xf32>
    %c0_346 = arith.constant 0 : index
    %c0_347 = arith.constant 0 : index
    %c0_348 = arith.constant 0 : index
    %611 = vector.load %arg28[%c0_346, %c0_347, %c0_348] : memref<2x4x8xf32, #tpu.memory_space<vmem>>, vector<1x4x8xf32>
    %612 = vector.shape_cast %611 : vector<1x4x8xf32> to vector<4x8xf32>
    %613 = vector.shape_cast %610 : vector<4x8xf32> to vector<1x4x8xf32>
    tpu.vector_store %arg28[%c0_346, %c0_347, %c0_348], %613 {strides = array<i32>} : memref<2x4x8xf32, #tpu.memory_space<vmem>>, vector<1x4x8xf32>,
    %614 = vector.extract_strided_slice %608 {offsets = [8, 0], sizes = [8, 4], strides = [1, 1]} : vector<16x4xf32> to vector<8x4xf32>
    %615 = tpu.transpose %614, [1, 0] : vector<8x4xf32> -> vector<4x8xf32>
    %c1_349 = arith.constant 1 : index
    %c0_350 = arith.constant 0 : index
    %c0_351 = arith.constant 0 : index
    %616 = vector.load %arg28[%c1_349, %c0_350, %c0_351] : memref<2x4x8xf32, #tpu.memory_space<vmem>>, vector<1x4x8xf32>
    %617 = vector.shape_cast %616 : vector<1x4x8xf32> to vector<4x8xf32>
    %618 = vector.shape_cast %615 : vector<4x8xf32> to vector<1x4x8xf32>
    tpu.vector_store %arg28[%c1_349, %c0_350, %c0_351], %618 {strides = array<i32>} : memref<2x4x8xf32, #tpu.memory_space<vmem>>, vector<1x4x8xf32>,
    return
  }
  func.func @transform_0(%arg0: i32, %arg1: memref<2xi32, #tpu.memory_space<smem>>) -> (i32, i32, i32) {
    %c0_i32 = arith.constant 0 : i32
    %c0_i32_0 = arith.constant 0 : i32
    %c0_i32_1 = arith.constant 0 : i32
    return %arg0, %c0_i32, %c0_i32_0 : i32, i32, i32
  }
  func.func @transform_1(%arg0: i32, %arg1: memref<2xi32, #tpu.memory_space<smem>>) -> (i32, i32) {
    %c0_i32 = arith.constant 0 : i32
    %c0_i32_0 = arith.constant 0 : i32
    %c0_i32_1 = arith.constant 0 : i32
    return %c0_i32, %c0_i32_0 : i32, i32
  }
  func.func @transform_2(%arg0: i32, %arg1: memref<2xi32, #tpu.memory_space<smem>>) -> (i32, i32) {
    %c0_i32 = arith.constant 0 : i32
    %c0_i32_0 = arith.constant 0 : i32
    %c0_i32_1 = arith.constant 0 : i32
    return %c0_i32, %c0_i32_0 : i32, i32
  }
  func.func @transform_3(%arg0: i32, %arg1: memref<2xi32, #tpu.memory_space<smem>>) -> (i32, i32) {
    %c0_i32 = arith.constant 0 : i32
    %c0_i32_0 = arith.constant 0 : i32
    %c0_i32_1 = arith.constant 0 : i32
    return %c0_i32, %c0_i32_0 : i32, i32
  }
  func.func @transform_4(%arg0: i32, %arg1: memref<2xi32, #tpu.memory_space<smem>>) -> (i32, i32) {
    %c0_i32 = arith.constant 0 : i32
    %c0_i32_0 = arith.constant 0 : i32
    %c0_i32_1 = arith.constant 0 : i32
    return %c0_i32, %c0_i32_0 : i32, i32
  }
  func.func @transform_5(%arg0: i32, %arg1: memref<2xi32, #tpu.memory_space<smem>>) -> (i32, i32) {
    %c0_i32 = arith.constant 0 : i32
    %c0_i32_0 = arith.constant 0 : i32
    %c0_i32_1 = arith.constant 0 : i32
    return %c0_i32, %c0_i32_0 : i32, i32
  }
  func.func @transform_6(%arg0: i32, %arg1: memref<2xi32, #tpu.memory_space<smem>>) -> (i32, i32) {
    %c0_i32 = arith.constant 0 : i32
    %c0_i32_0 = arith.constant 0 : i32
    %c0_i32_1 = arith.constant 0 : i32
    return %c0_i32, %c0_i32_0 : i32, i32
  }
  func.func @transform_7(%arg0: i32, %arg1: memref<2xi32, #tpu.memory_space<smem>>) -> (i32, i32) {
    %c0_i32 = arith.constant 0 : i32
    %c0_i32_0 = arith.constant 0 : i32
    %c0_i32_1 = arith.constant 0 : i32
    return %c0_i32, %c0_i32_0 : i32, i32
  }
  func.func @transform_8(%arg0: i32, %arg1: memref<2xi32, #tpu.memory_space<smem>>) -> (i32, i32, i32) {
    %c0_i32 = arith.constant 0 : i32
    %c0_i32_0 = arith.constant 0 : i32
    %c0_i32_1 = arith.constant 0 : i32
    %c0_i32_2 = arith.constant 0 : i32
    return %c0_i32, %c0_i32_0, %c0_i32_1 : i32, i32, i32
  }
  func.func @transform_9(%arg0: i32, %arg1: memref<2xi32, #tpu.memory_space<smem>>) -> (i32, i32, i32) {
    %c0_i32 = arith.constant 0 : i32
    %c0_i32_0 = arith.constant 0 : i32
    %c0_i32_1 = arith.constant 0 : i32
    %c0_i32_2 = arith.constant 0 : i32
    return %c0_i32, %c0_i32_0, %c0_i32_1 : i32, i32, i32
  }
  func.func @transform_10(%arg0: i32, %arg1: memref<2xi32, #tpu.memory_space<smem>>) -> (i32, i32, i32) {
    %c0_i32 = arith.constant 0 : i32
    %c0_i32_0 = arith.constant 0 : i32
    %c0_i32_1 = arith.constant 0 : i32
    %c0_i32_2 = arith.constant 0 : i32
    return %c0_i32, %c0_i32_0, %c0_i32_1 : i32, i32, i32
  }
  func.func @transform_11(%arg0: i32, %arg1: memref<2xi32, #tpu.memory_space<smem>>) -> (i32, i32, i32) {
    %c0_i32 = arith.constant 0 : i32
    %c0_i32_0 = arith.constant 0 : i32
    %c0_i32_1 = arith.constant 0 : i32
    %c0_i32_2 = arith.constant 0 : i32
    return %c0_i32, %c0_i32_0, %c0_i32_1 : i32, i32, i32
  }
  func.func @transform_12(%arg0: i32, %arg1: memref<2xi32, #tpu.memory_space<smem>>) -> (i32, i32, i32) {
    %c0_i32 = arith.constant 0 : i32
    %c0_i32_0 = arith.constant 0 : i32
    %c0_i32_1 = arith.constant 0 : i32
    %c0_i32_2 = arith.constant 0 : i32
    return %c0_i32, %c0_i32_0, %c0_i32_1 : i32, i32, i32
  }
  func.func @transform_13(%arg0: i32, %arg1: memref<2xi32, #tpu.memory_space<smem>>) -> (i32, i32, i32) {
    %c0_i32 = arith.constant 0 : i32
    %c0_i32_0 = arith.constant 0 : i32
    %c0_i32_1 = arith.constant 0 : i32
    %c0_i32_2 = arith.constant 0 : i32
    return %c0_i32, %c0_i32_0, %c0_i32_1 : i32, i32, i32
  }
  func.func @transform_14(%arg0: i32, %arg1: memref<2xi32, #tpu.memory_space<smem>>) -> (i32, i32, i32) {
    %c0_i32 = arith.constant 0 : i32
    %c0_i32_0 = arith.constant 0 : i32
    %c0_i32_1 = arith.constant 0 : i32
    %c0_i32_2 = arith.constant 0 : i32
    return %c0_i32, %c0_i32_0, %c0_i32_1 : i32, i32, i32
  }
  func.func @transform_15(%arg0: i32, %arg1: memref<2xi32, #tpu.memory_space<smem>>) -> (i32, i32, i32) {
    %c0_i32 = arith.constant 0 : i32
    %c0_i32_0 = arith.constant 0 : i32
    %c0_i32_1 = arith.constant 0 : i32
    %c0_i32_2 = arith.constant 0 : i32
    return %c0_i32, %c0_i32_0, %c0_i32_1 : i32, i32, i32
  }
  func.func @transform_16(%arg0: i32, %arg1: memref<2xi32, #tpu.memory_space<smem>>) -> (i32, i32, i32) {
    %c0_i32 = arith.constant 0 : i32
    %c0_i32_0 = arith.constant 0 : i32
    %c0_i32_1 = arith.constant 0 : i32
    %c0_i32_2 = arith.constant 0 : i32
    return %c0_i32, %c0_i32_0, %c0_i32_1 : i32, i32, i32
  }
  func.func @transform_17(%arg0: i32, %arg1: memref<2xi32, #tpu.memory_space<smem>>) -> (i32, i32, i32) {
    %c0_i32 = arith.constant 0 : i32
    %c0_i32_0 = arith.constant 0 : i32
    %c0_i32_1 = arith.constant 0 : i32
    %c0_i32_2 = arith.constant 0 : i32
    return %c0_i32, %c0_i32_0, %c0_i32_1 : i32, i32, i32
  }
  func.func @transform_18(%arg0: i32, %arg1: memref<2xi32, #tpu.memory_space<smem>>) -> (i32, i32, i32) {
    %c0_i32 = arith.constant 0 : i32
    %c0_i32_0 = arith.constant 0 : i32
    %c0_i32_1 = arith.constant 0 : i32
    %c0_i32_2 = arith.constant 0 : i32
    return %c0_i32, %c0_i32_0, %c0_i32_1 : i32, i32, i32
  }
  func.func @transform_19(%arg0: i32, %arg1: memref<2xi32, #tpu.memory_space<smem>>) -> (i32, i32, i32) {
    %c0_i32 = arith.constant 0 : i32
    %c0_i32_0 = arith.constant 0 : i32
    %c0_i32_1 = arith.constant 0 : i32
    %c0_i32_2 = arith.constant 0 : i32
    return %c0_i32, %c0_i32_0, %c0_i32_1 : i32, i32, i32
  }
  func.func @transform_20(%arg0: i32, %arg1: memref<2xi32, #tpu.memory_space<smem>>) -> (i32, i32, i32) {
    %c0_i32 = arith.constant 0 : i32
    %c0_i32_0 = arith.constant 0 : i32
    %c0_i32_1 = arith.constant 0 : i32
    %c0_i32_2 = arith.constant 0 : i32
    return %c0_i32, %c0_i32_0, %c0_i32_1 : i32, i32, i32
  }
  func.func @transform_21(%arg0: i32, %arg1: memref<2xi32, #tpu.memory_space<smem>>) -> (i32, i32, i32) {
    %c0_i32 = arith.constant 0 : i32
    %c0_i32_0 = arith.constant 0 : i32
    %c0_i32_1 = arith.constant 0 : i32
    %c0_i32_2 = arith.constant 0 : i32
    return %c0_i32, %c0_i32_0, %c0_i32_1 : i32, i32, i32
  }
  func.func @transform_22(%arg0: i32, %arg1: memref<2xi32, #tpu.memory_space<smem>>) -> (i32, i32, i32) {
    %c0_i32 = arith.constant 0 : i32
    %c0_i32_0 = arith.constant 0 : i32
    %c0_i32_1 = arith.constant 0 : i32
    %c0_i32_2 = arith.constant 0 : i32
    return %c0_i32, %c0_i32_0, %c0_i32_1 : i32, i32, i32
  }
  func.func @transform_23(%arg0: i32, %arg1: memref<2xi32, #tpu.memory_space<smem>>) -> (i32, i32, i32) {
    %c0_i32 = arith.constant 0 : i32
    %c0_i32_0 = arith.constant 0 : i32
    %c0_i32_1 = arith.constant 0 : i32
    %c0_i32_2 = arith.constant 0 : i32
    return %c0_i32, %c0_i32_0, %c0_i32_1 : i32, i32, i32
  }
  func.func @transform_24(%arg0: i32, %arg1: memref<2xi32, #tpu.memory_space<smem>>) -> (i32, i32) {
    %c0_i32 = arith.constant 0 : i32
    %c0_i32_0 = arith.constant 0 : i32
    %c0_i32_1 = arith.constant 0 : i32
    return %c0_i32, %c0_i32_0 : i32, i32
  }
  func.func @transform_25(%arg0: i32, %arg1: memref<2xi32, #tpu.memory_space<smem>>) -> (i32, i32) {
    %c0_i32 = arith.constant 0 : i32
    %c0_i32_0 = arith.constant 0 : i32
    %c0_i32_1 = arith.constant 0 : i32
    return %c0_i32, %c0_i32_0 : i32, i32
  }
  func.func @transform_26(%arg0: i32, %arg1: memref<2xi32, #tpu.memory_space<smem>>) -> (i32, i32, i32) {
    %c0_i32 = arith.constant 0 : i32
    %c0_i32_0 = arith.constant 0 : i32
    %c0_i32_1 = arith.constant 0 : i32
    return %arg0, %c0_i32, %c0_i32_0 : i32, i32, i32
  }
}

</mosaic_0001>

<bundles_post_ra>
// kernel: trans_encoder_forward.1
= control target key start
LH: loop header
LB: loop body
LE: loop exit
PB: predicated region body
PF: predicated region fallthrough
CT: control target
= control target key end

     0   :  { %s17376_s0 = inlined_call_operand.vmem [shape: s32[2], index: 0, kind: input, shape index: {}]   ;;  %s17377_s1 = inlined_call_operand.vmem [shape: f32[2,4,8], index: 1, kind: input, shape index: {}]   ;;  %s17378_s2 = inlined_call_operand.vmem [shape: f32[64,32], index: 2, kind: input, shape index: {}]   ;;  %s17379_s3 = inlined_call_operand.vmem [shape: bf16[4,32], index: 3, kind: input, shape index: {}]   ;;  %s17380_s4 = inlined_call_operand.vmem [shape: f32[1,32], index: 4, kind: input, shape index: {}]   ;;  %s17381_s5 = inlined_call_operand.vmem [shape: bf16[32,32], index: 5, kind: input, shape index: {}]   ;;  %s17382_s6 = inlined_call_operand.vmem [shape: f32[1,32], index: 6, kind: input, shape index: {}]   ;;  %s17383_s7 = inlined_call_operand.vmem [shape: bf16[32,32], index: 7, kind: input, shape index: {}]   ;;  %s17384_s8 = inlined_call_operand.vmem [shape: f32[1,32], index: 8, kind: input, shape index: {}]   ;;  %s17385_s9 = inlined_call_operand.vmem [shape: bf16[8,32,8], index: 9, kind: input, shape index: {}]   ;;  %s17386_s10 = inlined_call_operand.vmem [shape: f32[8,1,8], index: 10, kind: input, shape index: {}]   ;;  %s17387_s11 = inlined_call_operand.vmem [shape: bf16[8,32,8], index: 11, kind: input, shape index: {}]   ;;  %s17388_s12 = inlined_call_operand.vmem [shape: f32[8,1,8], index: 12, kind: input, shape index: {}]   ;;  %s17389_s13 = inlined_call_operand.vmem [shape: bf16[8,32,8], index: 13, kind: input, shape index: {}]   ;;  %s17390_s14 = inlined_call_operand.vmem [shape: f32[8,1,8], index: 14, kind: input, shape index: {}]   ;;  %s17391_s15 = inlined_call_operand.vmem [shape: bf16[8,8,32], index: 15, kind: input, shape index: {}]   ;;  %s17392_s16 = inlined_call_operand.vmem [shape: f32[2,1,32], index: 16, kind: input, shape index: {}]   ;;  %s17393_s17 = inlined_call_operand.vmem [shape: bf16[2,32,64], index: 17, kind: input, shape index: {}]   ;;  %s17394_s18 = inlined_call_operand.vmem [shape: f32[2,1,64], index: 18, kind: input, shape index: {}]   ;;  %s17395_s19 = inlined_call_operand.vmem [shape: bf16[2,64,32], index: 19, kind: input, shape index: {}]   ;;  %s17396_s20 = inlined_call_operand.vmem [shape: f32[2,1,32], index: 20, kind: input, shape index: {}]   ;;  %s17397_s21 = inlined_call_operand.vmem [shape: f32[2,1,32], index: 21, kind: input, shape index: {}]   ;;  %s17398_s22 = inlined_call_operand.vmem [shape: f32[2,1,32], index: 22, kind: input, shape index: {}]   ;;  %s17399_s23 = inlined_call_operand.vmem [shape: f32[2,1,32], index: 23, kind: input, shape index: {}]   ;;  %s17400_s24 = inlined_call_operand.vmem [shape: f32[2,1,32], index: 24, kind: input, shape index: {}]   ;;  %s17401_s25 = inlined_call_operand.vmem [shape: bf16[32,4], index: 25, kind: input, shape index: {}]   ;;  %s17402_s26 = inlined_call_operand.vmem [shape: f32[1,4], index: 26, kind: input, shape index: {}]   ;;  %s17403_s27 = inlined_call_operand.hbm [shape: f32[2,4,8], index: 27, kind: output, shape index: {}]  }
   0x1   :  { %17412 = sst [smem:[#allocation8_spill]] %s17376_s0 }
   0x2   :  { %17413 = sst [smem:[#allocation9_spill]] %s17377_s1 }
   0x3   :  { %17414 = sst [smem:[#allocation10_spill]] %s17378_s2 }
   0x4   :  { %17415 = sst [smem:[#allocation11_spill]] %s17379_s3 }
   0x5   :  { %17416 = sst [smem:[#allocation12_spill]] %s17380_s4 }
   0x6   :  { %17417 = sst [smem:[#allocation13_spill]] %s17381_s5 }
   0x7   :  { %17418 = sst [smem:[#allocation14_spill]] %s17382_s6 }
   0x8   :  { %17419 = sst [smem:[#allocation15_spill]] %s17383_s7 }
   0x9   :  { %17420 = sst [smem:[#allocation16_spill]] %s17384_s8 }
   0xa   :  { %17421 = sst [smem:[#allocation17_spill]] %s17385_s9  ;;  %s17425_s8 = sld [smem:[#allocation8_spill]] }
   0xb   :  { %17422 = sst [smem:[#allocation18_spill]] %s17386_s10 }
   0xc   :  { %17423 = sst [smem:[#allocation19_spill]] %s17387_s11 }
   0xd   :  { %17424 = sst [smem:[#allocation20_spill]] %s17396_s20 }
  0x10   :  { %s32_s20 = sshll.u32 %s17425_s8, 4  ;;  %s33_s20 = int_to_ptr.vmem [resolvable:$true] %s32_s20 }
  0x11   :  { %s14831_s30 = scalar_lea.vmem %s33_s20, 16  ;;  %p14836_p1 = scmp.lt.s32.totalorder %s33_s20, %s33_s20 }
  0x12   :  { %p14832_p0 = scmp.ne.s32.totalorder %s33_s20, %s14831_s30  ;;  %p14837_p2 = scmp.lt.s32.totalorder %s14831_s30, %s14831_s30 }
  0x14   :  { %p14838_p3 = por %p14837_p2, %p14836_p1 }
  0x16   :  { %p14839_p4 = pnand %p14838_p3, %p14832_p0 }
  0x18   :  { %14842 = shalt.err (!%p14839_p4)  }
  0x19   :  { %s14869_s9 = smov [#allocation3]  }
  0x1a   :  { %35 = dma.vmem_to_smem %s33_s20, 16, %s14869_s9, [#allocation2] }
  0x1b   :  { %14865 = dma.done.wait [#allocation2], 16 }
  0x1c   :  { %14866 = vsyncadd [#allocation2], 4294967280 }
  0x1d   :  { %37 = sfence }
  0x1e   :  { %s17426_s0 = sld [smem:[#allocation13_spill]]  ;;  %v14870_v1 = vmov 0.0   ;;  %vm14871_vm0 = vmmov 0   ;;  %s93_s20 = sld [smem:[#allocation3]]  ;;  %vm103_vm1 = vcmask 1040384   ;;  %vm129_vm2 = vcmask 261120  }
  0x1f   :  { %14068 = vmatprep.subr.bf16.mxu0 %v14870_v1  ;;  %14076 = vmatprep.subr.bf16.mxu1 %v14870_v1  ;;  %s13440_s1 = sld [smem:[#allocation3 + $0x1]]  ;;  %s17428_s30 = sld [smem:[#allocation10_spill]] }
  0x20   :  { %14072 = vmatprep.mubr.msk.bf16.mxu0 %vm14871_vm0, %v14870_v1  ;;  %s17427_s2 = sld [smem:[#allocation9_spill]]  ;;  %14080 = vmatprep.mubr.msk.bf16.mxu1 %vm14871_vm0, %v14870_v1 }
  0x24   :  { %v14593_v0 = vld [vmem:[%s17426_s0] sm:$0xff]   ;;  %v14594_v2 = vld [vmem:[%s17426_s0 + $0x8] sm:$0xff]  }
  0x25   :  { %14069 = vmatpush3.bf16.msra.mxu0 %v14593_v0  ;;  %s94_s9 = scalar_lea.vmem %s17428_s30, %s93_s20  ;;  %s98_s0 = scalar_lea.vmem %s17428_s30, %s13440_s1 }
  0x26   :  { %14070 = vmatprep.subr.bf16.mxu0 %v14870_v1  ;;  %v254_v3 = vld [vmem:[%s17427_s2] sm:$0xf]  ;;  %v13449_v4 = vld [vmem:[%s17427_s2 + $0x4] sm:$0xf] }
  0x27   :  { %v14586_v5 = vpack.i.bf16 %v13449_v4, %v254_v3  ;;  %v95_v6 = vld [vmem:[%s94_s9] sm:$0x1] }
  0x28   :  { %v99_v7 = vld [vmem:[%s98_s0] sm:$0x1] }
  0x29   :  { %14071 = vmatpush3.bf16.msra.mxu0 %v14594_v2  ;;  %14587 = vxpose.xlu0.b32.start.end [1/1] (short) (narrow) %v14586_v5, 8  ;;  %v101_v8 = vrot.slane %v99_v7, 7 }
  0x2a   :  { %14084 = vmatprep.subr.bf16.mxu0 %v14870_v1 }
  0x2b   :  { %v104_v9 = vsel %vm103_vm1, %v95_v6, %v101_v8 }
  0x2c   :  { %v110_v10 = vpack.c.bf16 %v104_v9, %v104_v9 }
  0x2e   :  { %14073 = vmatmul.mubr.msk.bf16.vlgmr.msra.gmra.mrb[0].mxu0 %vm129_vm2, %v110_v10 }
  0x2f   :  { %14086 = vmatprep.mubr.msk.bf16.mxu0 %vm14871_vm0, %v14870_v1 }
  0x30   :  { %38 = vsyncpa [#allocation5], 0  ;;  %s17429_s20 = sld [smem:[#allocation11_spill]]  ;;  %vm334_vm3 = vcmask 1041408   ;;  %s17430_s11 = sld [smem:[#allocation15_spill]]  ;;  %vm330_vm4 = vcmask 31744   ;;  %v479_v8 = vlaneseq }
  0x31   :  { %s17431_s8 = sld [smem:[#allocation14_spill]]  ;;  %s17432_s28 = sld [smem:[#allocation17_spill]]  ;;  %v14601_v45 = vld [vmem:[%s17389_s13] sm:$0xff]   ;;  %v14602_v5 = vld [vmem:[%s17389_s13 + $0x8] sm:$0xff]   ;;  %v14872_v6 = vmov 1966171168  }
  0x32   :  { %s17433_s29 = sld [smem:[#allocation19_spill]]  ;;  %v379_v49 = vld [vmem:[%s17428_s30 + $0x1] sm:$0xff]  ;;  %v380_v50 = vld [vmem:[%s17428_s30] sm:$0x1]  ;;  %s17435_s1 = sld [smem:[#allocation16_spill]]  ;;  %v477_v7 = vunpack.c.l.s4 %v14872_v6  ;;  %v480_v10 = vshrl.u32 %v479_v8, 7 }
  0x33   :  { %v385_v53 = vrot.slane %v380_v50, 7  ;;  %s17436_s7 = sld [smem:[#allocation18_spill]]  ;;  %vm1525_vm6 = vcmask 1043456   ;;  %vm1526_vm7 = vcmask 1044480   ;;  %vm1247_vm8 = vcmask 64512  }
  0x34   :  { %v478_v9 = vunpack.c.0.s8 %v477_v7  ;;  %vm1342_vm9 = vcmask 72704   ;;  %vm1346_vm10 = vcmask 65536   ;;  %vm6528_vm11 = vcmask 254976  }
  0x35   :  { %vm6716_vm12 = vcmask 523264   ;;  %vm13281_vm13 = vcmask 1046528   ;;  %vm13386_vm14 = vcmask 60416  }
  0x36   :  { %v321_v11 = vld [vmem:[%s17429_s20] sm:$0x3]  ;;  %v14596_v14 = vld [vmem:[%s17430_s11 + $0x8] sm:$0xff]  }
  0x37   :  { %v14595_v12 = vld [vmem:[%s17430_s11] sm:$0xff]   ;;  %v336_v13 = vsel %vm334_vm3, %v321_v11, 0  ;;  %v14599_v40 = vld [vmem:[%s17432_s28 + $0x8] sm:$0xff]   ;;  %s17437_s11 = sld [smem:[#allocation20_spill]] }
  0x38   :  { %14085 = vmatpush3.bf16.msra.mxu0 %v336_v13  ;;  %14077 = vmatpush3.bf16.msra.mxu1 %v14595_v12  ;;  %v13441_v19 = vld [vmem:[%s17431_s8] ss:$0 sm:$0xff]  ;;  %v14600_v41 = vld [vmem:[%s17433_s29 + $0x8] sm:$0xff]   ;;  %s17434_s8 = sld [smem:[#allocation12_spill]]  ;;  %v15136_v13 = vsub.s32 %v478_v9, %v480_v10 }
  0x39   :  { %14078 = vmatprep.subr.bf16.mxu1 %v14870_v1  ;;  %v14597_v38 = vld [vmem:[%s17432_s28] sm:$0xff]  }
  0x3a   :  { %v14598_v39 = vld [vmem:[%s17433_s29] sm:$0xff]  }
  0x3b   :  { %14098 = vmatprep.subr.bf16.mxu0 %v14598_v39  ;;  %v13445_v51 = vld [vmem:[%s17435_s1] ss:$0 sm:$0xff] }
  0x3c   :  { %14079 = vmatpush3.bf16.msra.mxu1 %v14596_v14  ;;  %v13452_v11 = vld [vmem:[%s17436_s7] ss:$0 sm:$0xff] }
  0x3d   :  { %14090 = vmatprep.subr.bf16.mxu1 %v14597_v38  ;;  %v15134_v12 = vld [vmem:[%s17388_s12] ss:$0 sm:$0xff] }
  0x3e   :  { %v13450_v47 = vld [vmem:[%s17434_s8] ss:$0 sm:$0xff] }
  0xa9   :  { %v14588_v15 = vpop.trf.xlu0 }
  0xaa   :  { %v14592_v16 = vunpack.i.h.bf16 %v14588_v15  ;;  %v14589_v17 = vunpack.i.l.bf16 %v14588_v15 }
  0xac   :  { %v323_v18 = vpack.c.bf16 %v14592_v16, %v14589_v17 }
  0xae   :  { %14087 = vmatmul.mubr.msk.bf16.vlgmr.msra.gmra.mrb[4].mxu0 %vm330_vm4, %v323_v18 }
  0xaf   :  { %14099 = vmatpush3.bf16.msra.mxu0 %v14598_v39 }
  0xb0   :  { %14100 = vmatprep.subr.bf16.mxu0 %v14600_v41 }
  0xb3   :  { %14101 = vmatpush3.bf16.msra.mxu0 %v14600_v41 }
  0xb4   :  { %14114 = vmatprep.subr.bf16.mxu0 %v14870_v1 }
 0x101   :  { %v167_v20 = vpop.f32.mrb[0].mxu0 }
 0x102   :  { %v168_v21 = vadd.f32 %v13441_v19, %v167_v20  ;;  %v14074_v22 = vpop.f32.mrb[1].mxu0 }
 0x103   :  { %v170_v23 = vpop.f32.mrb[2].mxu0 }
 0x104   :  { %v173_v24 = vsub.f32 0.0, %v168_v21  ;;  %v179_v25 = vmul.f32 1.442695, %v168_v21  ;;  %v14075_v26 = vpop.f32.mrb[3].mxu0  ;;  %vm184_vm5 = vcmp.ge.f32.partialorder %v168_v21, 0.0 }
 0x106   :  { %v174_v27 = vmul.f32 1.442695, %v173_v24  ;;  %14659 = vpow2.f32 %v179_v25 }
 0x108   :  { %14661 = vpow2.f32 %v174_v27 }
 0x110   :  { %v14660_v28 = vpop.eup %14659 }
 0x111   :  { %v181_v29 = vadd.f32 1.0, %v14660_v28 }
 0x112   :  { %v14662_v30 = vpop.eup %14661 }
 0x113   :  { %v176_v31 = vadd.f32 1.0, %v14662_v30  ;;  %14663 = vrcp.f32 %v181_v29 }
 0x115   :  { %14665 = vrcp.f32 %v176_v31 }
 0x11d   :  { %v14664_v32 = vpop.eup %14663 }
 0x11e   :  { %v183_v33 = vmul.f32 %v14664_v32, %v14660_v28 }
 0x11f   :  { %v14666_v34 = vpop.eup %14665 }
 0x120   :  { %v185_v35 = vsel %vm184_vm5, %v14666_v34, %v183_v33 }
 0x121   :  { %v186_v36 = vmul.f32 %v185_v35, %v168_v21  ;;  %v14873_v35 = vmov 65535  }
 0x123   :  { %v192_v37 = vpack.c.bf16 %v186_v36, %v186_v36  ;;  %v15151_v36 = vsel %vm1525_vm6, 4294967295, %v14873_v35 }
 0x125   :  { %14081 = vmatmul.mubr.msk.bf16.vlgmr.msra.gmra.mrb[0].mxu1 %vm129_vm2, %v192_v37 }
 0x126   :  { %14091 = vmatpush3.bf16.msra.mxu1 %v14597_v38 }
 0x127   :  { %14092 = vmatprep.subr.bf16.mxu1 %v14599_v40 }
 0x12a   :  { %14093 = vmatpush3.bf16.msra.mxu1 %v14599_v40 }
 0x12b   :  { %14106 = vmatprep.subr.bf16.mxu1 %v14601_v45 }
 0x181   :  { %v372_v42 = vpop.f32.mrb[4].mxu0 }
 0x182   :  { %v14088_v43 = vpop.f32.mrb[5].mxu0  ;;  %v373_v54 = vadd.f32 %v13450_v47, %v372_v42 }
 0x183   :  { %v375_v44 = vpop.f32.mrb[6].mxu0 }
 0x184   :  { %v14089_v46 = vpop.f32.mrb[7].mxu0  ;;  %v376_v48 = vadd.f32 %v13450_v47, %v375_v44  ;;  %v15092_v63 = vadd.f32 %v379_v49, %v373_v54 }
 0x186   :  { %v383_v52 = vadd.f32 %v379_v49, %v376_v48 }
 0x188   :  { %v389_v59 = vrot.slane %v383_v52, 7 }
 0x1f8   :  { %v248_v55 = vpop.f32.mrb[0].mxu1 }
 0x1f9   :  { %v249_v56 = vadd.f32 %v13445_v51, %v248_v55  ;;  %v14082_v57 = vpop.f32.mrb[1].mxu1 }
 0x1fa   :  { %v251_v58 = vpop.f32.mrb[2].mxu1 }
 0x1fb   :  { %v382_v60 = vadd.f32 %v380_v50, %v249_v56  ;;  %v387_v61 = vadd.f32 %v385_v53, %v249_v56  ;;  %v14083_v62 = vpop.f32.mrb[3].mxu1 }
 0x1fd   :  { %v15095_v0 = vsel %vm103_vm1, %v382_v60, %v389_v59  ;;  %v15098_v2 = vsel %vm103_vm1, %v389_v59, %v387_v61 }
 0x1fe   :  { %v15102_v3 = vpack.c.bf16 %v15095_v0, %v15092_v63  ;;  %v15106_v4 = vpack.c.bf16 %v15098_v2, %v15098_v2 }
 0x200   :  { %14094 = vmatprep.mubr.msk.bf16.mxu1 %vm129_vm2, %v15102_v3  ;;  %14102 = vmatprep.mubr.msk.bf16.mxu0 %vm129_vm2, %v15102_v3 }
 0x201   :  { %14095 = vmatmul.mubr.msk.bf16.vlgmr.msra.gmra.mrb[4].mxu1 %vm129_vm2, %v15106_v4  ;;  %14103 = vmatmul.mubr.msk.bf16.vlgmr.msra.gmra.mrb[8].mxu0 %vm129_vm2, %v15106_v4 }
 0x202   :  { %14107 = vmatpush3.bf16.msra.mxu1 %v14601_v45  ;;  %14110 = vmatprep.mubr.msk.bf16.mxu1 %vm129_vm2, %v15102_v3 }
 0x203   :  { %14108 = vmatprep.subr.bf16.mxu1 %v14602_v5  ;;  %14116 = vmatprep.mubr.msk.bf16.mxu0 %vm14871_vm0, %v14870_v1 }
 0x206   :  { %14109 = vmatpush3.bf16.msra.mxu1 %v14602_v5 }
 0x207   :  { %14120 = vmatprep.subr.bf16.mxu1 %v14870_v1 }
 0x209   :  { %14111 = vmatmul.mubr.msk.bf16.vlgmr.msra.gmra.mrb[8].mxu1 %vm129_vm2, %v15106_v4 }
 0x20a   :  { %14122 = vmatprep.mubr.msk.bf16.mxu1 %vm14871_vm0, %v14870_v1 }
 0x2d4   :  { %v14096_v14 = vpop.f32.mrb[4].mxu1  ;;  %v14104_v15 = vpop.f32.mrb[8].mxu0 }
 0x2d5   :  { %v467_v16 = vadd.f32 %v14096_v14, %v13452_v11  ;;  %v661_v17 = vadd.f32 %v14104_v15, %v15134_v12  ;;  %v458_v18 = vpop.f32.mrb[5].mxu1  ;;  %v652_v19 = vpop.f32.mrb[9].mxu0 }
 0x2d6   :  { %v459_v20 = vadd.f32 %v13452_v11, %v458_v18  ;;  %v653_v21 = vadd.f32 %v15134_v12, %v652_v19  ;;  %v14097_v22 = vpop.f32.mrb[6].mxu1  ;;  %v14105_v23 = vpop.f32.mrb[10].mxu0 }
 0x2d7   :  { %v15141_v24 = vrot.slane %v467_v16, %v15136_v13  ;;  %v15144_v25 = vrot.slane %v661_v17, %v15136_v13  ;;  %v461_v26 = vpop.f32.mrb[7].mxu1  ;;  %v655_v27 = vpop.f32.mrb[11].mxu0  ;;  %v15184_v17 = vld [vmem:[%s17390_s14] ss:$0 sm:$0xff] }
 0x2d8   :  { %v475_v28 = vcombine.high %v459_v20, %v459_v20  ;;  %v482_v29 = vrot.slane %v459_v20, %v15136_v13  ;;  %v669_v30 = vcombine.high %v653_v21, %v653_v21  ;;  %v676_v31 = vrot.slane %v653_v21, %v15136_v13 }
 0x2d9   :  { %v580_v37 = vcombine.high %v15141_v24, %v15141_v24  ;;  %v587_v38 = vrot.slane %v15141_v24, %v15136_v13  ;;  %v774_v39 = vcombine.high %v15144_v25, %v15144_v25  ;;  %v781_v46 = vrot.slane %v15144_v25, %v15136_v13 }
 0x2da   :  { %v489_v32 = vrot.slane %v475_v28, %v15136_v13  ;;  %v490_v33 = vcombine.high %v482_v29, %v482_v29  ;;  %v683_v34 = vrot.slane %v669_v30, %v15136_v13  ;;  %v684_v40 = vcombine.high %v676_v31, %v676_v31 }
 0x2db   :  { %v498_v42 = vrot.slane %v482_v29, %v15136_v13  ;;  %v692_v48 = vrot.slane %v676_v31, %v15136_v13  ;;  %v462_v59 = vadd.f32 %v13452_v11, %v461_v26  ;;  %v15174_v7 = vrot.slane %v580_v37, %v15136_v13 }
 0x2dc   :  { %v491_v41 = vcombine.high %v489_v32, %v489_v32  ;;  %v512_v43 = vrot.slane %v490_v33, %v15136_v13  ;;  %v685_v44 = vcombine.high %v683_v34, %v683_v34  ;;  %v14112_v45 = vpop.f32.mrb[8].mxu1  ;;  %v505_v47 = vrot.slane %v489_v32, %v15136_v13 }
 0x2dd   :  { %v706_v49 = vrot.slane %v684_v40, %v15136_v13  ;;  %v846_v50 = vpop.f32.mrb[9].mxu1  ;;  %v699_v56 = vrot.slane %v683_v34, %v15136_v13  ;;  %v15177_v8 = vrot.slane %v774_v39, %v15136_v13  ;;  %v524_v16 = vcombine.high %v462_v59, %v462_v59 }
 0x2de   :  { %v519_v51 = vrot.slane %v491_v41, %v15136_v13  ;;  %v983_v52 = vcombine.low %v498_v42, %v512_v43  ;;  %v13467_v53 = vcombine.high %v498_v42, %v512_v43  ;;  %v713_v54 = vrot.slane %v685_v44, %v15136_v13  ;;  %v14113_v55 = vpop.f32.mrb[10].mxu1 }
 0x2df   :  { %v1115_v57 = vcombine.low %v692_v48, %v706_v49  ;;  %v13469_v58 = vcombine.high %v692_v48, %v706_v49  ;;  %v15169_v60 = vpop.f32.mrb[11].mxu1  ;;  %v531_v21 = vrot.slane %v462_v59, %v15136_v13  ;;  %v538_v26 = vrot.slane %v524_v16, %v15136_v13 }
 0x2e0   :  { %v985_v61 = vcombine.low %v505_v47, %v519_v51  ;;  %v13468_v62 = vcombine.high %v505_v47, %v519_v51  ;;  %v993_v5 = vrot.slane %v983_v52, %v15136_v13  ;;  %v1000_v6 = vrot.slane %v13467_v53, %v15136_v13 }
 0x2e1   :  { %v1117_v9 = vcombine.low %v699_v56, %v713_v54  ;;  %v13470_v10 = vcombine.high %v699_v56, %v713_v54  ;;  %v15187_v18 = vrot.slane %v1115_v57, %v15136_v13  ;;  %v15190_v19 = vrot.slane %v13469_v58, %v15136_v13 }
 0x2e2   :  { %v1007_v14 = vrot.slane %v985_v61, %v15136_v13  ;;  %v1014_v11 = vrot.slane %v13468_v62, %v15136_v13  ;;  %v1015_v15 = vcombine.low %v993_v5, %v1000_v6  ;;  %v656_v28 = vadd.f32 %v15134_v12, %v655_v27 }
 0x2e3   :  { %v15193_v20 = vrot.slane %v1117_v9, %v15136_v13  ;;  %v15197_v23 = vrot.slane %v13470_v10, %v15136_v13  ;;  %v539_v30 = vcombine.high %v531_v21, %v531_v21  ;;  %v547_v31 = vrot.slane %v531_v21, %v15136_v13 }
 0x2e4   :  { %v1016_v22 = vcombine.low %v1007_v14, %v1014_v11  ;;  %v1023_v29 = vrot.slane %v1015_v15, %v15136_v13  ;;  %v855_v32 = vadd.f32 %v14112_v45, %v15184_v17  ;;  %v540_v33 = vcombine.high %v538_v26, %v538_v26 }
 0x2e5   :  { %v554_v34 = vrot.slane %v538_v26, %v15136_v13  ;;  %v718_v37 = vcombine.high %v656_v28, %v656_v28  ;;  %v561_v39 = vrot.slane %v539_v30, %v15136_v13  ;;  %v569_v40 = vcombine.high %v547_v31, %v547_v31 }
 0x2e6   :  { %v1030_v35 = vrot.slane %v1016_v22, %v15136_v13  ;;  %v1038_v41 = vrot.slane %v547_v31, %v15136_v13  ;;  %v725_v12 = vrot.slane %v656_v28, %v15136_v13  ;;  %v568_v27 = vrot.slane %v540_v33, %v15136_v13 }
 0x2e7   :  { %v570_v42 = vcombine.high %v554_v34, %v554_v34  ;;  %v732_v44 = vrot.slane %v718_v37, %v15136_v13  ;;  %v571_v45 = vcombine.high %v561_v39, %v561_v39  ;;  %v1046_v48 = vcombine.low %v561_v39, %v569_v40 }
 0x2e8   :  { %v1031_v43 = vcombine.low %v1023_v29, %v1030_v35  ;;  %v1045_v47 = vrot.slane %v1038_v41, %v15136_v13  ;;  %v733_v49 = vcombine.high %v725_v12, %v725_v12  ;;  %v572_v51 = vcombine.high %v568_v27, %v568_v27 }
 0x2e9   :  { %v1048_v52 = vcombine.low %v568_v27, %v570_v42  ;;  %v734_v53 = vcombine.high %v732_v44, %v732_v44  ;;  %v741_v54 = vrot.slane %v725_v12, %v15136_v13  ;;  %v1047_v55 = vcombine.low %v571_v45, %v554_v34 }
 0x2ea   :  { %v15213_v56 = vpack.c.bf16 %v1045_v47, %v1031_v43  ;;  %v748_v57 = vrot.slane %v732_v44, %v15136_v13  ;;  %v847_v58 = vadd.f32 %v15184_v17, %v846_v50  ;;  %v1049_v59 = vcombine.low %v572_v51, %v587_v38 }
 0x2eb   :  { %v1056_v61 = vrot.slane %v1046_v48, %v15136_v13  ;;  %v755_v62 = vrot.slane %v733_v49, %v15136_v13  ;;  %v762_v5 = vrot.slane %v734_v53, %v15136_v13  ;;  %v1063_v6 = vrot.slane %v1047_v55, %v15136_v13 }
 0x2ec   :  { %v1070_v9 = vrot.slane %v1048_v52, %v15136_v13  ;;  %v763_v10 = vcombine.high %v741_v54, %v741_v54  ;;  %v764_v14 = vcombine.high %v748_v57, %v748_v57  ;;  %v1077_v11 = vrot.slane %v1049_v59, %v15136_v13 }
 0x2ed   :  { %v765_v15 = vcombine.high %v755_v62, %v755_v62  ;;  %v766_v50 = vcombine.high %v762_v5, %v762_v5  ;;  %v15227_v16 = vrot.slane %v855_v32, %v15136_v13  ;;  %v15229_v24 = vcombine.low %v1056_v61, %v1063_v6 }
 0x2ee   :  { %v15231_v38 = vcombine.low %v755_v62, %v763_v10  ;;  %v15233_v21 = vcombine.low %v762_v5, %v764_v14  ;;  %v863_v22 = vcombine.high %v847_v58, %v847_v58  ;;  %v1147_v26 = vcombine.low %v15187_v18, %v15190_v19 }
 0x2ef   :  { %v15237_v28 = vcombine.low %v1070_v9, %v1077_v11  ;;  %v1179_v29 = vcombine.low %v765_v15, %v748_v57  ;;  %v15242_v30 = vcombine.low %v766_v50, %v781_v46  ;;  %v1101_v31 = vrot.slane %v15174_v7, %v15136_v13 }
 0x2f0   :  { %v1233_v32 = vrot.slane %v15177_v8, %v15136_v13  ;;  %v1170_v33 = vrot.slane %v741_v54, %v15136_v13  ;;  %v15251_v34 = vsel %vm1526_vm7, %v15151_v36, 0  ;;  %v1086_v18 = vrot.slane %v15229_v24, %v15136_v13 }
 0x2f1   :  { %v968_v25 = vcombine.high %v15227_v16, %v15227_v16  ;;  %v870_v46 = vrot.slane %v847_v58, %v15136_v13  ;;  %v877_v19 = vrot.slane %v863_v22, %v15136_v13  ;;  %v1188_v35 = vrot.slane %v15231_v38, %v15136_v13 }
 0x2f2   :  { %v1202_v37 = vrot.slane %v15233_v21, %v15136_v13  ;;  %v850_v36 = vadd.f32 %v15184_v17, %v15169_v60  ;;  %v1148_v39 = vcombine.low %v15193_v20, %v15197_v23  ;;  %v1195_v40 = vrot.slane %v1179_v29, %v15136_v13 }
 0x2f3   :  { %v878_v41 = vcombine.high %v870_v46, %v870_v46  ;;  %v879_v12 = vcombine.high %v877_v19, %v877_v19  ;;  %v1155_v27 = vrot.slane %v1147_v26, %v15136_v13  ;;  %v1177_v45 = vrot.slane %v1170_v33, %v15136_v13 }
 0x2f4   :  { %v912_v42 = vcombine.high %v850_v36, %v850_v36  ;;  %v919_v43 = vrot.slane %v850_v36, %v15136_v13  ;;  %v1162_v44 = vrot.slane %v1148_v39, %v15136_v13  ;;  %v886_v47 = vrot.slane %v870_v46, %v15136_v13 }
 0x2f5   :  { %v893_v60 = vrot.slane %v877_v19, %v15136_v13  ;;  %v900_v17 = vrot.slane %v878_v41, %v15136_v13  ;;  %v907_v20 = vrot.slane %v879_v12, %v15136_v13  ;;  %v1209_v15 = vrot.slane %v15242_v30, %v15136_v13 }
 0x2f6   :  { %v926_v23 = vrot.slane %v912_v42, %v15136_v13  ;;  %v927_v48 = vcombine.high %v919_v43, %v919_v43  ;;  %v935_v49 = vrot.slane %v919_v43, %v15136_v13  ;;  %v1163_v51 = vcombine.low %v1155_v27, %v1162_v44 }
 0x2f7   :  { %v1390_v52 = vcombine.low %v886_v47, %v900_v17  ;;  %v13473_v53 = vcombine.high %v886_v47, %v900_v17  ;;  %v1392_v54 = vcombine.low %v893_v60, %v907_v20  ;;  %v13474_v55 = vcombine.high %v893_v60, %v907_v20 }
 0x2f8   :  { %v928_v57 = vcombine.high %v926_v23, %v926_v23  ;;  %v942_v58 = vrot.slane %v926_v23, %v15136_v13  ;;  %v949_v59 = vrot.slane %v927_v48, %v15136_v13  ;;  %v957_v61 = vcombine.high %v935_v49, %v935_v49 }
 0x2f9   :  { %v1400_v62 = vrot.slane %v1390_v52, %v15136_v13  ;;  %v1407_v5 = vrot.slane %v13473_v53, %v15136_v13  ;;  %v1414_v6 = vrot.slane %v1392_v54, %v15136_v13  ;;  %v1421_v9 = vrot.slane %v13474_v55, %v15136_v13 }
 0x2fa   :  { %v956_v10 = vrot.slane %v928_v57, %v15136_v13  ;;  %v958_v14 = vcombine.high %v942_v58, %v942_v58  ;;  %v959_v11 = vcombine.high %v949_v59, %v949_v59  ;;  %v1453_v21 = vcombine.low %v949_v59, %v957_v61 }
 0x2fb   :  { %v1422_v50 = vcombine.low %v1400_v62, %v1407_v5  ;;  %v1423_v38 = vcombine.low %v1414_v6, %v1421_v9  ;;  %v1245_v22 = vpack.c.bf16 %v1177_v45, %v1163_v51  ;;  %v975_v26 = vrot.slane %v15227_v16, %v15136_v13 }
 0x2fc   :  { %v960_v29 = vcombine.high %v956_v10, %v956_v10  ;;  %v1454_v33 = vcombine.low %v959_v11, %v942_v58  ;;  %v1455_v46 = vcombine.low %v956_v10, %v958_v14  ;;  %v982_v19 = vrot.slane %v968_v25, %v15136_v13 }
 0x2fd   :  { %v1445_v36 = vrot.slane %v935_v49, %v15136_v13  ;;  %v1252_v39 = vsel %vm1247_vm8, %v1245_v22, 0  ;;  %v1210_v41 = vcombine.low %v1188_v35, %v1195_v40  ;;  %v1463_v30 = vrot.slane %v1453_v21, %v15136_v13 }
 0x2fe   :  { %v1456_v12 = vcombine.low %v960_v29, %v975_v26  ;;  %v1470_v27 = vrot.slane %v1454_v33, %v15136_v13  ;;  %14115 = vmatpush3.bf16.xpose.msra.mxu0 %v1252_v39  ;;  %v1211_v42 = vcombine.low %v1202_v37, %v1209_v15  ;;  %v1430_v43 = vrot.slane %v1422_v50, %v15136_v13 }
 0x2ff   :  { %v1477_v16 = vrot.slane %v1455_v46, %v15136_v13  ;;  %14126 = vmatprep.subr.bf16.mxu0 %v14870_v1  ;;  %v1437_v25 = vrot.slane %v1423_v38, %v15136_v13  ;;  %v1093_v44 = vrot.slane %v15237_v28, %v15136_v13  ;;  %v1218_v45 = vrot.slane %v1210_v41, %v15136_v13 }
 0x300   :  { %v1484_v35 = vrot.slane %v1456_v12, %v15136_v13  ;;  %v1485_v40 = vcombine.low %v1463_v30, %v1470_v27  ;;  %v1225_v47 = vrot.slane %v1211_v42, %v15136_v13  ;;  %v1108_v37 = vrot.slane %v1101_v31, %v15136_v13 }
 0x301   :  { %v1452_v60 = vrot.slane %v1445_v36, %v15136_v13  ;;  %v1438_v17 = vcombine.low %v1430_v43, %v1437_v25  ;;  %v1094_v20 = vcombine.low %v1086_v18, %v1093_v44  ;;  %v1508_v28 = vrot.slane %v982_v19, %v15136_v13  ;;  %v14603_v44 = vld [vmem:[%s17433_s29 + $0x10] sm:$0xff]  }
 0x302   :  { %v1486_v23 = vcombine.low %v1477_v16, %v1484_v35  ;;  %v1226_v48 = vcombine.low %v1218_v45, %v1225_v47  ;;  %v1240_v49 = vrot.slane %v1233_v32, %v15136_v13  ;;  %v1493_v31 = vrot.slane %v1485_v40, %v15136_v13  ;;  %v14605_v35 = vld [vmem:[%s17432_s28 + $0x10] sm:$0xff]  }
 0x303   :  { %v1520_v51 = vpack.c.bf16 %v1452_v60, %v1438_v17  ;;  %v1114_v52 = vpack.c.bf16 %v1108_v37, %v1094_v20  ;;  %v1515_v18 = vrot.slane %v1508_v28, %v15136_v13 }
 0x304   :  { %v1246_v7 = vpack.c.bf16 %v1240_v49, %v1226_v48  ;;  %v1500_v53 = vrot.slane %v1486_v23, %v15136_v13  ;;  %v14604_v48 = vld [vmem:[%s17433_s29 + $0x18] sm:$0xff]  }
 0x305   :  { %14117 = vmatmul.mubr.msk.bf16.vlgmr.msra.gmra.mrb[12].mxu0 %vm1247_vm8, %v15213_v56  ;;  %v1530_v24 = vand.u32 %v15251_v34, %v1520_v51 }
 0x306   :  { %v1299_v54 = vsel %vm1247_vm8, %v1246_v7, 0  ;;  %v1501_v55 = vcombine.low %v1493_v31, %v1500_v53  ;;  %14128 = vmatprep.mubr.msk.bf16.mxu0 %vm14871_vm0, %v14870_v1  ;;  %v14606_v53 = vld [vmem:[%s17432_s28 + $0x18] sm:$0xff]  }
 0x307   :  { %14121 = vmatpush3.bf16.xpose.msra.mxu1 %v1299_v54  ;;  %14127 = vmatpush3.bf16.msra.mxu0 %v1530_v24  ;;  %v14607_v24 = vld [vmem:[%s17389_s13 + $0x10] sm:$0xff]  }
 0x308   :  { %14132 = vmatprep.subr.bf16.mxu1 %v14870_v1  ;;  %v1521_v8 = vpack.c.bf16 %v1515_v18, %v1501_v55  ;;  %14138 = vmatprep.subr.bf16.mxu0 %v14605_v35  ;;  %v14608_v18 = vld [vmem:[%s17389_s13 + $0x18] sm:$0xff]  }
 0x30a   :  { %v1577_v32 = vand.u32 %v15251_v34, %v1521_v8 }
 0x30e   :  { %14123 = vmatmul.mubr.msk.bf16.vlgmr.msra.gmra.mrb[12].mxu1 %vm1247_vm8, %v1114_v52 }
 0x30f   :  { %14133 = vmatpush3.bf16.msra.mxu1 %v1577_v32  ;;  %14134 = vmatprep.mubr.msk.bf16.mxu1 %vm14871_vm0, %v14870_v1 }
 0x310   :  { %14146 = vmatprep.subr.bf16.mxu1 %v14603_v44 }
 0x3d8   :  { %v1288_v56 = vpop.f32.mrb[12].mxu0 }
 0x3d9   :  { %v14118_v57 = vpop.f32.mrb[13].mxu0  ;;  %v1343_v14 = vsel %vm1342_vm9, %v1288_v56, -inf }
 0x3da   :  { %v1291_v58 = vpop.f32.mrb[14].mxu0 }
 0x3db   :  { %v14119_v59 = vpop.f32.mrb[15].mxu0  ;;  %v1347_v11 = vsel %vm1346_vm10, %v1291_v58, -inf }
 0x3e1   :  { %v1335_v61 = vpop.f32.mrb[12].mxu1 }
 0x3e2   :  { %v14124_v62 = vpop.f32.mrb[13].mxu1  ;;  %v1350_v5 = vsel %vm1342_vm9, %v1335_v61, -inf }
 0x3e3   :  { %1351 = vmax.xlane.f32.xlu0 %v1350_v5  ;;  %v1338_v6 = vpop.f32.mrb[14].mxu1 }
 0x3e4   :  { %v14125_v9 = vpop.f32.mrb[15].mxu1  ;;  %v1353_v10 = vsel %vm1346_vm10, %v1338_v6, -inf }
 0x3e5   :  { %1354 = vmax.xlane.f32.xlu1 %v1353_v10 }
 0x3e9   :  { %1344 = vmax.xlane.f32.xlu1 %v1343_v14 }
 0x3ed   :  { %1348 = vmax.xlane.f32.xlu1 %v1347_v11 }
 0x470   :  { %v1352_v15 = vpop.xlane.xlu0 %1351 }
 0x471   :  { %v1358_v50 = vsub.f32 %v1335_v61, %v1352_v15  ;;  %v13494_v15 = vld [vmem:[%s17388_s12 + $0x1] ss:$0 sm:$0xff] }
 0x472   :  { %v1355_v38 = vpop.xlane.xlu1 %1354 }
 0x473   :  { %v1364_v21 = vmul.f32 1.442695, %v1358_v50  ;;  %v1359_v22 = vsub.f32 %v1338_v6, %v1355_v38 }
 0x475   :  { %14667 = vpow2.f32 %v1364_v21  ;;  %v1366_v26 = vmul.f32 1.442695, %v1359_v22 }
 0x476   :  { %v1345_v29 = vpop.xlane.xlu1 %1344 }
 0x477   :  { %14669 = vpow2.f32 %v1366_v26  ;;  %v1356_v33 = vsub.f32 %v1288_v56, %v1345_v29 }
 0x479   :  { %v1360_v46 = vmul.f32 1.442695, %v1356_v33 }
 0x47a   :  { %v1349_v19 = vpop.xlane.xlu1 %1348 }
 0x47b   :  { %14671 = vpow2.f32 %v1360_v46  ;;  %v1357_v36 = vsub.f32 %v1291_v58, %v1349_v19 }
 0x47d   :  { %v1362_v39 = vmul.f32 1.442695, %v1357_v36 }
 0x47f   :  { %v14668_v41 = vpop.eup %14667  ;;  %14673 = vpow2.f32 %v1362_v39 }
 0x480   :  { %v1374_v12 = vsel %vm1342_vm9, %v14668_v41, 0.0 }
 0x481   :  { %v14670_v30 = vpop.eup %14669  ;;  %1375 = vadd.xlane.f32.xlu1 %v1374_v12 }
 0x482   :  { %v1377_v27 = vsel %vm1346_vm10, %v14670_v30, 0.0 }
 0x485   :  { %v14672_v42 = vpop.eup %14671  ;;  %1378 = vadd.xlane.f32.xlu1 %v1377_v27 }
 0x486   :  { %v1368_v43 = vsel %vm1342_vm9, %v14672_v42, 0.0 }
 0x489   :  { %v14674_v16 = vpop.eup %14673  ;;  %1369 = vadd.xlane.f32.xlu1 %v1368_v43 }
 0x48a   :  { %v1371_v25 = vsel %vm1346_vm10, %v14674_v16, 0.0 }
 0x48d   :  { %1372 = vadd.xlane.f32.xlu1 %v1371_v25 }
 0x50e   :  { %v1376_v40 = vpop.xlane.xlu1 %1375 }
 0x50f   :  { %14675 = vrcp.f32 %v1376_v40 }
 0x512   :  { %v1379_v45 = vpop.xlane.xlu1 %1378 }
 0x513   :  { %14677 = vrcp.f32 %v1379_v45 }
 0x516   :  { %v1370_v47 = vpop.xlane.xlu1 %1369 }
 0x517   :  { %14679 = vrcp.f32 %v1370_v47 }
 0x519   :  { %v14676_v60 = vpop.eup %14675 }
 0x51a   :  { %v1373_v37 = vpop.xlane.xlu1 %1372  ;;  %v1386_v20 = vmul.f32 %v14676_v60, %v14668_v41 }
 0x51b   :  { %14681 = vrcp.f32 %v1373_v37 }
 0x51d   :  { %v14678_v17 = vpop.eup %14677 }
 0x51e   :  { %v1387_v28 = vmul.f32 %v14678_v17, %v14670_v30 }
 0x520   :  { %v1389_v23 = vpack.c.bf16 %v1387_v28, %v1386_v20 }
 0x521   :  { %v14680_v49 = vpop.eup %14679 }
 0x522   :  { %14135 = vmatmul.mubr.msk.bf16.vlgmr.msra.gmra.mrb[16].mxu1 %vm1342_vm9, %v1389_v23  ;;  %v1384_v52 = vmul.f32 %v14680_v49, %v14672_v42 }
 0x523   :  { %14147 = vmatpush3.bf16.msra.mxu1 %v14603_v44  ;;  %14150 = vmatprep.mubr.msk.bf16.mxu1 %vm129_vm2, %v15102_v3 }
 0x524   :  { %14148 = vmatprep.subr.bf16.mxu1 %v14604_v48 }
 0x525   :  { %v14682_v51 = vpop.eup %14681 }
 0x526   :  { %v1385_v7 = vmul.f32 %v14682_v51, %v14674_v16 }
 0x527   :  { %14149 = vmatpush3.bf16.msra.mxu1 %v14604_v48 }
 0x528   :  { %v1388_v31 = vpack.c.bf16 %v1385_v7, %v1384_v52  ;;  %14162 = vmatprep.subr.bf16.mxu1 %v14870_v1 }
 0x52a   :  { %14129 = vmatmul.mubr.msk.bf16.vlgmr.msra.gmra.mrb[16].mxu0 %vm1342_vm9, %v1388_v31  ;;  %14151 = vmatmul.mubr.msk.bf16.vlgmr.msra.gmra.mrb[20].mxu1 %vm129_vm2, %v15106_v4 }
 0x52b   :  { %14139 = vmatpush3.bf16.msra.mxu0 %v14605_v35  ;;  %14142 = vmatprep.mubr.msk.bf16.mxu0 %vm129_vm2, %v15102_v3 }
 0x52c   :  { %14140 = vmatprep.subr.bf16.mxu0 %v14606_v53  ;;  %14164 = vmatprep.mubr.msk.bf16.mxu1 %vm14871_vm0, %v14870_v1 }
 0x52f   :  { %14141 = vmatpush3.bf16.msra.mxu0 %v14606_v53 }
 0x530   :  { %14154 = vmatprep.subr.bf16.mxu0 %v14607_v24 }
 0x532   :  { %14143 = vmatmul.mubr.msk.bf16.vlgmr.msra.gmra.mrb[20].mxu0 %vm129_vm2, %v15106_v4 }
 0x533   :  { %14155 = vmatpush3.bf16.msra.mxu0 %v14607_v24  ;;  %14158 = vmatprep.mubr.msk.bf16.mxu0 %vm129_vm2, %v15102_v3 }
 0x534   :  { %14156 = vmatprep.subr.bf16.mxu0 %v14608_v18 }
 0x537   :  { %14157 = vmatpush3.bf16.msra.mxu0 %v14608_v18 }
 0x538   :  { %14168 = vmatprep.subr.bf16.mxu0 %v14870_v1 }
 0x53a   :  { %14159 = vmatmul.mubr.msk.bf16.vlgmr.msra.gmra.mrb[24].mxu0 %vm129_vm2, %v15106_v4 }
 0x53b   :  { %14170 = vmatprep.mubr.msk.bf16.mxu0 %vm14871_vm0, %v14870_v1 }
 0x5f5   :  { %v1613_v54 = vpop.f32.mrb[16].mxu1 }
 0x5f6   :  { %v1687_v55 = vcombine.high %v1613_v54, %v1613_v54  ;;  %v1694_v8 = vrot.slane %v1613_v54, %v15136_v13  ;;  %v14136_v32 = vpop.f32.mrb[17].mxu1 }
 0x5f7   :  { %v1616_v56 = vpop.f32.mrb[18].mxu1 }
 0x5f8   :  { %v1701_v57 = vrot.slane %v1687_v55, %v15136_v13  ;;  %v1702_v58 = vcombine.high %v1694_v8, %v1694_v8  ;;  %v14137_v59 = vpop.f32.mrb[19].mxu1  ;;  %v15379_v61 = vrot.slane %v1694_v8, %v15136_v13  ;;  %v1742_v9 = vrot.slane %v1616_v56, %v15136_v13 }
 0x5fa   :  { %v1703_v62 = vcombine.high %v1701_v57, %v1701_v57  ;;  %v1717_v5 = vrot.slane %v1701_v57, %v15136_v13  ;;  %v1724_v6 = vrot.slane %v1702_v58, %v15136_v13  ;;  %v1732_v21 = vcombine.high %v15379_v61, %v15379_v61 }
 0x5fb   :  { %v1749_v29 = vrot.slane %v1742_v9, %v15136_v13 }
 0x5fc   :  { %v1731_v10 = vrot.slane %v1703_v62, %v15136_v13  ;;  %v1733_v14 = vcombine.high %v1717_v5, %v1717_v5  ;;  %v1734_v11 = vcombine.high %v1724_v6, %v1724_v6  ;;  %v1800_v40 = vcombine.low %v1724_v6, %v1732_v21 }
 0x5fd   :  { %v1566_v50 = vpop.f32.mrb[16].mxu0  ;;  %v14152_v38 = vpop.f32.mrb[20].mxu1 }
 0x5fe   :  { %v1801_v22 = vcombine.low %v1734_v11, %v1717_v5  ;;  %v1735_v26 = vcombine.high %v1731_v10, %v1731_v10  ;;  %v14130_v33 = vpop.f32.mrb[17].mxu0  ;;  %v2124_v46 = vpop.f32.mrb[21].mxu1  ;;  %v1624_v19 = vcombine.high %v1566_v50, %v1566_v50  ;;  %v1631_v36 = vrot.slane %v1566_v50, %v15136_v13 }
 0x5ff   :  { %v2133_v39 = vadd.f32 %v14152_v38, %v13494_v15  ;;  %v2125_v41 = vadd.f32 %v13494_v15, %v2124_v46  ;;  %v1569_v12 = vpop.f32.mrb[18].mxu0  ;;  %v14153_v30 = vpop.f32.mrb[22].mxu1  ;;  %v1802_v27 = vcombine.low %v1731_v10, %v1733_v14  ;;  %v1816_v18 = vrot.slane %v1800_v40, %v15136_v13 }
 0x600   :  { %v15392_v42 = vcombine.low %v1735_v26, %v1749_v29  ;;  %v14131_v43 = vpop.f32.mrb[19].mxu0  ;;  %v2127_v16 = vpop.f32.mrb[23].mxu1  ;;  %v1638_v25 = vrot.slane %v1624_v19, %v15136_v13  ;;  %v1639_v44 = vcombine.high %v1631_v36, %v1631_v36  ;;  %v1823_v45 = vrot.slane %v1801_v22, %v15136_v13 }
 0x601   :  { %v15396_v35 = vrot.slane %v2133_v39, %v15136_v13  ;;  %v2141_v47 = vcombine.high %v2125_v41, %v2125_v41  ;;  %v2148_v37 = vrot.slane %v2125_v41, %v15136_v13  ;;  %v1647_v17 = vrot.slane %v1631_v36, %v15136_v13  ;;  %v13484_v41 = vld [vmem:[%s17436_s7 + $0x1] ss:$0 sm:$0xff] }
 0x602   :  { %v1640_v60 = vcombine.high %v1638_v25, %v1638_v25  ;;  %v1661_v20 = vrot.slane %v1639_v44, %v15136_v13  ;;  %v1830_v23 = vrot.slane %v1802_v27, %v15136_v13  ;;  %v1679_v51 = vrot.slane %v1569_v12, %v15136_v13 }
 0x603   :  { %v2246_v28 = vcombine.high %v15396_v35, %v15396_v35  ;;  %v2155_v48 = vrot.slane %v2141_v47, %v15136_v13  ;;  %v2156_v49 = vcombine.high %v2148_v37, %v2148_v37  ;;  %v1654_v52 = vrot.slane %v1638_v25, %v15136_v13 }
 0x604   :  { %v1668_v7 = vrot.slane %v1640_v60, %v15136_v13  ;;  %v1750_v31 = vcombine.low %v1647_v17, %v1661_v20  ;;  %v13477_v53 = vcombine.high %v1647_v17, %v1661_v20  ;;  %v2164_v8 = vrot.slane %v2148_v37, %v15136_v13 }
 0x605   :  { %v14144_v24 = vpop.f32.mrb[20].mxu0  ;;  %v15411_v54 = vrot.slane %v2246_v28, %v15136_v13  ;;  %v2157_v55 = vcombine.high %v2155_v48, %v2155_v48  ;;  %v2171_v59 = vrot.slane %v2155_v48, %v15136_v13  ;;  %v2178_v6 = vrot.slane %v2156_v49, %v15136_v13 }
 0x606   :  { %v1928_v32 = vpop.f32.mrb[21].mxu0  ;;  %v1752_v56 = vcombine.low %v1654_v52, %v1668_v7  ;;  %v13478_v57 = vcombine.high %v1654_v52, %v1668_v7  ;;  %v15415_v58 = vrot.slane %v1750_v31, %v15136_v13  ;;  %v15419_v5 = vrot.slane %v13477_v53, %v15136_v13 }
 0x607   :  { %v14145_v62 = vpop.f32.mrb[22].mxu0  ;;  %v2185_v9 = vrot.slane %v2157_v55, %v15136_v13  ;;  %v1686_v10 = vrot.slane %v1679_v51, %v15136_v13  ;;  %v15424_v11 = vcombine.low %v1823_v45, %v1830_v23  ;;  %v2253_v38 = vrot.slane %v15396_v35, %v15136_v13 }
 0x608   :  { %v1931_v14 = vpop.f32.mrb[23].mxu0  ;;  %v15427_v50 = vrot.slane %v1752_v56, %v15136_v13  ;;  %v2128_v21 = vadd.f32 %v13494_v15, %v2127_v16  ;;  %v15432_v22 = vrot.slane %v13478_v57, %v15136_v13  ;;  %v2589_v26 = vcombine.low %v2164_v8, %v2178_v6 }
 0x609   :  { %v13511_v29 = vcombine.high %v2164_v8, %v2178_v6  ;;  %v2591_v33 = vcombine.low %v2171_v59, %v2185_v9  ;;  %v2707_v46 = vrot.slane %v15411_v54, %v15136_v13  ;;  %v1799_v19 = vcombine.low %v1686_v10, %v15379_v61 }
 0x60a   :  { %v2190_v36 = vcombine.high %v2128_v21, %v2128_v21  ;;  %v2197_v39 = vrot.slane %v2128_v21, %v15136_v13  ;;  %v1782_v15 = vcombine.low %v15415_v58, %v15419_v5  ;;  %v13512_v12 = vcombine.high %v2171_v59, %v2185_v9 }
 0x60b   :  { %v15444_v30 = vrot.slane %v2589_v26, %v15136_v13  ;;  %v15447_v27 = vrot.slane %v13511_v29, %v15136_v13  ;;  %v1809_v43 = vrot.slane %v1799_v19, %v15136_v13  ;;  %v1783_v35 = vcombine.low %v15427_v50, %v15432_v22 }
 0x60c   :  { %v2204_v61 = vrot.slane %v2190_v36, %v15136_v13  ;;  %v2205_v16 = vcombine.high %v2197_v39, %v2197_v39  ;;  %v15452_v25 = vrot.slane %v2197_v39, %v15136_v13  ;;  %v15457_v40 = vrot.slane %v2591_v33, %v15136_v13 }
 0x60d   :  { %v14160_v44 = vpop.f32.mrb[24].mxu0  ;;  %v1937_v45 = vadd.f32 %v14144_v24, %v13484_v41  ;;  %v1929_v47 = vadd.f32 %v13484_v41, %v1928_v32  ;;  %v15459_v60 = vcombine.low %v1809_v43, %v1816_v18  ;;  %v15464_v48 = vrot.slane %v13512_v12, %v15136_v13 }
 0x60e   :  { %v2320_v37 = vpop.f32.mrb[25].mxu0  ;;  %v2206_v17 = vcombine.high %v2204_v61, %v2204_v61  ;;  %v2220_v20 = vrot.slane %v2204_v61, %v15136_v13  ;;  %v2227_v28 = vrot.slane %v2205_v16, %v15136_v13  ;;  %v2235_v49 = vcombine.high %v15452_v25, %v15452_v25 }
 0x60f   :  { %v14161_v23 = vpop.f32.mrb[26].mxu0  ;;  %v15469_v51 = vrot.slane %v1937_v45, %v15136_v13  ;;  %v1945_v52 = vcombine.high %v1929_v47, %v1929_v47  ;;  %v2621_v31 = vcombine.low %v15444_v30, %v15447_v27  ;;  %v1952_v32 = vrot.slane %v1929_v47, %v15136_v13 }
 0x610   :  { %v15471_v7 = vpop.f32.mrb[27].mxu0  ;;  %v2234_v53 = vrot.slane %v2206_v17, %v15136_v13  ;;  %v2236_v24 = vcombine.high %v2220_v20, %v2220_v20  ;;  %v2237_v18 = vcombine.high %v2227_v28, %v2227_v28  ;;  %v15476_v55 = vcombine.low %v2227_v28, %v2235_v49 }
 0x611   :  { %v2050_v8 = vcombine.high %v15469_v51, %v15469_v51  ;;  %v1932_v56 = vadd.f32 %v13484_v41, %v1931_v14  ;;  %v2644_v59 = vrot.slane %v15452_v25, %v15136_v13  ;;  %v1959_v6 = vrot.slane %v1945_v52, %v15136_v13  ;;  %v13504_v14 = vld [vmem:[%s17390_s14 + $0x1] ss:$0 sm:$0xff] }
 0x612   :  { %v2238_v57 = vcombine.high %v2234_v53, %v2234_v53  ;;  %v15483_v62 = vcombine.low %v2237_v18, %v2220_v20  ;;  %v1839_v9 = vrot.slane %v15459_v60, %v15136_v13  ;;  %v15488_v10 = vcombine.low %v2234_v53, %v2236_v24 }
 0x613   :  { %v2057_v21 = vrot.slane %v15469_v51, %v15136_v13  ;;  %v1960_v26 = vcombine.high %v1952_v32, %v1952_v32  ;;  %v2662_v33 = vrot.slane %v15476_v55, %v15136_v13  ;;  %v2064_v19 = vrot.slane %v2050_v8, %v15136_v13 }
 0x614   :  { %v15495_v29 = vcombine.low %v2238_v57, %v2253_v38  ;;  %v1961_v36 = vcombine.high %v1959_v6, %v1959_v6  ;;  %v2669_v39 = vrot.slane %v15483_v62, %v15136_v13  ;;  %v1968_v41 = vrot.slane %v1952_v32, %v15136_v13 }
 0x615   :  { %v1982_v12 = vrot.slane %v1960_v26, %v15136_v13  ;;  %v1994_v43 = vcombine.high %v1932_v56, %v1932_v56  ;;  %v1975_v61 = vrot.slane %v1959_v6, %v15136_v13  ;;  %v2001_v38 = vrot.slane %v1932_v56, %v15136_v13 }
 0x616   :  { %v1989_v16 = vrot.slane %v1961_v36, %v15136_v13  ;;  %v2329_v45 = vadd.f32 %v14160_v44, %v13504_v14  ;;  %v2321_v28 = vadd.f32 %v13504_v14, %v2320_v37  ;;  %v2684_v25 = vcombine.low %v2662_v33, %v2669_v39 }
 0x617   :  { %v2457_v47 = vcombine.low %v1968_v41, %v1982_v12  ;;  %v13509_v17 = vcombine.high %v1968_v41, %v1982_v12  ;;  %v2008_v20 = vrot.slane %v1994_v43, %v15136_v13  ;;  %v2009_v51 = vcombine.high %v2001_v38, %v2001_v38 }
 0x618   :  { %v2459_v23 = vcombine.low %v1975_v61, %v1989_v16  ;;  %v13510_v49 = vcombine.high %v1975_v61, %v1989_v16  ;;  %v2017_v52 = vrot.slane %v2001_v38, %v15136_v13  ;;  %v15518_v61 = vrot.slane %v2329_v45, %v15136_v13 }
 0x619   :  { %v2467_v53 = vrot.slane %v2457_v47, %v15136_v13  ;;  %v2474_v24 = vrot.slane %v13509_v17, %v15136_v13  ;;  %v2010_v18 = vcombine.high %v2008_v20, %v2008_v20  ;;  %v2024_v8 = vrot.slane %v2008_v20, %v15136_v13 }
 0x61a   :  { %v2481_v32 = vrot.slane %v2459_v23, %v15136_v13  ;;  %v2488_v44 = vrot.slane %v13510_v49, %v15136_v13  ;;  %v2031_v56 = vrot.slane %v2009_v51, %v15136_v13  ;;  %v2039_v57 = vcombine.high %v2017_v52, %v2017_v52 }
 0x61b   :  { %v2489_v37 = vcombine.low %v2467_v53, %v2474_v24  ;;  %v2038_v6 = vrot.slane %v2010_v18, %v15136_v13  ;;  %v2040_v26 = vcombine.high %v2024_v8, %v2024_v8  ;;  %v2512_v36 = vrot.slane %v2017_v52, %v15136_v13 }
 0x61c   :  { %v2490_v41 = vcombine.low %v2481_v32, %v2488_v44  ;;  %v2041_v12 = vcombine.high %v2031_v56, %v2031_v56  ;;  %v2520_v43 = vcombine.low %v2031_v56, %v2039_v57  ;;  %v2676_v16 = vrot.slane %v15488_v10, %v15136_v13 }
 0x61d   :  { %v2575_v38 = vrot.slane %v2064_v19, %v15136_v13  ;;  %v2042_v47 = vcombine.high %v2038_v6, %v2038_v6  ;;  %v2522_v17 = vcombine.low %v2038_v6, %v2040_v26  ;;  %v2497_v20 = vrot.slane %v2489_v37, %v15136_v13 }
 0x61e   :  { %v2504_v23 = vrot.slane %v2490_v41, %v15136_v13  ;;  %v2521_v49 = vcombine.low %v2041_v12, %v2024_v8  ;;  %v2442_v51 = vcombine.high %v15518_v61, %v15518_v61  ;;  %v2519_v52 = vrot.slane %v2512_v36, %v15136_v13 }
 0x61f   :  { %v2523_v53 = vcombine.low %v2042_v47, %v2057_v21  ;;  %v2530_v45 = vrot.slane %v2520_v43, %v15136_v13  ;;  %v2337_v24 = vcombine.high %v2321_v28, %v2321_v28  ;;  %v2344_v44 = vrot.slane %v2321_v28, %v15136_v13 }
 0x620   :  { %v2505_v18 = vcombine.low %v2497_v20, %v2504_v23  ;;  %v2537_v32 = vrot.slane %v2521_v49, %v15136_v13  ;;  %v15531_v19 = vrot.slane %v2442_v51, %v15136_v13  ;;  %v2544_v56 = vrot.slane %v2522_v17, %v15136_v13 }
 0x621   :  { %v2551_v8 = vrot.slane %v2523_v53, %v15136_v13  ;;  %v2351_v57 = vrot.slane %v2337_v24, %v15136_v13  ;;  %v2324_v37 = vadd.f32 %v13504_v14, %v15471_v7  ;;  %v15539_v21 = vrot.slane %v2575_v38, %v15136_v13 }
 0x622   :  { %v15541_v6 = vpack.c.bf16 %v2519_v52, %v2505_v18  ;;  %v2352_v26 = vcombine.high %v2344_v44, %v2344_v44  ;;  %v2622_v36 = vcombine.low %v15457_v40, %v15464_v48  ;;  %v2552_v41 = vcombine.low %v2530_v45, %v2537_v32 }
 0x623   :  { %v2553_v12 = vcombine.low %v2544_v56, %v2551_v8  ;;  %v2449_v28 = vrot.slane %v15518_v61, %v15136_v13  ;;  %v2353_v43 = vcombine.high %v2351_v57, %v2351_v57  ;;  %v2979_v47 = vrot.slane %v15531_v19, %v15136_v13 }
 0x624   :  { %v2360_v7 = vrot.slane %v2344_v44, %v15136_v13  ;;  %v2374_v14 = vrot.slane %v2352_v26, %v15136_v13  ;;  %v2386_v38 = vcombine.high %v2324_v37, %v2324_v37  ;;  %v2367_v17 = vrot.slane %v2351_v57, %v15136_v13 }
 0x625   :  { %v2381_v20 = vrot.slane %v2353_v43, %v15136_v13  ;;  %v2393_v40 = vrot.slane %v2324_v37, %v15136_v13  ;;  %v2629_v48 = vrot.slane %v2621_v31, %v15136_v13  ;;  %v2636_v51 = vrot.slane %v2622_v36, %v15136_v13 }
 0x626   :  { %v2861_v61 = vcombine.low %v2360_v7, %v2374_v14  ;;  %v13515_v23 = vcombine.high %v2360_v7, %v2374_v14  ;;  %v2400_v49 = vrot.slane %v2386_v38, %v15136_v13  ;;  %v2560_v57 = vrot.slane %v2552_v41, %v15136_v13 }
 0x627   :  { %v2863_v52 = vcombine.low %v2367_v17, %v2381_v20  ;;  %v13516_v53 = vcombine.high %v2367_v17, %v2381_v20  ;;  %v2401_v45 = vcombine.high %v2393_v40, %v2393_v40  ;;  %v2409_v24 = vrot.slane %v2393_v40, %v15136_v13 }
 0x628   :  { %v2871_v18 = vrot.slane %v2861_v61, %v15136_v13  ;;  %v2878_v32 = vrot.slane %v13515_v23, %v15136_v13  ;;  %v2402_v44 = vcombine.high %v2400_v49, %v2400_v49  ;;  %v2416_v56 = vrot.slane %v2400_v49, %v15136_v13 }
 0x629   :  { %v2885_v30 = vrot.slane %v2863_v52, %v15136_v13  ;;  %v2892_v27 = vrot.slane %v13516_v53, %v15136_v13  ;;  %v2423_v31 = vrot.slane %v2401_v45, %v15136_v13  ;;  %v2431_v8 = vcombine.high %v2409_v24, %v2409_v24 }
 0x62a   :  { %v2893_v37 = vcombine.low %v2871_v18, %v2878_v32  ;;  %v2430_v26 = vrot.slane %v2402_v44, %v15136_v13  ;;  %v2432_v36 = vcombine.high %v2416_v56, %v2416_v56  ;;  %v2637_v14 = vcombine.low %v2629_v48, %v2636_v51 }
 0x62b   :  { %v2433_v43 = vcombine.high %v2423_v31, %v2423_v31  ;;  %v2924_v7 = vcombine.low %v2423_v31, %v2431_v8  ;;  %v2651_v38 = vrot.slane %v2644_v59, %v15136_v13  ;;  %v2894_v17 = vcombine.low %v2885_v30, %v2892_v27 }
 0x62c   :  { %v2434_v20 = vcombine.high %v2430_v26, %v2430_v26  ;;  %v2916_v40 = vrot.slane %v2409_v24, %v15136_v13  ;;  %v2926_v61 = vcombine.low %v2430_v26, %v2432_v36  ;;  %v2901_v23 = vrot.slane %v2893_v37, %v15136_v13 }
 0x62d   :  { %v2925_v41 = vcombine.low %v2433_v43, %v2416_v56  ;;  %v2719_v49 = vpack.c.bf16 %v2651_v38, %v2637_v14  ;;  %v2683_v52 = vrot.slane %v15495_v29, %v15136_v13  ;;  %v2934_v48 = vrot.slane %v2924_v7, %v15136_v13 }
 0x62e   :  { %v2927_v53 = vcombine.low %v2434_v20, %v2449_v28  ;;  %v2948_v51 = vrot.slane %v2926_v61, %v15136_v13  ;;  %v2567_v28 = vrot.slane %v2553_v12, %v15136_v13  ;;  %v2692_v18 = vrot.slane %v2684_v25, %v15136_v13 }
 0x62f   :  { %v2941_v59 = vrot.slane %v2925_v41, %v15136_v13  ;;  %v2725_v45 = vsel %vm1247_vm8, %v2719_v49, 0  ;;  %v2685_v29 = vcombine.low %v2676_v16, %v2683_v52  ;;  %v2908_v62 = vrot.slane %v2894_v17, %v15136_v13 }
 0x630   :  { %v2955_v24 = vrot.slane %v2927_v53, %v15136_v13  ;;  %14163 = vmatpush3.bf16.xpose.msra.mxu1 %v2725_v45  ;;  %v1790_v55 = vrot.slane %v1782_v15, %v15136_v13  ;;  %v2568_v32 = vcombine.low %v2560_v57, %v2567_v28  ;;  %v1797_v10 = vrot.slane %v1783_v35, %v15136_v13 }
 0x631   :  { %v2956_v33 = vcombine.low %v2934_v48, %v2941_v59  ;;  %v2699_v39 = vrot.slane %v2685_v29, %v15136_v13  ;;  %14174 = vmatprep.subr.bf16.mxu1 %v14870_v1  ;;  %v2923_v16 = vrot.slane %v2916_v40, %v15136_v13  ;;  %v2909_v44 = vcombine.low %v2901_v23, %v2908_v62 }
 0x632   :  { %v2957_v12 = vcombine.low %v2948_v51, %v2955_v24  ;;  %v1846_v56 = vrot.slane %v15424_v11, %v15136_v13  ;;  %v2714_v5 = vrot.slane %v2707_v46, %v15136_v13  ;;  %v2588_v15 = vpack.c.bf16 %v15539_v21, %v2568_v32 }
 0x633   :  { %v2700_v58 = vcombine.low %v2692_v18, %v2699_v39  ;;  %v1798_v30 = vcombine.low %v1790_v55, %v1797_v10  ;;  %v2991_v27 = vpack.c.bf16 %v2923_v16, %v2909_v44  ;;  %v2964_v50 = vrot.slane %v2956_v33, %v15136_v13  ;;  %v1868_v39 = vld [vmem:[%s17391_s15] sm:$0xf] }
 0x634   :  { %v2971_v22 = vrot.slane %v2957_v12, %v15136_v13  ;;  %v1847_v35 = vcombine.low %v1839_v9, %v1846_v56  ;;  %v2986_v11 = vrot.slane %v2979_v47, %v15136_v13 }
 0x635   :  { %v2720_v31 = vpack.c.bf16 %v2714_v5, %v2700_v58  ;;  %v2997_v54 = vand.u32 %v2991_v27, %v15251_v34 }
 0x636   :  { %v2972_v46 = vcombine.low %v2964_v50, %v2971_v22  ;;  %v15622_v21 = vpack.c.bf16 %v1847_v35, %v1798_v30  ;;  %v1855_v35 = vrot.slane %v15392_v42, %v15136_v13  ;;  %v14610_v42 = vld [vmem:[%s17433_s29 + $0x28] sm:$0xff]  }
 0x637   :  { %v2772_v8 = vsel %vm1247_vm8, %v2720_v31, 0  ;;  %14165 = vmatmul.mubr.msk.bf16.vlgmr.msra.gmra.mrb[24].mxu1 %vm1247_vm8, %v15541_v6 }
 0x638   :  { %14169 = vmatpush3.bf16.xpose.msra.mxu0 %v2772_v8  ;;  %14175 = vmatpush3.bf16.msra.mxu1 %v2997_v54  ;;  %v2992_v60 = vpack.c.bf16 %v2986_v11, %v2972_v46  ;;  %v3401_v11 = vsel %vm1525_vm6, %v1868_v39, 0  ;;  %v14609_v54 = vld [vmem:[%s17433_s29 + $0x20] sm:$0xff]   ;;  %v1862_v46 = vrot.slane %v1855_v35, %v15136_v13 }
 0x639   :  { %14180 = vmatprep.subr.bf16.mxu0 %v14870_v1  ;;  %14176 = vmatprep.mubr.msk.bf16.mxu1 %vm14871_vm0, %v14870_v1 }
 0x63a   :  { %v3044_v9 = vand.u32 %v2992_v60, %v15251_v34  ;;  %v1867_v8 = vpack.c.bf16 %v1862_v46, %v1862_v46 }
 0x63f   :  { %14171 = vmatmul.mubr.msk.bf16.vlgmr.msra.gmra.mrb[28].mxu0 %vm1247_vm8, %v2588_v15 }
 0x640   :  { %14181 = vmatpush3.bf16.msra.mxu0 %v3044_v9  ;;  %14182 = vmatprep.mubr.msk.bf16.mxu0 %vm14871_vm0, %v14870_v1  ;;  %v15676_v9 = vld [vmem:[%s17432_s28 + $0x20] sm:$0xff]  }
 0x641   :  { %14571 = vmatprep.subr.msk.bf16.mxu0 %vm1525_vm6, %v1868_v39 }
 0x70a   :  { %v2761_v19 = vpop.f32.mrb[24].mxu1 }
 0x70b   :  { %v14166_v47 = vpop.f32.mrb[25].mxu1  ;;  %v2815_v6 = vsel %vm1342_vm9, %v2761_v19, -inf }
 0x70c   :  { %2816 = vmax.xlane.f32.xlu1 %v2815_v6  ;;  %v2764_v57 = vpop.f32.mrb[26].mxu1 }
 0x70d   :  { %v14167_v37 = vpop.f32.mrb[27].mxu1  ;;  %v2818_v26 = vsel %vm1346_vm10, %v2764_v57, -inf }
 0x710   :  { %2819 = vmax.xlane.f32.xlu1 %v2818_v26 }
 0x712   :  { %v2808_v36 = vpop.f32.mrb[28].mxu0 }
 0x713   :  { %v14172_v43 = vpop.f32.mrb[29].mxu0  ;;  %v2821_v7 = vsel %vm1342_vm9, %v2808_v36, -inf }
 0x714   :  { %v2811_v14 = vpop.f32.mrb[30].mxu0  ;;  %2822 = vmax.xlane.f32.xlu1 %v2821_v7 }
 0x715   :  { %v14173_v38 = vpop.f32.mrb[31].mxu0  ;;  %v2824_v17 = vsel %vm1346_vm10, %v2811_v14, -inf }
 0x718   :  { %2825 = vmax.xlane.f32.xlu1 %v2824_v17 }
 0x799   :  { %v2817_v20 = vpop.xlane.xlu1 %2816 }
 0x79a   :  { %v2827_v40 = vsub.f32 %v2761_v19, %v2817_v20 }
 0x79c   :  { %v2831_v61 = vmul.f32 1.442695, %v2827_v40 }
 0x79d   :  { %v2820_v23 = vpop.xlane.xlu1 %2819 }
 0x79e   :  { %14683 = vpow2.f32 %v2831_v61  ;;  %v2828_v41 = vsub.f32 %v2764_v57, %v2820_v23 }
 0x7a0   :  { %v2833_v49 = vmul.f32 1.442695, %v2828_v41 }
 0x7a1   :  { %v2823_v52 = vpop.xlane.xlu1 %2822 }
 0x7a2   :  { %14685 = vpow2.f32 %v2833_v49  ;;  %v2829_v53 = vsub.f32 %v2808_v36, %v2823_v52 }
 0x7a4   :  { %v2835_v48 = vmul.f32 1.442695, %v2829_v53 }
 0x7a5   :  { %v2826_v51 = vpop.xlane.xlu1 %2825 }
 0x7a6   :  { %14687 = vpow2.f32 %v2835_v48  ;;  %v2830_v25 = vsub.f32 %v2811_v14, %v2826_v51 }
 0x7a8   :  { %v14684_v59 = vpop.eup %14683  ;;  %v2837_v45 = vmul.f32 1.442695, %v2830_v25 }
 0x7a9   :  { %v2839_v29 = vsel %vm1342_vm9, %v14684_v59, 0.0 }
 0x7aa   :  { %14689 = vpow2.f32 %v2837_v45  ;;  %2840 = vadd.xlane.f32.xlu1 %v2839_v29 }
 0x7ac   :  { %v14686_v28 = vpop.eup %14685 }
 0x7ad   :  { %v2842_v24 = vsel %vm1346_vm10, %v14686_v28, 0.0 }
 0x7ae   :  { %2843 = vadd.xlane.f32.xlu1 %v2842_v24 }
 0x7b0   :  { %v14688_v18 = vpop.eup %14687 }
 0x7b1   :  { %v2845_v62 = vsel %vm1342_vm9, %v14688_v18, 0.0 }
 0x7b2   :  { %2846 = vadd.xlane.f32.xlu0 %v2845_v62 }
 0x7b4   :  { %v14690_v55 = vpop.eup %14689 }
 0x7b5   :  { %v2848_v33 = vsel %vm1346_vm10, %v14690_v55, 0.0 }
 0x7b6   :  { %2849 = vadd.xlane.f32.xlu1 %v2848_v33 }
 0x837   :  { %v2841_v32 = vpop.xlane.xlu1 %2840 }
 0x838   :  { %14691 = vrcp.f32 %v2841_v32 }
 0x83b   :  { %v2844_v10 = vpop.xlane.xlu1 %2843 }
 0x83c   :  { %14693 = vrcp.f32 %v2844_v10 }
 0x83f   :  { %v2847_v16 = vpop.xlane.xlu0 %2846 }
 0x840   :  { %14695 = vrcp.f32 %v2847_v16 }
 0x842   :  { %v14692_v44 = vpop.eup %14691 }
 0x843   :  { %v2850_v12 = vpop.xlane.xlu1 %2849  ;;  %v2855_v58 = vmul.f32 %v14692_v44, %v14684_v59 }
 0x844   :  { %14697 = vrcp.f32 %v2850_v12 }
 0x846   :  { %v14694_v56 = vpop.eup %14693 }
 0x847   :  { %v2856_v5 = vmul.f32 %v14694_v56, %v14686_v28 }
 0x849   :  { %v2859_v15 = vpack.c.bf16 %v2856_v5, %v2855_v58 }
 0x84a   :  { %v14696_v30 = vpop.eup %14695 }
 0x84b   :  { %14177 = vmatmul.mubr.msk.bf16.vlgmr.msra.gmra.mrb[28].mxu1 %vm1342_vm9, %v2859_v15  ;;  %v2857_v50 = vmul.f32 %v14696_v30, %v14688_v18 }
 0x84e   :  { %v14698_v27 = vpop.eup %14697 }
 0x84f   :  { %v2858_v22 = vmul.f32 %v14698_v27, %v14690_v55 }
 0x851   :  { %v2860_v31 = vpack.c.bf16 %v2858_v22, %v2857_v50 }
 0x853   :  { %14183 = vmatmul.mubr.msk.bf16.vlgmr.msra.gmra.mrb[32].mxu0 %vm1342_vm9, %v2860_v31 }
 0x854   :  { %14194 = vmatprep.mubr.msk.bf16.mxu0 %vm1247_vm8, %v15622_v21  ;;  %14193 = vmatpush3.bf16.msra.mxu0 %v3401_v11  ;;  %v13521_v21 = vld [vmem:[%s17391_s15 + $0x4] sm:$0xf] }
 0x855   :  { %14206 = vmatprep.subr.bf16.mxu0 %v14609_v54  ;;  %14570 = vmatprep.subr.msk.bf16.mxu1 %vm1525_vm6, %v13521_v21  ;;  %v3344_v60 = vsel %vm1525_vm6, %v13521_v21, 0 }
 0x856   :  { %14187 = vmatpush3.bf16.msra.mxu1 %v3344_v60 }
 0x857   :  { %14198 = vmatprep.subr.bf16.mxu1 %v15676_v9 }
 0x85b   :  { %14195 = vmatmul.mubr.msk.bf16.vlgmr.msra.gmra.mrb[36].mxu0 %vm1247_vm8, %v1867_v8 }
 0x85c   :  { %14207 = vmatpush3.bf16.msra.mxu0 %v14609_v54  ;;  %14210 = vmatprep.mubr.msk.bf16.mxu0 %vm129_vm2, %v15102_v3 }
 0x85d   :  { %14208 = vmatprep.subr.bf16.mxu0 %v14610_v42 }
 0x860   :  { %14209 = vmatpush3.bf16.msra.mxu0 %v14610_v42 }
 0x861   :  { %14222 = vmatprep.subr.bf16.mxu0 %v14870_v1 }
 0x863   :  { %14211 = vmatmul.mubr.msk.bf16.vlgmr.msra.gmra.mrb[40].mxu0 %vm129_vm2, %v15106_v4 }
 0x864   :  { %14224 = vmatprep.mubr.msk.bf16.mxu0 %vm14871_vm0, %v14870_v1 }
 0x91e   :  { %v3033_v19 = vpop.f32.mrb[28].mxu1 }
 0x91f   :  { %v3091_v47 = vcombine.high %v3033_v19, %v3033_v19  ;;  %v3098_v6 = vrot.slane %v3033_v19, %v15136_v13  ;;  %v14178_v57 = vpop.f32.mrb[29].mxu1 }
 0x920   :  { %v3036_v37 = vpop.f32.mrb[30].mxu1 }
 0x921   :  { %v3105_v26 = vrot.slane %v3091_v47, %v15136_v13  ;;  %v3106_v36 = vcombine.high %v3098_v6, %v3098_v6  ;;  %v14179_v43 = vpop.f32.mrb[31].mxu1  ;;  %v3114_v40 = vrot.slane %v3098_v6, %v15136_v13  ;;  %v3146_v41 = vrot.slane %v3036_v37, %v15136_v13 }
 0x923   :  { %v3107_v7 = vcombine.high %v3105_v26, %v3105_v26  ;;  %v3121_v14 = vrot.slane %v3105_v26, %v15136_v13  ;;  %v3128_v38 = vrot.slane %v3106_v36, %v15136_v13  ;;  %v3153_v62 = vrot.slane %v3146_v41, %v15136_v13  ;;  %v13541_v36 = vld [vmem:[%s17388_s12 + $0x2] ss:$0 sm:$0xff] }
 0x925   :  { %v3135_v17 = vrot.slane %v3107_v7, %v15136_v13  ;;  %v3217_v51 = vcombine.low %v3114_v40, %v3128_v38  ;;  %v13519_v25 = vcombine.high %v3114_v40, %v3128_v38 }
 0x926   :  { %v3080_v20 = vpop.f32.mrb[32].mxu0 }
 0x927   :  { %v3219_v61 = vcombine.low %v3121_v14, %v3135_v17  ;;  %v13520_v23 = vcombine.high %v3121_v14, %v3135_v17  ;;  %v14184_v49 = vpop.f32.mrb[33].mxu0  ;;  %v3154_v52 = vcombine.high %v3080_v20, %v3080_v20  ;;  %v3161_v53 = vrot.slane %v3080_v20, %v15136_v13 }
 0x928   :  { %v3083_v48 = vpop.f32.mrb[34].mxu0  ;;  %v3227_v16 = vrot.slane %v3217_v51, %v15136_v13  ;;  %v3234_v12 = vrot.slane %v13519_v25, %v15136_v13 }
 0x929   :  { %v14185_v59 = vpop.f32.mrb[35].mxu0  ;;  %v3168_v45 = vrot.slane %v3154_v52, %v15136_v13  ;;  %v3169_v29 = vcombine.high %v3161_v53, %v3161_v53  ;;  %v3177_v28 = vrot.slane %v3161_v53, %v15136_v13  ;;  %v3241_v24 = vrot.slane %v3219_v61, %v15136_v13 }
 0x92a   :  { %v3248_v18 = vrot.slane %v13520_v23, %v15136_v13  ;;  %v3209_v55 = vrot.slane %v3083_v48, %v15136_v13  ;;  %v3249_v42 = vcombine.low %v3227_v16, %v3234_v12 }
 0x92b   :  { %v3170_v33 = vcombine.high %v3168_v45, %v3168_v45  ;;  %v3184_v39 = vrot.slane %v3168_v45, %v15136_v13  ;;  %v3191_v32 = vrot.slane %v3169_v29, %v15136_v13  ;;  %v3199_v10 = vcombine.high %v3177_v28, %v3177_v28  ;;  %v14612_v45 = vld [vmem:[%s17432_s28 + $0x28] sm:$0xff]  }
 0x92c   :  { %v3266_v44 = vcombine.low %v3153_v62, %v3177_v28  ;;  %v3250_v27 = vcombine.low %v3241_v24, %v3248_v18  ;;  %v3216_v22 = vrot.slane %v3209_v55, %v15136_v13  ;;  %v3257_v7 = vrot.slane %v3249_v42, %v15136_v13 }
 0x92d   :  { %v3198_v56 = vrot.slane %v3170_v33, %v15136_v13  ;;  %v3200_v58 = vcombine.high %v3184_v39, %v3184_v39  ;;  %v3201_v5 = vcombine.high %v3191_v32, %v3191_v32  ;;  %v3267_v15 = vcombine.low %v3191_v32, %v3199_v10 }
 0x92e   :  { %v15698_v30 = vpop.f32.mrb[36].mxu0  ;;  %v3276_v50 = vrot.slane %v3266_v44, %v15136_v13  ;;  %v3264_v26 = vrot.slane %v3250_v27, %v15136_v13  ;;  %v14613_v44 = vld [vmem:[%s17389_s13 + $0x20] sm:$0xff]  }
 0x92f   :  { %v15702_v35 = vpop.f32.mrb[37].mxu0  ;;  %v3268_v31 = vcombine.low %v3201_v5, %v3184_v39  ;;  %v3269_v11 = vcombine.low %v3198_v56, %v3200_v58  ;;  %v3283_v54 = vrot.slane %v3267_v15, %v15136_v13  ;;  %v3202_v46 = vcombine.high %v3198_v56, %v3198_v56 }
 0x930   :  { %v14197_v8 = vpop.f32.mrb[38].mxu0  ;;  %v3265_v23 = vcombine.low %v3257_v7, %v3264_v26 }
 0x931   :  { %v15705_v21 = vpop.f32.mrb[39].mxu0  ;;  %v3290_v60 = vrot.slane %v3268_v31, %v15136_v13  ;;  %v3297_v19 = vrot.slane %v3269_v11, %v15136_v13  ;;  %v3298_v47 = vcombine.low %v3276_v50, %v3283_v54  ;;  %v3315_v6 = vcombine.low %v3202_v46, %v3216_v22 }
 0x933   :  { %v3299_v57 = vcombine.low %v3290_v60, %v3297_v19  ;;  %v3322_v37 = vrot.slane %v3315_v6, %v15136_v13  ;;  %v3306_v14 = vrot.slane %v3298_v47, %v15136_v13  ;;  %v14614_v47 = vld [vmem:[%s17389_s13 + $0x28] sm:$0xff]  }
 0x935   :  { %v3313_v38 = vrot.slane %v3299_v57, %v15136_v13  ;;  %v3329_v17 = vrot.slane %v3322_v37, %v15136_v13 }
 0x936   :  { %v14212_v43 = vpop.f32.mrb[40].mxu0 }
 0x937   :  { %v3706_v20 = vpop.f32.mrb[41].mxu0  ;;  %v3314_v41 = vcombine.low %v3306_v14, %v3313_v38  ;;  %v3715_v49 = vadd.f32 %v14212_v43, %v13541_v36  ;;  %v3334_v59 = vpack.c.bf16 %v3329_v17, %v3329_v17 }
 0x938   :  { %v3707_v40 = vadd.f32 %v13541_v36, %v3706_v20  ;;  %v14213_v61 = vpop.f32.mrb[42].mxu0 }
 0x939   :  { %v3709_v52 = vpop.f32.mrb[43].mxu0  ;;  %v3333_v25 = vpack.c.bf16 %v3314_v41, %v3265_v23  ;;  %v3827_v18 = vrot.slane %v3715_v49, %v15136_v13 }
 0x93a   :  { %v3723_v53 = vcombine.high %v3707_v40, %v3707_v40  ;;  %v3730_v48 = vrot.slane %v3707_v40, %v15136_v13  ;;  %v3710_v51 = vadd.f32 %v13541_v36, %v3709_v52 }
 0x93b   :  { %14188 = vmatprep.mubr.msk.bf16.mxu1 %vm1247_vm8, %v3333_v25  ;;  %v3828_v27 = vcombine.high %v3827_v18, %v3827_v18  ;;  %v3835_v26 = vrot.slane %v3827_v18, %v15136_v13 }
 0x93c   :  { %v3737_v29 = vrot.slane %v3723_v53, %v15136_v13  ;;  %v3738_v28 = vcombine.high %v3730_v48, %v3730_v48  ;;  %v3772_v24 = vcombine.high %v3710_v51, %v3710_v51  ;;  %v3779_v62 = vrot.slane %v3710_v51, %v15136_v13  ;;  %14189 = vmatmul.mubr.msk.bf16.vlgmr.msra.gmra.mrb[32].mxu1 %vm1247_vm8, %v3334_v59 }
 0x93d   :  { %v3746_v33 = vrot.slane %v3730_v48, %v15136_v13  ;;  %14199 = vmatpush3.bf16.msra.mxu1 %v15676_v9  ;;  %14202 = vmatprep.mubr.msk.bf16.mxu1 %vm129_vm2, %v15102_v3  ;;  %v3842_v17 = vrot.slane %v3828_v27, %v15136_v13 }
 0x93e   :  { %v3739_v55 = vcombine.high %v3737_v29, %v3737_v29  ;;  %v3760_v39 = vrot.slane %v3738_v28, %v15136_v13  ;;  %v3786_v32 = vrot.slane %v3772_v24, %v15136_v13  ;;  %v3753_v10 = vrot.slane %v3737_v29, %v15136_v13  ;;  %14200 = vmatprep.subr.bf16.mxu1 %v14612_v45 }
 0x93f   :  { %v3787_v16 = vcombine.high %v3779_v62, %v3779_v62  ;;  %v3795_v12 = vrot.slane %v3779_v62, %v15136_v13  ;;  %v4289_v25 = vrot.slane %v3842_v17, %v15136_v13 }
 0x940   :  { %v3767_v56 = vrot.slane %v3739_v55, %v15136_v13  ;;  %v4171_v58 = vcombine.low %v3746_v33, %v3760_v39  ;;  %v13558_v5 = vcombine.high %v3746_v33, %v3760_v39  ;;  %v3788_v15 = vcombine.high %v3786_v32, %v3786_v32 }
 0x941   :  { %v3802_v9 = vrot.slane %v3786_v32, %v15136_v13  ;;  %v3809_v50 = vrot.slane %v3787_v16, %v15136_v13  ;;  %v3817_v22 = vcombine.high %v3795_v12, %v3795_v12  ;;  %14201 = vmatpush3.bf16.msra.mxu1 %v14612_v45  ;;  %v4226_v14 = vrot.slane %v3795_v12, %v15136_v13 }
 0x942   :  { %v4173_v31 = vcombine.low %v3753_v10, %v3767_v56  ;;  %v13559_v11 = vcombine.high %v3753_v10, %v3767_v56  ;;  %v4181_v54 = vrot.slane %v4171_v58, %v15136_v13  ;;  %v4188_v46 = vrot.slane %v13558_v5, %v15136_v13  ;;  %14214 = vmatprep.subr.bf16.mxu1 %v14613_v44  ;;  %v13531_v58 = vld [vmem:[%s17436_s7 + $0x2] ss:$0 sm:$0xff] }
 0x943   :  { %v3816_v8 = vrot.slane %v3788_v15, %v15136_v13  ;;  %v3818_v42 = vcombine.high %v3802_v9, %v3802_v9  ;;  %v3819_v60 = vcombine.high %v3809_v50, %v3809_v50  ;;  %v4234_v19 = vcombine.low %v3809_v50, %v3817_v22 }
 0x944   :  { %v4195_v6 = vrot.slane %v4173_v31, %v15136_v13  ;;  %v4202_v57 = vrot.slane %v13559_v11, %v15136_v13  ;;  %v4203_v37 = vcombine.low %v4181_v54, %v4188_v46  ;;  %14203 = vmatmul.mubr.msk.bf16.vlgmr.msra.gmra.mrb[36].mxu1 %vm129_vm2, %v15106_v4  ;;  %v4233_v51 = vrot.slane %v4226_v14, %v15136_v13 }
 0x945   :  { %v3820_v36 = vcombine.high %v3816_v8, %v3816_v8  ;;  %v4235_v43 = vcombine.low %v3819_v60, %v3802_v9  ;;  %v4236_v7 = vcombine.low %v3816_v8, %v3818_v42  ;;  %14215 = vmatpush3.bf16.msra.mxu1 %v14613_v44  ;;  %14218 = vmatprep.mubr.msk.bf16.mxu1 %vm129_vm2, %v15102_v3 }
 0x946   :  { %v4204_v38 = vcombine.low %v4195_v6, %v4202_v57  ;;  %v4244_v40 = vrot.slane %v4234_v19, %v15136_v13  ;;  %14216 = vmatprep.subr.bf16.mxu1 %v14614_v47  ;;  %v4211_v23 = vrot.slane %v4203_v37, %v15136_v13  ;;  %v4296_v62 = vrot.slane %v4289_v25, %v15136_v13 }
 0x947   :  { %v4237_v20 = vcombine.low %v3820_v36, %v3835_v26  ;;  %v4251_v61 = vrot.slane %v4235_v43, %v15136_v13  ;;  %v4258_v49 = vrot.slane %v4236_v7, %v15136_v13 }
 0x948   :  { %v4218_v41 = vrot.slane %v4204_v38, %v15136_v13 }
 0x949   :  { %v4265_v52 = vrot.slane %v4237_v20, %v15136_v13  ;;  %v4266_v53 = vcombine.low %v4244_v40, %v4251_v61  ;;  %14217 = vmatpush3.bf16.msra.mxu1 %v14614_v47 }
 0x94a   :  { %v4219_v48 = vcombine.low %v4211_v23, %v4218_v41  ;;  %14228 = vmatprep.subr.bf16.mxu1 %v14870_v1 }
 0x94b   :  { %v4267_v59 = vcombine.low %v4258_v49, %v4265_v52  ;;  %v4274_v29 = vrot.slane %v4266_v53, %v15136_v13  ;;  %v13551_v49 = vld [vmem:[%s17390_s14 + $0x2] ss:$0 sm:$0xff] }
 0x94c   :  { %v4301_v45 = vpack.c.bf16 %v4233_v51, %v4219_v48  ;;  %14219 = vmatmul.mubr.msk.bf16.vlgmr.msra.gmra.mrb[40].mxu1 %vm129_vm2, %v15106_v4 }
 0x94d   :  { %v4281_v28 = vrot.slane %v4267_v59, %v15136_v13  ;;  %14230 = vmatprep.mubr.msk.bf16.mxu1 %vm14871_vm0, %v14870_v1 }
 0x94e   :  { %v4307_v24 = vsel %vm1247_vm8, %v4301_v45, 0 }
 0x94f   :  { %14223 = vmatpush3.bf16.xpose.msra.mxu0 %v4307_v24  ;;  %v4282_v18 = vcombine.low %v4274_v29, %v4281_v28 }
 0x950   :  { %14234 = vmatprep.subr.bf16.mxu0 %v14870_v1 }
 0x951   :  { %v4302_v55 = vpack.c.bf16 %v4296_v62, %v4282_v18 }
 0x953   :  { %v4354_v33 = vsel %vm1247_vm8, %v4302_v55, 0 }
 0x954   :  { %14229 = vmatpush3.bf16.xpose.msra.mxu1 %v4354_v33 }
 0x955   :  { %14240 = vmatprep.subr.bf16.mxu1 %v14870_v1 }
 0xa0f   :  { %v14190_v39 = vpop.f32.mrb[32].mxu1 }
 0xa10   :  { %v15777_v32 = vadd.f32 %v15698_v30, %v14190_v39  ;;  %v3380_v10 = vpop.f32.mrb[33].mxu1 }
 0xa11   :  { %v15780_v16 = vadd.f32 %v15702_v35, %v3380_v10  ;;  %v14191_v12 = vpop.f32.mrb[34].mxu1 }
 0xa12   :  { %v3383_v44 = vpop.f32.mrb[35].mxu1 }
 0xa13   :  { %v15783_v56 = vadd.f32 %v15705_v21, %v3383_v44 }
 0xa17   :  { %v14204_v5 = vpop.f32.mrb[36].mxu1 }
 0xa18   :  { %v3519_v15 = vadd.f32 %v14204_v5, %v13531_v58  ;;  %v3510_v27 = vpop.f32.mrb[37].mxu1 }
 0xa19   :  { %v3511_v9 = vadd.f32 %v13531_v58, %v3510_v27  ;;  %v14205_v50 = vpop.f32.mrb[38].mxu1 }
 0xa1a   :  { %v3631_v30 = vrot.slane %v3519_v15, %v15136_v13  ;;  %v3513_v22 = vpop.f32.mrb[39].mxu1 }
 0xa1b   :  { %v3527_v31 = vcombine.high %v3511_v9, %v3511_v9  ;;  %v3534_v35 = vrot.slane %v3511_v9, %v15136_v13  ;;  %v3514_v11 = vadd.f32 %v13531_v58, %v3513_v22 }
 0xa1c   :  { %v3632_v8 = vcombine.high %v3631_v30, %v3631_v30  ;;  %v3639_v33 = vrot.slane %v3631_v30, %v15136_v13 }
 0xa1d   :  { %v3541_v54 = vrot.slane %v3527_v31, %v15136_v13  ;;  %v3542_v21 = vcombine.high %v3534_v35, %v3534_v35  ;;  %v3576_v46 = vcombine.high %v3514_v11, %v3514_v11  ;;  %v3583_v42 = vrot.slane %v3514_v11, %v15136_v13 }
 0xa1e   :  { %v3550_v19 = vrot.slane %v3534_v35, %v15136_v13  ;;  %v15799_v40 = vrot.slane %v3632_v8, %v15136_v13 }
 0xa1f   :  { %v3543_v60 = vcombine.high %v3541_v54, %v3541_v54  ;;  %v3564_v47 = vrot.slane %v3542_v21, %v15136_v13  ;;  %v3590_v6 = vrot.slane %v3576_v46, %v15136_v13  ;;  %v14220_v57 = vpop.f32.mrb[40].mxu1  ;;  %v3557_v37 = vrot.slane %v3541_v54, %v15136_v13 }
 0xa20   :  { %v3591_v26 = vcombine.high %v3583_v42, %v3583_v42  ;;  %v3599_v36 = vrot.slane %v3583_v42, %v15136_v13  ;;  %v3902_v43 = vpop.f32.mrb[41].mxu1  ;;  %v3911_v55 = vadd.f32 %v14220_v57, %v13551_v49  ;;  %v4157_v12 = vrot.slane %v15799_v40, %v15136_v13 }
 0xa21   :  { %v3571_v7 = vrot.slane %v3543_v60, %v15136_v13  ;;  %v4039_v14 = vcombine.low %v3550_v19, %v3564_v47  ;;  %v13556_v38 = vcombine.high %v3550_v19, %v3564_v47  ;;  %v3592_v17 = vcombine.high %v3590_v6, %v3590_v6  ;;  %v14221_v20 = vpop.f32.mrb[42].mxu1 }
 0xa22   :  { %v3606_v61 = vrot.slane %v3590_v6, %v15136_v13  ;;  %v3613_v23 = vrot.slane %v3591_v26, %v15136_v13  ;;  %v3621_v41 = vcombine.high %v3599_v36, %v3599_v36  ;;  %v3905_v52 = vpop.f32.mrb[43].mxu1  ;;  %v4094_v28 = vrot.slane %v3599_v36, %v15136_v13 }
 0xa23   :  { %v4041_v53 = vcombine.low %v3557_v37, %v3571_v7  ;;  %v13557_v48 = vcombine.high %v3557_v37, %v3571_v7  ;;  %v4049_v51 = vrot.slane %v4039_v14, %v15136_v13  ;;  %v4056_v25 = vrot.slane %v13556_v38, %v15136_v13 }
 0xa24   :  { %v3620_v59 = vrot.slane %v3592_v17, %v15136_v13  ;;  %v3622_v45 = vcombine.high %v3606_v61, %v3606_v61  ;;  %v3623_v29 = vcombine.high %v3613_v23, %v3613_v23  ;;  %v4102_v58 = vcombine.low %v3613_v23, %v3621_v41 }
 0xa25   :  { %v4063_v24 = vrot.slane %v4041_v53, %v15136_v13  ;;  %v4070_v18 = vrot.slane %v13557_v48, %v15136_v13  ;;  %v4071_v62 = vcombine.low %v4049_v51, %v4056_v25  ;;  %v4101_v5 = vrot.slane %v4094_v28, %v15136_v13 }
 0xa26   :  { %v3624_v39 = vcombine.high %v3620_v59, %v3620_v59  ;;  %v4104_v10 = vcombine.low %v3620_v59, %v3622_v45  ;;  %v4103_v15 = vcombine.low %v3623_v29, %v3606_v61  ;;  %v3903_v9 = vadd.f32 %v13551_v49, %v3902_v43 }
 0xa27   :  { %v4072_v44 = vcombine.low %v4063_v24, %v4070_v18  ;;  %v4079_v50 = vrot.slane %v4071_v62, %v15136_v13  ;;  %v4023_v31 = vrot.slane %v3911_v55, %v15136_v13  ;;  %v3906_v35 = vadd.f32 %v13551_v49, %v3905_v52 }
 0xa28   :  { %v4105_v27 = vcombine.low %v3624_v39, %v3639_v33  ;;  %v4126_v30 = vrot.slane %v4104_v10, %v15136_v13  ;;  %v3919_v54 = vcombine.high %v3903_v9, %v3903_v9  ;;  %v3926_v21 = vrot.slane %v3903_v9, %v15136_v13 }
 0xa29   :  { %v4086_v22 = vrot.slane %v4072_v44, %v15136_v13  ;;  %v4112_v8 = vrot.slane %v4102_v58, %v15136_v13  ;;  %v3968_v42 = vcombine.high %v3906_v35, %v3906_v35  ;;  %v3975_v60 = vrot.slane %v3906_v35, %v15136_v13 }
 0xa2a   :  { %v4133_v11 = vrot.slane %v4105_v27, %v15136_v13  ;;  %v4119_v19 = vrot.slane %v4103_v15, %v15136_v13  ;;  %v3933_v6 = vrot.slane %v3919_v54, %v15136_v13  ;;  %v3934_v57 = vcombine.high %v3926_v21, %v3926_v21 }
 0xa2b   :  { %v4087_v46 = vcombine.low %v4079_v50, %v4086_v22  ;;  %v4024_v26 = vcombine.high %v4023_v31, %v4023_v31  ;;  %v4031_v36 = vrot.slane %v4023_v31, %v15136_v13  ;;  %v3982_v43 = vrot.slane %v3968_v42, %v15136_v13 }
 0xa2c   :  { %v4135_v47 = vcombine.low %v4126_v30, %v4133_v11  ;;  %v3935_v7 = vcombine.high %v3933_v6, %v3933_v6  ;;  %v3942_v14 = vrot.slane %v3926_v21, %v15136_v13  ;;  %v3956_v38 = vrot.slane %v3934_v57, %v15136_v13 }
 0xa2d   :  { %v4169_v37 = vpack.c.bf16 %v4101_v5, %v4087_v46  ;;  %v3983_v17 = vcombine.high %v3975_v60, %v3975_v60  ;;  %v3949_v20 = vrot.slane %v3933_v6, %v15136_v13  ;;  %v3984_v40 = vcombine.high %v3982_v43, %v3982_v43 }
 0xa2e   :  { %v3991_v61 = vrot.slane %v3975_v60, %v15136_v13  ;;  %v3998_v23 = vrot.slane %v3982_v43, %v15136_v13  ;;  %v3963_v41 = vrot.slane %v3935_v7, %v15136_v13  ;;  %v4443_v49 = vcombine.low %v3942_v14, %v3956_v38 }
 0xa2f   :  { %14225 = vmatmul.mubr.msk.bf16.vlgmr.msra.gmra.mrb[44].mxu0 %vm1247_vm8, %v4169_v37  ;;  %v13562_v52 = vcombine.high %v3942_v14, %v3956_v38  ;;  %v4005_v53 = vrot.slane %v3983_v17, %v15136_v13  ;;  %v4134_v48 = vcombine.low %v4112_v8, %v4119_v19  ;;  %v4012_v51 = vrot.slane %v3984_v40, %v15136_v13 }
 0xa30   :  { %14236 = vmatprep.mubr.msk.bf16.mxu0 %vm14871_vm0, %v14870_v1  ;;  %v4013_v25 = vcombine.high %v3991_v61, %v3991_v61  ;;  %v4014_v59 = vcombine.high %v3998_v23, %v3998_v23  ;;  %v4445_v45 = vcombine.low %v3949_v20, %v3963_v41  ;;  %v13563_v29 = vcombine.high %v3949_v20, %v3963_v41 }
 0xa31   :  { %v4453_v28 = vrot.slane %v4443_v49, %v15136_v13  ;;  %v4460_v24 = vrot.slane %v13562_v52, %v15136_v13  ;;  %v4038_v18 = vrot.slane %v4024_v26, %v15136_v13  ;;  %v4015_v62 = vcombine.high %v4005_v53, %v4005_v53 }
 0xa32   :  { %v4016_v55 = vcombine.high %v4012_v51, %v4012_v51  ;;  %v4506_v33 = vcombine.low %v4005_v53, %v4013_v25  ;;  %v4467_v39 = vrot.slane %v4445_v45, %v15136_v13  ;;  %v4474_v10 = vrot.slane %v13563_v29, %v15136_v13 }
 0xa33   :  { %v4475_v44 = vcombine.low %v4453_v28, %v4460_v24  ;;  %v4508_v58 = vcombine.low %v4012_v51, %v4014_v59  ;;  %v4142_v5 = vrot.slane %v4134_v48, %v15136_v13  ;;  %v4507_v15 = vcombine.low %v4015_v62, %v3998_v23 }
 0xa34   :  { %v4509_v27 = vcombine.low %v4016_v55, %v4031_v36  ;;  %v4149_v9 = vrot.slane %v4135_v47, %v15136_v13  ;;  %v4164_v50 = vrot.slane %v4157_v12, %v15136_v13  ;;  %v4476_v22 = vcombine.low %v4467_v39, %v4474_v10 }
 0xa35   :  { %v4498_v31 = vrot.slane %v3991_v61, %v15136_v13  ;;  %v4516_v35 = vrot.slane %v4506_v33, %v15136_v13  ;;  %v4523_v30 = vrot.slane %v4507_v15, %v15136_v13  ;;  %v4530_v11 = vrot.slane %v4508_v58, %v15136_v13 }
 0xa36   :  { %v4537_v54 = vrot.slane %v4509_v27, %v15136_v13  ;;  %v4150_v21 = vcombine.low %v4142_v5, %v4149_v9  ;;  %v4483_v46 = vrot.slane %v4475_v44, %v15136_v13  ;;  %v4490_v8 = vrot.slane %v4476_v22, %v15136_v13 }
 0xa37   :  { %v4561_v42 = vrot.slane %v4038_v18, %v15136_v13  ;;  %v4538_v60 = vcombine.low %v4516_v35, %v4523_v30  ;;  %v4505_v47 = vrot.slane %v4498_v31, %v15136_v13  ;;  %v14615_v35 = vld [vmem:[%s17432_s28 + $0x30] sm:$0xff]  }
 0xa38   :  { %v4539_v12 = vcombine.low %v4530_v11, %v4537_v54  ;;  %v4170_v19 = vpack.c.bf16 %v4164_v50, %v4150_v21  ;;  %v4491_v6 = vcombine.low %v4483_v46, %v4490_v8 }
 0xa39   :  { %v4546_v57 = vrot.slane %v4538_v60, %v15136_v13  ;;  %v4568_v36 = vrot.slane %v4561_v42, %v15136_v13 }
 0xa3a   :  { %14231 = vmatmul.mubr.msk.bf16.vlgmr.msra.gmra.mrb[44].mxu1 %vm1247_vm8, %v4170_v19  ;;  %v4553_v37 = vrot.slane %v4539_v12, %v15136_v13  ;;  %v4573_v26 = vpack.c.bf16 %v4505_v47, %v4491_v6 }
 0xa3b   :  { %14242 = vmatprep.mubr.msk.bf16.mxu1 %vm14871_vm0, %v14870_v1 }
 0xa3c   :  { %v4554_v43 = vcombine.low %v4546_v57, %v4553_v37  ;;  %v4579_v7 = vand.u32 %v4573_v26, %v15251_v34  ;;  %v14616_v26 = vld [vmem:[%s17432_s28 + $0x38] sm:$0xff]  }
 0xa3e   :  { %v4574_v14 = vpack.c.bf16 %v4568_v36, %v4554_v43  ;;  %14235 = vmatpush3.bf16.msra.mxu0 %v4579_v7  ;;  %v14617_v36 = vld [vmem:[%s17389_s13 + $0x30] sm:$0xff]   ;;  %v14618_v43 = vld [vmem:[%s17389_s13 + $0x38] sm:$0xff]   ;;  %v13568_v7 = vld [vmem:[%s17391_s15 + $0x8] sm:$0xf] }
 0xa3f   :  { %14572 = vmatprep.subr.msk.bf16.mxu0 %vm1525_vm6, %v13568_v7 }
 0xa40   :  { %v4626_v38 = vand.u32 %v4574_v14, %v15251_v34  ;;  %v4926_v14 = vsel %vm1525_vm6, %v13568_v7, 0 }
 0xa42   :  { %14241 = vmatpush3.bf16.msra.mxu1 %v4626_v38  ;;  %v15905_v38 = vld [vmem:[%s17433_s29 + $0x30] sm:$0xff]  }
 0xa43   :  { %14252 = vmatprep.subr.bf16.mxu1 %v14615_v35 }
 0xb02   :  { %v4343_v17 = vpop.f32.mrb[44].mxu0 }
 0xb03   :  { %v14226_v20 = vpop.f32.mrb[45].mxu0  ;;  %v4397_v40 = vsel %vm1342_vm9, %v4343_v17, -inf }
 0xb04   :  { %4398 = vmax.xlane.f32.xlu0 %v4397_v40  ;;  %v4346_v61 = vpop.f32.mrb[46].mxu0 }
 0xb05   :  { %v14227_v23 = vpop.f32.mrb[47].mxu0  ;;  %v4400_v41 = vsel %vm1346_vm10, %v4346_v61, -inf }
 0xb06   :  { %4401 = vmax.xlane.f32.xlu1 %v4400_v41 }
 0xb0d   :  { %v4390_v49 = vpop.f32.mrb[44].mxu1 }
 0xb0e   :  { %v14232_v52 = vpop.f32.mrb[45].mxu1  ;;  %v4403_v53 = vsel %vm1342_vm9, %v4390_v49, -inf }
 0xb0f   :  { %v4393_v48 = vpop.f32.mrb[46].mxu1  ;;  %4404 = vmax.xlane.f32.xlu0 %v4403_v53 }
 0xb10   :  { %v14233_v51 = vpop.f32.mrb[47].mxu1  ;;  %v4406_v25 = vsel %vm1346_vm10, %v4393_v48, -inf }
 0xb11   :  { %4407 = vmax.xlane.f32.xlu1 %v4406_v25 }
 0xb91   :  { %v4399_v59 = vpop.xlane.xlu0 %4398 }
 0xb92   :  { %v4409_v45 = vsub.f32 %v4343_v17, %v4399_v59 }
 0xb93   :  { %v4402_v29 = vpop.xlane.xlu1 %4401 }
 0xb94   :  { %v4413_v28 = vmul.f32 1.442695, %v4409_v45  ;;  %v4410_v24 = vsub.f32 %v4346_v61, %v4402_v29 }
 0xb96   :  { %14699 = vpow2.f32 %v4413_v28  ;;  %v4415_v18 = vmul.f32 1.442695, %v4410_v24 }
 0xb98   :  { %14701 = vpow2.f32 %v4415_v18 }
 0xb9c   :  { %v4405_v62 = vpop.xlane.xlu0 %4404 }
 0xb9d   :  { %v4411_v55 = vsub.f32 %v4390_v49, %v4405_v62 }
 0xb9e   :  { %v4408_v33 = vpop.xlane.xlu1 %4407 }
 0xb9f   :  { %v4417_v10 = vmul.f32 1.442695, %v4411_v55  ;;  %v4412_v44 = vsub.f32 %v4393_v48, %v4408_v33 }
 0xba0   :  { %v14700_v39 = vpop.eup %14699 }
 0xba1   :  { %v4421_v58 = vsel %vm1342_vm9, %v14700_v39, 0.0  ;;  %14703 = vpow2.f32 %v4417_v10  ;;  %v4419_v15 = vmul.f32 1.442695, %v4412_v44 }
 0xba2   :  { %v14702_v5 = vpop.eup %14701  ;;  %4422 = vadd.xlane.f32.xlu0 %v4421_v58 }
 0xba3   :  { %v4424_v27 = vsel %vm1346_vm10, %v14702_v5, 0.0  ;;  %14705 = vpow2.f32 %v4419_v15 }
 0xba4   :  { %4425 = vadd.xlane.f32.xlu1 %v4424_v27 }
 0xbab   :  { %v14704_v9 = vpop.eup %14703 }
 0xbac   :  { %v4427_v50 = vsel %vm1342_vm9, %v14704_v9, 0.0 }
 0xbad   :  { %v14706_v22 = vpop.eup %14705  ;;  %4428 = vadd.xlane.f32.xlu0 %v4427_v50 }
 0xbae   :  { %v4430_v31 = vsel %vm1346_vm10, %v14706_v22, 0.0 }
 0xbaf   :  { %4431 = vadd.xlane.f32.xlu1 %v4430_v31 }
 0xc2f   :  { %v4423_v30 = vpop.xlane.xlu0 %4422 }
 0xc30   :  { %14707 = vrcp.f32 %v4423_v30 }
 0xc31   :  { %v4426_v11 = vpop.xlane.xlu1 %4425 }
 0xc32   :  { %14709 = vrcp.f32 %v4426_v11 }
 0xc3a   :  { %v14708_v54 = vpop.eup %14707  ;;  %v4429_v21 = vpop.xlane.xlu0 %4428 }
 0xc3b   :  { %14711 = vrcp.f32 %v4429_v21  ;;  %v4437_v8 = vmul.f32 %v14708_v54, %v14700_v39 }
 0xc3c   :  { %v14710_v46 = vpop.eup %14709  ;;  %v4432_v60 = vpop.xlane.xlu1 %4431 }
 0xc3d   :  { %v4438_v42 = vmul.f32 %v14710_v46, %v14702_v5  ;;  %14713 = vrcp.f32 %v4432_v60 }
 0xc3f   :  { %v4441_v12 = vpack.c.bf16 %v4438_v42, %v4437_v8 }
 0xc41   :  { %14237 = vmatmul.mubr.msk.bf16.vlgmr.msra.gmra.mrb[48].mxu0 %vm1342_vm9, %v4441_v12 }
 0xc42   :  { %14247 = vmatpush3.bf16.msra.mxu0 %v4926_v14 }
 0xc43   :  { %14260 = vmatprep.subr.bf16.mxu0 %v15905_v38 }
 0xc45   :  { %v14712_v19 = vpop.eup %14711 }
 0xc46   :  { %v4439_v6 = vmul.f32 %v14712_v19, %v14704_v9 }
 0xc47   :  { %v14714_v47 = vpop.eup %14713 }
 0xc48   :  { %v4440_v57 = vmul.f32 %v14714_v47, %v14706_v22  ;;  %v13576_v47 = vld [vmem:[%s17436_s7 + $0x3] ss:$0 sm:$0xff] }
 0xc4a   :  { %v4442_v37 = vpack.c.bf16 %v4440_v57, %v4439_v6 }
 0xc4c   :  { %14243 = vmatmul.mubr.msk.bf16.vlgmr.msra.gmra.mrb[48].mxu1 %vm1342_vm9, %v4442_v37 }
 0xc4d   :  { %14253 = vmatpush3.bf16.msra.mxu1 %v14615_v35  ;;  %14256 = vmatprep.mubr.msk.bf16.mxu1 %vm129_vm2, %v15102_v3 }
 0xc4e   :  { %14254 = vmatprep.subr.bf16.mxu1 %v14616_v26 }
 0xc51   :  { %14255 = vmatpush3.bf16.msra.mxu1 %v14616_v26 }
 0xc52   :  { %14268 = vmatprep.subr.bf16.mxu1 %v14617_v36 }
 0xc54   :  { %14257 = vmatmul.mubr.msk.bf16.vlgmr.msra.gmra.mrb[52].mxu1 %vm129_vm2, %v15106_v4 }
 0xc55   :  { %14269 = vmatpush3.bf16.msra.mxu1 %v14617_v36  ;;  %14272 = vmatprep.mubr.msk.bf16.mxu1 %vm129_vm2, %v15102_v3 }
 0xc56   :  { %14270 = vmatprep.subr.bf16.mxu1 %v14618_v43 }
 0xc59   :  { %14271 = vmatpush3.bf16.msra.mxu1 %v14618_v43 }
 0xc5a   :  { %14282 = vmatprep.subr.bf16.mxu1 %v14870_v1 }
 0xc5c   :  { %14273 = vmatmul.mubr.msk.bf16.vlgmr.msra.gmra.mrb[56].mxu1 %vm129_vm2, %v15106_v4 }
 0xc5d   :  { %14284 = vmatprep.mubr.msk.bf16.mxu1 %vm14871_vm0, %v14870_v1 }
 0xd14   :  { %v4615_v17 = vpop.f32.mrb[48].mxu0 }
 0xd15   :  { %v4673_v20 = vcombine.high %v4615_v17, %v4615_v17  ;;  %v4680_v40 = vrot.slane %v4615_v17, %v15136_v13  ;;  %v14238_v61 = vpop.f32.mrb[49].mxu0 }
 0xd16   :  { %v4618_v23 = vpop.f32.mrb[50].mxu0 }
 0xd17   :  { %v4687_v41 = vrot.slane %v4673_v20, %v15136_v13  ;;  %v14239_v49 = vpop.f32.mrb[51].mxu0  ;;  %v4688_v52 = vcombine.high %v4680_v40, %v4680_v40  ;;  %v4696_v59 = vrot.slane %v4680_v40, %v15136_v13  ;;  %v4728_v18 = vrot.slane %v4618_v23, %v15136_v13 }
 0xd19   :  { %v4689_v53 = vcombine.high %v4687_v41, %v4687_v41  ;;  %v4703_v51 = vrot.slane %v4687_v41, %v15136_v13  ;;  %v4710_v25 = vrot.slane %v4688_v52, %v15136_v13  ;;  %v4735_v31 = vrot.slane %v4728_v18, %v15136_v13 }
 0xd1b   :  { %v4717_v48 = vrot.slane %v4689_v53, %v15136_v13  ;;  %v4799_v28 = vcombine.low %v4696_v59, %v4710_v25  ;;  %v13566_v24 = vcombine.high %v4696_v59, %v4710_v25 }
 0xd1d   :  { %v4801_v45 = vcombine.low %v4703_v51, %v4717_v48  ;;  %v13567_v29 = vcombine.high %v4703_v51, %v4717_v48  ;;  %v4809_v50 = vrot.slane %v4799_v28, %v15136_v13  ;;  %v4816_v22 = vrot.slane %v13566_v24, %v15136_v13 }
 0xd1f   :  { %v4662_v62 = vpop.f32.mrb[48].mxu1  ;;  %v4823_v10 = vrot.slane %v4801_v45, %v15136_v13  ;;  %v4830_v44 = vrot.slane %v13567_v29, %v15136_v13  ;;  %v4831_v6 = vcombine.low %v4809_v50, %v4816_v22 }
 0xd20   :  { %v4736_v55 = vcombine.high %v4662_v62, %v4662_v62  ;;  %v4743_v33 = vrot.slane %v4662_v62, %v15136_v13  ;;  %v14244_v39 = vpop.f32.mrb[49].mxu1 }
 0xd21   :  { %v4665_v58 = vpop.f32.mrb[50].mxu1  ;;  %v4832_v46 = vcombine.low %v4823_v10, %v4830_v44  ;;  %v15942_v45 = vrot.slane %v4831_v6, %v15136_v13 }
 0xd22   :  { %v4750_v5 = vrot.slane %v4736_v55, %v15136_v13  ;;  %v4751_v15 = vcombine.high %v4743_v33, %v4743_v33  ;;  %v4759_v27 = vrot.slane %v4743_v33, %v15136_v13  ;;  %v14245_v9 = vpop.f32.mrb[51].mxu1  ;;  %v4791_v35 = vrot.slane %v4665_v58, %v15136_v13 }
 0xd23   :  { %v15934_v23 = vrot.slane %v4832_v46, %v15136_v13 }
 0xd24   :  { %v4752_v30 = vcombine.high %v4750_v5, %v4750_v5  ;;  %v4766_v11 = vrot.slane %v4750_v5, %v15136_v13  ;;  %v4773_v54 = vrot.slane %v4751_v15, %v15136_v13  ;;  %v4781_v21 = vcombine.high %v4759_v27, %v4759_v27 }
 0xd25   :  { %v4848_v8 = vcombine.low %v4735_v31, %v4759_v27  ;;  %v4798_v37 = vrot.slane %v4791_v35, %v15136_v13  ;;  %v4847_v18 = vcombine.low %v15942_v45, %v15934_v23 }
 0xd26   :  { %v4780_v42 = vrot.slane %v4752_v30, %v15136_v13  ;;  %v4782_v60 = vcombine.high %v4766_v11, %v4766_v11  ;;  %v4783_v12 = vcombine.high %v4773_v54, %v4773_v54  ;;  %v4849_v19 = vcombine.low %v4773_v54, %v4781_v21 }
 0xd27   :  { %v4858_v57 = vrot.slane %v4848_v8, %v15136_v13  ;;  %v14258_v26 = vpop.f32.mrb[52].mxu1 }
 0xd28   :  { %v4850_v36 = vcombine.low %v4783_v12, %v4766_v11  ;;  %v4851_v43 = vcombine.low %v4780_v42, %v4782_v60  ;;  %v4865_v7 = vrot.slane %v4849_v19, %v15136_v13  ;;  %v4784_v14 = vcombine.high %v4780_v42, %v4780_v42  ;;  %v5038_v17 = vpop.f32.mrb[53].mxu1 }
 0xd29   :  { %v5047_v20 = vadd.f32 %v14258_v26, %v13576_v47  ;;  %v5039_v40 = vadd.f32 %v13576_v47, %v5038_v17  ;;  %v14259_v61 = vpop.f32.mrb[54].mxu1 }
 0xd2a   :  { %v4872_v41 = vrot.slane %v4850_v36, %v15136_v13  ;;  %v4879_v49 = vrot.slane %v4851_v43, %v15136_v13  ;;  %v15938_v52 = vcombine.low %v4858_v57, %v4865_v7  ;;  %v4897_v53 = vcombine.low %v4784_v14, %v4798_v37  ;;  %v5041_v48 = vpop.f32.mrb[55].mxu1  ;;  %v13596_v7 = vld [vmem:[%s17390_s14 + $0x3] ss:$0 sm:$0xff] }
 0xd2b   :  { %v5055_v51 = vcombine.high %v5039_v40, %v5039_v40  ;;  %v5062_v25 = vrot.slane %v5039_v40, %v15136_v13  ;;  %v5042_v59 = vadd.f32 %v13576_v47, %v5041_v48  ;;  %v5159_v29 = vrot.slane %v5047_v20, %v15136_v13 }
 0xd2c   :  { %v15948_v62 = vcombine.low %v4872_v41, %v4879_v49  ;;  %v4904_v55 = vrot.slane %v4897_v53, %v15136_v13  ;;  %v4888_v15 = vrot.slane %v15938_v52, %v15136_v13 }
 0xd2d   :  { %v5069_v28 = vrot.slane %v5055_v51, %v15136_v13  ;;  %v5070_v24 = vcombine.high %v5062_v25, %v5062_v25  ;;  %v5104_v33 = vcombine.high %v5042_v59, %v5042_v59  ;;  %v5111_v39 = vrot.slane %v5042_v59, %v15136_v13 }
 0xd2e   :  { %v5078_v44 = vrot.slane %v5062_v25, %v15136_v13  ;;  %v5160_v27 = vcombine.high %v5159_v29, %v5159_v29  ;;  %v5167_v19 = vrot.slane %v5159_v29, %v15136_v13  ;;  %v15970_v14 = vrot.slane %v4904_v55, %v15136_v13 }
 0xd2f   :  { %v5071_v10 = vcombine.high %v5069_v28, %v5069_v28  ;;  %v5092_v58 = vrot.slane %v5070_v24, %v15136_v13  ;;  %v14274_v5 = vpop.f32.mrb[56].mxu1  ;;  %v5118_v9 = vrot.slane %v5104_v33, %v15136_v13  ;;  %v5119_v50 = vcombine.high %v5111_v39, %v5111_v39 }
 0xd30   :  { %v5127_v22 = vrot.slane %v5111_v39, %v15136_v13  ;;  %v5430_v31 = vpop.f32.mrb[57].mxu1  ;;  %v5085_v35 = vrot.slane %v5069_v28, %v15136_v13  ;;  %v15975_v48 = vrot.slane %v5160_v27, %v15136_v13  ;;  %v5439_v59 = vadd.f32 %v14274_v5, %v13596_v7 }
 0xd31   :  { %v5099_v30 = vrot.slane %v5071_v10, %v15136_v13  ;;  %v5567_v11 = vcombine.low %v5078_v44, %v5092_v58  ;;  %v13601_v54 = vcombine.high %v5078_v44, %v5092_v58  ;;  %v14275_v21 = vpop.f32.mrb[58].mxu1  ;;  %v5120_v46 = vcombine.high %v5118_v9, %v5118_v9 }
 0xd32   :  { %v5134_v8 = vrot.slane %v5118_v9, %v15136_v13  ;;  %v5141_v42 = vrot.slane %v5119_v50, %v15136_v13  ;;  %v5149_v60 = vcombine.high %v5127_v22, %v5127_v22  ;;  %v5433_v12 = vpop.f32.mrb[59].mxu1  ;;  %v5622_v25 = vrot.slane %v5127_v22, %v15136_v13 }
 0xd33   :  { %v5569_v47 = vcombine.low %v5085_v35, %v5099_v30  ;;  %v13602_v6 = vcombine.high %v5085_v35, %v5099_v30  ;;  %v5577_v57 = vrot.slane %v5567_v11, %v15136_v13  ;;  %v5584_v37 = vrot.slane %v13601_v54, %v15136_v13 }
 0xd34   :  { %v5148_v26 = vrot.slane %v5120_v46, %v15136_v13  ;;  %v5150_v36 = vcombine.high %v5134_v8, %v5134_v8  ;;  %v5151_v43 = vcombine.high %v5141_v42, %v5141_v42  ;;  %v5630_v40 = vcombine.low %v5141_v42, %v5149_v60 }
 0xd35   :  { %v5591_v17 = vrot.slane %v5569_v47, %v15136_v13  ;;  %v5598_v20 = vrot.slane %v13602_v6, %v15136_v13  ;;  %v5599_v61 = vcombine.low %v5577_v57, %v5584_v37  ;;  %v5551_v39 = vrot.slane %v5439_v59, %v15136_v13  ;;  %v14620_v59 = vld [vmem:[%s17433_s29 + $0x38] sm:$0xff]  }
 0xd36   :  { %v5152_v41 = vcombine.high %v5148_v26, %v5148_v26  ;;  %v5631_v49 = vcombine.low %v5151_v43, %v5134_v8  ;;  %v5632_v53 = vcombine.low %v5148_v26, %v5150_v36  ;;  %v5640_v24 = vrot.slane %v5630_v40, %v15136_v13 }
 0xd37   :  { %v5600_v51 = vcombine.low %v5591_v17, %v5598_v20  ;;  %v5607_v29 = vrot.slane %v5599_v61, %v15136_v13  ;;  %v5431_v10 = vadd.f32 %v13596_v7, %v5430_v31  ;;  %v5434_v44 = vadd.f32 %v13596_v7, %v5433_v12 }
 0xd38   :  { %v5633_v28 = vcombine.low %v5152_v41, %v5167_v19  ;;  %v5647_v55 = vrot.slane %v5631_v49, %v15136_v13  ;;  %v4916_v58 = vpack.c.bf16 %v15970_v14, %v15970_v14  ;;  %v5654_v27 = vrot.slane %v5632_v53, %v15136_v13 }
 0xd39   :  { %v5614_v33 = vrot.slane %v5600_v51, %v15136_v13  ;;  %v4895_v9 = vrot.slane %v15948_v62, %v15136_v13  ;;  %v5629_v22 = vrot.slane %v5622_v25, %v15136_v13  ;;  %v5447_v30 = vcombine.high %v5431_v10, %v5431_v10 }
 0xd3a   :  { %v5661_v5 = vrot.slane %v5633_v28, %v15136_v13  ;;  %v15990_v35 = vcombine.low %v5640_v24, %v5647_v55  ;;  %v5685_v31 = vrot.slane %v15975_v48, %v15136_v13  ;;  %v5454_v54 = vrot.slane %v5431_v10, %v15136_v13 }
 0xd3b   :  { %v5615_v50 = vcombine.low %v5607_v29, %v5614_v33  ;;  %v5496_v21 = vcombine.high %v5434_v44, %v5434_v44  ;;  %v5552_v8 = vcombine.high %v5551_v39, %v5551_v39  ;;  %v5461_v42 = vrot.slane %v5447_v30, %v15136_v13 }
 0xd3c   :  { %v5663_v11 = vcombine.low %v5654_v27, %v5661_v5  ;;  %v5503_v62 = vrot.slane %v5434_v44, %v15136_v13  ;;  %v5559_v60 = vrot.slane %v5551_v39, %v15136_v13  ;;  %v5462_v12 = vcombine.high %v5454_v54, %v5454_v54 }
 0xd3d   :  { %v15995_v46 = vpack.c.bf16 %v5629_v22, %v5615_v50  ;;  %v5510_v19 = vrot.slane %v5496_v21, %v15136_v13  ;;  %v4896_v47 = vcombine.low %v4888_v15, %v4895_v9  ;;  %v5670_v6 = vrot.slane %v15990_v35, %v15136_v13 }
 0xd3e   :  { %v5463_v57 = vcombine.high %v5461_v42, %v5461_v42  ;;  %v5470_v37 = vrot.slane %v5454_v54, %v15136_v13  ;;  %v5511_v26 = vcombine.high %v5503_v62, %v5503_v62  ;;  %v5484_v36 = vrot.slane %v5462_v12, %v15136_v13 }
 0xd3f   :  { %v5512_v43 = vcombine.high %v5510_v19, %v5510_v19  ;;  %v5519_v7 = vrot.slane %v5503_v62, %v15136_v13  ;;  %v5526_v14 = vrot.slane %v5510_v19, %v15136_v13  ;;  %v5477_v17 = vrot.slane %v5461_v42, %v15136_v13 }
 0xd40   :  { %v5491_v20 = vrot.slane %v5463_v57, %v15136_v13  ;;  %v5533_v52 = vrot.slane %v5511_v26, %v15136_v13  ;;  %v4915_v15 = vpack.c.bf16 %v4896_v47, %v4847_v18  ;;  %v5971_v40 = vcombine.low %v5470_v37, %v5484_v36 }
 0xd41   :  { %v13607_v61 = vcombine.high %v5470_v37, %v5484_v36  ;;  %v5540_v41 = vrot.slane %v5512_v43, %v15136_v13  ;;  %v5541_v49 = vcombine.high %v5519_v7, %v5519_v7  ;;  %v5542_v51 = vcombine.high %v5526_v14, %v5526_v14 }
 0xd42   :  { %v5973_v53 = vcombine.low %v5477_v17, %v5491_v20  ;;  %v13608_v48 = vcombine.high %v5477_v17, %v5491_v20  ;;  %v5543_v25 = vcombine.high %v5533_v52, %v5533_v52  ;;  %14248 = vmatprep.mubr.msk.bf16.mxu0 %vm1247_vm8, %v4915_v15  ;;  %v5566_v29 = vrot.slane %v5552_v8, %v15136_v13  ;;  %v13586_v17 = vld [vmem:[%s17388_s12 + $0x3] ss:$0 sm:$0xff] }
 0xd43   :  { %v5981_v23 = vrot.slane %v5971_v40, %v15136_v13  ;;  %v5988_v45 = vrot.slane %v13607_v61, %v15136_v13  ;;  %v5544_v18 = vcombine.high %v5540_v41, %v5540_v41  ;;  %14249 = vmatmul.mubr.msk.bf16.vlgmr.msra.gmra.mrb[52].mxu0 %vm1247_vm8, %v4916_v58  ;;  %v6034_v55 = vcombine.low %v5533_v52, %v5541_v49 }
 0xd44   :  { %v5995_v28 = vrot.slane %v5973_v53, %v15136_v13  ;;  %v6002_v24 = vrot.slane %v13608_v48, %v15136_v13  ;;  %v6035_v33 = vcombine.low %v5543_v25, %v5526_v14  ;;  %14261 = vmatpush3.bf16.msra.mxu0 %v15905_v38  ;;  %v6026_v10 = vrot.slane %v5519_v7, %v15136_v13 }
 0xd45   :  { %v6003_v39 = vcombine.low %v5981_v23, %v5988_v45  ;;  %v6036_v44 = vcombine.low %v5540_v41, %v5542_v51  ;;  %v6037_v27 = vcombine.low %v5544_v18, %v5559_v60  ;;  %14264 = vmatprep.mubr.msk.bf16.mxu0 %vm129_vm2, %v15102_v3  ;;  %v6044_v9 = vrot.slane %v6034_v55, %v15136_v13 }
 0xd46   :  { %v6004_v5 = vcombine.low %v5995_v28, %v6002_v24  ;;  %v6051_v58 = vrot.slane %v6035_v33, %v15136_v13  ;;  %14262 = vmatprep.subr.bf16.mxu0 %v14620_v59  ;;  %v5677_v50 = vrot.slane %v5663_v11, %v15136_v13  ;;  %v16035_v22 = vrot.slane %v5685_v31, %v15136_v13 }
 0xd47   :  { %v6058_v38 = vrot.slane %v6036_v44, %v15136_v13  ;;  %v6065_v35 = vrot.slane %v6037_v27, %v15136_v13  ;;  %v6011_v30 = vrot.slane %v6003_v39, %v15136_v13  ;;  %v6089_v8 = vrot.slane %v5566_v29, %v15136_v13 }
 0xd48   :  { %v6066_v54 = vcombine.low %v6044_v9, %v6051_v58  ;;  %14263 = vmatpush3.bf16.msra.mxu0 %v14620_v59  ;;  %v6018_v3 = vrot.slane %v6004_v5, %v15136_v13  ;;  %v16041_v21 = vcombine.low %v5670_v6, %v5677_v50  ;;  %v6033_v31 = vrot.slane %v6026_v10, %v15136_v13 }
 0xd49   :  { %v6067_v42 = vcombine.low %v6058_v38, %v6065_v35  ;;  %14276 = vmatprep.subr.bf16.mxu0 %v14870_v1  ;;  %v16057_v47 = vrot.slane %v6089_v8, %v15136_v13 }
 0xd4a   :  { %v6019_v11 = vcombine.low %v6011_v30, %v6018_v3  ;;  %v5698_v62 = vpack.c.bf16 %v16035_v22, %v16041_v21  ;;  %v6074_v60 = vrot.slane %v6066_v54, %v15136_v13 }
 0xd4b   :  { %14265 = vmatmul.mubr.msk.bf16.vlgmr.msra.gmra.mrb[56].mxu0 %vm129_vm2, %v15106_v4  ;;  %v6081_v12 = vrot.slane %v6067_v42, %v15136_v13 }
 0xd4c   :  { %14278 = vmatprep.mubr.msk.bf16.mxu0 %vm14871_vm0, %v14870_v1  ;;  %v16054_v19 = vpack.c.bf16 %v6033_v31, %v6019_v11 }
 0xd4d   :  { %v16059_v6 = vcombine.low %v6074_v60, %v6081_v12 }
 0xd4f   :  { %v6102_v57 = vpack.c.bf16 %v16057_v47, %v16059_v6 }
 0xe16   :  { %v14250_v37 = vpop.f32.mrb[52].mxu0 }
 0xe17   :  { %v16064_v4 = vadd.f32 %v14250_v37, %v15777_v32  ;;  %v4962_v26 = vpop.f32.mrb[53].mxu0 }
 0xe18   :  { %v16067_v36 = vadd.f32 %v4962_v26, %v15780_v16  ;;  %v14251_v43 = vpop.f32.mrb[54].mxu0 }
 0xe19   :  { %v4965_v7 = vpop.f32.mrb[55].mxu0 }
 0xe1a   :  { %v16070_v14 = vadd.f32 %v4965_v7, %v15783_v56 }
 0xe1e   :  { %v14266_v20 = vpop.f32.mrb[56].mxu0 }
 0xe1f   :  { %v5234_v52 = vpop.f32.mrb[57].mxu0  ;;  %v5243_v61 = vadd.f32 %v14266_v20, %v13586_v17 }
 0xe20   :  { %v5235_v15 = vadd.f32 %v13586_v17, %v5234_v52  ;;  %v14267_v40 = vpop.f32.mrb[58].mxu0 }
 0xe21   :  { %v5237_v32 = vpop.f32.mrb[59].mxu0  ;;  %v5355_v56 = vrot.slane %v5243_v61, %v15136_v13 }
 0xe22   :  { %v5251_v41 = vcombine.high %v5235_v15, %v5235_v15  ;;  %v5258_v49 = vrot.slane %v5235_v15, %v15136_v13  ;;  %v5238_v16 = vadd.f32 %v13586_v17, %v5237_v32 }
 0xe23   :  { %v5356_v44 = vcombine.high %v5355_v56, %v5355_v56  ;;  %v5363_v60 = vrot.slane %v5355_v56, %v15136_v13 }
 0xe24   :  { %v5265_v53 = vrot.slane %v5251_v41, %v15136_v13  ;;  %v5266_v48 = vcombine.high %v5258_v49, %v5258_v49  ;;  %v5300_v51 = vcombine.high %v5238_v16, %v5238_v16  ;;  %v5307_v25 = vrot.slane %v5238_v16, %v15136_v13 }
 0xe25   :  { %v5274_v29 = vrot.slane %v5258_v49, %v15136_v13  ;;  %v5370_v17 = vrot.slane %v5356_v44, %v15136_v13 }
 0xe26   :  { %v5267_v59 = vcombine.high %v5265_v53, %v5265_v53  ;;  %v5288_v23 = vrot.slane %v5266_v48, %v15136_v13  ;;  %v5314_v45 = vrot.slane %v5300_v51, %v15136_v13  ;;  %v5281_v18 = vrot.slane %v5265_v53, %v15136_v13 }
 0xe27   :  { %v5315_v28 = vcombine.high %v5307_v25, %v5307_v25  ;;  %v5323_v24 = vrot.slane %v5307_v25, %v15136_v13  ;;  %v5817_v48 = vrot.slane %v5370_v17, %v15136_v13 }
 0xe28   :  { %v5295_v55 = vrot.slane %v5267_v59, %v15136_v13  ;;  %v5699_v33 = vcombine.low %v5274_v29, %v5288_v23  ;;  %v13603_v39 = vcombine.high %v5274_v29, %v5288_v23  ;;  %v5316_v10 = vcombine.high %v5314_v45, %v5314_v45 }
 0xe29   :  { %v5330_v27 = vrot.slane %v5314_v45, %v15136_v13  ;;  %v5337_v5 = vrot.slane %v5315_v28, %v15136_v13  ;;  %v5345_v9 = vcombine.high %v5323_v24, %v5323_v24  ;;  %v5754_v43 = vrot.slane %v5323_v24, %v15136_v13 }
 0xe2a   :  { %v5701_v58 = vcombine.low %v5281_v18, %v5295_v55  ;;  %v13604_v50 = vcombine.high %v5281_v18, %v5295_v55  ;;  %v5709_v38 = vrot.slane %v5699_v33, %v15136_v13  ;;  %v5716_v35 = vrot.slane %v13603_v39, %v15136_v13 }
 0xe2b   :  { %v5344_v30 = vrot.slane %v5316_v10, %v15136_v13  ;;  %v5346_v54 = vcombine.high %v5330_v27, %v5330_v27  ;;  %v5347_v3 = vcombine.high %v5337_v5, %v5337_v5  ;;  %v5762_v8 = vcombine.low %v5337_v5, %v5345_v9 }
 0xe2c   :  { %v5723_v42 = vrot.slane %v5701_v58, %v15136_v13  ;;  %v5730_v31 = vrot.slane %v13604_v50, %v15136_v13  ;;  %v5731_v11 = vcombine.low %v5709_v38, %v5716_v35  ;;  %v5761_v53 = vrot.slane %v5754_v43, %v15136_v13 }
 0xe2d   :  { %v5348_v12 = vcombine.high %v5344_v30, %v5344_v30  ;;  %v5763_v37 = vcombine.low %v5347_v3, %v5330_v27  ;;  %v5764_v26 = vcombine.low %v5344_v30, %v5346_v54  ;;  %v5772_v52 = vrot.slane %v5762_v8, %v15136_v13 }
 0xe2e   :  { %v5732_v7 = vcombine.low %v5723_v42, %v5730_v31  ;;  %v5739_v40 = vrot.slane %v5731_v11, %v15136_v13  ;;  %v5824_v45 = vrot.slane %v5817_v48, %v15136_v13  ;;  %v6107_v24 = vand.u32 %v16054_v19, %v15251_v34 }
 0xe2f   :  { %v5765_v20 = vcombine.low %v5348_v12, %v5363_v60  ;;  %v5779_v15 = vrot.slane %v5763_v37, %v15136_v13  ;;  %v5786_v32 = vrot.slane %v5764_v26, %v15136_v13  ;;  %v6154_v55 = vand.u32 %v6102_v57, %v15251_v34 }
 0xe30   :  { %v5746_v61 = vrot.slane %v5732_v7, %v15136_v13 }
 0xe31   :  { %v5793_v41 = vrot.slane %v5765_v20, %v15136_v13  ;;  %v5794_v49 = vcombine.low %v5772_v52, %v5779_v15 }
 0xe32   :  { %v5747_v16 = vcombine.low %v5739_v40, %v5746_v61 }
 0xe33   :  { %v5795_v51 = vcombine.low %v5786_v32, %v5793_v41  ;;  %v5802_v25 = vrot.slane %v5794_v49, %v15136_v13 }
 0xe34   :  { %v5829_v56 = vpack.c.bf16 %v5761_v53, %v5747_v16 }
 0xe35   :  { %v5809_v59 = vrot.slane %v5795_v51, %v15136_v13 }
 0xe36   :  { %v5835_v29 = vsel %vm1247_vm8, %v5829_v56, 0 }
 0xe37   :  { %14277 = vmatpush3.bf16.xpose.msra.mxu0 %v5835_v29  ;;  %v5810_v23 = vcombine.low %v5802_v25, %v5809_v59  ;;  %v13613_v25 = vld [vmem:[%s17391_s15 + $0xc] sm:$0xf] }
 0xe38   :  { %14288 = vmatprep.subr.bf16.mxu0 %v14870_v1  ;;  %v6454_v59 = vsel %vm1525_vm6, %v13613_v25, 0 }
 0xe39   :  { %v5830_v18 = vpack.c.bf16 %v5824_v45, %v5810_v23 }
 0xe3b   :  { %v5882_v28 = vsel %vm1247_vm8, %v5830_v18, 0 }
 0xe3c   :  { %14283 = vmatpush3.bf16.xpose.msra.mxu1 %v5882_v28 }
 0xe3d   :  { %14294 = vmatprep.subr.bf16.mxu1 %v14870_v1 }
 0xe3e   :  { %14279 = vmatmul.mubr.msk.bf16.vlgmr.msra.gmra.mrb[60].mxu0 %vm1247_vm8, %v15995_v46 }
 0xe3f   :  { %14289 = vmatpush3.bf16.msra.mxu0 %v6107_v24  ;;  %14290 = vmatprep.mubr.msk.bf16.mxu0 %vm14871_vm0, %v14870_v1 }
 0xe40   :  { %14573 = vmatprep.subr.msk.bf16.mxu0 %vm1525_vm6, %v13613_v25 }
 0xe43   :  { %14285 = vmatmul.mubr.msk.bf16.vlgmr.msra.gmra.mrb[60].mxu1 %vm1247_vm8, %v5698_v62 }
 0xe44   :  { %14295 = vmatpush3.bf16.msra.mxu1 %v6154_v55  ;;  %14296 = vmatprep.mubr.msk.bf16.mxu1 %vm14871_vm0, %v14870_v1 }
 0xf11   :  { %v5871_v19 = vpop.f32.mrb[60].mxu0 }
 0xf12   :  { %v14280_v46 = vpop.f32.mrb[61].mxu0  ;;  %v5925_v33 = vsel %vm1342_vm9, %v5871_v19, -inf }
 0xf13   :  { %5926 = vmax.xlane.f32.xlu0 %v5925_v33  ;;  %v5874_v39 = vpop.f32.mrb[62].mxu0 }
 0xf14   :  { %v14281_v10 = vpop.f32.mrb[63].mxu0  ;;  %v5928_v44 = vsel %vm1346_vm10, %v5874_v39, -inf }
 0xf15   :  { %5929 = vmax.xlane.f32.xlu1 %v5928_v44 }
 0xf16   :  { %v5918_v47 = vpop.f32.mrb[60].mxu1 }
 0xf17   :  { %v14286_v6 = vpop.f32.mrb[61].mxu1  ;;  %v5931_v22 = vsel %vm1342_vm9, %v5918_v47, -inf }
 0xf18   :  { %v5921_v21 = vpop.f32.mrb[62].mxu1  ;;  %5932 = vmax.xlane.f32.xlu0 %v5931_v22 }
 0xf19   :  { %v14287_v62 = vpop.f32.mrb[63].mxu1  ;;  %v5934_v57 = vsel %vm1346_vm10, %v5921_v21, -inf }
 0xf1a   :  { %5935 = vmax.xlane.f32.xlu1 %v5934_v57 }
 0xfa0   :  { %v5927_v27 = vpop.xlane.xlu0 %5926 }
 0xfa1   :  { %v5937_v5 = vsub.f32 %v5871_v19, %v5927_v27 }
 0xfa2   :  { %v5930_v9 = vpop.xlane.xlu1 %5929 }
 0xfa3   :  { %v5941_v58 = vmul.f32 1.442695, %v5937_v5  ;;  %v5938_v50 = vsub.f32 %v5874_v39, %v5930_v9 }
 0xfa5   :  { %14715 = vpow2.f32 %v5941_v58  ;;  %v5943_v38 = vmul.f32 1.442695, %v5938_v50  ;;  %v5933_v35 = vpop.xlane.xlu0 %5932 }
 0xfa6   :  { %v5939_v30 = vsub.f32 %v5918_v47, %v5933_v35 }
 0xfa7   :  { %14717 = vpow2.f32 %v5943_v38  ;;  %v5936_v54 = vpop.xlane.xlu1 %5935 }
 0xfa8   :  { %v5945_v3 = vmul.f32 1.442695, %v5939_v30  ;;  %v5940_v8 = vsub.f32 %v5921_v21, %v5936_v54 }
 0xfaa   :  { %14719 = vpow2.f32 %v5945_v3  ;;  %v5947_v42 = vmul.f32 1.442695, %v5940_v8 }
 0xfac   :  { %14721 = vpow2.f32 %v5947_v42 }
 0xfaf   :  { %v14716_v31 = vpop.eup %14715 }
 0xfb0   :  { %v5949_v11 = vsel %vm1342_vm9, %v14716_v31, 0.0 }
 0xfb1   :  { %v14718_v60 = vpop.eup %14717  ;;  %5950 = vadd.xlane.f32.xlu0 %v5949_v11 }
 0xfb2   :  { %v5952_v12 = vsel %vm1346_vm10, %v14718_v60, 0.0 }
 0xfb3   :  { %5953 = vadd.xlane.f32.xlu1 %v5952_v12 }
 0xfb4   :  { %v14720_v37 = vpop.eup %14719 }
 0xfb5   :  { %v5955_v26 = vsel %vm1342_vm9, %v14720_v37, 0.0 }
 0xfb6   :  { %v14722_v43 = vpop.eup %14721  ;;  %5956 = vadd.xlane.f32.xlu0 %v5955_v26 }
 0xfb7   :  { %v5958_v7 = vsel %vm1346_vm10, %v14722_v43, 0.0 }
 0xfb8   :  { %5959 = vadd.xlane.f32.xlu1 %v5958_v7 }
0x103e   :  { %v5951_v17 = vpop.xlane.xlu0 %5950 }
0x103f   :  { %14723 = vrcp.f32 %v5951_v17 }
0x1040   :  { %v5954_v20 = vpop.xlane.xlu1 %5953 }
0x1041   :  { %14725 = vrcp.f32 %v5954_v20 }
0x1043   :  { %v5957_v52 = vpop.xlane.xlu0 %5956 }
0x1044   :  { %14727 = vrcp.f32 %v5957_v52 }
0x1045   :  { %v5960_v15 = vpop.xlane.xlu1 %5959 }
0x1046   :  { %14729 = vrcp.f32 %v5960_v15 }
0x1049   :  { %v14724_v40 = vpop.eup %14723 }
0x104a   :  { %v5965_v32 = vmul.f32 %v14724_v40, %v14716_v31 }
0x104b   :  { %v14726_v61 = vpop.eup %14725 }
0x104c   :  { %v5966_v41 = vmul.f32 %v14726_v61, %v14718_v60 }
0x104e   :  { %v14728_v49 = vpop.eup %14727  ;;  %v5969_v16 = vpack.c.bf16 %v5966_v41, %v5965_v32 }
0x104f   :  { %v5967_v48 = vmul.f32 %v14728_v49, %v14720_v37 }
0x1050   :  { %v14730_v53 = vpop.eup %14729  ;;  %14291 = vmatmul.mubr.msk.bf16.vlgmr.msra.gmra.mrb[64].mxu0 %vm1342_vm9, %v5969_v16 }
0x1051   :  { %v5968_v51 = vmul.f32 %v14730_v53, %v14722_v43  ;;  %14301 = vmatpush3.bf16.msra.mxu0 %v6454_v59 }
0x1053   :  { %v5970_v56 = vpack.c.bf16 %v5968_v51, %v5967_v48 }
0x1055   :  { %14297 = vmatmul.mubr.msk.bf16.vlgmr.msra.gmra.mrb[64].mxu1 %vm1342_vm9, %v5970_v56 }
0x1123   :  { %v6143_v29 = vpop.f32.mrb[64].mxu0 }
0x1124   :  { %v6201_v23 = vcombine.high %v6143_v29, %v6143_v29  ;;  %v6208_v45 = vrot.slane %v6143_v29, %v15136_v13  ;;  %v14292_v18 = vpop.f32.mrb[65].mxu0 }
0x1125   :  { %v6146_v28 = vpop.f32.mrb[66].mxu0 }
0x1126   :  { %v6215_v24 = vrot.slane %v6201_v23, %v15136_v13  ;;  %v6216_v55 = vcombine.high %v6208_v45, %v6208_v45  ;;  %v14293_v19 = vpop.f32.mrb[67].mxu0  ;;  %v6256_v46 = vrot.slane %v6146_v28, %v15136_v13  ;;  %v6224_v39 = vrot.slane %v6208_v45, %v15136_v13 }
0x1128   :  { %v6217_v33 = vcombine.high %v6215_v24, %v6215_v24  ;;  %v6238_v10 = vrot.slane %v6216_v55, %v15136_v13  ;;  %v6190_v44 = vpop.f32.mrb[64].mxu1  ;;  %v6231_v21 = vrot.slane %v6215_v24, %v15136_v13  ;;  %v6263_v9 = vrot.slane %v6256_v46, %v15136_v13 }
0x1129   :  { %v6264_v47 = vcombine.high %v6190_v44, %v6190_v44  ;;  %v6271_v6 = vrot.slane %v6190_v44, %v15136_v13  ;;  %v14298_v22 = vpop.f32.mrb[65].mxu1 }
0x112a   :  { %v6245_v62 = vrot.slane %v6217_v33, %v15136_v13  ;;  %v6327_v57 = vcombine.low %v6224_v39, %v6238_v10  ;;  %v13611_v27 = vcombine.high %v6224_v39, %v6238_v10  ;;  %v6193_v5 = vpop.f32.mrb[66].mxu1 }
0x112b   :  { %v6278_v58 = vrot.slane %v6264_v47, %v15136_v13  ;;  %v6279_v50 = vcombine.high %v6271_v6, %v6271_v6  ;;  %v6287_v38 = vrot.slane %v6271_v6, %v15136_v13  ;;  %v14299_v35 = vpop.f32.mrb[67].mxu1  ;;  %v6319_v8 = vrot.slane %v6193_v5, %v15136_v13 }
0x112c   :  { %v6329_v30 = vcombine.low %v6231_v21, %v6245_v62  ;;  %v13612_v54 = vcombine.high %v6231_v21, %v6245_v62  ;;  %v6337_v3 = vrot.slane %v6327_v57, %v15136_v13  ;;  %v6344_v12 = vrot.slane %v13611_v27, %v15136_v13  ;;  %v13616_v21 = vld [vmem:[%s17392_s16] ss:$0 sm:$0xff] }
0x112d   :  { %v6280_v42 = vcombine.high %v6278_v58, %v6278_v58  ;;  %v6294_v31 = vrot.slane %v6278_v58, %v15136_v13  ;;  %v6301_v11 = vrot.slane %v6279_v50, %v15136_v13  ;;  %v6309_v60 = vcombine.high %v6287_v38, %v6287_v38 }
0x112e   :  { %v6351_v37 = vrot.slane %v6329_v30, %v15136_v13  ;;  %v6358_v26 = vrot.slane %v13612_v54, %v15136_v13  ;;  %v6376_v43 = vcombine.low %v6263_v9, %v6287_v38  ;;  %v6326_v61 = vrot.slane %v6319_v8, %v15136_v13 }
0x112f   :  { %v6308_v7 = vrot.slane %v6280_v42, %v15136_v13  ;;  %v6310_v17 = vcombine.high %v6294_v31, %v6294_v31  ;;  %v6311_v20 = vcombine.high %v6301_v11, %v6301_v11  ;;  %v6377_v52 = vcombine.low %v6301_v11, %v6309_v60 }
0x1130   :  { %v6360_v15 = vcombine.low %v6351_v37, %v6358_v26  ;;  %v6386_v40 = vrot.slane %v6376_v43, %v15136_v13  ;;  %v6359_v53 = vcombine.low %v6337_v3, %v6344_v12  ;;  %v14621_v26 = vld [vmem:[%s17393_s17] sm:$0xff]   ;;  %v14622_v43 = vld [vmem:[%s17393_s17 + $0x8] sm:$0xff]  }
0x1131   :  { %v6378_v32 = vcombine.low %v6311_v20, %v6294_v31  ;;  %v6379_v41 = vcombine.low %v6308_v7, %v6310_v17  ;;  %v6393_v49 = vrot.slane %v6377_v52, %v15136_v13  ;;  %v6312_v16 = vcombine.high %v6308_v7, %v6308_v7  ;;  %14306 = vmatprep.subr.bf16.mxu1 %v14621_v26 }
0x1132   :  { %v6374_v23 = vrot.slane %v6360_v15, %v15136_v13  ;;  %v6367_v45 = vrot.slane %v6359_v53, %v15136_v13  ;;  %14307 = vmatpush3.bf16.msra.mxu1 %v14621_v26 }
0x1133   :  { %v6400_v48 = vrot.slane %v6378_v32, %v15136_v13  ;;  %v6407_v51 = vrot.slane %v6379_v41, %v15136_v13  ;;  %v6408_v56 = vcombine.low %v6386_v40, %v6393_v49  ;;  %v6425_v25 = vcombine.low %v6312_v16, %v6326_v61  ;;  %14308 = vmatprep.subr.bf16.mxu1 %v14622_v43  ;;  %v13617_v16 = vld [vmem:[%s17397_s21] ss:$0 sm:$0xff] }
0x1134   :  { %v6375_v55 = vcombine.low %v6367_v45, %v6374_v23 }
0x1135   :  { %v6409_v59 = vcombine.low %v6400_v48, %v6407_v51  ;;  %v6432_v29 = vrot.slane %v6425_v25, %v15136_v13  ;;  %v6416_v18 = vrot.slane %v6408_v56, %v15136_v13 }
0x1136   :  { %14309 = vmatpush3.bf16.msra.mxu1 %v14622_v43 }
0x1137   :  { %v6423_v28 = vrot.slane %v6409_v59, %v15136_v13  ;;  %v6439_v24 = vrot.slane %v6432_v29, %v15136_v13  ;;  %v13618_v59 = vld [vmem:[%s17398_s22] ss:$0 sm:$0xff] }
0x1139   :  { %v6424_v19 = vcombine.low %v6416_v18, %v6423_v28  ;;  %v6444_v33 = vpack.c.bf16 %v6439_v24, %v6439_v24 }
0x113b   :  { %v6443_v46 = vpack.c.bf16 %v6424_v19, %v6375_v55 }
0x113d   :  { %14302 = vmatprep.mubr.msk.bf16.mxu0 %vm1247_vm8, %v6443_v46  ;;  %v14623_v46 = vld [vmem:[%s17395_s19] sm:$0xff]  }
0x113e   :  { %14303 = vmatmul.mubr.msk.bf16.vlgmr.msra.gmra.mrb[68].mxu0 %vm1247_vm8, %v6444_v33  ;;  %14314 = vmatprep.subr.bf16.mxu0 %v14623_v46  ;;  %v14624_v33 = vld [vmem:[%s17395_s19 + $0x8] sm:$0xff]  }
0x113f   :  { %14315 = vmatpush3.bf16.msra.mxu0 %v14623_v46  ;;  %v14630_v46 = vld [vmem:[%s17389_s13 + $0x48] sm:$0xff]  }
0x1140   :  { %14316 = vmatprep.subr.bf16.mxu0 %v14624_v33 }
0x1143   :  { %14317 = vmatpush3.bf16.msra.mxu0 %v14624_v33  ;;  %v14631_v33 = vld [vmem:[%s17433_s29 + $0x40] sm:$0xff]  }
0x1211   :  { %v14304_v39 = vpop.f32.mrb[68].mxu0 }
0x1212   :  { %v6506_v10 = vadd.f32 %v14304_v39, %v16064_v4  ;;  %v6490_v44 = vpop.f32.mrb[69].mxu0  ;;  %v14625_v39 = vld [vmem:[%s17395_s19 + $0x10] sm:$0xff]  }
0x1213   :  { %v6504_v47 = vadd.f32 %v6490_v44, %v16067_v36  ;;  %v14305_v6 = vpop.f32.mrb[70].mxu0  ;;  %14318 = vmatprep.subr.bf16.mxu0 %v14625_v39  ;;  %v13619_v44 = vld [vmem:[%s17394_s18] ss:$0 sm:$0xff] }
0x1214   :  { %v6493_v22 = vpop.f32.mrb[71].mxu0  ;;  %v6509_v62 = vadd.f32 %v6506_v10, %v15098_v2  ;;  %14319 = vmatpush3.bf16.msra.mxu0 %v14625_v39  ;;  %v14626_v10 = vld [vmem:[%s17395_s19 + $0x18] sm:$0xff]  }
0x1215   :  { %v6507_v57 = vadd.f32 %v6504_v47, %v15092_v63  ;;  %v6505_v27 = vadd.f32 %v6493_v22, %v16070_v14  ;;  %14320 = vmatprep.subr.bf16.mxu0 %v14626_v10 }
0x1216   :  { %v6519_v50 = vadd.f32 %v13616_v21, %v6509_v62 }
0x1217   :  { %v6508_v5 = vadd.f32 %v6505_v27, %v15095_v0  ;;  %v6517_v9 = vadd.f32 %v13616_v21, %v6507_v57 }
0x1218   :  { %v6529_v38 = vsel %vm6528_vm11, %v6519_v50, 0.0  ;;  %14321 = vmatpush3.bf16.msra.mxu0 %v14626_v10 }
0x1219   :  { %v6522_v4 = vsel %vm129_vm2, %v6517_v9, 0.0  ;;  %v6518_v58 = vadd.f32 %v13616_v21, %v6508_v5 }
0x121a   :  { %6523 = vadd.xlane.f32.xlu0 %v6522_v4 }
0x121b   :  { %v6525_v36 = vsel %vm129_vm2, %v6518_v58, 0.0 }
0x121c   :  { %6526 = vadd.xlane.f32.xlu1 %v6525_v36 }
0x121e   :  { %6530 = vadd.xlane.f32.xlu0 %v6529_v38 }
0x12a7   :  { %v6524_v2 = vpop.xlane.xlu0 %6523 }
0x12a8   :  { %v6533_v35 = vmul.f32 0.03125, %v6524_v2 }
0x12a9   :  { %v6527_v63 = vpop.xlane.xlu1 %6526 }
0x12aa   :  { %v6536_v30 = vsub.f32 %v6517_v9, %v6533_v35  ;;  %v6534_v14 = vmul.f32 0.03125, %v6527_v63 }
0x12ab   :  { %v6531_v54 = vpop.xlane.xlu0 %6530 }
0x12ac   :  { %v6537_v0 = vsub.f32 %v6518_v58, %v6534_v14  ;;  %v6535_v3 = vmul.f32 0.03125, %v6531_v54  ;;  %v6539_v8 = vmul.f32 %v6536_v30, %v6536_v30 }
0x12ae   :  { %v6538_v42 = vsub.f32 %v6519_v50, %v6535_v3  ;;  %v6542_v31 = vsel %vm129_vm2, %v6539_v8, 0.0  ;;  %v6540_v11 = vmul.f32 %v6537_v0, %v6537_v0 }
0x12af   :  { %6543 = vadd.xlane.f32.xlu1 %v6542_v31  ;;  %v13624_v31 = vld [vmem:[%s17437_s11] ss:$0 sm:$0xff] }
0x12b0   :  { %v6545_v60 = vsel %vm129_vm2, %v6540_v11, 0.0  ;;  %v6541_v12 = vmul.f32 %v6538_v42, %v6538_v42 }
0x12b1   :  { %6546 = vadd.xlane.f32.xlu0 %v6545_v60 }
0x12b2   :  { %v6548_v37 = vsel %vm6528_vm11, %v6541_v12, 0.0 }
0x12b3   :  { %6549 = vadd.xlane.f32.xlu1 %v6548_v37 }
0x133c   :  { %v6544_v7 = vpop.xlane.xlu1 %6543 }
0x133d   :  { %v6551_v17 = vmul.f32 0.03125, %v6544_v7 }
0x133e   :  { %v6547_v20 = vpop.xlane.xlu0 %6546 }
0x133f   :  { %v6554_v52 = vadd.f32 1e-05, %v6551_v17  ;;  %v6552_v15 = vmul.f32 0.03125, %v6547_v20 }
0x1340   :  { %v6550_v40 = vpop.xlane.xlu1 %6549 }
0x1341   :  { %14731 = vrsqrt.f32 %v6554_v52  ;;  %v6555_v61 = vadd.f32 1e-05, %v6552_v15  ;;  %v6553_v32 = vmul.f32 0.03125, %v6550_v40 }
0x1343   :  { %14733 = vrsqrt.f32 %v6555_v61  ;;  %v6556_v41 = vadd.f32 1e-05, %v6553_v32 }
0x1345   :  { %14735 = vrsqrt.f32 %v6556_v41 }
0x134b   :  { %v14732_v49 = vpop.eup %14731 }
0x134c   :  { %v6560_v53 = vmul.f32 %v14732_v49, %v6536_v30 }
0x134d   :  { %v14734_v48 = vpop.eup %14733 }
0x134e   :  { %v6561_v51 = vmul.f32 %v14734_v48, %v6537_v0  ;;  %v6569_v56 = vmul.f32 %v13617_v16, %v6560_v53 }
0x134f   :  { %v14736_v25 = vpop.eup %14735 }
0x1350   :  { %v6562_v29 = vmul.f32 %v14736_v25, %v6538_v42  ;;  %v6570_v23 = vmul.f32 %v13617_v16, %v6561_v51  ;;  %v6578_v45 = vadd.f32 %v13618_v59, %v6569_v56 }
0x1352   :  { %v6579_v18 = vadd.f32 %v13618_v59, %v6570_v23  ;;  %v6571_v28 = vmul.f32 %v13617_v16, %v6562_v29 }
0x1354   :  { %v6586_v24 = vpack.c.bf16 %v6579_v18, %v6578_v45  ;;  %v6580_v55 = vadd.f32 %v13618_v59, %v6571_v28 }
0x1356   :  { %14310 = vmatprep.mubr.msk.bf16.mxu1 %vm129_vm2, %v6586_v24  ;;  %v6587_v19 = vpack.c.bf16 %v6580_v55, %v6580_v55  ;;  %v14627_v24 = vld [vmem:[%s17432_s28 + $0x40] sm:$0xff]  }
0x1357   :  { %14326 = vmatprep.subr.bf16.mxu1 %v14627_v24 }
0x1358   :  { %14311 = vmatmul.mubr.msk.bf16.vlgmr.msra.gmra.mrb[68].mxu1 %vm129_vm2, %v6587_v19  ;;  %v14629_v19 = vld [vmem:[%s17432_s28 + $0x48] sm:$0xff]  }
0x1359   :  { %14327 = vmatpush3.bf16.msra.mxu1 %v14627_v24 }
0x135a   :  { %14328 = vmatprep.subr.bf16.mxu1 %v14629_v19 }
0x135d   :  { %14329 = vmatpush3.bf16.msra.mxu1 %v14629_v19 }
0x135e   :  { %14334 = vmatprep.subr.bf16.mxu1 %v14631_v33 }
0x142b   :  { %v14312_v47 = vpop.f32.mrb[68].mxu1 }
0x142c   :  { %v6655_v6 = vadd.f32 %v14312_v47, %v13619_v44  ;;  %v6646_v22 = vpop.f32.mrb[69].mxu1 }
0x142d   :  { %v6647_v21 = vadd.f32 %v13619_v44, %v6646_v22  ;;  %v14313_v62 = vpop.f32.mrb[70].mxu1 }
0x142e   :  { %v6665_v57 = vmul.f32 0.70710677, %v6655_v6  ;;  %v6649_v27 = vpop.f32.mrb[71].mxu1  ;;  %v6662_v35 = vmul.f32 0.5, %v6655_v6 }
0x142f   :  { %v6663_v5 = vmul.f32 0.70710677, %v6647_v21  ;;  %v6650_v9 = vadd.f32 %v13619_v44, %v6649_v27  ;;  %v6660_v63 = vmul.f32 0.5, %v6647_v21 }
0x1430   :  { %14737 = verf.f32 %v6665_v57 }
0x1431   :  { %14739 = verf.f32 %v6663_v5  ;;  %v6664_v4 = vmul.f32 0.70710677, %v6650_v9  ;;  %v6661_v30 = vmul.f32 0.5, %v6650_v9  ;;  %v13631_v5 = vld [vmem:[%s17399_s23] ss:$0 sm:$0xff] }
0x1433   :  { %14741 = verf.f32 %v6664_v4 }
0x143a   :  { %v14738_v58 = vpop.eup %14737 }
0x143b   :  { %v14740_v50 = vpop.eup %14739  ;;  %v6671_v36 = vadd.f32 1.0, %v14738_v58 }
0x143c   :  { %v6669_v38 = vadd.f32 1.0, %v14740_v50 }
0x143d   :  { %v14742_v2 = vpop.eup %14741  ;;  %v6674_v54 = vmul.f32 %v6671_v36, %v6662_v35 }
0x143e   :  { %v6670_v14 = vadd.f32 1.0, %v14742_v2  ;;  %v6672_v0 = vmul.f32 %v6669_v38, %v6660_v63  ;;  %v13632_v38 = vld [vmem:[%s17400_s24] ss:$0 sm:$0xff] }
0x143f   :  { %v6685_v42 = vpack.c.bf16 %v6674_v54, %v6674_v54 }
0x1440   :  { %v6673_v3 = vmul.f32 %v6670_v14, %v6661_v30 }
0x1442   :  { %v6684_v8 = vpack.c.bf16 %v6673_v3, %v6672_v0 }
0x1444   :  { %14322 = vmatprep.mubr.msk.bf16.mxu0 %vm6716_vm12, %v6684_v8  ;;  %v14632_v8 = vld [vmem:[%s17433_s29 + $0x48] sm:$0xff]  }
0x1445   :  { %14323 = vmatmul.mubr.msk.bf16.vlgmr.msra.gmra.mrb[72].mxu0 %vm6716_vm12, %v6685_v42  ;;  %v13638_v42 = vld [vmem:[%s17436_s7 + $0x4] ss:$0 sm:$0xff] }
0x1518   :  { %v14324_v11 = vpop.f32.mrb[72].mxu0 }
0x1519   :  { %v6757_v60 = vpop.f32.mrb[73].mxu0  ;;  %v6766_v12 = vadd.f32 %v14324_v11, %v13624_v31 }
0x151a   :  { %v6758_v37 = vadd.f32 %v13624_v31, %v6757_v60  ;;  %v14325_v26 = vpop.f32.mrb[74].mxu0 }
0x151b   :  { %v6760_v43 = vpop.f32.mrb[75].mxu0  ;;  %v6773_v15 = vadd.f32 %v6766_v12, %v6580_v55  ;;  %v14628_v55 = vld [vmem:[%s17389_s13 + $0x40] sm:$0xff]  }
0x151c   :  { %v6761_v7 = vadd.f32 %v13624_v31, %v6760_v43  ;;  %v6771_v17 = vadd.f32 %v6758_v37, %v6578_v45  ;;  %14342 = vmatprep.subr.bf16.mxu0 %v14628_v55  ;;  %v13658_v31 = vld [vmem:[%s17390_s14 + $0x4] ss:$0 sm:$0xff] }
0x151d   :  { %v6782_v61 = vsel %vm6528_vm11, %v6773_v15, 0.0  ;;  %14343 = vmatpush3.bf16.msra.mxu0 %v14628_v55 }
0x151e   :  { %v6776_v20 = vsel %vm129_vm2, %v6771_v17, 0.0  ;;  %v6772_v52 = vadd.f32 %v6761_v7, %v6579_v18  ;;  %14344 = vmatprep.subr.bf16.mxu0 %v14630_v46 }
0x151f   :  { %6777 = vadd.xlane.f32.xlu0 %v6776_v20 }
0x1520   :  { %v6779_v40 = vsel %vm129_vm2, %v6772_v52, 0.0 }
0x1521   :  { %6780 = vadd.xlane.f32.xlu1 %v6779_v40  ;;  %14345 = vmatpush3.bf16.msra.mxu0 %v14630_v46 }
0x1522   :  { %14356 = vmatprep.subr.bf16.mxu0 %v14870_v1 }
0x1523   :  { %6783 = vadd.xlane.f32.xlu0 %v6782_v61 }
0x15ac   :  { %v6778_v32 = vpop.xlane.xlu0 %6777 }
0x15ad   :  { %v6785_v41 = vmul.f32 0.03125, %v6778_v32 }
0x15ae   :  { %v6781_v49 = vpop.xlane.xlu1 %6780 }
0x15af   :  { %v6788_v16 = vsub.f32 %v6771_v17, %v6785_v41  ;;  %v6786_v53 = vmul.f32 0.03125, %v6781_v49 }
0x15b0   :  { %v6784_v48 = vpop.xlane.xlu0 %6783 }
0x15b1   :  { %v6789_v51 = vsub.f32 %v6772_v52, %v6786_v53  ;;  %v6787_v56 = vmul.f32 0.03125, %v6784_v48  ;;  %v6791_v25 = vmul.f32 %v6788_v16, %v6788_v16 }
0x15b3   :  { %v6790_v59 = vsub.f32 %v6773_v15, %v6787_v56  ;;  %v6794_v29 = vsel %vm129_vm2, %v6791_v25, 0.0  ;;  %v6792_v23 = vmul.f32 %v6789_v51, %v6789_v51 }
0x15b4   :  { %6795 = vadd.xlane.f32.xlu1 %v6794_v29 }
0x15b5   :  { %v6797_v45 = vsel %vm129_vm2, %v6792_v23, 0.0  ;;  %v6793_v18 = vmul.f32 %v6790_v59, %v6790_v59 }
0x15b6   :  { %6798 = vadd.xlane.f32.xlu0 %v6797_v45 }
0x15b7   :  { %v6800_v28 = vsel %vm6528_vm11, %v6793_v18, 0.0 }
0x15b8   :  { %6801 = vadd.xlane.f32.xlu1 %v6800_v28 }
0x1641   :  { %v6796_v39 = vpop.xlane.xlu1 %6795 }
0x1642   :  { %v6803_v10 = vmul.f32 0.03125, %v6796_v39 }
0x1643   :  { %v6799_v44 = vpop.xlane.xlu0 %6798 }
0x1644   :  { %v6806_v47 = vadd.f32 1e-05, %v6803_v10  ;;  %v6804_v6 = vmul.f32 0.03125, %v6799_v44 }
0x1645   :  { %v6802_v22 = vpop.xlane.xlu1 %6801 }
0x1646   :  { %14743 = vrsqrt.f32 %v6806_v47  ;;  %v6807_v21 = vadd.f32 1e-05, %v6804_v6  ;;  %v6805_v62 = vmul.f32 0.03125, %v6802_v22 }
0x1648   :  { %14745 = vrsqrt.f32 %v6807_v21  ;;  %v6808_v57 = vadd.f32 1e-05, %v6805_v62 }
0x164a   :  { %14747 = vrsqrt.f32 %v6808_v57 }
0x1650   :  { %v14744_v27 = vpop.eup %14743 }
0x1651   :  { %v6812_v9 = vmul.f32 %v14744_v27, %v6788_v16 }
0x1652   :  { %v14746_v4 = vpop.eup %14745 }
0x1653   :  { %v6821_v58 = vmul.f32 %v13631_v5, %v6812_v9  ;;  %v6813_v50 = vmul.f32 %v14746_v4, %v6789_v51 }
0x1654   :  { %v14748_v36 = vpop.eup %14747 }
0x1655   :  { %v6822_v2 = vmul.f32 %v13631_v5, %v6813_v50  ;;  %v6814_v35 = vmul.f32 %v14748_v36, %v6790_v59  ;;  %v16250_v63 = vadd.f32 %v13632_v38, %v6821_v58 }
0x1657   :  { %v16252_v30 = vadd.f32 %v13632_v38, %v6822_v2  ;;  %v6823_v14 = vmul.f32 %v13631_v5, %v6814_v35 }
0x1659   :  { %v16256_v54 = vpack.c.bf16 %v16252_v30, %v16250_v63  ;;  %v16258_v0 = vadd.f32 %v13632_v38, %v6823_v14 }
0x165b   :  { %v16262_v3 = vpack.c.bf16 %v16258_v0, %v16258_v0  ;;  %14330 = vmatprep.mubr.msk.bf16.mxu1 %vm129_vm2, %v16256_v54  ;;  %14346 = vmatprep.mubr.msk.bf16.mxu0 %vm129_vm2, %v16256_v54 }
0x165d   :  { %14331 = vmatmul.mubr.msk.bf16.vlgmr.msra.gmra.mrb[72].mxu1 %vm129_vm2, %v16262_v3  ;;  %14347 = vmatmul.mubr.msk.bf16.vlgmr.msra.gmra.mrb[76].mxu0 %vm129_vm2, %v16262_v3 }
0x165e   :  { %14335 = vmatpush3.bf16.msra.mxu1 %v14631_v33  ;;  %14338 = vmatprep.mubr.msk.bf16.mxu1 %vm129_vm2, %v16256_v54 }
0x165f   :  { %14336 = vmatprep.subr.bf16.mxu1 %v14632_v8  ;;  %14358 = vmatprep.mubr.msk.bf16.mxu0 %vm14871_vm0, %v14870_v1 }
0x1662   :  { %14337 = vmatpush3.bf16.msra.mxu1 %v14632_v8 }
0x1663   :  { %14350 = vmatprep.subr.bf16.mxu1 %v14870_v1 }
0x1665   :  { %14339 = vmatmul.mubr.msk.bf16.vlgmr.msra.gmra.mrb[76].mxu1 %vm129_vm2, %v16262_v3 }
0x1666   :  { %14352 = vmatprep.mubr.msk.bf16.mxu1 %vm14871_vm0, %v14870_v1 }
0x1730   :  { %v14332_v11 = vpop.f32.mrb[72].mxu1  ;;  %v14348_v60 = vpop.f32.mrb[76].mxu0 }
0x1731   :  { %v6909_v12 = vadd.f32 %v14332_v11, %v13638_v42  ;;  %v6900_v37 = vpop.f32.mrb[73].mxu1  ;;  %v7292_v26 = vpop.f32.mrb[77].mxu0  ;;  %v7301_v52 = vadd.f32 %v14348_v60, %v13658_v31 }
0x1732   :  { %v6901_v43 = vadd.f32 %v13638_v42, %v6900_v37  ;;  %v7293_v7 = vadd.f32 %v13658_v31, %v7292_v26  ;;  %v14333_v17 = vpop.f32.mrb[74].mxu1  ;;  %v14349_v20 = vpop.f32.mrb[78].mxu0 }
0x1733   :  { %v6903_v15 = vpop.f32.mrb[75].mxu1  ;;  %v7295_v40 = vpop.f32.mrb[79].mxu0  ;;  %v16293_v16 = vrot.slane %v6909_v12, %v15136_v13  ;;  %v16298_v56 = vrot.slane %v7301_v52, %v15136_v13 }
0x1734   :  { %v6917_v61 = vcombine.high %v6901_v43, %v6901_v43  ;;  %v6924_v32 = vrot.slane %v6901_v43, %v15136_v13  ;;  %v7309_v41 = vcombine.high %v7293_v7, %v7293_v7  ;;  %v7316_v49 = vrot.slane %v7293_v7, %v15136_v13 }
0x1735   :  { %v7022_v28 = vcombine.high %v16293_v16, %v16293_v16  ;;  %v7414_v6 = vcombine.high %v16298_v56, %v16298_v56  ;;  %v7029_v4 = vrot.slane %v16293_v16, %v15136_v13  ;;  %v7421_v58 = vrot.slane %v16298_v56, %v15136_v13 }
0x1736   :  { %v6931_v53 = vrot.slane %v6917_v61, %v15136_v13  ;;  %v6932_v48 = vcombine.high %v6924_v32, %v6924_v32  ;;  %v7323_v51 = vrot.slane %v7309_v41, %v15136_v13  ;;  %v7324_v25 = vcombine.high %v7316_v49, %v7316_v49 }
0x1737   :  { %v6940_v29 = vrot.slane %v6924_v32, %v15136_v13  ;;  %v7332_v55 = vrot.slane %v7316_v49, %v15136_v13  ;;  %v7036_v38 = vrot.slane %v7022_v28, %v15136_v13  ;;  %v6904_v14 = vadd.f32 %v13638_v42, %v6903_v15 }
0x1738   :  { %v6933_v59 = vcombine.high %v6931_v53, %v6931_v53  ;;  %v6954_v23 = vrot.slane %v6932_v48, %v15136_v13  ;;  %v7325_v45 = vcombine.high %v7323_v51, %v7323_v51  ;;  %v16302_v18 = vpop.f32.mrb[76].mxu1  ;;  %v6947_v24 = vrot.slane %v6931_v53, %v15136_v13 }
0x1739   :  { %v7346_v19 = vrot.slane %v7324_v25, %v15136_v13  ;;  %v16309_v46 = vpop.f32.mrb[77].mxu1  ;;  %v7339_v22 = vrot.slane %v7323_v51, %v15136_v13  ;;  %v16328_v8 = vrot.slane %v7414_v6, %v15136_v13  ;;  %v7296_v12 = vadd.f32 %v13658_v31, %v7295_v40 }
0x173a   :  { %v6961_v33 = vrot.slane %v6933_v59, %v15136_v13  ;;  %v7429_v39 = vcombine.low %v6940_v29, %v6954_v23  ;;  %v13663_v10 = vcombine.high %v6940_v29, %v6954_v23  ;;  %v7353_v44 = vrot.slane %v7325_v45, %v15136_v13  ;;  %v14341_v47 = vpop.f32.mrb[78].mxu1 }
0x173b   :  { %v7833_v21 = vcombine.low %v7332_v55, %v7346_v19  ;;  %v16316_v62 = vpop.f32.mrb[79].mxu1  ;;  %v13669_v50 = vcombine.high %v7332_v55, %v7346_v19  ;;  %v6966_v43 = vcombine.high %v6904_v14, %v6904_v14  ;;  %v6973_v7 = vrot.slane %v6904_v14, %v15136_v13 }
0x173c   :  { %v7431_v57 = vcombine.low %v6947_v24, %v6961_v33  ;;  %v13664_v27 = vcombine.high %v6947_v24, %v6961_v33  ;;  %v7439_v5 = vrot.slane %v7429_v39, %v15136_v13  ;;  %v7446_v9 = vrot.slane %v13663_v10, %v15136_v13 }
0x173d   :  { %v7835_v36 = vcombine.low %v7339_v22, %v7353_v44  ;;  %v13670_v60 = vcombine.high %v7339_v22, %v7353_v44  ;;  %v7843_v26 = vrot.slane %v7833_v21, %v15136_v13  ;;  %v7850_v17 = vrot.slane %v13669_v50, %v15136_v13 }
0x173e   :  { %v7453_v2 = vrot.slane %v7431_v57, %v15136_v13  ;;  %v7460_v35 = vrot.slane %v13664_v27, %v15136_v13  ;;  %v7461_v11 = vcombine.low %v7439_v5, %v7446_v9  ;;  %v7358_v52 = vcombine.high %v7296_v12, %v7296_v12  ;;  %v13648_v9 = vld [vmem:[%s17388_s12 + $0x4] ss:$0 sm:$0xff] }
0x173f   :  { %v16334_v20 = vrot.slane %v7835_v36, %v15136_v13  ;;  %v7365_v42 = vrot.slane %v7296_v12, %v15136_v13  ;;  %v6980_v15 = vrot.slane %v6966_v43, %v15136_v13  ;;  %v6981_v61 = vcombine.high %v6973_v7, %v6973_v7 }
0x1740   :  { %v7462_v37 = vcombine.low %v7453_v2, %v7460_v35  ;;  %v6989_v32 = vrot.slane %v6973_v7, %v15136_v13  ;;  %v7469_v40 = vrot.slane %v7461_v11, %v15136_v13  ;;  %v7372_v41 = vrot.slane %v7358_v52, %v15136_v13 }
0x1741   :  { %v7373_v49 = vcombine.high %v7365_v42, %v7365_v42  ;;  %v7381_v16 = vrot.slane %v7365_v42, %v15136_v13  ;;  %v6982_v53 = vcombine.high %v6980_v15, %v6980_v15  ;;  %v6996_v48 = vrot.slane %v6980_v15, %v15136_v13 }
0x1742   :  { %v7476_v31 = vrot.slane %v7462_v37, %v15136_v13  ;;  %v7003_v51 = vrot.slane %v6981_v61, %v15136_v13  ;;  %v7011_v56 = vcombine.high %v6989_v32, %v6989_v32  ;;  %v7484_v59 = vrot.slane %v6989_v32, %v15136_v13 }
0x1743   :  { %v7374_v29 = vcombine.high %v7372_v41, %v7372_v41  ;;  %v7388_v23 = vrot.slane %v7372_v41, %v15136_v13  ;;  %v7010_v45 = vrot.slane %v6982_v53, %v15136_v13  ;;  %v7012_v28 = vcombine.high %v6996_v48, %v6996_v48 }
0x1744   :  { %v7477_v25 = vcombine.low %v7469_v40, %v7476_v31  ;;  %v7013_v24 = vcombine.high %v7003_v51, %v7003_v51  ;;  %v7492_v55 = vcombine.low %v7003_v51, %v7011_v56  ;;  %v7864_v19 = vrot.slane %v13670_v60, %v15136_v13 }
0x1745   :  { %v7491_v33 = vrot.slane %v7484_v59, %v15136_v13  ;;  %v7395_v39 = vrot.slane %v7373_v49, %v15136_v13  ;;  %v7402_v10 = vrot.slane %v7374_v29, %v15136_v13  ;;  %v7547_v44 = vrot.slane %v7036_v38, %v15136_v13 }
0x1746   :  { %v7014_v47 = vcombine.high %v7010_v45, %v7010_v45  ;;  %v7493_v6 = vcombine.low %v7013_v24, %v6996_v48  ;;  %v7494_v22 = vcombine.low %v7010_v45, %v7012_v28  ;;  %v7865_v21 = vcombine.low %v7843_v26, %v7850_v17 }
0x1747   :  { %v16353_v57 = vpack.c.bf16 %v7491_v33, %v7477_v25  ;;  %v7404_v27 = vcombine.high %v7388_v23, %v7388_v23  ;;  %v7406_v5 = vcombine.high %v7402_v10, %v7402_v10  ;;  %v7502_v36 = vrot.slane %v7492_v55, %v15136_v13 }
0x1748   :  { %v7495_v50 = vcombine.low %v7014_v47, %v7029_v4  ;;  %v7509_v2 = vrot.slane %v7493_v6, %v15136_v13  ;;  %v7403_v35 = vcombine.high %v7381_v16, %v7381_v16  ;;  %v7866_v38 = vcombine.low %v16334_v20, %v7864_v19 }
0x1749   :  { %v7405_v14 = vcombine.high %v7395_v39, %v7395_v39  ;;  %v7898_v11 = vcombine.low %v7402_v10, %v7404_v27  ;;  %v7899_v60 = vcombine.low %v7406_v5, %v7421_v58  ;;  %v7516_v12 = vrot.slane %v7494_v22, %v15136_v13 }
0x174a   :  { %v7523_v37 = vrot.slane %v7495_v50, %v15136_v13  ;;  %v7524_v26 = vcombine.low %v7502_v36, %v7509_v2  ;;  %v7105_v43 = vadd.f32 %v16302_v18, %v13648_v9  ;;  %v16365_v7 = vrot.slane %v7547_v44, %v15136_v13 }
0x174b   :  { %v7951_v4 = vrot.slane %v16328_v8, %v15136_v13  ;;  %v7920_v17 = vrot.slane %v7898_v11, %v15136_v13  ;;  %v7927_v20 = vrot.slane %v7899_v60, %v15136_v13  ;;  %v7873_v52 = vrot.slane %v7865_v21, %v15136_v13 }
0x174c   :  { %v7525_v58 = vcombine.low %v7516_v12, %v7523_v37  ;;  %v7888_v42 = vrot.slane %v7381_v16, %v15136_v13  ;;  %v7896_v15 = vcombine.low %v7395_v39, %v7403_v35  ;;  %v7897_v61 = vcombine.low %v7405_v14, %v7388_v23 }
0x174d   :  { %v16373_v32 = vcombine.low %v7920_v17, %v7927_v20  ;;  %v7097_v18 = vadd.f32 %v13648_v9, %v16309_v46  ;;  %v7100_v31 = vadd.f32 %v13648_v9, %v16316_v62  ;;  %v7532_v40 = vrot.slane %v7524_v26, %v15136_v13 }
0x174e   :  { %v7217_v41 = vrot.slane %v7105_v43, %v15136_v13  ;;  %v7880_v49 = vrot.slane %v7866_v38, %v15136_v13  ;;  %v7539_v53 = vrot.slane %v7525_v58, %v15136_v13  ;;  %v7895_v25 = vrot.slane %v7888_v42, %v15136_v13 }
0x174f   :  { %v7113_v48 = vcombine.high %v7097_v18, %v7097_v18  ;;  %v7120_v51 = vrot.slane %v7097_v18, %v15136_v13  ;;  %v7162_v16 = vcombine.high %v7100_v31, %v7100_v31  ;;  %v7169_v56 = vrot.slane %v7100_v31, %v15136_v13 }
0x1750   :  { %v7906_v46 = vrot.slane %v7896_v15, %v15136_v13  ;;  %v7881_v59 = vcombine.low %v7873_v52, %v7880_v49  ;;  %v16385_v62 = vcombine.low %v7532_v40, %v7539_v53  ;;  %v7913_v29 = vrot.slane %v7897_v61, %v15136_v13 }
0x1751   :  { %v7127_v23 = vrot.slane %v7113_v48, %v15136_v13  ;;  %v7128_v45 = vcombine.high %v7120_v51, %v7120_v51  ;;  %v7176_v28 = vrot.slane %v7162_v16, %v15136_v13  ;;  %v7218_v24 = vcombine.high %v7217_v41, %v7217_v41 }
0x1752   :  { %v7177_v55 = vcombine.high %v7169_v56, %v7169_v56  ;;  %v7185_v19 = vrot.slane %v7169_v56, %v15136_v13  ;;  %v16391_v33 = vpack.c.bf16 %v7895_v25, %v7881_v59  ;;  %v7136_v10 = vrot.slane %v7120_v51, %v15136_v13 }
0x1753   :  { %v7129_v39 = vcombine.high %v7127_v23, %v7127_v23  ;;  %v7150_v44 = vrot.slane %v7128_v45, %v15136_v13  ;;  %v7178_v47 = vcombine.high %v7176_v28, %v7176_v28  ;;  %v7143_v6 = vrot.slane %v7127_v23, %v15136_v13 }
0x1754   :  { %v7192_v22 = vrot.slane %v7176_v28, %v15136_v13  ;;  %v7199_v21 = vrot.slane %v7177_v55, %v15136_v13  ;;  %v7207_v27 = vcombine.high %v7185_v19, %v7185_v19  ;;  %v7928_v2 = vcombine.low %v7906_v46, %v7913_v29 }
0x1755   :  { %v7157_v5 = vrot.slane %v7129_v39, %v15136_v13  ;;  %v7561_v9 = vcombine.low %v7136_v10, %v7150_v44  ;;  %v13665_v50 = vcombine.high %v7136_v10, %v7150_v44  ;;  %v7206_v36 = vrot.slane %v7178_v47, %v15136_v13 }
0x1756   :  { %v7208_v35 = vcombine.high %v7192_v22, %v7192_v22  ;;  %v7209_v38 = vcombine.high %v7199_v21, %v7199_v21  ;;  %v7624_v14 = vcombine.low %v7199_v21, %v7207_v27  ;;  %v7225_v26 = vrot.slane %v7217_v41, %v15136_v13 }
0x1757   :  { %v7563_v11 = vcombine.low %v7143_v6, %v7157_v5  ;;  %v13666_v60 = vcombine.high %v7143_v6, %v7157_v5  ;;  %v7571_v12 = vrot.slane %v7561_v9, %v15136_v13  ;;  %v7578_v37 = vrot.slane %v13665_v50, %v15136_v13 }
0x1758   :  { %v7210_v43 = vcombine.high %v7206_v36, %v7206_v36  ;;  %v7625_v17 = vcombine.low %v7209_v38, %v7192_v22  ;;  %v7626_v20 = vcombine.low %v7206_v36, %v7208_v35  ;;  %v7232_v52 = vrot.slane %v7218_v24, %v15136_v13 }
0x1759   :  { %v7585_v58 = vrot.slane %v7563_v11, %v15136_v13  ;;  %v7592_v42 = vrot.slane %v13666_v60, %v15136_v13  ;;  %v7593_v15 = vcombine.low %v7571_v12, %v7578_v37  ;;  %v7634_v18 = vrot.slane %v7624_v14, %v15136_v13 }
0x175a   :  { %v7627_v61 = vcombine.low %v7210_v43, %v7225_v26  ;;  %v7641_v31 = vrot.slane %v7625_v17, %v15136_v13  ;;  %v7560_v40 = vpack.c.bf16 %v16365_v7, %v16385_v62  ;;  %v7616_v41 = vrot.slane %v7185_v19, %v15136_v13 }
0x175b   :  { %v7594_v49 = vcombine.low %v7585_v58, %v7592_v42  ;;  %v7936_v53 = vrot.slane %v7928_v2, %v15136_v13  ;;  %v7943_v48 = vrot.slane %v16373_v32, %v15136_v13  ;;  %v7648_v51 = vrot.slane %v7626_v20, %v15136_v13 }
0x175c   :  { %v7655_v16 = vrot.slane %v7627_v61, %v15136_v13  ;;  %v7656_v56 = vcombine.low %v7634_v18, %v7641_v31  ;;  %v7958_v25 = vrot.slane %v7951_v4, %v15136_v13  ;;  %v7601_v7 = vrot.slane %v7593_v15, %v15136_v13 }
0x175d   :  { %v7608_v46 = vrot.slane %v7594_v49, %v15136_v13  ;;  %v7944_v59 = vcombine.low %v7936_v53, %v7943_v48  ;;  %v7679_v62 = vrot.slane %v7232_v52, %v15136_v13  ;;  %v7623_v32 = vrot.slane %v7616_v41, %v15136_v13  ;;  %v14633_v53 = vld [vmem:[%s17433_s29 + $0x50] sm:$0xff]  }
0x175e   :  { %v7657_v29 = vcombine.low %v7648_v51, %v7655_v16  ;;  %v7664_v28 = vrot.slane %v7656_v56, %v15136_v13  ;;  %v7969_v44 = vand.u32 %v16391_v33, %v15251_v34  ;;  %v14634_v48 = vld [vmem:[%s17432_s28 + $0x50] sm:$0xff]  }
0x175f   :  { %v7609_v23 = vcombine.low %v7601_v7, %v7608_v46  ;;  %v7964_v45 = vpack.c.bf16 %v7958_v25, %v7944_v59  ;;  %v7686_v8 = vrot.slane %v7679_v62, %v15136_v13 }
0x1760   :  { %v7671_v24 = vrot.slane %v7657_v29, %v15136_v13 }
0x1761   :  { %v7691_v55 = vpack.c.bf16 %v7623_v32, %v7609_v23  ;;  %v8016_v47 = vand.u32 %v7964_v45, %v15251_v34  ;;  %v14635_v32 = vld [vmem:[%s17433_s29 + $0x58] sm:$0xff]  }
0x1762   :  { %v7672_v19 = vcombine.low %v7664_v28, %v7671_v24 }
0x1763   :  { %v7697_v4 = vsel %vm1247_vm8, %v7691_v55, 0 }
0x1764   :  { %14351 = vmatpush3.bf16.xpose.msra.mxu1 %v7697_v4  ;;  %v7692_v39 = vpack.c.bf16 %v7686_v8, %v7672_v19  ;;  %v14636_v19 = vld [vmem:[%s17432_s28 + $0x58] sm:$0xff]   ;;  %v14637_v8 = vld [vmem:[%s17389_s13 + $0x50] sm:$0xff]  }
0x1765   :  { %14362 = vmatprep.subr.bf16.mxu1 %v14870_v1  ;;  %v14638_v4 = vld [vmem:[%s17389_s13 + $0x58] sm:$0xff]  }
0x1766   :  { %v7744_v10 = vsel %vm1247_vm8, %v7692_v39, 0 }
0x1767   :  { %14357 = vmatpush3.bf16.xpose.msra.mxu0 %v7744_v10 }
0x1768   :  { %14368 = vmatprep.subr.bf16.mxu0 %v14870_v1 }
0x176b   :  { %14353 = vmatmul.mubr.msk.bf16.vlgmr.msra.gmra.mrb[80].mxu1 %vm1247_vm8, %v16353_v57 }
0x176c   :  { %14363 = vmatpush3.bf16.msra.mxu1 %v7969_v44  ;;  %14364 = vmatprep.mubr.msk.bf16.mxu1 %vm14871_vm0, %v14870_v1 }
0x176d   :  { %14374 = vmatprep.subr.bf16.mxu1 %v14634_v48 }
0x176e   :  { %14359 = vmatmul.mubr.msk.bf16.vlgmr.msra.gmra.mrb[80].mxu0 %vm1247_vm8, %v7560_v40 }
0x176f   :  { %14369 = vmatpush3.bf16.msra.mxu0 %v8016_v47  ;;  %14370 = vmatprep.mubr.msk.bf16.mxu0 %vm14871_vm0, %v14870_v1 }
0x1770   :  { %14382 = vmatprep.subr.bf16.mxu0 %v14633_v53 }
0x183e   :  { %v7733_v6 = vpop.f32.mrb[80].mxu1 }
0x183f   :  { %v14354_v22 = vpop.f32.mrb[81].mxu1  ;;  %v7787_v2 = vsel %vm1342_vm9, %v7733_v6, -inf }
0x1840   :  { %v7736_v21 = vpop.f32.mrb[82].mxu1 }
0x1841   :  { %v14355_v27 = vpop.f32.mrb[83].mxu1  ;;  %v7780_v33 = vpop.f32.mrb[80].mxu0  ;;  %v7790_v35 = vsel %vm1346_vm10, %v7736_v21, -inf }
0x1842   :  { %v14360_v5 = vpop.f32.mrb[81].mxu0  ;;  %v7793_v57 = vsel %vm1342_vm9, %v7780_v33, -inf }
0x1843   :  { %7794 = vmax.xlane.f32.xlu0 %v7793_v57  ;;  %v7783_v9 = vpop.f32.mrb[82].mxu0 }
0x1844   :  { %v14361_v50 = vpop.f32.mrb[83].mxu0  ;;  %v7796_v36 = vsel %vm1346_vm10, %v7783_v9, -inf }
0x1845   :  { %7797 = vmax.xlane.f32.xlu1 %v7796_v36 }
0x1847   :  { %7788 = vmax.xlane.f32.xlu0 %v7787_v2 }
0x1849   :  { %7791 = vmax.xlane.f32.xlu1 %v7790_v35 }
0x18d0   :  { %v7795_v38 = vpop.xlane.xlu0 %7794 }
0x18d1   :  { %v7801_v14 = vsub.f32 %v7780_v33, %v7795_v38 }
0x18d2   :  { %v7798_v11 = vpop.xlane.xlu1 %7797 }
0x18d3   :  { %v7807_v60 = vmul.f32 1.442695, %v7801_v14  ;;  %v7802_v12 = vsub.f32 %v7783_v9, %v7798_v11 }
0x18d4   :  { %v7789_v37 = vpop.xlane.xlu0 %7788 }
0x18d5   :  { %14749 = vpow2.f32 %v7807_v60  ;;  %v7809_v26 = vmul.f32 1.442695, %v7802_v12  ;;  %v7799_v43 = vsub.f32 %v7733_v6, %v7789_v37 }
0x18d6   :  { %v7792_v17 = vpop.xlane.xlu1 %7791 }
0x18d7   :  { %14751 = vpow2.f32 %v7809_v26  ;;  %v7803_v20 = vmul.f32 1.442695, %v7799_v43  ;;  %v7800_v52 = vsub.f32 %v7736_v21, %v7792_v17 }
0x18d9   :  { %14753 = vpow2.f32 %v7803_v20  ;;  %v7805_v58 = vmul.f32 1.442695, %v7800_v52  ;;  %v13691_v52 = vld [vmem:[%s17388_s12 + $0x5] ss:$0 sm:$0xff] }
0x18db   :  { %14755 = vpow2.f32 %v7805_v58 }
0x18df   :  { %v14750_v42 = vpop.eup %14749 }
0x18e0   :  { %v7817_v15 = vsel %vm1342_vm9, %v14750_v42, 0.0 }
0x18e1   :  { %v14752_v61 = vpop.eup %14751  ;;  %7818 = vadd.xlane.f32.xlu0 %v7817_v15 }
0x18e2   :  { %v7820_v18 = vsel %vm1346_vm10, %v14752_v61, 0.0 }
0x18e3   :  { %v14754_v31 = vpop.eup %14753  ;;  %7821 = vadd.xlane.f32.xlu1 %v7820_v18 }
0x18e4   :  { %v7811_v40 = vsel %vm1342_vm9, %v14754_v31, 0.0 }
0x18e5   :  { %v14756_v41 = vpop.eup %14755  ;;  %7812 = vadd.xlane.f32.xlu0 %v7811_v40 }
0x18e6   :  { %v7814_v49 = vsel %vm1346_vm10, %v14756_v41, 0.0 }
0x18e7   :  { %7815 = vadd.xlane.f32.xlu1 %v7814_v49 }
0x196e   :  { %v7819_v51 = vpop.xlane.xlu0 %7818 }
0x196f   :  { %14757 = vrcp.f32 %v7819_v51 }
0x1970   :  { %v7822_v16 = vpop.xlane.xlu1 %7821 }
0x1971   :  { %14759 = vrcp.f32 %v7822_v16 }
0x1972   :  { %v7813_v56 = vpop.xlane.xlu0 %7812 }
0x1973   :  { %14761 = vrcp.f32 %v7813_v56 }
0x1974   :  { %v7816_v25 = vpop.xlane.xlu1 %7815 }
0x1975   :  { %14763 = vrcp.f32 %v7816_v25 }
0x1979   :  { %v14758_v7 = vpop.eup %14757 }
0x197a   :  { %v7829_v59 = vmul.f32 %v14758_v7, %v14750_v42 }
0x197b   :  { %v14760_v46 = vpop.eup %14759 }
0x197c   :  { %v7830_v62 = vmul.f32 %v14760_v46, %v14752_v61 }
0x197d   :  { %v14762_v29 = vpop.eup %14761 }
0x197e   :  { %v7832_v23 = vpack.c.bf16 %v7830_v62, %v7829_v59  ;;  %v7827_v28 = vmul.f32 %v14762_v29, %v14754_v31 }
0x197f   :  { %v14764_v45 = vpop.eup %14763 }
0x1980   :  { %v7828_v24 = vmul.f32 %v14764_v45, %v14756_v41  ;;  %14371 = vmatmul.mubr.msk.bf16.vlgmr.msra.gmra.mrb[84].mxu0 %vm1342_vm9, %v7832_v23 }
0x1981   :  { %14383 = vmatpush3.bf16.msra.mxu0 %v14633_v53  ;;  %14386 = vmatprep.mubr.msk.bf16.mxu0 %vm129_vm2, %v16256_v54 }
0x1982   :  { %v7831_v55 = vpack.c.bf16 %v7828_v24, %v7827_v28  ;;  %14384 = vmatprep.subr.bf16.mxu0 %v14635_v32 }
0x1984   :  { %14365 = vmatmul.mubr.msk.bf16.vlgmr.msra.gmra.mrb[84].mxu1 %vm1342_vm9, %v7831_v55 }
0x1985   :  { %14375 = vmatpush3.bf16.msra.mxu1 %v14634_v48  ;;  %14378 = vmatprep.mubr.msk.bf16.mxu1 %vm129_vm2, %v16256_v54 }
0x1986   :  { %14385 = vmatpush3.bf16.msra.mxu0 %v14635_v32  ;;  %14376 = vmatprep.subr.bf16.mxu1 %v14636_v19 }
0x1987   :  { %14398 = vmatprep.subr.bf16.mxu0 %v14870_v1 }
0x1989   :  { %14387 = vmatmul.mubr.msk.bf16.vlgmr.msra.gmra.mrb[88].mxu0 %vm129_vm2, %v16262_v3  ;;  %14377 = vmatpush3.bf16.msra.mxu1 %v14636_v19 }
0x198a   :  { %14390 = vmatprep.subr.bf16.mxu1 %v14637_v8  ;;  %14400 = vmatprep.mubr.msk.bf16.mxu0 %vm14871_vm0, %v14870_v1 }
0x198c   :  { %14379 = vmatmul.mubr.msk.bf16.vlgmr.msra.gmra.mrb[88].mxu1 %vm129_vm2, %v16262_v3 }
0x198d   :  { %14391 = vmatpush3.bf16.msra.mxu1 %v14637_v8  ;;  %14394 = vmatprep.mubr.msk.bf16.mxu1 %vm129_vm2, %v16256_v54 }
0x198e   :  { %14392 = vmatprep.subr.bf16.mxu1 %v14638_v4 }
0x1991   :  { %14393 = vmatpush3.bf16.msra.mxu1 %v14638_v4 }
0x1992   :  { %14404 = vmatprep.subr.bf16.mxu1 %v14870_v1 }
0x1994   :  { %14395 = vmatmul.mubr.msk.bf16.vlgmr.msra.gmra.mrb[92].mxu1 %vm129_vm2, %v16262_v3 }
0x1995   :  { %14406 = vmatprep.mubr.msk.bf16.mxu1 %vm14871_vm0, %v14870_v1 }
0x1a53   :  { %v8052_v39 = vpop.f32.mrb[84].mxu0 }
0x1a54   :  { %v8126_v10 = vcombine.high %v8052_v39, %v8052_v39  ;;  %v8133_v44 = vrot.slane %v8052_v39, %v15136_v13  ;;  %v14372_v47 = vpop.f32.mrb[85].mxu0 }
0x1a55   :  { %v8055_v6 = vpop.f32.mrb[86].mxu0 }
0x1a56   :  { %v8140_v22 = vrot.slane %v8126_v10, %v15136_v13  ;;  %v8141_v21 = vcombine.high %v8133_v44, %v8133_v44  ;;  %v8149_v27 = vrot.slane %v8133_v44, %v15136_v13  ;;  %v14373_v33 = vpop.f32.mrb[87].mxu0  ;;  %v8181_v36 = vrot.slane %v8055_v6, %v15136_v13 }
0x1a57   :  { %v8005_v5 = vpop.f32.mrb[84].mxu1 }
0x1a58   :  { %v8142_v57 = vcombine.high %v8140_v22, %v8140_v22  ;;  %v8156_v9 = vrot.slane %v8140_v22, %v15136_v13  ;;  %v8163_v50 = vrot.slane %v8141_v21, %v15136_v13  ;;  %v14366_v2 = vpop.f32.mrb[85].mxu1  ;;  %v8063_v35 = vcombine.high %v8005_v5, %v8005_v5  ;;  %v13681_v22 = vld [vmem:[%s17436_s7 + $0x5] ss:$0 sm:$0xff] }
0x1a59   :  { %v8070_v38 = vrot.slane %v8005_v5, %v15136_v13  ;;  %v8008_v14 = vpop.f32.mrb[86].mxu1  ;;  %v8171_v60 = vcombine.high %v8149_v27, %v8149_v27  ;;  %v8188_v61 = vrot.slane %v8181_v36, %v15136_v13 }
0x1a5a   :  { %v8170_v11 = vrot.slane %v8142_v57, %v15136_v13  ;;  %v8172_v12 = vcombine.high %v8156_v9, %v8156_v9  ;;  %v8173_v37 = vcombine.high %v8163_v50, %v8163_v50  ;;  %v14367_v26 = vpop.f32.mrb[87].mxu1  ;;  %v8077_v43 = vrot.slane %v8063_v35, %v15136_v13 }
0x1a5b   :  { %v8078_v17 = vcombine.high %v8070_v38, %v8070_v38  ;;  %v8118_v20 = vrot.slane %v8008_v14, %v15136_v13  ;;  %v8086_v40 = vrot.slane %v8070_v38, %v15136_v13  ;;  %v8239_v48 = vcombine.low %v8163_v50, %v8171_v60 }
0x1a5c   :  { %v8240_v58 = vcombine.low %v8173_v37, %v8156_v9  ;;  %v8241_v42 = vcombine.low %v8170_v11, %v8172_v12  ;;  %v8174_v15 = vcombine.high %v8170_v11, %v8170_v11  ;;  %v14388_v18 = vpop.f32.mrb[88].mxu0  ;;  %v8079_v31 = vcombine.high %v8077_v43, %v8077_v43 }
0x1a5d   :  { %v8100_v41 = vrot.slane %v8078_v17, %v15136_v13  ;;  %v8125_v49 = vrot.slane %v8118_v20, %v15136_v13  ;;  %v8564_v53 = vpop.f32.mrb[89].mxu0  ;;  %v8093_v16 = vrot.slane %v8077_v43, %v15136_v13  ;;  %v8573_v56 = vadd.f32 %v14388_v18, %v13691_v52 }
0x1a5e   :  { %v16504_v51 = vcombine.low %v8174_v15, %v8188_v61  ;;  %v14389_v25 = vpop.f32.mrb[90].mxu0  ;;  %v8107_v7 = vrot.slane %v8079_v31, %v15136_v13  ;;  %v8262_v32 = vrot.slane %v8240_v58, %v15136_v13  ;;  %v8269_v45 = vrot.slane %v8241_v42, %v15136_v13 }
0x1a5f   :  { %v8189_v46 = vcombine.low %v8086_v40, %v8100_v41  ;;  %v13673_v59 = vcombine.high %v8086_v40, %v8100_v41  ;;  %v8238_v62 = vcombine.low %v8125_v49, %v8149_v27  ;;  %v8567_v29 = vpop.f32.mrb[91].mxu0  ;;  %v14380_v23 = vpop.f32.mrb[88].mxu1  ;;  %v16511_v28 = vrot.slane %v8573_v56, %v15136_v13 }
0x1a60   :  { %v8565_v24 = vadd.f32 %v13691_v52, %v8564_v53  ;;  %v8368_v55 = vpop.f32.mrb[89].mxu1  ;;  %v8191_v19 = vcombine.low %v8093_v16, %v8107_v7  ;;  %v13674_v8 = vcombine.high %v8093_v16, %v8107_v7  ;;  %v8255_v44 = vrot.slane %v8239_v48, %v15136_v13 }
0x1a61   :  { %v16514_v4 = vrot.slane %v8189_v46, %v15136_v13  ;;  %v16517_v39 = vrot.slane %v13673_v59, %v15136_v13  ;;  %v14381_v10 = vpop.f32.mrb[90].mxu1  ;;  %v8248_v47 = vrot.slane %v8238_v62, %v15136_v13  ;;  %v8686_v6 = vcombine.high %v16511_v28, %v16511_v28 }
0x1a62   :  { %v8371_v21 = vpop.f32.mrb[91].mxu1  ;;  %v16527_v27 = vrot.slane %v8191_v19, %v15136_v13  ;;  %v16530_v33 = vrot.slane %v13674_v8, %v15136_v13  ;;  %v8581_v5 = vcombine.high %v8565_v24, %v8565_v24  ;;  %v16532_v57 = vcombine.low %v8262_v32, %v8269_v45 }
0x1a63   :  { %v16534_v9 = vcombine.low %v8248_v47, %v8255_v44  ;;  %v8693_v50 = vrot.slane %v16511_v28, %v15136_v13  ;;  %v8588_v36 = vrot.slane %v8565_v24, %v15136_v13  ;;  %v8221_v2 = vcombine.low %v16514_v4, %v16517_v39 }
0x1a64   :  { %v8595_v35 = vrot.slane %v8581_v5, %v15136_v13  ;;  %v8568_v38 = vadd.f32 %v13691_v52, %v8567_v29  ;;  %v8377_v14 = vadd.f32 %v14380_v23, %v13681_v22  ;;  %v8222_v11 = vcombine.low %v16527_v27, %v16530_v33 }
0x1a65   :  { %v8278_v60 = vrot.slane %v16534_v9, %v15136_v13  ;;  %v16547_v12 = vrot.slane %v8686_v6, %v15136_v13  ;;  %v8596_v37 = vcombine.high %v8588_v36, %v8588_v36  ;;  %v8604_v43 = vrot.slane %v8588_v36, %v15136_v13 }
0x1a66   :  { %v8597_v26 = vcombine.high %v8595_v35, %v8595_v35  ;;  %v8630_v17 = vcombine.high %v8568_v38, %v8568_v38  ;;  %v8637_v20 = vrot.slane %v8568_v38, %v15136_v13  ;;  %v8611_v52 = vrot.slane %v8595_v35, %v15136_v13 }
0x1a67   :  { %v14396_v58 = vpop.f32.mrb[92].mxu1  ;;  %v8618_v42 = vrot.slane %v8596_v37, %v15136_v13  ;;  %v16554_v15 = vrot.slane %v8377_v14, %v15136_v13  ;;  %v8369_v61 = vadd.f32 %v13681_v22, %v8368_v55  ;;  %v8372_v25 = vadd.f32 %v13681_v22, %v8371_v21 }
0x1a68   :  { %v16556_v18 = vpop.f32.mrb[93].mxu1  ;;  %v8625_v31 = vrot.slane %v8597_v26, %v15136_v13  ;;  %v8644_v40 = vrot.slane %v8630_v17, %v15136_v13  ;;  %v8645_v41 = vcombine.high %v8637_v20, %v8637_v20  ;;  %v16561_v49 = vrot.slane %v8637_v20, %v15136_v13 }
0x1a69   :  { %v14397_v53 = vpop.f32.mrb[94].mxu1  ;;  %v9029_v48 = vcombine.low %v8604_v43, %v8618_v42  ;;  %v13708_v16 = vcombine.high %v8604_v43, %v8618_v42  ;;  %v8490_v56 = vcombine.high %v16554_v15, %v16554_v15  ;;  %v9147_v24 = vrot.slane %v16547_v12, %v15136_v13 }
0x1a6a   :  { %v16565_v7 = vpop.f32.mrb[95].mxu1  ;;  %v9031_v46 = vcombine.low %v8611_v52, %v8625_v31  ;;  %v13709_v59 = vcombine.high %v8611_v52, %v8625_v31  ;;  %v8646_v62 = vcombine.high %v8644_v40, %v8644_v40  ;;  %v8660_v29 = vrot.slane %v8644_v40, %v15136_v13 }
0x1a6b   :  { %v16569_v23 = vrot.slane %v9029_v48, %v15136_v13  ;;  %v16572_v32 = vrot.slane %v13708_v16, %v15136_v13  ;;  %v8667_v45 = vrot.slane %v8645_v41, %v15136_v13  ;;  %v8675_v28 = vcombine.high %v16561_v49, %v16561_v49 }
0x1a6c   :  { %v8674_v55 = vrot.slane %v8646_v62, %v15136_v13  ;;  %v8676_v19 = vcombine.high %v8660_v29, %v8660_v29  ;;  %v8497_v8 = vrot.slane %v16554_v15, %v15136_v13  ;;  %v16583_v10 = vrot.slane %v9031_v46, %v15136_v13 }
0x1a6d   :  { %v16586_v44 = vrot.slane %v13709_v59, %v15136_v13  ;;  %v8677_v47 = vcombine.high %v8667_v45, %v8667_v45  ;;  %v16588_v6 = vcombine.low %v8667_v45, %v8675_v28  ;;  %v8504_v5 = vrot.slane %v8490_v56, %v15136_v13 }
0x1a6e   :  { %v8678_v22 = vcombine.high %v8674_v55, %v8674_v55  ;;  %v16590_v21 = vcombine.low %v8674_v55, %v8676_v19  ;;  %v8385_v36 = vcombine.high %v8369_v61, %v8369_v61  ;;  %v9061_v35 = vcombine.low %v16569_v23, %v16572_v32 }
0x1a6f   :  { %v16595_v38 = vcombine.low %v8677_v47, %v8660_v29  ;;  %v8392_v14 = vrot.slane %v8369_v61, %v15136_v13  ;;  %v8434_v37 = vcombine.high %v8372_v25, %v8372_v25  ;;  %v9084_v26 = vrot.slane %v16561_v49, %v15136_v13  ;;  %v13701_v61 = vld [vmem:[%s17390_s14 + $0x5] ss:$0 sm:$0xff] }
0x1a70   :  { %v16600_v43 = vcombine.low %v8678_v22, %v8693_v50  ;;  %v9102_v17 = vrot.slane %v16588_v6, %v15136_v13  ;;  %v8399_v20 = vrot.slane %v8385_v36, %v15136_v13  ;;  %v9116_v52 = vrot.slane %v16590_v21, %v15136_v13 }
0x1a71   :  { %v9015_v42 = vrot.slane %v8504_v5, %v15136_v13  ;;  %v8400_v15 = vcombine.high %v8392_v14, %v8392_v14  ;;  %v8441_v31 = vrot.slane %v8372_v25, %v15136_v13  ;;  %v9109_v50 = vrot.slane %v16595_v38, %v15136_v13 }
0x1a72   :  { %v8401_v40 = vcombine.high %v8399_v20, %v8399_v20  ;;  %v8408_v41 = vrot.slane %v8392_v14, %v15136_v13  ;;  %v8448_v53 = vrot.slane %v8434_v37, %v15136_v13  ;;  %v8415_v48 = vrot.slane %v8399_v20, %v15136_v13 }
0x1a73   :  { %v8422_v16 = vrot.slane %v8400_v15, %v15136_v13  ;;  %v8449_v56 = vcombine.high %v8441_v31, %v8441_v31  ;;  %v8457_v46 = vrot.slane %v8441_v31, %v15136_v13  ;;  %v8769_v29 = vadd.f32 %v14396_v58, %v13701_v61 }
0x1a74   :  { %v8429_v25 = vrot.slane %v8401_v40, %v15136_v13  ;;  %v8450_v59 = vcombine.high %v8448_v53, %v8448_v53  ;;  %v8464_v62 = vrot.slane %v8448_v53, %v15136_v13  ;;  %v8761_v15 = vadd.f32 %v13701_v61, %v16556_v18 }
0x1a75   :  { %v8897_v45 = vcombine.low %v8408_v41, %v8422_v16  ;;  %v13706_v28 = vcombine.high %v8408_v41, %v8422_v16  ;;  %v8471_v55 = vrot.slane %v8449_v56, %v15136_v13  ;;  %v8479_v19 = vcombine.high %v8457_v46, %v8457_v46 }
0x1a76   :  { %v8899_v47 = vcombine.low %v8415_v48, %v8429_v25  ;;  %v13707_v22 = vcombine.high %v8415_v48, %v8429_v25  ;;  %v8478_v5 = vrot.slane %v8450_v59, %v15136_v13  ;;  %v8480_v36 = vcombine.high %v8464_v62, %v8464_v62 }
0x1a77   :  { %v8907_v14 = vrot.slane %v8897_v45, %v15136_v13  ;;  %v8914_v37 = vrot.slane %v13706_v28, %v15136_v13  ;;  %v8481_v20 = vcombine.high %v8471_v55, %v8471_v55  ;;  %v8960_v41 = vcombine.low %v8471_v55, %v8479_v19 }
0x1a78   :  { %v8921_v31 = vrot.slane %v8899_v47, %v15136_v13  ;;  %v8928_v58 = vrot.slane %v13707_v22, %v15136_v13  ;;  %v8482_v40 = vcombine.high %v8478_v5, %v8478_v5  ;;  %v16629_v53 = vrot.slane %v9015_v42, %v15136_v13 }
0x1a79   :  { %v8929_v48 = vcombine.low %v8907_v14, %v8914_v37  ;;  %v8961_v16 = vcombine.low %v8481_v20, %v8464_v62  ;;  %v8962_v56 = vcombine.low %v8478_v5, %v8480_v36  ;;  %v8952_v59 = vrot.slane %v8457_v46, %v15136_v13 }
0x1a7a   :  { %v8930_v25 = vcombine.low %v8921_v31, %v8928_v58  ;;  %v8963_v45 = vcombine.low %v8482_v40, %v8497_v8  ;;  %v16633_v28 = vrot.slane %v8769_v29, %v15136_v13  ;;  %v8970_v47 = vrot.slane %v8960_v41, %v15136_v13 }
0x1a7b   :  { %v8937_v18 = vrot.slane %v8929_v48, %v15136_v13  ;;  %v8977_v22 = vrot.slane %v8961_v16, %v15136_v13  ;;  %v8777_v55 = vcombine.high %v8761_v15, %v8761_v15  ;;  %v8984_v19 = vrot.slane %v8962_v56, %v15136_v13 }
0x1a7c   :  { %v8944_v42 = vrot.slane %v8930_v25, %v15136_v13  ;;  %v8991_v62 = vrot.slane %v8963_v45, %v15136_v13  ;;  %v8882_v46 = vcombine.high %v16633_v28, %v16633_v28  ;;  %v8784_v29 = vrot.slane %v8761_v15, %v15136_v13 }
0x1a7d   :  { %v16643_v8 = vcombine.low %v8970_v47, %v8977_v22  ;;  %v8791_v5 = vrot.slane %v8777_v55, %v15136_v13  ;;  %v8764_v36 = vadd.f32 %v13701_v61, %v16565_v7  ;;  %v8959_v37 = vrot.slane %v8952_v59, %v15136_v13 }
0x1a7e   :  { %v8945_v14 = vcombine.low %v8937_v18, %v8944_v42  ;;  %v16649_v20 = vcombine.low %v8984_v19, %v8991_v62  ;;  %v9062_v31 = vcombine.low %v16583_v10, %v16586_v44  ;;  %v8889_v58 = vrot.slane %v16633_v28, %v15136_v13 }
0x1a7f   :  { %v16656_v40 = vrot.slane %v8882_v46, %v15136_v13  ;;  %v8792_v41 = vcombine.high %v8784_v29, %v8784_v29  ;;  %v8793_v15 = vcombine.high %v8791_v5, %v8791_v5  ;;  %v9000_v48 = vrot.slane %v16643_v8, %v15136_v13 }
0x1a80   :  { %v16660_v7 = vpack.c.bf16 %v8959_v37, %v8945_v14  ;;  %v8800_v61 = vrot.slane %v8784_v29, %v15136_v13  ;;  %v8826_v16 = vcombine.high %v8764_v36, %v8764_v36  ;;  %v8807_v56 = vrot.slane %v8791_v5, %v15136_v13 }
0x1a81   :  { %v8814_v10 = vrot.slane %v8792_v41, %v15136_v13  ;;  %v8821_v44 = vrot.slane %v8793_v15, %v15136_v13  ;;  %v8833_v25 = vrot.slane %v8764_v36, %v15136_v13  ;;  %v9069_v45 = vrot.slane %v9061_v35, %v15136_v13 }
0x1a82   :  { %v8840_v59 = vrot.slane %v8826_v16, %v15136_v13  ;;  %v9076_v28 = vrot.slane %v9062_v31, %v15136_v13  ;;  %v9091_v18 = vrot.slane %v9084_v26, %v15136_v13  ;;  %v8229_v6 = vrot.slane %v8221_v2, %v15136_v13 }
0x1a83   :  { %v9301_v47 = vcombine.low %v8800_v61, %v8814_v10  ;;  %v13712_v22 = vcombine.high %v8800_v61, %v8814_v10  ;;  %v9303_v55 = vcombine.low %v8807_v56, %v8821_v44  ;;  %v13713_v42 = vcombine.high %v8807_v56, %v8821_v44 }
0x1a84   :  { %v8841_v19 = vcombine.high %v8833_v25, %v8833_v25  ;;  %v8842_v62 = vcombine.high %v8840_v59, %v8840_v59  ;;  %v8849_v46 = vrot.slane %v8833_v25, %v15136_v13  ;;  %v8856_v8 = vrot.slane %v8840_v59, %v15136_v13 }
0x1a85   :  { %v9311_v23 = vrot.slane %v9301_v47, %v15136_v13  ;;  %v9318_v32 = vrot.slane %v13712_v22, %v15136_v13  ;;  %v9325_v35 = vrot.slane %v9303_v55, %v15136_v13  ;;  %v9332_v29 = vrot.slane %v13713_v42, %v15136_v13 }
0x1a86   :  { %v8863_v49 = vrot.slane %v8841_v19, %v15136_v13  ;;  %v8870_v26 = vrot.slane %v8842_v62, %v15136_v13  ;;  %v8871_v5 = vcombine.high %v8849_v46, %v8849_v46  ;;  %v8872_v36 = vcombine.high %v8856_v8, %v8856_v8 }
0x1a87   :  { %v9333_v14 = vcombine.low %v9311_v23, %v9318_v32  ;;  %v9334_v37 = vcombine.low %v9325_v35, %v9332_v29  ;;  %v9356_v31 = vrot.slane %v8849_v46, %v15136_v13  ;;  %v9077_v41 = vcombine.low %v9069_v45, %v9076_v28 }
0x1a88   :  { %v8873_v15 = vcombine.high %v8863_v49, %v8863_v49  ;;  %v8874_v61 = vcombine.high %v8870_v26, %v8870_v26  ;;  %v9364_v16 = vcombine.low %v8863_v49, %v8871_v5  ;;  %v9366_v56 = vcombine.low %v8870_v26, %v8872_v36 }
0x1a89   :  { %v9419_v10 = vrot.slane %v16656_v40, %v15136_v13  ;;  %v9341_v44 = vrot.slane %v9333_v14, %v15136_v13  ;;  %v9159_v25 = vpack.c.bf16 %v9091_v18, %v9077_v41  ;;  %v9123_v59 = vrot.slane %v16600_v43, %v15136_v13 }
0x1a8a   :  { %v9363_v47 = vrot.slane %v9356_v31, %v15136_v13  ;;  %v9365_v22 = vcombine.low %v8873_v15, %v8856_v8  ;;  %v9367_v55 = vcombine.low %v8874_v61, %v8889_v58  ;;  %v9374_v42 = vrot.slane %v9364_v16, %v15136_v13 }
0x1a8b   :  { %v9388_v45 = vrot.slane %v9366_v56, %v15136_v13  ;;  %v9165_v28 = vsel %vm1247_vm8, %v9159_v25, 0  ;;  %v9124_v40 = vcombine.low %v9102_v17, %v9109_v50  ;;  %v9125_v43 = vcombine.low %v9116_v52, %v9123_v59 }
0x1a8c   :  { %v9381_v18 = vrot.slane %v9365_v22, %v15136_v13  ;;  %v9395_v58 = vrot.slane %v9367_v55, %v15136_v13  ;;  %14399 = vmatpush3.bf16.xpose.msra.mxu0 %v9165_v28  ;;  %v9007_v19 = vrot.slane %v16649_v20, %v15136_v13  ;;  %v9348_v62 = vrot.slane %v9334_v37, %v15136_v13 }
0x1a8d   :  { %v9132_v38 = vrot.slane %v9124_v40, %v15136_v13  ;;  %v9139_v46 = vrot.slane %v9125_v43, %v15136_v13  ;;  %14410 = vmatprep.subr.bf16.mxu0 %v14870_v1  ;;  %v8236_v21 = vrot.slane %v8222_v11, %v15136_v13  ;;  %v9154_v23 = vrot.slane %v9147_v24, %v15136_v13 }
0x1a8e   :  { %v9396_v17 = vcombine.low %v9374_v42, %v9381_v18  ;;  %v9397_v52 = vcombine.low %v9388_v45, %v9395_v58  ;;  %v9008_v50 = vcombine.low %v9000_v48, %v9007_v19  ;;  %v9349_v20 = vcombine.low %v9341_v44, %v9348_v62 }
0x1a8f   :  { %v9140_v8 = vcombine.low %v9132_v38, %v9139_v46  ;;  %v8237_v32 = vcombine.low %v8229_v6, %v8236_v21  ;;  %v8285_v4 = vrot.slane %v16532_v57, %v15136_v13  ;;  %v9426_v35 = vrot.slane %v9419_v10, %v15136_v13  ;;  %v13675_v6 = vld [vmem:[%s17391_s15 + $0x10] sm:$0xf] }
0x1a90   :  { %v9028_v39 = vpack.c.bf16 %v16629_v53, %v9008_v50  ;;  %v9431_v2 = vpack.c.bf16 %v9363_v47, %v9349_v20  ;;  %v9404_v27 = vrot.slane %v9396_v17, %v15136_v13  ;;  %v9411_v33 = vrot.slane %v9397_v52, %v15136_v13 }
0x1a91   :  { %v9160_v11 = vpack.c.bf16 %v9154_v23, %v9140_v8  ;;  %v8286_v48 = vcombine.low %v8278_v60, %v8285_v4 }
0x1a92   :  { %v9437_v12 = vand.u32 %v9431_v2, %v15251_v34  ;;  %v9412_v24 = vcombine.low %v9404_v27, %v9411_v33 }
0x1a93   :  { %v9212_v29 = vsel %vm1247_vm8, %v9160_v11, 0  ;;  %14401 = vmatmul.mubr.msk.bf16.vlgmr.msra.gmra.mrb[92].mxu0 %vm1247_vm8, %v16660_v7  ;;  %v16737_v57 = vpack.c.bf16 %v8286_v48, %v8237_v32  ;;  %v8294_v11 = vrot.slane %v16504_v51, %v15136_v13  ;;  %v14640_v51 = vld [vmem:[%s17433_s29 + $0x68] sm:$0xff]  }
0x1a94   :  { %14405 = vmatpush3.bf16.xpose.msra.mxu1 %v9212_v29  ;;  %14411 = vmatpush3.bf16.msra.mxu0 %v9437_v12  ;;  %v9432_v53 = vpack.c.bf16 %v9426_v35, %v9412_v24  ;;  %v9841_v35 = vsel %vm1525_vm6, %v13675_v6, 0  ;;  %v14639_v12 = vld [vmem:[%s17433_s29 + $0x60] sm:$0xff]  }
0x1a95   :  { %14416 = vmatprep.subr.bf16.mxu1 %v14870_v1  ;;  %14412 = vmatprep.mubr.msk.bf16.mxu0 %vm14871_vm0, %v14870_v1  ;;  %v8301_v24 = vrot.slane %v8294_v11, %v15136_v13 }
0x1a96   :  { %v9484_v9 = vand.u32 %v9432_v53, %v15251_v34 }
0x1a97   :  { %v8306_v29 = vpack.c.bf16 %v8301_v24, %v8301_v24 }
0x1a9b   :  { %14407 = vmatmul.mubr.msk.bf16.vlgmr.msra.gmra.mrb[96].mxu1 %vm1247_vm8, %v9028_v39 }
0x1a9c   :  { %14417 = vmatpush3.bf16.msra.mxu1 %v9484_v9  ;;  %14418 = vmatprep.mubr.msk.bf16.mxu1 %vm14871_vm0, %v14870_v1  ;;  %v16788_v9 = vld [vmem:[%s17432_s28 + $0x60] sm:$0xff]  }
0x1a9d   :  { %14575 = vmatprep.subr.msk.bf16.mxu1 %vm1525_vm6, %v13675_v6 }
0x1b66   :  { %v9201_v60 = vpop.f32.mrb[92].mxu0 }
0x1b67   :  { %v14402_v7 = vpop.f32.mrb[93].mxu0  ;;  %v9255_v49 = vsel %vm1342_vm9, %v9201_v60, -inf }
0x1b68   :  { %9256 = vmax.xlane.f32.xlu0 %v9255_v49  ;;  %v9204_v26 = vpop.f32.mrb[94].mxu0 }
0x1b69   :  { %v14403_v5 = vpop.f32.mrb[95].mxu0  ;;  %v9258_v36 = vsel %vm1346_vm10, %v9204_v26, -inf }
0x1b6a   :  { %9259 = vmax.xlane.f32.xlu1 %v9258_v36 }
0x1b6e   :  { %v9248_v14 = vpop.f32.mrb[96].mxu1 }
0x1b6f   :  { %v14408_v37 = vpop.f32.mrb[97].mxu1  ;;  %v9261_v31 = vsel %vm1342_vm9, %v9248_v14, -inf }
0x1b70   :  { %v9251_v41 = vpop.f32.mrb[98].mxu1  ;;  %9262 = vmax.xlane.f32.xlu0 %v9261_v31 }
0x1b71   :  { %v14409_v15 = vpop.f32.mrb[99].mxu1  ;;  %v9264_v61 = vsel %vm1346_vm10, %v9251_v41, -inf }
0x1b72   :  { %9265 = vmax.xlane.f32.xlu1 %v9264_v61 }
0x1bf5   :  { %v9257_v16 = vpop.xlane.xlu0 %9256 }
0x1bf6   :  { %v9267_v56 = vsub.f32 %v9201_v60, %v9257_v16 }
0x1bf7   :  { %v9260_v10 = vpop.xlane.xlu1 %9259 }
0x1bf8   :  { %v9271_v44 = vmul.f32 1.442695, %v9267_v56  ;;  %v9268_v25 = vsub.f32 %v9204_v26, %v9260_v10 }
0x1bfa   :  { %14765 = vpow2.f32 %v9271_v44  ;;  %v9273_v59 = vmul.f32 1.442695, %v9268_v25 }
0x1bfc   :  { %14767 = vpow2.f32 %v9273_v59 }
0x1bfd   :  { %v9263_v47 = vpop.xlane.xlu0 %9262 }
0x1bfe   :  { %v9269_v22 = vsub.f32 %v9248_v14, %v9263_v47 }
0x1bff   :  { %v9266_v55 = vpop.xlane.xlu1 %9265 }
0x1c00   :  { %v9275_v42 = vmul.f32 1.442695, %v9269_v22  ;;  %v9270_v45 = vsub.f32 %v9251_v41, %v9266_v55 }
0x1c02   :  { %14769 = vpow2.f32 %v9275_v42  ;;  %v9277_v28 = vmul.f32 1.442695, %v9270_v45 }
0x1c04   :  { %v14766_v40 = vpop.eup %14765  ;;  %14771 = vpow2.f32 %v9277_v28 }
0x1c05   :  { %v9279_v43 = vsel %vm1342_vm9, %v14766_v40, 0.0 }
0x1c06   :  { %v14768_v18 = vpop.eup %14767  ;;  %9280 = vadd.xlane.f32.xlu0 %v9279_v43 }
0x1c07   :  { %v9282_v58 = vsel %vm1346_vm10, %v14768_v18, 0.0 }
0x1c08   :  { %9283 = vadd.xlane.f32.xlu1 %v9282_v58 }
0x1c0c   :  { %v14770_v19 = vpop.eup %14769 }
0x1c0d   :  { %v9285_v62 = vsel %vm1342_vm9, %v14770_v19, 0.0 }
0x1c0e   :  { %v14772_v38 = vpop.eup %14771  ;;  %9286 = vadd.xlane.f32.xlu0 %v9285_v62 }
0x1c0f   :  { %v9288_v46 = vsel %vm1346_vm10, %v14772_v38, 0.0 }
0x1c10   :  { %9289 = vadd.xlane.f32.xlu1 %v9288_v46 }
0x1c93   :  { %v9281_v21 = vpop.xlane.xlu0 %9280 }
0x1c94   :  { %14773 = vrcp.f32 %v9281_v21 }
0x1c95   :  { %v9284_v17 = vpop.xlane.xlu1 %9283 }
0x1c96   :  { %14775 = vrcp.f32 %v9284_v17 }
0x1c9b   :  { %v9287_v52 = vpop.xlane.xlu0 %9286 }
0x1c9c   :  { %14777 = vrcp.f32 %v9287_v52 }
0x1c9d   :  { %v9290_v50 = vpop.xlane.xlu1 %9289 }
0x1c9e   :  { %v14774_v20 = vpop.eup %14773  ;;  %14779 = vrcp.f32 %v9290_v50 }
0x1c9f   :  { %v9295_v23 = vmul.f32 %v14774_v20, %v14766_v40 }
0x1ca0   :  { %v14776_v8 = vpop.eup %14775 }
0x1ca1   :  { %v9296_v32 = vmul.f32 %v14776_v8, %v14768_v18 }
0x1ca3   :  { %v9299_v4 = vpack.c.bf16 %v9296_v32, %v9295_v23 }
0x1ca5   :  { %14413 = vmatmul.mubr.msk.bf16.vlgmr.msra.gmra.mrb[96].mxu0 %vm1342_vm9, %v9299_v4 }
0x1ca6   :  { %v14778_v39 = vpop.eup %14777 }
0x1ca7   :  { %v9297_v27 = vmul.f32 %v14778_v39, %v14770_v19 }
0x1ca8   :  { %v14780_v2 = vpop.eup %14779 }
0x1ca9   :  { %v9298_v33 = vmul.f32 %v14780_v2, %v14772_v38 }
0x1cab   :  { %v9300_v48 = vpack.c.bf16 %v9298_v33, %v9297_v27 }
0x1cad   :  { %14419 = vmatmul.mubr.msk.bf16.vlgmr.msra.gmra.mrb[100].mxu1 %vm1342_vm9, %v9300_v48 }
0x1cae   :  { %14430 = vmatprep.mubr.msk.bf16.mxu1 %vm1247_vm8, %v16737_v57  ;;  %14429 = vmatpush3.bf16.msra.mxu1 %v9841_v35  ;;  %v13718_v57 = vld [vmem:[%s17391_s15 + $0x14] sm:$0xf] }
0x1caf   :  { %14442 = vmatprep.subr.bf16.mxu1 %v14639_v12  ;;  %14574 = vmatprep.subr.msk.bf16.mxu0 %vm1525_vm6, %v13718_v57  ;;  %v9784_v53 = vsel %vm1525_vm6, %v13718_v57, 0 }
0x1cb0   :  { %14423 = vmatpush3.bf16.msra.mxu0 %v9784_v53 }
0x1cb1   :  { %14434 = vmatprep.subr.bf16.mxu0 %v16788_v9 }
0x1cb5   :  { %14431 = vmatmul.mubr.msk.bf16.vlgmr.msra.gmra.mrb[104].mxu1 %vm1247_vm8, %v8306_v29 }
0x1cb6   :  { %14443 = vmatpush3.bf16.msra.mxu1 %v14639_v12  ;;  %14446 = vmatprep.mubr.msk.bf16.mxu1 %vm129_vm2, %v16256_v54 }
0x1cb7   :  { %14444 = vmatprep.subr.bf16.mxu1 %v14640_v51 }
0x1cba   :  { %14445 = vmatpush3.bf16.msra.mxu1 %v14640_v51 }
0x1cbb   :  { %14458 = vmatprep.subr.bf16.mxu1 %v14870_v1 }
0x1cbd   :  { %14447 = vmatmul.mubr.msk.bf16.vlgmr.msra.gmra.mrb[108].mxu1 %vm129_vm2, %v16262_v3 }
0x1cbe   :  { %14460 = vmatprep.mubr.msk.bf16.mxu1 %vm14871_vm0, %v14870_v1 }
0x1d78   :  { %v9473_v60 = vpop.f32.mrb[96].mxu0 }
0x1d79   :  { %v9531_v7 = vcombine.high %v9473_v60, %v9473_v60  ;;  %v9538_v49 = vrot.slane %v9473_v60, %v15136_v13  ;;  %v14414_v26 = vpop.f32.mrb[97].mxu0 }
0x1d7a   :  { %v9476_v5 = vpop.f32.mrb[98].mxu0 }
0x1d7b   :  { %v9545_v36 = vrot.slane %v9531_v7, %v15136_v13  ;;  %v9546_v14 = vcombine.high %v9538_v49, %v9538_v49  ;;  %v14415_v37 = vpop.f32.mrb[99].mxu0  ;;  %v9554_v56 = vrot.slane %v9538_v49, %v15136_v13  ;;  %v9586_v25 = vrot.slane %v9476_v5, %v15136_v13 }
0x1d7d   :  { %v9547_v31 = vcombine.high %v9545_v36, %v9545_v36  ;;  %v9561_v41 = vrot.slane %v9545_v36, %v15136_v13  ;;  %v9568_v15 = vrot.slane %v9546_v14, %v15136_v13  ;;  %v9593_v62 = vrot.slane %v9586_v25, %v15136_v13  ;;  %v13738_v14 = vld [vmem:[%s17388_s12 + $0x6] ss:$0 sm:$0xff] }
0x1d7f   :  { %v9575_v61 = vrot.slane %v9547_v31, %v15136_v13  ;;  %v9657_v42 = vcombine.low %v9554_v56, %v9568_v15  ;;  %v13716_v45 = vcombine.high %v9554_v56, %v9568_v15 }
0x1d80   :  { %v9520_v16 = vpop.f32.mrb[100].mxu1 }
0x1d81   :  { %v9659_v10 = vcombine.low %v9561_v41, %v9575_v61  ;;  %v13717_v44 = vcombine.high %v9561_v41, %v9575_v61  ;;  %v14420_v59 = vpop.f32.mrb[101].mxu1  ;;  %v9594_v47 = vcombine.high %v9520_v16, %v9520_v16  ;;  %v9601_v22 = vrot.slane %v9520_v16, %v15136_v13 }
0x1d82   :  { %v9523_v55 = vpop.f32.mrb[102].mxu1  ;;  %v9667_v52 = vrot.slane %v9657_v42, %v15136_v13  ;;  %v9674_v50 = vrot.slane %v13716_v45, %v15136_v13 }
0x1d83   :  { %v14421_v28 = vpop.f32.mrb[103].mxu1  ;;  %v9608_v40 = vrot.slane %v9594_v47, %v15136_v13  ;;  %v9609_v43 = vcombine.high %v9601_v22, %v9601_v22  ;;  %v9617_v18 = vrot.slane %v9601_v22, %v15136_v13  ;;  %v9681_v58 = vrot.slane %v9659_v10, %v15136_v13 }
0x1d84   :  { %v9688_v19 = vrot.slane %v13717_v44, %v15136_v13  ;;  %v9649_v38 = vrot.slane %v9523_v55, %v15136_v13  ;;  %v9689_v51 = vcombine.low %v9667_v52, %v9674_v50 }
0x1d85   :  { %v9610_v46 = vcombine.high %v9608_v40, %v9608_v40  ;;  %v9624_v6 = vrot.slane %v9608_v40, %v15136_v13  ;;  %v9631_v21 = vrot.slane %v9609_v43, %v15136_v13  ;;  %v9639_v17 = vcombine.high %v9617_v18, %v9617_v18  ;;  %v14642_v40 = vld [vmem:[%s17432_s28 + $0x68] sm:$0xff]  }
0x1d86   :  { %v9706_v20 = vcombine.low %v9593_v62, %v9617_v18  ;;  %v9690_v2 = vcombine.low %v9681_v58, %v9688_v19  ;;  %v9656_v33 = vrot.slane %v9649_v38, %v15136_v13  ;;  %v9697_v31 = vrot.slane %v9689_v51, %v15136_v13 }
0x1d87   :  { %v9638_v8 = vrot.slane %v9610_v46, %v15136_v13  ;;  %v9640_v23 = vcombine.high %v9624_v6, %v9624_v6  ;;  %v9641_v32 = vcombine.high %v9631_v21, %v9631_v21  ;;  %v9707_v4 = vcombine.low %v9631_v21, %v9639_v17 }
0x1d88   :  { %v16810_v39 = vpop.f32.mrb[104].mxu1  ;;  %v9716_v27 = vrot.slane %v9706_v20, %v15136_v13  ;;  %v9704_v36 = vrot.slane %v9690_v2, %v15136_v13  ;;  %v14643_v20 = vld [vmem:[%s17389_s13 + $0x60] sm:$0xff]  }
0x1d89   :  { %v16814_v11 = vpop.f32.mrb[105].mxu1  ;;  %v9708_v48 = vcombine.low %v9641_v32, %v9624_v6  ;;  %v9709_v35 = vcombine.low %v9638_v8, %v9640_v23  ;;  %v9723_v12 = vrot.slane %v9707_v4, %v15136_v13  ;;  %v9642_v24 = vcombine.high %v9638_v8, %v9638_v8 }
0x1d8a   :  { %v14433_v29 = vpop.f32.mrb[106].mxu1  ;;  %v9705_v44 = vcombine.low %v9697_v31, %v9704_v36 }
0x1d8b   :  { %v16817_v57 = vpop.f32.mrb[107].mxu1  ;;  %v9730_v53 = vrot.slane %v9708_v48, %v15136_v13  ;;  %v9737_v60 = vrot.slane %v9709_v35, %v15136_v13  ;;  %v9738_v7 = vcombine.low %v9716_v27, %v9723_v12  ;;  %v9755_v49 = vcombine.low %v9642_v24, %v9656_v33 }
0x1d8d   :  { %v9739_v26 = vcombine.low %v9730_v53, %v9737_v60  ;;  %v9762_v5 = vrot.slane %v9755_v49, %v15136_v13  ;;  %v9746_v41 = vrot.slane %v9738_v7, %v15136_v13  ;;  %v14644_v7 = vld [vmem:[%s17389_s13 + $0x68] sm:$0xff]  }
0x1d8f   :  { %v9753_v15 = vrot.slane %v9739_v26, %v15136_v13  ;;  %v9769_v61 = vrot.slane %v9762_v5, %v15136_v13 }
0x1d90   :  { %v14448_v37 = vpop.f32.mrb[108].mxu1 }
0x1d91   :  { %v10146_v16 = vpop.f32.mrb[109].mxu1  ;;  %v9754_v25 = vcombine.low %v9746_v41, %v9753_v15  ;;  %v10155_v59 = vadd.f32 %v14448_v37, %v13738_v14  ;;  %v9774_v28 = vpack.c.bf16 %v9769_v61, %v9769_v61 }
0x1d92   :  { %v10147_v56 = vadd.f32 %v13738_v14, %v10146_v16  ;;  %v14449_v10 = vpop.f32.mrb[110].mxu1 }
0x1d93   :  { %v10149_v47 = vpop.f32.mrb[111].mxu1  ;;  %v9773_v45 = vpack.c.bf16 %v9754_v25, %v9705_v44  ;;  %v10267_v19 = vrot.slane %v10155_v59, %v15136_v13 }
0x1d94   :  { %v10163_v22 = vcombine.high %v10147_v56, %v10147_v56  ;;  %v10170_v55 = vrot.slane %v10147_v56, %v15136_v13  ;;  %v10150_v42 = vadd.f32 %v13738_v14, %v10149_v47 }
0x1d95   :  { %14424 = vmatprep.mubr.msk.bf16.mxu0 %vm1247_vm8, %v9773_v45  ;;  %v10268_v2 = vcombine.high %v10267_v19, %v10267_v19  ;;  %v10275_v36 = vrot.slane %v10267_v19, %v15136_v13 }
0x1d96   :  { %v10177_v43 = vrot.slane %v10163_v22, %v15136_v13  ;;  %v10178_v18 = vcombine.high %v10170_v55, %v10170_v55  ;;  %v10212_v58 = vcombine.high %v10150_v42, %v10150_v42  ;;  %v10219_v62 = vrot.slane %v10150_v42, %v15136_v13  ;;  %14425 = vmatmul.mubr.msk.bf16.vlgmr.msra.gmra.mrb[100].mxu0 %vm1247_vm8, %v9774_v28 }
0x1d97   :  { %v10186_v46 = vrot.slane %v10170_v55, %v15136_v13  ;;  %14435 = vmatpush3.bf16.msra.mxu0 %v16788_v9  ;;  %14438 = vmatprep.mubr.msk.bf16.mxu0 %vm129_vm2, %v16256_v54  ;;  %v10282_v61 = vrot.slane %v10268_v2, %v15136_v13 }
0x1d98   :  { %v10179_v38 = vcombine.high %v10177_v43, %v10177_v43  ;;  %v10200_v6 = vrot.slane %v10178_v18, %v15136_v13  ;;  %v10226_v21 = vrot.slane %v10212_v58, %v15136_v13  ;;  %v10193_v17 = vrot.slane %v10177_v43, %v15136_v13  ;;  %14436 = vmatprep.subr.bf16.mxu0 %v14642_v40 }
0x1d99   :  { %v10227_v52 = vcombine.high %v10219_v62, %v10219_v62  ;;  %v10235_v50 = vrot.slane %v10219_v62, %v15136_v13  ;;  %v10729_v45 = vrot.slane %v10282_v61, %v15136_v13 }
0x1d9a   :  { %v10207_v8 = vrot.slane %v10179_v38, %v15136_v13  ;;  %v10611_v23 = vcombine.low %v10186_v46, %v10200_v6  ;;  %v13755_v32 = vcombine.high %v10186_v46, %v10200_v6  ;;  %v10228_v4 = vcombine.high %v10226_v21, %v10226_v21 }
0x1d9b   :  { %v10242_v9 = vrot.slane %v10226_v21, %v15136_v13  ;;  %v10249_v27 = vrot.slane %v10227_v52, %v15136_v13  ;;  %v10257_v33 = vcombine.high %v10235_v50, %v10235_v50  ;;  %14437 = vmatpush3.bf16.msra.mxu0 %v14642_v40  ;;  %v10666_v41 = vrot.slane %v10235_v50, %v15136_v13 }
0x1d9c   :  { %v10613_v48 = vcombine.low %v10193_v17, %v10207_v8  ;;  %v13756_v35 = vcombine.high %v10193_v17, %v10207_v8  ;;  %v10621_v12 = vrot.slane %v10611_v23, %v15136_v13  ;;  %v10628_v24 = vrot.slane %v13755_v32, %v15136_v13  ;;  %14450 = vmatprep.subr.bf16.mxu0 %v14643_v20  ;;  %v13728_v23 = vld [vmem:[%s17436_s7 + $0x6] ss:$0 sm:$0xff] }
0x1d9d   :  { %v10256_v29 = vrot.slane %v10228_v4, %v15136_v13  ;;  %v10258_v51 = vcombine.high %v10242_v9, %v10242_v9  ;;  %v10259_v53 = vcombine.high %v10249_v27, %v10249_v27  ;;  %v10674_v60 = vcombine.low %v10249_v27, %v10257_v33 }
0x1d9e   :  { %v10635_v49 = vrot.slane %v10613_v48, %v15136_v13  ;;  %v10642_v26 = vrot.slane %v13756_v35, %v15136_v13  ;;  %v10643_v5 = vcombine.low %v10621_v12, %v10628_v24  ;;  %14439 = vmatmul.mubr.msk.bf16.vlgmr.msra.gmra.mrb[104].mxu0 %vm129_vm2, %v16262_v3  ;;  %v10673_v42 = vrot.slane %v10666_v41, %v15136_v13 }
0x1d9f   :  { %v10260_v14 = vcombine.high %v10256_v29, %v10256_v29  ;;  %v10675_v37 = vcombine.low %v10259_v53, %v10242_v9  ;;  %v10676_v31 = vcombine.low %v10256_v29, %v10258_v51  ;;  %14451 = vmatpush3.bf16.msra.mxu0 %v14643_v20  ;;  %14454 = vmatprep.mubr.msk.bf16.mxu0 %vm129_vm2, %v16256_v54 }
0x1da0   :  { %v10644_v15 = vcombine.low %v10635_v49, %v10642_v26  ;;  %v10684_v56 = vrot.slane %v10674_v60, %v15136_v13  ;;  %14452 = vmatprep.subr.bf16.mxu0 %v14644_v7  ;;  %v10651_v44 = vrot.slane %v10643_v5, %v15136_v13  ;;  %v10736_v62 = vrot.slane %v10729_v45, %v15136_v13 }
0x1da1   :  { %v10677_v16 = vcombine.low %v10260_v14, %v10275_v36  ;;  %v10691_v10 = vrot.slane %v10675_v37, %v15136_v13  ;;  %v10698_v59 = vrot.slane %v10676_v31, %v15136_v13 }
0x1da2   :  { %v10658_v25 = vrot.slane %v10644_v15, %v15136_v13 }
0x1da3   :  { %v10705_v47 = vrot.slane %v10677_v16, %v15136_v13  ;;  %v10706_v22 = vcombine.low %v10684_v56, %v10691_v10  ;;  %14453 = vmatpush3.bf16.msra.mxu0 %v14644_v7 }
0x1da4   :  { %v10659_v55 = vcombine.low %v10651_v44, %v10658_v25  ;;  %14464 = vmatprep.subr.bf16.mxu0 %v14870_v1 }
0x1da5   :  { %v10707_v28 = vcombine.low %v10698_v59, %v10705_v47  ;;  %v10714_v43 = vrot.slane %v10706_v22, %v15136_v13  ;;  %v13748_v59 = vld [vmem:[%s17390_s14 + $0x6] ss:$0 sm:$0xff] }
0x1da6   :  { %v10741_v40 = vpack.c.bf16 %v10673_v42, %v10659_v55  ;;  %14455 = vmatmul.mubr.msk.bf16.vlgmr.msra.gmra.mrb[108].mxu0 %vm129_vm2, %v16262_v3 }
0x1da7   :  { %v10721_v18 = vrot.slane %v10707_v28, %v15136_v13  ;;  %14466 = vmatprep.mubr.msk.bf16.mxu0 %vm14871_vm0, %v14870_v1 }
0x1da8   :  { %v10747_v58 = vsel %vm1247_vm8, %v10741_v40, 0 }
0x1da9   :  { %14459 = vmatpush3.bf16.xpose.msra.mxu1 %v10747_v58  ;;  %v10722_v19 = vcombine.low %v10714_v43, %v10721_v18 }
0x1daa   :  { %14470 = vmatprep.subr.bf16.mxu1 %v14870_v1 }
0x1dab   :  { %v10742_v38 = vpack.c.bf16 %v10736_v62, %v10722_v19 }
0x1dad   :  { %v10794_v46 = vsel %vm1247_vm8, %v10742_v38, 0 }
0x1dae   :  { %14465 = vmatpush3.bf16.xpose.msra.mxu0 %v10794_v46 }
0x1daf   :  { %14476 = vmatprep.subr.bf16.mxu0 %v14870_v1 }
0x1e69   :  { %v14426_v6 = vpop.f32.mrb[100].mxu0 }
0x1e6a   :  { %v16889_v21 = vadd.f32 %v16810_v39, %v14426_v6  ;;  %v9820_v17 = vpop.f32.mrb[101].mxu0 }
0x1e6b   :  { %v16892_v52 = vadd.f32 %v16814_v11, %v9820_v17  ;;  %v14427_v50 = vpop.f32.mrb[102].mxu0 }
0x1e6c   :  { %v9823_v20 = vpop.f32.mrb[103].mxu0 }
0x1e6d   :  { %v16895_v8 = vadd.f32 %v16817_v57, %v9823_v20 }
0x1e71   :  { %v14440_v32 = vpop.f32.mrb[104].mxu0 }
0x1e72   :  { %v9959_v4 = vadd.f32 %v14440_v32, %v13728_v23  ;;  %v9950_v2 = vpop.f32.mrb[105].mxu0 }
0x1e73   :  { %v9951_v9 = vadd.f32 %v13728_v23, %v9950_v2  ;;  %v14441_v27 = vpop.f32.mrb[106].mxu0 }
0x1e74   :  { %v10071_v39 = vrot.slane %v9959_v4, %v15136_v13  ;;  %v9953_v33 = vpop.f32.mrb[107].mxu0 }
0x1e75   :  { %v9967_v48 = vcombine.high %v9951_v9, %v9951_v9  ;;  %v9974_v11 = vrot.slane %v9951_v9, %v15136_v13  ;;  %v9954_v35 = vadd.f32 %v13728_v23, %v9953_v33 }
0x1e76   :  { %v10072_v29 = vcombine.high %v10071_v39, %v10071_v39  ;;  %v10079_v46 = vrot.slane %v10071_v39, %v15136_v13 }
0x1e77   :  { %v9981_v12 = vrot.slane %v9967_v48, %v15136_v13  ;;  %v9982_v57 = vcombine.high %v9974_v11, %v9974_v11  ;;  %v10016_v24 = vcombine.high %v9954_v35, %v9954_v35  ;;  %v10023_v51 = vrot.slane %v9954_v35, %v15136_v13 }
0x1e78   :  { %v9990_v60 = vrot.slane %v9974_v11, %v15136_v13  ;;  %v16911_v56 = vrot.slane %v10072_v29, %v15136_v13 }
0x1e79   :  { %v9983_v53 = vcombine.high %v9981_v12, %v9981_v12  ;;  %v10004_v7 = vrot.slane %v9982_v57, %v15136_v13  ;;  %v10030_v49 = vrot.slane %v10016_v24, %v15136_v13  ;;  %v14456_v26 = vpop.f32.mrb[108].mxu0  ;;  %v9997_v5 = vrot.slane %v9981_v12, %v15136_v13 }
0x1e7a   :  { %v10031_v36 = vcombine.high %v10023_v51, %v10023_v51  ;;  %v10039_v14 = vrot.slane %v10023_v51, %v15136_v13  ;;  %v10342_v37 = vpop.f32.mrb[109].mxu0  ;;  %v10351_v38 = vadd.f32 %v14456_v26, %v13748_v59  ;;  %v10597_v50 = vrot.slane %v16911_v56, %v15136_v13 }
0x1e7b   :  { %v10011_v31 = vrot.slane %v9983_v53, %v15136_v13  ;;  %v10479_v41 = vcombine.low %v9990_v60, %v10004_v7  ;;  %v13753_v15 = vcombine.high %v9990_v60, %v10004_v7  ;;  %v10032_v61 = vcombine.high %v10030_v49, %v10030_v49  ;;  %v14457_v16 = vpop.f32.mrb[110].mxu0 }
0x1e7c   :  { %v10046_v10 = vrot.slane %v10030_v49, %v15136_v13  ;;  %v10053_v44 = vrot.slane %v10031_v36, %v15136_v13  ;;  %v10061_v25 = vcombine.high %v10039_v14, %v10039_v14  ;;  %v10345_v47 = vpop.f32.mrb[111].mxu0  ;;  %v10534_v18 = vrot.slane %v10039_v14, %v15136_v13 }
0x1e7d   :  { %v10481_v22 = vcombine.low %v9997_v5, %v10011_v31  ;;  %v13754_v55 = vcombine.high %v9997_v5, %v10011_v31  ;;  %v10489_v42 = vrot.slane %v10479_v41, %v15136_v13  ;;  %v10496_v45 = vrot.slane %v13753_v15, %v15136_v13 }
0x1e7e   :  { %v10060_v28 = vrot.slane %v10032_v61, %v15136_v13  ;;  %v10062_v40 = vcombine.high %v10046_v10, %v10046_v10  ;;  %v10063_v43 = vcombine.high %v10053_v44, %v10053_v44  ;;  %v10542_v23 = vcombine.low %v10053_v44, %v10061_v25 }
0x1e7f   :  { %v10503_v58 = vrot.slane %v10481_v22, %v15136_v13  ;;  %v10510_v19 = vrot.slane %v13754_v55, %v15136_v13  ;;  %v10511_v62 = vcombine.low %v10489_v42, %v10496_v45  ;;  %v10541_v32 = vrot.slane %v10534_v18, %v15136_v13 }
0x1e80   :  { %v10064_v6 = vcombine.high %v10060_v28, %v10060_v28  ;;  %v10544_v17 = vcombine.low %v10060_v28, %v10062_v40  ;;  %v10543_v4 = vcombine.low %v10063_v43, %v10046_v10  ;;  %v10343_v9 = vadd.f32 %v13748_v59, %v10342_v37 }
0x1e81   :  { %v10512_v20 = vcombine.low %v10503_v58, %v10510_v19  ;;  %v10519_v27 = vrot.slane %v10511_v62, %v15136_v13  ;;  %v10463_v48 = vrot.slane %v10351_v38, %v15136_v13  ;;  %v10346_v11 = vadd.f32 %v13748_v59, %v10345_v47 }
0x1e82   :  { %v10545_v2 = vcombine.low %v10064_v6, %v10079_v46  ;;  %v10566_v39 = vrot.slane %v10544_v17, %v15136_v13  ;;  %v10359_v12 = vcombine.high %v10343_v9, %v10343_v9  ;;  %v10366_v57 = vrot.slane %v10343_v9, %v15136_v13 }
0x1e83   :  { %v10526_v33 = vrot.slane %v10512_v20, %v15136_v13  ;;  %v10552_v29 = vrot.slane %v10542_v23, %v15136_v13  ;;  %v10408_v51 = vcombine.high %v10346_v11, %v10346_v11  ;;  %v10415_v53 = vrot.slane %v10346_v11, %v15136_v13 }
0x1e84   :  { %v10573_v35 = vrot.slane %v10545_v2, %v15136_v13  ;;  %v10559_v60 = vrot.slane %v10543_v4, %v15136_v13  ;;  %v10373_v49 = vrot.slane %v10359_v12, %v15136_v13  ;;  %v10374_v26 = vcombine.high %v10366_v57, %v10366_v57 }
0x1e85   :  { %v10527_v24 = vcombine.low %v10519_v27, %v10526_v33  ;;  %v10464_v36 = vcombine.high %v10463_v48, %v10463_v48  ;;  %v10471_v14 = vrot.slane %v10463_v48, %v15136_v13  ;;  %v10422_v37 = vrot.slane %v10408_v51, %v15136_v13 }
0x1e86   :  { %v10575_v7 = vcombine.low %v10566_v39, %v10573_v35  ;;  %v10375_v31 = vcombine.high %v10373_v49, %v10373_v49  ;;  %v10382_v41 = vrot.slane %v10366_v57, %v15136_v13  ;;  %v10396_v15 = vrot.slane %v10374_v26, %v15136_v13 }
0x1e87   :  { %v10609_v5 = vpack.c.bf16 %v10541_v32, %v10527_v24  ;;  %v10423_v61 = vcombine.high %v10415_v53, %v10415_v53  ;;  %v10389_v16 = vrot.slane %v10373_v49, %v15136_v13  ;;  %v10424_v56 = vcombine.high %v10422_v37, %v10422_v37 }
0x1e88   :  { %v10431_v10 = vrot.slane %v10415_v53, %v15136_v13  ;;  %v10438_v44 = vrot.slane %v10422_v37, %v15136_v13  ;;  %v10403_v25 = vrot.slane %v10375_v31, %v15136_v13  ;;  %v10883_v59 = vcombine.low %v10382_v41, %v10396_v15 }
0x1e89   :  { %14461 = vmatmul.mubr.msk.bf16.vlgmr.msra.gmra.mrb[112].mxu1 %vm1247_vm8, %v10609_v5  ;;  %v13759_v47 = vcombine.high %v10382_v41, %v10396_v15  ;;  %v10445_v22 = vrot.slane %v10423_v61, %v15136_v13  ;;  %v10574_v55 = vcombine.low %v10552_v29, %v10559_v60  ;;  %v10452_v42 = vrot.slane %v10424_v56, %v15136_v13 }
0x1e8a   :  { %14472 = vmatprep.mubr.msk.bf16.mxu1 %vm14871_vm0, %v14870_v1  ;;  %v10453_v45 = vcombine.high %v10431_v10, %v10431_v10  ;;  %v10454_v28 = vcombine.high %v10438_v44, %v10438_v44  ;;  %v10885_v40 = vcombine.low %v10389_v16, %v10403_v25  ;;  %v13760_v43 = vcombine.high %v10389_v16, %v10403_v25 }
0x1e8b   :  { %v10893_v18 = vrot.slane %v10883_v59, %v15136_v13  ;;  %v10900_v58 = vrot.slane %v13759_v47, %v15136_v13  ;;  %v10478_v19 = vrot.slane %v10464_v36, %v15136_v13  ;;  %v10455_v62 = vcombine.high %v10445_v22, %v10445_v22 }
0x1e8c   :  { %v10456_v38 = vcombine.high %v10452_v42, %v10452_v42  ;;  %v10946_v46 = vcombine.low %v10445_v22, %v10453_v45  ;;  %v10907_v6 = vrot.slane %v10885_v40, %v15136_v13  ;;  %v10914_v17 = vrot.slane %v13760_v43, %v15136_v13 }
0x1e8d   :  { %v10915_v20 = vcombine.low %v10893_v18, %v10900_v58  ;;  %v10948_v23 = vcombine.low %v10452_v42, %v10454_v28  ;;  %v10582_v32 = vrot.slane %v10574_v55, %v15136_v13  ;;  %v10947_v4 = vcombine.low %v10455_v62, %v10438_v44 }
0x1e8e   :  { %v10949_v2 = vcombine.low %v10456_v38, %v10471_v14  ;;  %v10589_v9 = vrot.slane %v10575_v7, %v15136_v13  ;;  %v10604_v27 = vrot.slane %v10597_v50, %v15136_v13  ;;  %v10916_v33 = vcombine.low %v10907_v6, %v10914_v17 }
0x1e8f   :  { %v10938_v48 = vrot.slane %v10431_v10, %v15136_v13  ;;  %v10956_v11 = vrot.slane %v10946_v46, %v15136_v13  ;;  %v10963_v39 = vrot.slane %v10947_v4, %v15136_v13  ;;  %v10970_v35 = vrot.slane %v10948_v23, %v15136_v13 }
0x1e90   :  { %v10977_v12 = vrot.slane %v10949_v2, %v15136_v13  ;;  %v10590_v57 = vcombine.low %v10582_v32, %v10589_v9  ;;  %v10923_v24 = vrot.slane %v10915_v20, %v15136_v13  ;;  %v10930_v29 = vrot.slane %v10916_v33, %v15136_v13 }
0x1e91   :  { %v11001_v51 = vrot.slane %v10478_v19, %v15136_v13  ;;  %v10978_v53 = vcombine.low %v10956_v11, %v10963_v39  ;;  %v10945_v7 = vrot.slane %v10938_v48, %v15136_v13  ;;  %v14645_v11 = vld [vmem:[%s17432_s28 + $0x70] sm:$0xff]  }
0x1e92   :  { %v10979_v50 = vcombine.low %v10970_v35, %v10977_v12  ;;  %v10610_v60 = vpack.c.bf16 %v10604_v27, %v10590_v57  ;;  %v10931_v49 = vcombine.low %v10923_v24, %v10930_v29 }
0x1e93   :  { %v10986_v26 = vrot.slane %v10978_v53, %v15136_v13  ;;  %v11008_v14 = vrot.slane %v11001_v51, %v15136_v13 }
0x1e94   :  { %14467 = vmatmul.mubr.msk.bf16.vlgmr.msra.gmra.mrb[112].mxu0 %vm1247_vm8, %v10610_v60  ;;  %v10993_v5 = vrot.slane %v10979_v50, %v15136_v13  ;;  %v11013_v36 = vpack.c.bf16 %v10945_v7, %v10931_v49 }
0x1e95   :  { %14478 = vmatprep.mubr.msk.bf16.mxu0 %vm14871_vm0, %v14870_v1 }
0x1e96   :  { %v10994_v37 = vcombine.low %v10986_v26, %v10993_v5  ;;  %v11019_v31 = vand.u32 %v11013_v36, %v15251_v34  ;;  %v14646_v36 = vld [vmem:[%s17432_s28 + $0x78] sm:$0xff]  }
0x1e98   :  { %v11014_v41 = vpack.c.bf16 %v11008_v14, %v10994_v37  ;;  %14471 = vmatpush3.bf16.msra.mxu1 %v11019_v31  ;;  %v14647_v14 = vld [vmem:[%s17389_s13 + $0x70] sm:$0xff]   ;;  %v14648_v37 = vld [vmem:[%s17389_s13 + $0x78] sm:$0xff]  }
0x1e99   :  { %v13765_v31 = vld [vmem:[%s17391_s15 + $0x18] sm:$0xf] }
0x1e9a   :  { %v11066_v15 = vand.u32 %v11014_v41, %v15251_v34  ;;  %14576 = vmatprep.subr.msk.bf16.mxu1 %vm1525_vm6, %v13765_v31  ;;  %v11366_v41 = vsel %vm1525_vm6, %v13765_v31, 0 }
0x1e9c   :  { %14477 = vmatpush3.bf16.msra.mxu0 %v11066_v15  ;;  %v17017_v15 = vld [vmem:[%s17433_s29 + $0x70] sm:$0xff]  }
0x1e9d   :  { %14488 = vmatprep.subr.bf16.mxu0 %v14645_v11 }
0x1f5c   :  { %v10783_v61 = vpop.f32.mrb[112].mxu1 }
0x1f5d   :  { %v14462_v16 = vpop.f32.mrb[113].mxu1  ;;  %v10837_v56 = vsel %vm1342_vm9, %v10783_v61, -inf }
0x1f5e   :  { %10838 = vmax.xlane.f32.xlu0 %v10837_v56  ;;  %v10786_v10 = vpop.f32.mrb[114].mxu1 }
0x1f5f   :  { %v14463_v44 = vpop.f32.mrb[115].mxu1  ;;  %v10840_v25 = vsel %vm1346_vm10, %v10786_v10, -inf }
0x1f60   :  { %10841 = vmax.xlane.f32.xlu1 %v10840_v25 }
0x1f67   :  { %v10830_v59 = vpop.f32.mrb[112].mxu0 }
0x1f68   :  { %v14468_v47 = vpop.f32.mrb[113].mxu0  ;;  %v10843_v22 = vsel %vm1342_vm9, %v10830_v59, -inf }
0x1f69   :  { %v10833_v55 = vpop.f32.mrb[114].mxu0  ;;  %10844 = vmax.xlane.f32.xlu0 %v10843_v22 }
0x1f6a   :  { %v14469_v42 = vpop.f32.mrb[115].mxu0  ;;  %v10846_v45 = vsel %vm1346_vm10, %v10833_v55, -inf }
0x1f6b   :  { %10847 = vmax.xlane.f32.xlu1 %v10846_v45 }
0x1feb   :  { %v10839_v28 = vpop.xlane.xlu0 %10838 }
0x1fec   :  { %v10849_v40 = vsub.f32 %v10783_v61, %v10839_v28 }
0x1fed   :  { %v10842_v43 = vpop.xlane.xlu1 %10841 }
0x1fee   :  { %v10853_v18 = vmul.f32 1.442695, %v10849_v40  ;;  %v10850_v58 = vsub.f32 %v10786_v10, %v10842_v43 }
0x1ff0   :  { %14781 = vpow2.f32 %v10853_v18  ;;  %v10855_v19 = vmul.f32 1.442695, %v10850_v58 }
0x1ff2   :  { %14783 = vpow2.f32 %v10855_v19 }
0x1ff6   :  { %v10845_v62 = vpop.xlane.xlu0 %10844 }
0x1ff7   :  { %v10851_v38 = vsub.f32 %v10830_v59, %v10845_v62 }
0x1ff8   :  { %v10848_v46 = vpop.xlane.xlu1 %10847 }
0x1ff9   :  { %v10857_v17 = vmul.f32 1.442695, %v10851_v38  ;;  %v10852_v20 = vsub.f32 %v10833_v55, %v10848_v46 }
0x1ffa   :  { %v14782_v6 = vpop.eup %14781 }
0x1ffb   :  { %v10861_v23 = vsel %vm1342_vm9, %v14782_v6, 0.0  ;;  %14785 = vpow2.f32 %v10857_v17  ;;  %v10859_v4 = vmul.f32 1.442695, %v10852_v20 }
0x1ffc   :  { %v14784_v32 = vpop.eup %14783  ;;  %10862 = vadd.xlane.f32.xlu0 %v10861_v23 }
0x1ffd   :  { %v10864_v2 = vsel %vm1346_vm10, %v14784_v32, 0.0  ;;  %14787 = vpow2.f32 %v10859_v4 }
0x1ffe   :  { %10865 = vadd.xlane.f32.xlu1 %v10864_v2 }
0x2005   :  { %v14786_v9 = vpop.eup %14785 }
0x2006   :  { %v10867_v27 = vsel %vm1342_vm9, %v14786_v9, 0.0 }
0x2007   :  { %v14788_v33 = vpop.eup %14787  ;;  %10868 = vadd.xlane.f32.xlu0 %v10867_v27 }
0x2008   :  { %v10870_v48 = vsel %vm1346_vm10, %v14788_v33, 0.0 }
0x2009   :  { %10871 = vadd.xlane.f32.xlu1 %v10870_v48 }
0x2089   :  { %v10863_v39 = vpop.xlane.xlu0 %10862 }
0x208a   :  { %14789 = vrcp.f32 %v10863_v39 }
0x208b   :  { %v10866_v35 = vpop.xlane.xlu1 %10865 }
0x208c   :  { %14791 = vrcp.f32 %v10866_v35 }
0x2094   :  { %v14790_v12 = vpop.eup %14789  ;;  %v10869_v57 = vpop.xlane.xlu0 %10868 }
0x2095   :  { %14793 = vrcp.f32 %v10869_v57  ;;  %v10877_v29 = vmul.f32 %v14790_v12, %v14782_v6 }
0x2096   :  { %v14792_v24 = vpop.eup %14791  ;;  %v10872_v53 = vpop.xlane.xlu1 %10871 }
0x2097   :  { %v10878_v51 = vmul.f32 %v14792_v24, %v14784_v32  ;;  %14795 = vrcp.f32 %v10872_v53 }
0x2099   :  { %v10881_v50 = vpack.c.bf16 %v10878_v51, %v10877_v29 }
0x209b   :  { %14473 = vmatmul.mubr.msk.bf16.vlgmr.msra.gmra.mrb[116].mxu1 %vm1342_vm9, %v10881_v50 }
0x209c   :  { %14483 = vmatpush3.bf16.msra.mxu1 %v11366_v41 }
0x209d   :  { %14496 = vmatprep.subr.bf16.mxu1 %v17017_v15 }
0x209f   :  { %v14794_v60 = vpop.eup %14793 }
0x20a0   :  { %v10879_v49 = vmul.f32 %v14794_v60, %v14786_v9 }
0x20a1   :  { %v14796_v7 = vpop.eup %14795 }
0x20a2   :  { %v10880_v26 = vmul.f32 %v14796_v7, %v14788_v33  ;;  %v13773_v7 = vld [vmem:[%s17436_s7 + $0x7] ss:$0 sm:$0xff] }
0x20a4   :  { %v10882_v5 = vpack.c.bf16 %v10880_v26, %v10879_v49 }
0x20a6   :  { %14479 = vmatmul.mubr.msk.bf16.vlgmr.msra.gmra.mrb[116].mxu0 %vm1342_vm9, %v10882_v5 }
0x20a7   :  { %14489 = vmatpush3.bf16.msra.mxu0 %v14645_v11  ;;  %14492 = vmatprep.mubr.msk.bf16.mxu0 %vm129_vm2, %v16256_v54 }
0x20a8   :  { %14490 = vmatprep.subr.bf16.mxu0 %v14646_v36 }
0x20ab   :  { %14491 = vmatpush3.bf16.msra.mxu0 %v14646_v36 }
0x20ac   :  { %14504 = vmatprep.subr.bf16.mxu0 %v14647_v14 }
0x20ae   :  { %14493 = vmatmul.mubr.msk.bf16.vlgmr.msra.gmra.mrb[120].mxu0 %vm129_vm2, %v16262_v3 }
0x20af   :  { %14505 = vmatpush3.bf16.msra.mxu0 %v14647_v14  ;;  %14508 = vmatprep.mubr.msk.bf16.mxu0 %vm129_vm2, %v16256_v54 }
0x20b0   :  { %14506 = vmatprep.subr.bf16.mxu0 %v14648_v37 }
0x20b3   :  { %14507 = vmatpush3.bf16.msra.mxu0 %v14648_v37 }
0x20b4   :  { %14518 = vmatprep.subr.bf16.mxu0 %v14870_v1 }
0x20b6   :  { %14509 = vmatmul.mubr.msk.bf16.vlgmr.msra.gmra.mrb[124].mxu0 %vm129_vm2, %v16262_v3 }
0x20b7   :  { %14520 = vmatprep.mubr.msk.bf16.mxu0 %vm14871_vm0, %v14870_v1 }
0x216e   :  { %v11055_v61 = vpop.f32.mrb[116].mxu1 }
0x216f   :  { %v11113_v16 = vcombine.high %v11055_v61, %v11055_v61  ;;  %v11120_v56 = vrot.slane %v11055_v61, %v15136_v13  ;;  %v14474_v10 = vpop.f32.mrb[117].mxu1 }
0x2170   :  { %v11058_v44 = vpop.f32.mrb[118].mxu1 }
0x2171   :  { %v11127_v25 = vrot.slane %v11113_v16, %v15136_v13  ;;  %v14475_v59 = vpop.f32.mrb[119].mxu1  ;;  %v11128_v47 = vcombine.high %v11120_v56, %v11120_v56  ;;  %v11136_v28 = vrot.slane %v11120_v56, %v15136_v13  ;;  %v11168_v19 = vrot.slane %v11058_v44, %v15136_v13 }
0x2173   :  { %v11129_v22 = vcombine.high %v11127_v25, %v11127_v25  ;;  %v11143_v42 = vrot.slane %v11127_v25, %v15136_v13  ;;  %v11150_v45 = vrot.slane %v11128_v47, %v15136_v13  ;;  %v11175_v48 = vrot.slane %v11168_v19, %v15136_v13 }
0x2175   :  { %v11157_v55 = vrot.slane %v11129_v22, %v15136_v13  ;;  %v11239_v18 = vcombine.low %v11136_v28, %v11150_v45  ;;  %v13763_v58 = vcombine.high %v11136_v28, %v11150_v45 }
0x2177   :  { %v11241_v40 = vcombine.low %v11143_v42, %v11157_v55  ;;  %v13764_v43 = vcombine.high %v11143_v42, %v11157_v55  ;;  %v11249_v27 = vrot.slane %v11239_v18, %v15136_v13  ;;  %v11256_v33 = vrot.slane %v13763_v58, %v15136_v13 }
0x2179   :  { %v11102_v62 = vpop.f32.mrb[116].mxu0  ;;  %v11263_v17 = vrot.slane %v11241_v40, %v15136_v13  ;;  %v11270_v20 = vrot.slane %v13764_v43, %v15136_v13  ;;  %v11271_v49 = vcombine.low %v11249_v27, %v11256_v33 }
0x217a   :  { %v11176_v38 = vcombine.high %v11102_v62, %v11102_v62  ;;  %v11183_v46 = vrot.slane %v11102_v62, %v15136_v13  ;;  %v14480_v6 = vpop.f32.mrb[117].mxu0 }
0x217b   :  { %v11105_v23 = vpop.f32.mrb[118].mxu0  ;;  %v11272_v24 = vcombine.low %v11263_v17, %v11270_v20  ;;  %v17054_v40 = vrot.slane %v11271_v49, %v15136_v13 }
0x217c   :  { %v11190_v32 = vrot.slane %v11176_v38, %v15136_v13  ;;  %v11191_v4 = vcombine.high %v11183_v46, %v11183_v46  ;;  %v11199_v2 = vrot.slane %v11183_v46, %v15136_v13  ;;  %v14481_v9 = vpop.f32.mrb[119].mxu0  ;;  %v11231_v11 = vrot.slane %v11105_v23, %v15136_v13 }
0x217d   :  { %v17046_v44 = vrot.slane %v11272_v24, %v15136_v13 }
0x217e   :  { %v11192_v39 = vcombine.high %v11190_v32, %v11190_v32  ;;  %v11206_v35 = vrot.slane %v11190_v32, %v15136_v13  ;;  %v11213_v12 = vrot.slane %v11191_v4, %v15136_v13  ;;  %v11221_v57 = vcombine.high %v11199_v2, %v11199_v2 }
0x217f   :  { %v11288_v29 = vcombine.low %v11175_v48, %v11199_v2  ;;  %v11238_v5 = vrot.slane %v11231_v11, %v15136_v13  ;;  %v11287_v19 = vcombine.low %v17054_v40, %v17046_v44 }
0x2180   :  { %v11220_v51 = vrot.slane %v11192_v39, %v15136_v13  ;;  %v11222_v53 = vcombine.high %v11206_v35, %v11206_v35  ;;  %v11223_v50 = vcombine.high %v11213_v12, %v11213_v12  ;;  %v11289_v60 = vcombine.low %v11213_v12, %v11221_v57 }
0x2181   :  { %v11298_v26 = vrot.slane %v11288_v29, %v15136_v13  ;;  %v14494_v36 = vpop.f32.mrb[120].mxu0 }
0x2182   :  { %v11290_v14 = vcombine.low %v11223_v50, %v11206_v35  ;;  %v11291_v37 = vcombine.low %v11220_v51, %v11222_v53  ;;  %v11305_v31 = vrot.slane %v11289_v60, %v15136_v13  ;;  %v11224_v41 = vcombine.high %v11220_v51, %v11220_v51  ;;  %v11478_v61 = vpop.f32.mrb[121].mxu0 }
0x2183   :  { %v11487_v16 = vadd.f32 %v14494_v36, %v13773_v7  ;;  %v11479_v56 = vadd.f32 %v13773_v7, %v11478_v61  ;;  %v14495_v10 = vpop.f32.mrb[122].mxu0 }
0x2184   :  { %v11312_v25 = vrot.slane %v11290_v14, %v15136_v13  ;;  %v11319_v59 = vrot.slane %v11291_v37, %v15136_v13  ;;  %v17050_v47 = vcombine.low %v11298_v26, %v11305_v31  ;;  %v11337_v22 = vcombine.low %v11224_v41, %v11238_v5  ;;  %v11481_v55 = vpop.f32.mrb[123].mxu0  ;;  %v13793_v31 = vld [vmem:[%s17390_s14 + $0x7] ss:$0 sm:$0xff] }
0x2185   :  { %v11495_v42 = vcombine.high %v11479_v56, %v11479_v56  ;;  %v11502_v45 = vrot.slane %v11479_v56, %v15136_v13  ;;  %v11482_v28 = vadd.f32 %v13773_v7, %v11481_v55  ;;  %v11599_v43 = vrot.slane %v11487_v16, %v15136_v13 }
0x2186   :  { %v17060_v62 = vcombine.low %v11312_v25, %v11319_v59  ;;  %v11344_v38 = vrot.slane %v11337_v22, %v15136_v13  ;;  %v11328_v4 = vrot.slane %v17050_v47, %v15136_v13 }
0x2187   :  { %v11509_v18 = vrot.slane %v11495_v42, %v15136_v13  ;;  %v11510_v58 = vcombine.high %v11502_v45, %v11502_v45  ;;  %v11544_v46 = vcombine.high %v11482_v28, %v11482_v28  ;;  %v11551_v6 = vrot.slane %v11482_v28, %v15136_v13 }
0x2188   :  { %v11518_v20 = vrot.slane %v11502_v45, %v15136_v13  ;;  %v11600_v2 = vcombine.high %v11599_v43, %v11599_v43  ;;  %v11607_v60 = vrot.slane %v11599_v43, %v15136_v13  ;;  %v17082_v41 = vrot.slane %v11344_v38, %v15136_v13 }
0x2189   :  { %v11511_v17 = vcombine.high %v11509_v18, %v11509_v18  ;;  %v11532_v23 = vrot.slane %v11510_v58, %v15136_v13  ;;  %v14510_v32 = vpop.f32.mrb[124].mxu0  ;;  %v11558_v9 = vrot.slane %v11544_v46, %v15136_v13  ;;  %v11559_v27 = vcombine.high %v11551_v6, %v11551_v6 }
0x218a   :  { %v11567_v33 = vrot.slane %v11551_v6, %v15136_v13  ;;  %v11870_v48 = vpop.f32.mrb[125].mxu0  ;;  %v11525_v11 = vrot.slane %v11509_v18, %v15136_v13  ;;  %v17087_v55 = vrot.slane %v11600_v2, %v15136_v13  ;;  %v11879_v28 = vadd.f32 %v14510_v32, %v13793_v31 }
0x218b   :  { %v11539_v39 = vrot.slane %v11511_v17, %v15136_v13  ;;  %v12007_v35 = vcombine.low %v11518_v20, %v11532_v23  ;;  %v13798_v12 = vcombine.high %v11518_v20, %v11532_v23  ;;  %v14511_v57 = vpop.f32.mrb[126].mxu0  ;;  %v11560_v24 = vcombine.high %v11558_v9, %v11558_v9 }
0x218c   :  { %v11574_v29 = vrot.slane %v11558_v9, %v15136_v13  ;;  %v11581_v51 = vrot.slane %v11559_v27, %v15136_v13  ;;  %v11589_v53 = vcombine.high %v11567_v33, %v11567_v33  ;;  %v11873_v50 = vpop.f32.mrb[127].mxu0  ;;  %v12062_v45 = vrot.slane %v11567_v33, %v15136_v13 }
0x218d   :  { %v12009_v7 = vcombine.low %v11525_v11, %v11539_v39  ;;  %v13799_v49 = vcombine.high %v11525_v11, %v11539_v39  ;;  %v12017_v26 = vrot.slane %v12007_v35, %v15136_v13  ;;  %v12024_v5 = vrot.slane %v13798_v12, %v15136_v13 }
0x218e   :  { %v11588_v36 = vrot.slane %v11560_v24, %v15136_v13  ;;  %v11590_v14 = vcombine.high %v11574_v29, %v11574_v29  ;;  %v11591_v37 = vcombine.high %v11581_v51, %v11581_v51  ;;  %v12070_v56 = vcombine.low %v11581_v51, %v11589_v53 }
0x218f   :  { %v12031_v61 = vrot.slane %v12009_v7, %v15136_v13  ;;  %v12038_v16 = vrot.slane %v13799_v49, %v15136_v13  ;;  %v12039_v10 = vcombine.low %v12017_v26, %v12024_v5  ;;  %v11991_v6 = vrot.slane %v11879_v28, %v15136_v13  ;;  %v14650_v28 = vld [vmem:[%s17433_s29 + $0x78] sm:$0xff]  }
0x2190   :  { %v11592_v25 = vcombine.high %v11588_v36, %v11588_v36  ;;  %v12071_v59 = vcombine.low %v11591_v37, %v11574_v29  ;;  %v12072_v22 = vcombine.low %v11588_v36, %v11590_v14  ;;  %v12080_v58 = vrot.slane %v12070_v56, %v15136_v13 }
0x2191   :  { %v12040_v42 = vcombine.low %v12031_v61, %v12038_v16  ;;  %v12047_v43 = vrot.slane %v12039_v10, %v15136_v13  ;;  %v11871_v17 = vadd.f32 %v13793_v31, %v11870_v48  ;;  %v11874_v20 = vadd.f32 %v13793_v31, %v11873_v50 }
0x2192   :  { %v12073_v18 = vcombine.low %v11592_v25, %v11607_v60  ;;  %v12087_v38 = vrot.slane %v12071_v59, %v15136_v13  ;;  %v11356_v23 = vpack.c.bf16 %v17082_v41, %v17082_v41  ;;  %v12094_v2 = vrot.slane %v12072_v22, %v15136_v13 }
0x2193   :  { %v12054_v46 = vrot.slane %v12040_v42, %v15136_v13  ;;  %v11335_v9 = vrot.slane %v17060_v62, %v15136_v13  ;;  %v12069_v33 = vrot.slane %v12062_v45, %v15136_v13  ;;  %v11887_v39 = vcombine.high %v11871_v17, %v11871_v17 }
0x2194   :  { %v12101_v32 = vrot.slane %v12073_v18, %v15136_v13  ;;  %v17102_v11 = vcombine.low %v12080_v58, %v12087_v38  ;;  %v12125_v48 = vrot.slane %v17087_v55, %v15136_v13  ;;  %v11894_v12 = vrot.slane %v11871_v17, %v15136_v13 }
0x2195   :  { %v12055_v27 = vcombine.low %v12047_v43, %v12054_v46  ;;  %v11936_v57 = vcombine.high %v11874_v20, %v11874_v20  ;;  %v11992_v29 = vcombine.high %v11991_v6, %v11991_v6  ;;  %v11901_v51 = vrot.slane %v11887_v39, %v15136_v13 }
0x2196   :  { %v12103_v35 = vcombine.low %v12094_v2, %v12101_v32  ;;  %v11943_v62 = vrot.slane %v11874_v20, %v15136_v13  ;;  %v11999_v53 = vrot.slane %v11991_v6, %v15136_v13  ;;  %v11902_v50 = vcombine.high %v11894_v12, %v11894_v12 }
0x2197   :  { %v17107_v24 = vpack.c.bf16 %v12069_v33, %v12055_v27  ;;  %v11950_v60 = vrot.slane %v11936_v57, %v15136_v13  ;;  %v11336_v7 = vcombine.low %v11328_v4, %v11335_v9  ;;  %v12110_v49 = vrot.slane %v17102_v11, %v15136_v13 }
0x2198   :  { %v11903_v26 = vcombine.high %v11901_v51, %v11901_v51  ;;  %v11910_v5 = vrot.slane %v11894_v12, %v15136_v13  ;;  %v11951_v36 = vcombine.high %v11943_v62, %v11943_v62  ;;  %v11924_v14 = vrot.slane %v11902_v50, %v15136_v13 }
0x2199   :  { %v11952_v37 = vcombine.high %v11950_v60, %v11950_v60  ;;  %v11959_v31 = vrot.slane %v11943_v62, %v15136_v13  ;;  %v11966_v41 = vrot.slane %v11950_v60, %v15136_v13  ;;  %v11917_v61 = vrot.slane %v11901_v51, %v15136_v13 }
0x219a   :  { %v11931_v16 = vrot.slane %v11903_v26, %v15136_v13  ;;  %v11973_v47 = vrot.slane %v11951_v36, %v15136_v13  ;;  %v11355_v4 = vpack.c.bf16 %v11336_v7, %v11287_v19  ;;  %v12411_v56 = vcombine.low %v11910_v5, %v11924_v14 }
0x219b   :  { %v13804_v10 = vcombine.high %v11910_v5, %v11924_v14  ;;  %v11980_v25 = vrot.slane %v11952_v37, %v15136_v13  ;;  %v11981_v59 = vcombine.high %v11959_v31, %v11959_v31  ;;  %v11982_v42 = vcombine.high %v11966_v41, %v11966_v41 }
0x219c   :  { %v12413_v22 = vcombine.low %v11917_v61, %v11931_v16  ;;  %v13805_v55 = vcombine.high %v11917_v61, %v11931_v16  ;;  %v11983_v45 = vcombine.high %v11973_v47, %v11973_v47  ;;  %14484 = vmatprep.mubr.msk.bf16.mxu1 %vm1247_vm8, %v11355_v4  ;;  %v12006_v43 = vrot.slane %v11992_v29, %v15136_v13  ;;  %v13783_v61 = vld [vmem:[%s17388_s12 + $0x7] ss:$0 sm:$0xff] }
0x219d   :  { %v12421_v44 = vrot.slane %v12411_v56, %v15136_v13  ;;  %v12428_v40 = vrot.slane %v13804_v10, %v15136_v13  ;;  %v11984_v19 = vcombine.high %v11980_v25, %v11980_v25  ;;  %14485 = vmatmul.mubr.msk.bf16.vlgmr.msra.gmra.mrb[120].mxu1 %vm1247_vm8, %v11356_v23  ;;  %v12474_v38 = vcombine.low %v11973_v47, %v11981_v59 }
0x219e   :  { %v12435_v18 = vrot.slane %v12413_v22, %v15136_v13  ;;  %v12442_v58 = vrot.slane %v13805_v55, %v15136_v13  ;;  %v12475_v46 = vcombine.low %v11983_v45, %v11966_v41  ;;  %14497 = vmatpush3.bf16.msra.mxu1 %v17017_v15  ;;  %v12466_v17 = vrot.slane %v11959_v31, %v15136_v13 }
0x219f   :  { %v12443_v6 = vcombine.low %v12421_v44, %v12428_v40  ;;  %v12476_v20 = vcombine.low %v11980_v25, %v11982_v42  ;;  %v12477_v2 = vcombine.low %v11984_v19, %v11999_v53  ;;  %14500 = vmatprep.mubr.msk.bf16.mxu1 %vm129_vm2, %v16256_v54  ;;  %v12484_v9 = vrot.slane %v12474_v38, %v15136_v13 }
0x21a0   :  { %v12444_v32 = vcombine.low %v12435_v18, %v12442_v58  ;;  %v12491_v23 = vrot.slane %v12475_v46, %v15136_v13  ;;  %14498 = vmatprep.subr.bf16.mxu1 %v14650_v28  ;;  %v12117_v27 = vrot.slane %v12103_v35, %v15136_v13  ;;  %v17147_v33 = vrot.slane %v12125_v48, %v15136_v13 }
0x21a1   :  { %v12498_v15 = vrot.slane %v12476_v20, %v15136_v13  ;;  %v12505_v11 = vrot.slane %v12477_v2, %v15136_v13  ;;  %v12451_v39 = vrot.slane %v12443_v6, %v15136_v13  ;;  %v12529_v29 = vrot.slane %v12006_v43, %v15136_v13 }
0x21a2   :  { %v12506_v12 = vcombine.low %v12484_v9, %v12491_v23  ;;  %14499 = vmatpush3.bf16.msra.mxu1 %v14650_v28  ;;  %v12458_v54 = vrot.slane %v12444_v32, %v15136_v13  ;;  %v17153_v57 = vcombine.low %v12110_v49, %v12117_v27  ;;  %v12473_v48 = vrot.slane %v12466_v17, %v15136_v13 }
0x21a3   :  { %v12507_v51 = vcombine.low %v12498_v15, %v12505_v11  ;;  %14512 = vmatprep.subr.bf16.mxu1 %v14870_v1  ;;  %v17169_v7 = vrot.slane %v12529_v29, %v15136_v13 }
0x21a4   :  { %v12459_v35 = vcombine.low %v12451_v39, %v12458_v54  ;;  %v12138_v62 = vpack.c.bf16 %v17147_v33, %v17153_v57  ;;  %v12514_v53 = vrot.slane %v12506_v12, %v15136_v13 }
0x21a5   :  { %14501 = vmatmul.mubr.msk.bf16.vlgmr.msra.gmra.mrb[124].mxu1 %vm129_vm2, %v16262_v3  ;;  %v12521_v50 = vrot.slane %v12507_v51, %v15136_v13 }
0x21a6   :  { %14514 = vmatprep.mubr.msk.bf16.mxu1 %vm14871_vm0, %v14870_v1  ;;  %v17166_v60 = vpack.c.bf16 %v12473_v48, %v12459_v35 }
0x21a7   :  { %v17171_v49 = vcombine.low %v12514_v53, %v12521_v50 }
0x21a9   :  { %v12542_v26 = vpack.c.bf16 %v17169_v7, %v17171_v49 }
0x2270   :  { %v14486_v5 = vpop.f32.mrb[120].mxu1 }
0x2271   :  { %v17176_v3 = vadd.f32 %v14486_v5, %v16889_v21  ;;  %v11402_v36 = vpop.f32.mrb[121].mxu1 }
0x2272   :  { %v17179_v14 = vadd.f32 %v11402_v36, %v16892_v52  ;;  %v14487_v37 = vpop.f32.mrb[122].mxu1 }
0x2273   :  { %v11405_v31 = vpop.f32.mrb[123].mxu1 }
0x2274   :  { %v17182_v41 = vadd.f32 %v11405_v31, %v16895_v8 }
0x2278   :  { %v14502_v16 = vpop.f32.mrb[124].mxu1 }
0x2279   :  { %v11674_v47 = vpop.f32.mrb[125].mxu1  ;;  %v11683_v10 = vadd.f32 %v14502_v16, %v13783_v61 }
0x227a   :  { %v11675_v4 = vadd.f32 %v13783_v61, %v11674_v47  ;;  %v14503_v56 = vpop.f32.mrb[126].mxu1 }
0x227b   :  { %v11677_v21 = vpop.f32.mrb[127].mxu1  ;;  %v11795_v8 = vrot.slane %v11683_v10, %v15136_v13 }
0x227c   :  { %v11691_v25 = vcombine.high %v11675_v4, %v11675_v4  ;;  %v11698_v59 = vrot.slane %v11675_v4, %v15136_v13  ;;  %v11678_v52 = vadd.f32 %v13783_v61, %v11677_v21 }
0x227d   :  { %v11796_v20 = vcombine.high %v11795_v8, %v11795_v8  ;;  %v11803_v53 = vrot.slane %v11795_v8, %v15136_v13 }
0x227e   :  { %v11705_v22 = vrot.slane %v11691_v25, %v15136_v13  ;;  %v11706_v55 = vcombine.high %v11698_v59, %v11698_v59  ;;  %v11740_v42 = vcombine.high %v11678_v52, %v11678_v52  ;;  %v11747_v45 = vrot.slane %v11678_v52, %v15136_v13 }
0x227f   :  { %v11714_v43 = vrot.slane %v11698_v59, %v15136_v13  ;;  %v11810_v61 = vrot.slane %v11796_v20, %v15136_v13 }
0x2280   :  { %v11707_v28 = vcombine.high %v11705_v22, %v11705_v22  ;;  %v11728_v44 = vrot.slane %v11706_v55, %v15136_v13  ;;  %v11754_v40 = vrot.slane %v11740_v42, %v15136_v13  ;;  %v11721_v19 = vrot.slane %v11705_v22, %v15136_v13 }
0x2281   :  { %v11755_v18 = vcombine.high %v11747_v45, %v11747_v45  ;;  %v11763_v58 = vrot.slane %v11747_v45, %v15136_v13  ;;  %v12257_v55 = vrot.slane %v11810_v61, %v15136_v13 }
0x2282   :  { %v11735_v38 = vrot.slane %v11707_v28, %v15136_v13  ;;  %v12139_v46 = vcombine.low %v11714_v43, %v11728_v44  ;;  %v13800_v6 = vcombine.high %v11714_v43, %v11728_v44  ;;  %v11756_v17 = vcombine.high %v11754_v40, %v11754_v40 }
0x2283   :  { %v11770_v2 = vrot.slane %v11754_v40, %v15136_v13  ;;  %v11777_v32 = vrot.slane %v11755_v18, %v15136_v13  ;;  %v11785_v9 = vcombine.high %v11763_v58, %v11763_v58  ;;  %v12194_v37 = vrot.slane %v11763_v58, %v15136_v13 }
0x2284   :  { %v12141_v23 = vcombine.low %v11721_v19, %v11735_v38  ;;  %v13801_v27 = vcombine.high %v11721_v19, %v11735_v38  ;;  %v12149_v15 = vrot.slane %v12139_v46, %v15136_v13  ;;  %v12156_v11 = vrot.slane %v13800_v6, %v15136_v13 }
0x2285   :  { %v11784_v39 = vrot.slane %v11756_v17, %v15136_v13  ;;  %v11786_v12 = vcombine.high %v11770_v2, %v11770_v2  ;;  %v11787_v54 = vcombine.high %v11777_v32, %v11777_v32  ;;  %v12202_v29 = vcombine.low %v11777_v32, %v11785_v9 }
0x2286   :  { %v12163_v51 = vrot.slane %v12141_v23, %v15136_v13  ;;  %v12170_v48 = vrot.slane %v13801_v27, %v15136_v13  ;;  %v12171_v35 = vcombine.low %v12149_v15, %v12156_v11  ;;  %v12201_v22 = vrot.slane %v12194_v37, %v15136_v13 }
0x2287   :  { %v11788_v50 = vcombine.high %v11784_v39, %v11784_v39  ;;  %v12203_v5 = vcombine.low %v11787_v54, %v11770_v2  ;;  %v12204_v36 = vcombine.low %v11784_v39, %v11786_v12  ;;  %v12212_v47 = vrot.slane %v12202_v29, %v15136_v13 }
0x2288   :  { %v12172_v31 = vcombine.low %v12163_v51, %v12170_v48  ;;  %v12179_v56 = vrot.slane %v12171_v35, %v15136_v13  ;;  %v12264_v40 = vrot.slane %v12257_v55, %v15136_v13  ;;  %v12547_v58 = vand.u32 %v17166_v60, %v15251_v34 }
0x2289   :  { %v12205_v16 = vcombine.low %v11788_v50, %v11803_v53  ;;  %v12219_v4 = vrot.slane %v12203_v5, %v15136_v13  ;;  %v12226_v21 = vrot.slane %v12204_v36, %v15136_v13  ;;  %v12594_v38 = vand.u32 %v12542_v26, %v15251_v34 }
0x228a   :  { %v12186_v10 = vrot.slane %v12172_v31, %v15136_v13 }
0x228b   :  { %v12233_v25 = vrot.slane %v12205_v16, %v15136_v13  ;;  %v12234_v59 = vcombine.low %v12212_v47, %v12219_v4 }
0x228c   :  { %v12187_v52 = vcombine.low %v12179_v56, %v12186_v10 }
0x228d   :  { %v12235_v42 = vcombine.low %v12226_v21, %v12233_v25  ;;  %v12242_v45 = vrot.slane %v12234_v59, %v15136_v13 }
0x228e   :  { %v12269_v8 = vpack.c.bf16 %v12201_v22, %v12187_v52 }
0x228f   :  { %v12249_v28 = vrot.slane %v12235_v42, %v15136_v13 }
0x2290   :  { %v12275_v43 = vsel %vm1247_vm8, %v12269_v8, 0  ;;  %v13810_v8 = vld [vmem:[%s17391_s15 + $0x1c] sm:$0xf] }
0x2291   :  { %14513 = vmatpush3.bf16.xpose.msra.mxu1 %v12275_v43  ;;  %v12250_v44 = vcombine.low %v12242_v45, %v12249_v28  ;;  %v12894_v45 = vsel %vm1525_vm6, %v13810_v8, 0 }
0x2292   :  { %14524 = vmatprep.subr.bf16.mxu1 %v14870_v1 }
0x2293   :  { %v12270_v19 = vpack.c.bf16 %v12264_v40, %v12250_v44 }
0x2295   :  { %v12322_v18 = vsel %vm1247_vm8, %v12270_v19, 0 }
0x2296   :  { %14519 = vmatpush3.bf16.xpose.msra.mxu0 %v12322_v18 }
0x2297   :  { %14530 = vmatprep.subr.bf16.mxu0 %v14870_v1 }
0x2298   :  { %14515 = vmatmul.mubr.msk.bf16.vlgmr.msra.gmra.mrb[128].mxu1 %vm1247_vm8, %v17107_v24 }
0x2299   :  { %14525 = vmatpush3.bf16.msra.mxu1 %v12547_v58  ;;  %14526 = vmatprep.mubr.msk.bf16.mxu1 %vm14871_vm0, %v14870_v1 }
0x229a   :  { %14577 = vmatprep.subr.msk.bf16.mxu1 %vm1525_vm6, %v13810_v8 }
0x229d   :  { %14521 = vmatmul.mubr.msk.bf16.vlgmr.msra.gmra.mrb[128].mxu0 %vm1247_vm8, %v12138_v62 }
0x229e   :  { %14531 = vmatpush3.bf16.msra.mxu0 %v12594_v38  ;;  %14532 = vmatprep.mubr.msk.bf16.mxu0 %vm14871_vm0, %v14870_v1 }
0x236b   :  { %v12311_v60 = vpop.f32.mrb[128].mxu1 }
0x236c   :  { %v14516_v24 = vpop.f32.mrb[129].mxu1  ;;  %v12365_v46 = vsel %vm1342_vm9, %v12311_v60, -inf }
0x236d   :  { %12366 = vmax.xlane.f32.xlu0 %v12365_v46  ;;  %v12314_v6 = vpop.f32.mrb[130].mxu1 }
0x236e   :  { %v14517_v17 = vpop.f32.mrb[131].mxu1  ;;  %v12368_v20 = vsel %vm1346_vm10, %v12314_v6, -inf }
0x236f   :  { %12369 = vmax.xlane.f32.xlu1 %v12368_v20 }
0x2370   :  { %v12358_v34 = vpop.f32.mrb[128].mxu0 }
0x2371   :  { %v14522_v7 = vpop.f32.mrb[129].mxu0  ;;  %v12371_v33 = vsel %vm1342_vm9, %v12358_v34, -inf }
0x2372   :  { %v12361_v57 = vpop.f32.mrb[130].mxu0  ;;  %12372 = vmax.xlane.f32.xlu0 %v12371_v33 }
0x2373   :  { %v14523_v62 = vpop.f32.mrb[131].mxu0  ;;  %v12374_v49 = vsel %vm1346_vm10, %v12361_v57, -inf }
0x2374   :  { %12375 = vmax.xlane.f32.xlu1 %v12374_v49 }
0x23fa   :  { %v12367_v26 = vpop.xlane.xlu0 %12366 }
0x23fb   :  { %v12377_v2 = vsub.f32 %v12311_v60, %v12367_v26 }
0x23fc   :  { %v12370_v32 = vpop.xlane.xlu1 %12369 }
0x23fd   :  { %v12381_v9 = vmul.f32 1.442695, %v12377_v2  ;;  %v12378_v23 = vsub.f32 %v12314_v6, %v12370_v32 }
0x23ff   :  { %14797 = vpow2.f32 %v12381_v9  ;;  %v12383_v27 = vmul.f32 1.442695, %v12378_v23  ;;  %v12373_v15 = vpop.xlane.xlu0 %12372 }
0x2400   :  { %v12379_v11 = vsub.f32 %v12358_v34, %v12373_v15 }
0x2401   :  { %14799 = vpow2.f32 %v12383_v27  ;;  %v12376_v39 = vpop.xlane.xlu1 %12375 }
0x2402   :  { %v12385_v12 = vmul.f32 1.442695, %v12379_v11  ;;  %v12380_v54 = vsub.f32 %v12361_v57, %v12376_v39 }
0x2404   :  { %14801 = vpow2.f32 %v12385_v12  ;;  %v12387_v29 = vmul.f32 1.442695, %v12380_v54 }
0x2406   :  { %14803 = vpow2.f32 %v12387_v29 }
0x2409   :  { %v14798_v51 = vpop.eup %14797 }
0x240a   :  { %v12389_v48 = vsel %vm1342_vm9, %v14798_v51, 0.0 }
0x240b   :  { %v14800_v35 = vpop.eup %14799  ;;  %12390 = vadd.xlane.f32.xlu0 %v12389_v48 }
0x240c   :  { %v12392_v53 = vsel %vm1346_vm10, %v14800_v35, 0.0 }
0x240d   :  { %12393 = vadd.xlane.f32.xlu1 %v12392_v53 }
0x240e   :  { %v14802_v50 = vpop.eup %14801 }
0x240f   :  { %v12395_v5 = vsel %vm1342_vm9, %v14802_v50, 0.0 }
0x2410   :  { %v14804_v36 = vpop.eup %14803  ;;  %12396 = vadd.xlane.f32.xlu0 %v12395_v5 }
0x2411   :  { %v12398_v37 = vsel %vm1346_vm10, %v14804_v36, 0.0 }
0x2412   :  { %12399 = vadd.xlane.f32.xlu1 %v12398_v37 }
0x2498   :  { %v12391_v31 = vpop.xlane.xlu0 %12390 }
0x2499   :  { %14805 = vrcp.f32 %v12391_v31 }
0x249a   :  { %v12394_v61 = vpop.xlane.xlu1 %12393 }
0x249b   :  { %14807 = vrcp.f32 %v12394_v61 }
0x249d   :  { %v12397_v16 = vpop.xlane.xlu0 %12396 }
0x249e   :  { %14809 = vrcp.f32 %v12397_v16 }
0x249f   :  { %v12400_v47 = vpop.xlane.xlu1 %12399 }
0x24a0   :  { %14811 = vrcp.f32 %v12400_v47 }
0x24a3   :  { %v14806_v4 = vpop.eup %14805 }
0x24a4   :  { %v12405_v10 = vmul.f32 %v14806_v4, %v14798_v51 }
0x24a5   :  { %v14808_v56 = vpop.eup %14807 }
0x24a6   :  { %v12406_v21 = vmul.f32 %v14808_v56, %v14800_v35 }
0x24a8   :  { %v14810_v25 = vpop.eup %14809  ;;  %v12409_v59 = vpack.c.bf16 %v12406_v21, %v12405_v10 }
0x24a9   :  { %v12407_v22 = vmul.f32 %v14810_v25, %v14802_v50 }
0x24aa   :  { %v14812_v52 = vpop.eup %14811  ;;  %14527 = vmatmul.mubr.msk.bf16.vlgmr.msra.gmra.mrb[132].mxu1 %vm1342_vm9, %v12409_v59 }
0x24ab   :  { %v12408_v55 = vmul.f32 %v14812_v52, %v14804_v36  ;;  %14537 = vmatpush3.bf16.msra.mxu1 %v12894_v45 }
0x24ad   :  { %v12410_v42 = vpack.c.bf16 %v12408_v55, %v12407_v22 }
0x24af   :  { %14533 = vmatmul.mubr.msk.bf16.vlgmr.msra.gmra.mrb[132].mxu0 %vm1342_vm9, %v12410_v42 }
0x257d   :  { %v12583_v28 = vpop.f32.mrb[132].mxu1 }
0x257e   :  { %v12641_v43 = vcombine.high %v12583_v28, %v12583_v28  ;;  %v12648_v44 = vrot.slane %v12583_v28, %v15136_v13  ;;  %v14528_v40 = vpop.f32.mrb[133].mxu1 }
0x257f   :  { %v12586_v19 = vpop.f32.mrb[134].mxu1 }
0x2580   :  { %v12655_v18 = vrot.slane %v12641_v43, %v15136_v13  ;;  %v12656_v58 = vcombine.high %v12648_v44, %v12648_v44  ;;  %v14529_v38 = vpop.f32.mrb[135].mxu1  ;;  %v12696_v60 = vrot.slane %v12586_v19, %v15136_v13  ;;  %v12664_v46 = vrot.slane %v12648_v44, %v15136_v13 }
0x2582   :  { %v12657_v24 = vcombine.high %v12655_v18, %v12655_v18  ;;  %v12678_v6 = vrot.slane %v12656_v58, %v15136_v13  ;;  %v12630_v17 = vpop.f32.mrb[132].mxu0  ;;  %v12671_v33 = vrot.slane %v12655_v18, %v15136_v13  ;;  %v12703_v2 = vrot.slane %v12696_v60, %v15136_v13 }
0x2583   :  { %v12704_v20 = vcombine.high %v12630_v17, %v12630_v17  ;;  %v12711_v34 = vrot.slane %v12630_v17, %v15136_v13  ;;  %v14534_v7 = vpop.f32.mrb[133].mxu0 }
0x2584   :  { %v12685_v57 = vrot.slane %v12657_v24, %v15136_v13  ;;  %v12767_v62 = vcombine.low %v12664_v46, %v12678_v6  ;;  %v13808_v49 = vcombine.high %v12664_v46, %v12678_v6  ;;  %v12633_v26 = vpop.f32.mrb[134].mxu0 }
0x2585   :  { %v12718_v32 = vrot.slane %v12704_v20, %v15136_v13  ;;  %v12719_v9 = vcombine.high %v12711_v34, %v12711_v34  ;;  %v12727_v23 = vrot.slane %v12711_v34, %v15136_v13  ;;  %v14535_v27 = vpop.f32.mrb[135].mxu0  ;;  %v12759_v12 = vrot.slane %v12633_v26, %v15136_v13 }
0x2586   :  { %v12769_v15 = vcombine.low %v12671_v33, %v12685_v57  ;;  %v13809_v11 = vcombine.high %v12671_v33, %v12685_v57  ;;  %v12777_v39 = vrot.slane %v12767_v62, %v15136_v13  ;;  %v12784_v35 = vrot.slane %v13808_v49, %v15136_v13 }
0x2587   :  { %v12720_v54 = vcombine.high %v12718_v32, %v12718_v32  ;;  %v12734_v29 = vrot.slane %v12718_v32, %v15136_v13  ;;  %v12741_v51 = vrot.slane %v12719_v9, %v15136_v13  ;;  %v12749_v48 = vcombine.high %v12727_v23, %v12727_v23 }
0x2588   :  { %v12791_v53 = vrot.slane %v12769_v15, %v15136_v13  ;;  %v12798_v50 = vrot.slane %v13809_v11, %v15136_v13  ;;  %v12816_v5 = vcombine.low %v12703_v2, %v12727_v23  ;;  %v12766_v4 = vrot.slane %v12759_v12, %v15136_v13 }
0x2589   :  { %v12748_v36 = vrot.slane %v12720_v54, %v15136_v13  ;;  %v12750_v37 = vcombine.high %v12734_v29, %v12734_v29  ;;  %v12751_v31 = vcombine.high %v12741_v51, %v12741_v51  ;;  %v12817_v61 = vcombine.low %v12741_v51, %v12749_v48 }
0x258a   :  { %v12800_v16 = vcombine.low %v12791_v53, %v12798_v50  ;;  %v12826_v47 = vrot.slane %v12816_v5, %v15136_v13  ;;  %v12799_v59 = vcombine.low %v12777_v39, %v12784_v35  ;;  %v14651_v35 = vld [vmem:[%s17393_s17 + $0x10] sm:$0xff]   ;;  %v14652_v53 = vld [vmem:[%s17393_s17 + $0x18] sm:$0xff]  }
0x258b   :  { %v12818_v56 = vcombine.low %v12751_v31, %v12734_v29  ;;  %v12819_v10 = vcombine.low %v12748_v36, %v12750_v37  ;;  %v12833_v21 = vrot.slane %v12817_v61, %v15136_v13  ;;  %v12752_v25 = vcombine.high %v12748_v36, %v12748_v36  ;;  %14542 = vmatprep.subr.bf16.mxu0 %v14651_v35 }
0x258c   :  { %v12814_v28 = vrot.slane %v12800_v16, %v15136_v13  ;;  %v12807_v43 = vrot.slane %v12799_v59, %v15136_v13  ;;  %14543 = vmatpush3.bf16.msra.mxu0 %v14651_v35 }
0x258d   :  { %v12840_v52 = vrot.slane %v12818_v56, %v15136_v13  ;;  %v12847_v22 = vrot.slane %v12819_v10, %v15136_v13  ;;  %v12848_v55 = vcombine.low %v12826_v47, %v12833_v21  ;;  %v12865_v42 = vcombine.low %v12752_v25, %v12766_v4  ;;  %14544 = vmatprep.subr.bf16.mxu0 %v14652_v53  ;;  %v13817_v10 = vld [vmem:[%s17397_s21 + $0x1] ss:$0 sm:$0xff] }
0x258e   :  { %v12815_v18 = vcombine.low %v12807_v43, %v12814_v28 }
0x258f   :  { %v12849_v8 = vcombine.low %v12840_v52, %v12847_v22  ;;  %v12872_v45 = vrot.slane %v12865_v42, %v15136_v13  ;;  %v12856_v44 = vrot.slane %v12848_v55, %v15136_v13  ;;  %v13818_v55 = vld [vmem:[%s17398_s22 + $0x1] ss:$0 sm:$0xff] }
0x2590   :  { %14545 = vmatpush3.bf16.msra.mxu0 %v14652_v53 }
0x2591   :  { %v12863_v40 = vrot.slane %v12849_v8, %v15136_v13  ;;  %v12879_v19 = vrot.slane %v12872_v45, %v15136_v13  ;;  %v13814_v13 = vld [vmem:[%s17392_s16 + $0x1] ss:$0 sm:$0xff]  ;;  %14562 = vmatprep.subr.bf16.mxu0 %v14870_v1 }
0x2593   :  { %v12864_v58 = vcombine.low %v12856_v44, %v12863_v40  ;;  %v12884_v60 = vpack.c.bf16 %v12879_v19, %v12879_v19 }
0x2595   :  { %v12883_v38 = vpack.c.bf16 %v12864_v58, %v12815_v18  ;;  %v14653_v18 = vld [vmem:[%s17395_s19 + $0x20] sm:$0xff]   ;;  %v14654_v58 = vld [vmem:[%s17395_s19 + $0x28] sm:$0xff]  }
0x2596   :  { %14550 = vmatprep.subr.bf16.mxu1 %v14653_v18 }
0x2597   :  { %14538 = vmatprep.mubr.msk.bf16.mxu1 %vm1247_vm8, %v12883_v38  ;;  %v14655_v38 = vld [vmem:[%s17395_s19 + $0x30] sm:$0xff]  }
0x2598   :  { %14539 = vmatmul.mubr.msk.bf16.vlgmr.msra.gmra.mrb[136].mxu1 %vm1247_vm8, %v12884_v60  ;;  %v14656_v60 = vld [vmem:[%s17395_s19 + $0x38] sm:$0xff]  }
0x2599   :  { %14551 = vmatpush3.bf16.msra.mxu1 %v14653_v18 }
0x259a   :  { %14552 = vmatprep.subr.bf16.mxu1 %v14654_v58 }
0x259d   :  { %14553 = vmatpush3.bf16.msra.mxu1 %v14654_v58 }
0x259e   :  { %14554 = vmatprep.subr.bf16.mxu1 %v14655_v38 }
0x25a1   :  { %14555 = vmatpush3.bf16.msra.mxu1 %v14655_v38 }
0x25a2   :  { %14556 = vmatprep.subr.bf16.mxu1 %v14656_v60 }
0x25a5   :  { %14557 = vmatpush3.bf16.msra.mxu1 %v14656_v60 }
0x266b   :  { %v14540_v24 = vpop.f32.mrb[136].mxu1 }
0x266c   :  { %v12946_v46 = vadd.f32 %v14540_v24, %v17176_v3  ;;  %v12930_v6 = vpop.f32.mrb[137].mxu1  ;;  %v13824_v24 = vld [vmem:[%s17394_s18 + $0x1] ss:$0 sm:$0xff] }
0x266d   :  { %v12944_v17 = vadd.f32 %v12930_v6, %v17179_v14  ;;  %v14541_v20 = vpop.f32.mrb[138].mxu1 }
0x266e   :  { %v12933_v34 = vpop.f32.mrb[139].mxu1  ;;  %v12949_v7 = vadd.f32 %v12946_v46, %v16258_v0 }
0x266f   :  { %v12947_v33 = vadd.f32 %v12944_v17, %v16250_v63  ;;  %v12945_v57 = vadd.f32 %v12933_v34, %v17182_v41 }
0x2670   :  { %v12960_v2 = vadd.f32 %v13814_v13, %v12949_v7 }
0x2671   :  { %v12948_v62 = vadd.f32 %v12945_v57, %v16252_v30  ;;  %v12958_v49 = vadd.f32 %v13814_v13, %v12947_v33 }
0x2672   :  { %v12971_v32 = vsel %vm6528_vm11, %v12960_v2, 0.0 }
0x2673   :  { %v12965_v3 = vsel %vm129_vm2, %v12958_v49, 0.0  ;;  %v12959_v26 = vadd.f32 %v13814_v13, %v12948_v62 }
0x2674   :  { %12966 = vadd.xlane.f32.xlu0 %v12965_v3 }
0x2675   :  { %v12968_v14 = vsel %vm129_vm2, %v12959_v26, 0.0 }
0x2676   :  { %12969 = vadd.xlane.f32.xlu1 %v12968_v14 }
0x2678   :  { %12972 = vadd.xlane.f32.xlu0 %v12971_v32 }
0x2701   :  { %v12967_v9 = vpop.xlane.xlu0 %12966 }
0x2702   :  { %v12974_v0 = vmul.f32 0.03125, %v12967_v9 }
0x2703   :  { %v12970_v23 = vpop.xlane.xlu1 %12969 }
0x2704   :  { %v12977_v63 = vsub.f32 %v12958_v49, %v12974_v0  ;;  %v12975_v27 = vmul.f32 0.03125, %v12970_v23 }
0x2705   :  { %v12973_v41 = vpop.xlane.xlu0 %12972 }
0x2706   :  { %v12978_v15 = vsub.f32 %v12959_v26, %v12975_v27  ;;  %v12976_v30 = vmul.f32 0.03125, %v12973_v41  ;;  %v12980_v11 = vmul.f32 %v12977_v63, %v12977_v63 }
0x2708   :  { %v12979_v39 = vsub.f32 %v12960_v2, %v12976_v30  ;;  %v12983_v12 = vsel %vm129_vm2, %v12980_v11, 0.0  ;;  %v12981_v54 = vmul.f32 %v12978_v15, %v12978_v15  ;;  %v13838_v11 = vld [vmem:[%s17437_s11 + $0x1] ss:$0 sm:$0xff] }
0x2709   :  { %12984 = vadd.xlane.f32.xlu1 %v12983_v12 }
0x270a   :  { %v12986_v29 = vsel %vm129_vm2, %v12981_v54, 0.0  ;;  %v12982_v51 = vmul.f32 %v12979_v39, %v12979_v39 }
0x270b   :  { %12987 = vadd.xlane.f32.xlu0 %v12986_v29 }
0x270c   :  { %v12989_v48 = vsel %vm6528_vm11, %v12982_v51, 0.0 }
0x270d   :  { %12990 = vadd.xlane.f32.xlu1 %v12989_v48 }
0x2796   :  { %v12985_v50 = vpop.xlane.xlu1 %12984 }
0x2797   :  { %v12992_v5 = vmul.f32 0.03125, %v12985_v50 }
0x2798   :  { %v12988_v36 = vpop.xlane.xlu0 %12987 }
0x2799   :  { %v12995_v37 = vadd.f32 1e-05, %v12992_v5  ;;  %v12993_v31 = vmul.f32 0.03125, %v12988_v36 }
0x279a   :  { %v12991_v61 = vpop.xlane.xlu1 %12990 }
0x279b   :  { %14813 = vrsqrt.f32 %v12995_v37  ;;  %v12996_v16 = vadd.f32 1e-05, %v12993_v31  ;;  %v12994_v47 = vmul.f32 0.03125, %v12991_v61 }
0x279d   :  { %14815 = vrsqrt.f32 %v12996_v16  ;;  %v12997_v4 = vadd.f32 1e-05, %v12994_v47 }
0x279f   :  { %14817 = vrsqrt.f32 %v12997_v4 }
0x27a5   :  { %v14814_v56 = vpop.eup %14813 }
0x27a6   :  { %v13001_v21 = vmul.f32 %v14814_v56, %v12977_v63 }
0x27a7   :  { %v14816_v25 = vpop.eup %14815 }
0x27a8   :  { %v13002_v59 = vmul.f32 %v14816_v25, %v12978_v15  ;;  %v13010_v52 = vmul.f32 %v13817_v10, %v13001_v21 }
0x27a9   :  { %v14818_v22 = vpop.eup %14817 }
0x27aa   :  { %v13003_v42 = vmul.f32 %v14818_v22, %v12979_v39  ;;  %v13011_v8 = vmul.f32 %v13817_v10, %v13002_v59  ;;  %v17313_v45 = vadd.f32 %v13818_v55, %v13010_v52 }
0x27ac   :  { %v13020_v28 = vadd.f32 %v13818_v55, %v13011_v8  ;;  %v13012_v43 = vmul.f32 %v13817_v10, %v13003_v42 }
0x27ae   :  { %v13029_v44 = vpack.c.bf16 %v13020_v28, %v17313_v45  ;;  %v13021_v40 = vadd.f32 %v13818_v55, %v13012_v43  ;;  %v14658_v43 = vld [vmem:[%s17401_s25 + $0x8] sm:$0xff]  }
0x27b0   :  { %14546 = vmatprep.mubr.msk.bf16.mxu0 %vm129_vm2, %v13029_v44  ;;  %v13030_v19 = vpack.c.bf16 %v13021_v40, %v13021_v40 }
0x27b2   :  { %14547 = vmatmul.mubr.msk.bf16.vlgmr.msra.gmra.mrb[136].mxu0 %vm129_vm2, %v13030_v19 }
0x27b3   :  { %14566 = vmatprep.mubr.msk.bf16.mxu0 %vm14871_vm0, %v14870_v1 }
0x2885   :  { %v14548_v46 = vpop.f32.mrb[136].mxu0 }
0x2886   :  { %v13098_v6 = vadd.f32 %v14548_v46, %v13824_v24  ;;  %v13089_v17 = vpop.f32.mrb[137].mxu0 }
0x2887   :  { %v13090_v20 = vadd.f32 %v13824_v24, %v13089_v17  ;;  %v14549_v34 = vpop.f32.mrb[138].mxu0  ;;  %v13847_v17 = vld [vmem:[%s17399_s23 + $0x1] ss:$0 sm:$0xff] }
0x2888   :  { %v13108_v13 = vmul.f32 0.70710677, %v13098_v6  ;;  %v13092_v7 = vpop.f32.mrb[139].mxu0  ;;  %v13105_v32 = vmul.f32 0.5, %v13098_v6 }
0x2889   :  { %v13106_v33 = vmul.f32 0.70710677, %v13090_v20  ;;  %v13093_v57 = vadd.f32 %v13824_v24, %v13092_v7  ;;  %v13103_v9 = vmul.f32 0.5, %v13090_v20 }
0x288a   :  { %14819 = verf.f32 %v13108_v13  ;;  %v13848_v13 = vld [vmem:[%s17400_s24 + $0x1] ss:$0 sm:$0xff]  ;;  %s14874_s24 = smov [#allocation4]  }
0x288b   :  { %14821 = verf.f32 %v13106_v33  ;;  %v13107_v62 = vmul.f32 0.70710677, %v13093_v57  ;;  %v13104_v0 = vmul.f32 0.5, %v13093_v57  ;;  %s13427_s20 = sshll.u32 %s14874_s24, 4  ;;  %s13428_s20 = int_to_ptr.vmem [resolvable:$true] %s13427_s20 }
0x288c   :  { %s14843_s6 = scalar_lea.vmem %s13428_s20, 128  ;;  %p14848_p6 = scmp.lt.s32.totalorder %s13428_s20, %s13428_s20 }
0x288d   :  { %14823 = verf.f32 %v13107_v62  ;;  %p14844_p5 = scmp.ne.s32.totalorder %s13428_s20, %s14843_s6  ;;  %p14849_p7 = scmp.lt.s32.totalorder %s14843_s6, %s14843_s6 }
0x288f   :  { %p14850_p8 = por %p14849_p7, %p14848_p6 }
0x2891   :  { %p14851_p9 = pnand %p14850_p8, %p14844_p5 }
0x2894   :  { %v14820_v49 = vpop.eup %14819 }
0x2895   :  { %v14822_v3 = vpop.eup %14821  ;;  %v13114_v26 = vadd.f32 1.0, %v14820_v49 }
0x2896   :  { %v13112_v2 = vadd.f32 1.0, %v14822_v3 }
0x2897   :  { %v14824_v14 = vpop.eup %14823  ;;  %v13117_v63 = vmul.f32 %v13114_v26, %v13105_v32 }
0x2898   :  { %v13113_v23 = vadd.f32 1.0, %v14824_v14  ;;  %v13115_v27 = vmul.f32 %v13112_v2, %v13103_v9 }
0x2899   :  { %v13130_v30 = vpack.c.bf16 %v13117_v63, %v13117_v63 }
0x289a   :  { %v13116_v41 = vmul.f32 %v13113_v23, %v13104_v0  ;;  %v13849_v23 = vld [vmem:[%s17402_s26] ss:$0 sm:$0xff] }
0x289c   :  { %v13129_v15 = vpack.c.bf16 %v13116_v41, %v13115_v27 }
0x289e   :  { %14558 = vmatprep.mubr.msk.bf16.mxu1 %vm6716_vm12, %v13129_v15 }
0x289f   :  { %14559 = vmatmul.mubr.msk.bf16.vlgmr.msra.gmra.mrb[140].mxu1 %vm6716_vm12, %v13130_v30 }
0x2972   :  { %v14560_v39 = vpop.f32.mrb[140].mxu1 }
0x2973   :  { %v13210_v12 = vadd.f32 %v14560_v39, %v13838_v11  ;;  %v13201_v54 = vpop.f32.mrb[141].mxu1 }
0x2974   :  { %v14561_v29 = vpop.f32.mrb[142].mxu1  ;;  %v13202_v35 = vadd.f32 %v13838_v11, %v13201_v54 }
0x2975   :  { %v13204_v51 = vpop.f32.mrb[143].mxu1  ;;  %v13217_v48 = vadd.f32 %v13210_v12, %v13021_v40 }
0x2976   :  { %v13205_v53 = vadd.f32 %v13838_v11, %v13204_v51  ;;  %v13215_v37 = vadd.f32 %v13202_v35, %v17313_v45 }
0x2977   :  { %v13228_v50 = vsel %vm6528_vm11, %v13217_v48, 0.0 }
0x2978   :  { %13229 = vadd.xlane.f32.xlu1 %v13228_v50  ;;  %v13216_v5 = vadd.f32 %v13205_v53, %v13020_v28  ;;  %v13222_v31 = vsel %vm129_vm2, %v13215_v37, 0.0  ;;  %v14657_v28 = vld [vmem:[%s17401_s25] sm:$0xff]  }
0x2979   :  { %14563 = vmatpush3.bf16.msra.mxu0 %v14657_v28 }
0x297a   :  { %v13225_v36 = vsel %vm129_vm2, %v13216_v5, 0.0  ;;  %14564 = vmatprep.subr.bf16.mxu0 %v14870_v1 }
0x297b   :  { %13226 = vadd.xlane.f32.xlu0 %v13225_v36 }
0x297d   :  { %14565 = vmatpush3.bf16.msra.mxu0 %v14658_v43 }
0x297f   :  { %13223 = vadd.xlane.f32.xlu0 %v13222_v31 }
0x2a05   :  { %v13230_v61 = vpop.xlane.xlu1 %13229 }
0x2a06   :  { %v13233_v16 = vmul.f32 0.03125, %v13230_v61 }
0x2a08   :  { %v13236_v47 = vsub.f32 %v13217_v48, %v13233_v16  ;;  %v13227_v4 = vpop.xlane.xlu0 %13226 }
0x2a09   :  { %v13232_v56 = vmul.f32 0.03125, %v13227_v4 }
0x2a0a   :  { %v13239_v10 = vmul.f32 %v13236_v47, %v13236_v47 }
0x2a0b   :  { %v13235_v21 = vsub.f32 %v13216_v5, %v13232_v56 }
0x2a0c   :  { %v13224_v25 = vpop.xlane.xlu0 %13223  ;;  %v13246_v59 = vsel %vm6528_vm11, %v13239_v10, 0.0 }
0x2a0d   :  { %v13231_v52 = vmul.f32 0.03125, %v13224_v25  ;;  %13247 = vadd.xlane.f32.xlu0 %v13246_v59  ;;  %v13238_v22 = vmul.f32 %v13235_v21, %v13235_v21 }
0x2a0f   :  { %v13234_v55 = vsub.f32 %v13215_v37, %v13231_v52  ;;  %v13243_v42 = vsel %vm129_vm2, %v13238_v22, 0.0 }
0x2a10   :  { %13244 = vadd.xlane.f32.xlu1 %v13243_v42 }
0x2a11   :  { %v13237_v8 = vmul.f32 %v13234_v55, %v13234_v55 }
0x2a13   :  { %v13240_v45 = vsel %vm129_vm2, %v13237_v8, 0.0 }
0x2a14   :  { %13241 = vadd.xlane.f32.xlu1 %v13240_v45 }
0x2a9a   :  { %v13248_v44 = vpop.xlane.xlu0 %13247 }
0x2a9b   :  { %v13251_v40 = vmul.f32 0.03125, %v13248_v44 }
0x2a9d   :  { %v13254_v19 = vadd.f32 1e-05, %v13251_v40  ;;  %v13245_v18 = vpop.xlane.xlu1 %13244 }
0x2a9e   :  { %v13250_v58 = vmul.f32 0.03125, %v13245_v18 }
0x2a9f   :  { %14825 = vrsqrt.f32 %v13254_v19 }
0x2aa0   :  { %v13253_v38 = vadd.f32 1e-05, %v13250_v58 }
0x2aa1   :  { %v13242_v60 = vpop.xlane.xlu1 %13241 }
0x2aa2   :  { %14827 = vrsqrt.f32 %v13253_v38  ;;  %v13249_v24 = vmul.f32 0.03125, %v13242_v60 }
0x2aa4   :  { %v13252_v46 = vadd.f32 1e-05, %v13249_v24 }
0x2aa6   :  { %14829 = vrsqrt.f32 %v13252_v46 }
0x2aa9   :  { %v14826_v6 = vpop.eup %14825 }
0x2aaa   :  { %v13260_v20 = vmul.f32 %v14826_v6, %v13236_v47 }
0x2aac   :  { %v14828_v1 = vpop.eup %14827  ;;  %v13269_v34 = vmul.f32 %v13847_v17, %v13260_v20 }
0x2aad   :  { %v13259_v7 = vmul.f32 %v14828_v1, %v13235_v21 }
0x2aae   :  { %v13278_v57 = vadd.f32 %v13848_v13, %v13269_v34 }
0x2aaf   :  { %v13268_v33 = vmul.f32 %v13847_v17, %v13259_v7 }
0x2ab0   :  { %v14830_v62 = vpop.eup %14829  ;;  %v13283_v14 = vrot.slane %v13278_v57, 1 }
0x2ab1   :  { %v13258_v49 = vmul.f32 %v14830_v62, %v13234_v55  ;;  %v13277_v3 = vadd.f32 %v13848_v13, %v13268_v33 }
0x2ab3   :  { %v13267_v26 = vmul.f32 %v13847_v17, %v13258_v49  ;;  %v13282_v2 = vrot.slane %v13277_v3, 1 }
0x2ab5   :  { %v13276_v32 = vadd.f32 %v13848_v13, %v13267_v26  ;;  %v13284_v9 = vsel %vm13281_vm13, %v13282_v2, %v13283_v14 }
0x2ab7   :  { %v13291_v0 = vpack.c.bf16 %v13284_v9, %v13276_v32 }
0x2ab9   :  { %14567 = vmatmul.mubr.msk.bf16.vlgmr.msra.gmra.mrb[140].mxu0 %vm129_vm2, %v13291_v0 }
0x2b8c   :  { %v13347_v63 = vpop.f32.mrb[140].mxu0 }
0x2b8d   :  { %v13348_v27 = vadd.f32 %v13849_v23, %v13347_v63  ;;  %v14568_v41 = vpop.f32.mrb[141].mxu0 }
0x2b8e   :  { %v13350_v15 = vpop.f32.mrb[142].mxu0 }
0x2b8f   :  { %v13351_v30 = vadd.f32 %v13849_v23, %v13350_v15  ;;  %13354 = vxpose.xlu0.b32.start.end [1/1] (short) (narrow) %v13348_v27, 8  ;;  %v14569_v11 = vpop.f32.mrb[143].mxu0 }
0x2b91   :  { %13388 = vxpose.xlu1.b32.start.end [1/1] (short) (narrow) %v13351_v30, 8 }
0x2c0f   :  { %v13370_v39 = vpop.trf.xlu0 }
0x2c10   :  { %13387 = vst.msk [vmem:[#allocation4] sm:$0xf] %vm13386_vm14, %v13370_v39 }
0x2c11   :  { %v13404_v12 = vpop.trf.xlu1 }
0x2c12   :  { %13421 = vst.msk [vmem:[#allocation4 + $0x4] sm:$0xf] %vm13386_vm14, %v13404_v12 }
0x2c13   :  { %14854 = shalt.err (!%p14851_p9)
}
0x2c14   :  { %s14855_s28 = scalar_lea.hbm %s17403_s27, 128 }
0x2c15   :  { %p14856_p10 = scmp.ne.s32.totalorder %s17403_s27, %s14855_s28  ;;  %p14859_p11 = scmp.lt.u32.totalorder %s14855_s28, %s17403_s27 }
0x2c17   :  { %p14861_p12 = pnand %p14859_p11, %p14856_p10 }
0x2c19   :  { %14864 = shalt.err (!%p14861_p12)
}
0x2c1a   :  { %s14875_s22 = smov 64   ;;  %s14876_s2 = smov 4  }
0x2c1b   :  { %13433 = dma.vmem_to_hbm [thread:$0]  %s13428_s20, 128, %s17403_s27, [#allocation5], %s14875_s22, %s14875_s22, %s14876_s2  }
0x2c1c   :  { %14867 = dma.done.wait [#allocation5], 128  }
0x2c1d   :  { %14868 = vsyncadd [#allocation5], 4294967168 }
0x2c1e   :  { %13437 = vsyncpa [#allocation5], 1 }

</bundles_post_ra>
